<compile_context>
chip_gen: v6e
topology: v6e:2x2x1
jax: 0.10.0
libtpu: 0.0.40
codegen_flags: <defaults>
</compile_context>

<pallas_src>
import jax
import jax.numpy as jnp
from jax import lax
from jax.experimental import pallas as pl
from jax.experimental.pallas import tpu as pltpu

# Problem dims fixed by the module: x is [1, 256, 14, 14] NCHW.
N, C, H, W = 1, 256, 14, 14
KH = KW = 3
N_TAPS = KH * KW
EPS = 1e-5
DROP_P = 0.5

WP = 16                          # W padded 14 -> 16 (sublane-friendly rows)
P_FLAT = H * WP                  # 224 flat rows, o = y*16 + x
N_VALID = H * W                  # 196 real spatial positions
FRAME_OFF = 24                   # row offset of the big frame store (mult of 8)
# tap (ky,kx) for output row o reads frame rows [o + off, o + off + 224)
TAP_OFFSETS = tuple(FRAME_OFF - WP - 1 + ky * WP + kx
                    for ky in range(KH) for kx in range(KW))   # 7,8,9,23,...,41
PB_ROWS = 272                    # >= 41 + 224 and >= 24 + 224, multiple of 8
assert PB_ROWS >= TAP_OFFSETS[-1] + P_FLAT
assert PB_ROWS >= FRAME_OFF + P_FLAT

VMEM = pltpu.MemorySpace.VMEM


# ---------------------------------------------------------------------------
# Fused kernel: BN1(batch stats)+ReLU+Dropout -> zero-pad frame -> conv as 9
#               accumulating bf16 MXU matmuls (weights streamed from HBM)
#               -> BN2(batch stats)
# ---------------------------------------------------------------------------
def fused_kernel(x_ref, mask_ref, p_ref, w_hbm, o_ref, pb_ref, w_vmem, sem):
    # ---- kick off the weight stream immediately (overlaps all compute) ------
    for k in range(N_TAPS):
        pltpu.make_async_copy(w_hbm.at[k], w_vmem.at[k], sem.at[k]).start()

    inv_n = 1.0 / N_VALID
    g1 = p_ref[0:1, :]          # pre-scaled by 1/(1-p) in the wrapper
    b1 = p_ref[1:2, :]
    g2 = p_ref[2:3, :]
    b2 = p_ref[3:4, :]

    # ---- BatchNorm1 + ReLU + Dropout (f32 on the VPU) -----------------------
    x = x_ref[...]                                   # (224,256), zeros at pad cols
    s = jnp.sum(x, axis=0, keepdims=True)            # pads contribute 0
    ss = jnp.sum(x * x, axis=0, keepdims=True)
    mean1 = s * inv_n
    var1 = ss * inv_n - mean1 * mean1
    xhat = (x - mean1) * lax.rsqrt(var1 + EPS)
    # mask is a {0,1} keep-mask (bf16), zero at the spatial pad columns.
    y = jnp.maximum(xhat * g1 + b1, 0.0) * mask_ref[...].astype(jnp.float32)

    # ---- zero-padded conv frame, flat (py*16 + px) rows ----------------------
    # Only the halo rows are zeroed; the big store is sublane aligned (row 24).
    pb_ref[0:FRAME_OFF, :] = jnp.zeros((FRAME_OFF, C), jnp.float32)
    pb_ref[FRAME_OFF + P_FLAT:PB_ROWS, :] = jnp.zeros(
        (PB_ROWS - FRAME_OFF - P_FLAT, C), jnp.float32)
    pb_ref[FRAME_OFF:FRAME_OFF + P_FLAT, :] = y

    # ---- conv = 9 accumulating bf16 matmuls over shifted frame views --------
    acc = None
    for k, off in enumerate(TAP_OFFSETS):            # static unroll (9 taps)
        pltpu.make_async_copy(w_hbm.at[k], w_vmem.at[k], sem.at[k]).wait()
        lhs = pb_ref[off:off + P_FLAT, :].astype(jnp.bfloat16)   # (224,256)
        d = jnp.dot(lhs, w_vmem[k], preferred_element_type=jnp.float32)
        acc = d if acc is None else acc + d          # (224,256) f32

    # ---- BatchNorm2 over the 196 valid positions (two-pass variance) --------
    rows = lax.broadcasted_iota(jnp.int32, (P_FLAT, C), 0)
    valid = ((rows % WP) < W).astype(jnp.float32)    # 1 for x<14, else 0
    mean2 = jnp.sum(acc * valid, axis=0, keepdims=True) * inv_n
    cen = acc - mean2
    var2 = jnp.sum(cen * cen * valid, axis=0, keepdims=True) * inv_n
    o_ref[...] = cen * lax.rsqrt(var2 + EPS) * g2 + b2


# ---------------------------------------------------------------------------
# Wrapper
# ---------------------------------------------------------------------------
def prepare_conv_weight(conv_w):
    """(Cout, Cin, kh, kw) -> (kh*kw, Cin, Cout) bf16. Do once, outside forward."""
    return jnp.transpose(conv_w, (2, 3, 1, 0)).reshape(N_TAPS, C, C).astype(jnp.bfloat16)


@jax.jit
def forward(x_nchw, gamma1, beta1, w_taps, gamma2, beta2, dropout_key):
    # NCHW -> NHWC, pad W 14->16 with zeros, flatten spatial to (y*16 + x) rows.
    x_nhwc = jnp.transpose(x_nchw, (0, 2, 3, 1)).astype(jnp.float32)     # (1,14,14,256)
    x_flat = jnp.pad(x_nhwc, ((0, 0), (0, 0), (0, WP - W), (0, 0))).reshape(P_FLAT, C)

    # Dropout keep-mask (prob 0.5), zero at the spatial pad columns, bf16.
    keep = jax.random.bernoulli(dropout_key, 1.0 - DROP_P, (1, H, W, C))
    mask = jnp.pad(keep, ((0, 0), (0, 0), (0, WP - W), (0, 0)))
    mask = mask.reshape(P_FLAT, C).astype(jnp.bfloat16)

    # Fold the 1/(1-p) dropout scale into the BN1 affine (ReLU commutes with +scale);
    # pack all four affine vectors into one (8,256) tile (single DMA).
    scale = 1.0 / (1.0 - DROP_P)
    params = jnp.zeros((8, C), jnp.float32)
    params = (params.at[0].set(gamma1 * scale)
                    .at[1].set(beta1 * scale)
                    .at[2].set(gamma2)
                    .at[3].set(beta2))

    out_flat = pl.pallas_call(
        fused_kernel,
        out_shape=jax.ShapeDtypeStruct((P_FLAT, C), jnp.float32),
        in_specs=[
            pl.BlockSpec(memory_space=VMEM),       # x_flat
            pl.BlockSpec(memory_space=VMEM),       # dropout keep-mask (bf16)
            pl.BlockSpec(memory_space=VMEM),       # packed BN affine params
            pl.BlockSpec(memory_space=pl.ANY),     # conv weights stay in HBM
        ],
        out_specs=pl.BlockSpec(memory_space=VMEM),
        scratch_shapes=[
            pltpu.VMEM((PB_ROWS, C), jnp.float32),     # zero-padded conv frame
            pltpu.VMEM((N_TAPS, C, C), jnp.bfloat16),  # streamed weight taps
            pltpu.SemaphoreType.DMA((N_TAPS,)),        # one DMA sem per tap
        ],
    )(x_flat, mask, params, w_taps)

    out = out_flat.reshape(H, WP, C)[:, :W, :]            # drop the pad columns
    return jnp.transpose(out, (2, 0, 1))[None]            # -> (1, 256, 14, 14)


# ---------------------------------------------------------------------------
# Pure-JAX reference (same dropout mask; conv operands cast to bf16 like kernel)
# ---------------------------------------------------------------------------
def reference(x_nchw, gamma1, beta1, conv_w, gamma2, beta2, dropout_key):
    x = jnp.transpose(x_nchw, (0, 2, 3, 1)).astype(jnp.float32)          # NHWC
    mean = jnp.mean(x, axis=(0, 1, 2), keepdims=True)
    var = jnp.mean((x - mean) ** 2, axis=(0, 1, 2), keepdims=True)
    y = (x - mean) * lax.rsqrt(var + EPS) * gamma1 + beta1
    y = jnp.maximum(y, 0.0)
    keep = jax.random.bernoulli(dropout_key, 1.0 - DROP_P, y.shape)
    y = jnp.where(keep, y / (1.0 - DROP_P), 0.0)
    w_hwio = jnp.transpose(conv_w, (2, 3, 1, 0))
    z = lax.conv_general_dilated(
        y.astype(jnp.bfloat16), w_hwio.astype(jnp.bfloat16), (1, 1), "SAME",
        dimension_numbers=("NHWC", "HWIO", "NHWC"),
        preferred_element_type=jnp.float32)
    mean2 = jnp.mean(z, axis=(0, 1, 2), keepdims=True)
    var2 = jnp.mean((z - mean2) ** 2, axis=(0, 1, 2), keepdims=True)
    z = (z - mean2) * lax.rsqrt(var2 + EPS) * gamma2 + beta2
    return jnp.transpose(z, (0, 3, 1, 2))


if __name__ == "__main__":
    key = jax.random.PRNGKey(0)
    k_x, k_w, k_drop = jax.random.split(key, 3)

    # Input matching the module: [1, 256, 14, 14] NCHW.
    x = jax.random.normal(k_x, (N, C, H, W), dtype=jnp.float32)

    # BatchNorm2d defaults: weight=1, bias=0. Conv2d weight: synthetic init, bias=False.
    gamma1 = jnp.ones((C,), jnp.float32)
    beta1 = jnp.zeros((C,), jnp.float32)
    gamma2 = jnp.ones((C,), jnp.float32)
    beta2 = jnp.zeros((C,), jnp.float32)
    conv_w = jax.random.normal(k_w, (C, C, KH, KW), dtype=jnp.float32) * 0.05

    w_taps = prepare_conv_weight(conv_w)     # hoisted out of the per-call path

    out = forward(x, gamma1, beta1, w_taps, gamma2, beta2, k_drop)
    jax.block_until_ready(out)
    assert out.shape == (N, C, H, W), out.shape

    ref = reference(x, gamma1, beta1, conv_w, gamma2, beta2, k_drop)
    max_diff = float(jnp.max(jnp.abs(out - ref)))
    assert max_diff < 3e-2, f"mismatch vs reference: max|diff|={max_diff}"

    print("KERNEL_OK")
</pallas_src>

<mosaic_0001>
module attributes {stable_mosaic.version = 11 : i64} {
  func.func @fused_kernel(%arg0: memref<224x256xf32, #tpu.memory_space<vmem>>, %arg1: memref<224x256xbf16, #tpu.memory_space<vmem>>, %arg2: memref<8x256xf32, #tpu.memory_space<vmem>>, %arg3: memref<9x256x256xbf16, #tpu.memory_space<any>>, %arg4: memref<224x256xf32, #tpu.memory_space<vmem>>, %arg5: memref<272x256xf32, #tpu.memory_space<vmem>>, %arg6: memref<9x256x256xbf16, #tpu.memory_space<vmem>>, %arg7: memref<9x!tpu.dma_semaphore, #tpu.memory_space<semaphore_mem>>) attributes {dimension_semantics = [], scalar_prefetch = 0 : i64, scratch_operands = 3 : i64, tpu.core_type = #tpu.core_type<tc>} {
    %c0_i32 = arith.constant 0 : i32
    %c0_i32_0 = arith.constant 0 : i32
    %c0_i32_1 = arith.constant 0 : i32
    %c0_i32_2 = arith.constant 0 : i32
    %c0_i32_3 = arith.constant 0 : i32
    %0 = tpu.memref_slice %arg3[%c0_i32, %c0_i32_2, %c0_i32_3] : memref<9x256x256xbf16, #tpu.memory_space<any>> -> memref<1x256x256xbf16, #tpu.memory_space<any>>
    %1 = tpu.memref_squeeze %0 : memref<1x256x256xbf16, #tpu.memory_space<any>> -> memref<256x256xbf16, #tpu.memory_space<any>>
    %c0_i32_4 = arith.constant 0 : i32
    %c0_i32_5 = arith.constant 0 : i32
    %2 = tpu.memref_slice %arg6[%c0_i32_0, %c0_i32_4, %c0_i32_5] : memref<9x256x256xbf16, #tpu.memory_space<vmem>> -> memref<1x256x256xbf16, #tpu.memory_space<vmem>>
    %3 = tpu.memref_squeeze %2 : memref<1x256x256xbf16, #tpu.memory_space<vmem>> -> memref<256x256xbf16, #tpu.memory_space<vmem>>
    %4 = tpu.memref_slice %arg7[%c0_i32_1] : memref<9x!tpu.dma_semaphore, #tpu.memory_space<semaphore_mem>> -> memref<1x!tpu.dma_semaphore, #tpu.memory_space<semaphore_mem>>
    %5 = tpu.memref_squeeze %4 : memref<1x!tpu.dma_semaphore, #tpu.memory_space<semaphore_mem>> -> memref<!tpu.dma_semaphore, #tpu.memory_space<semaphore_mem>>
    tpu.enqueue_dma source(%1 : memref<256x256xbf16, #tpu.memory_space<any>>) target(%3 : memref<256x256xbf16, #tpu.memory_space<vmem>>) target_semaphore(%5 : memref<!tpu.dma_semaphore, #tpu.memory_space<semaphore_mem>>)
    %c1_i32 = arith.constant 1 : i32
    %c1_i32_6 = arith.constant 1 : i32
    %c1_i32_7 = arith.constant 1 : i32
    %c0_i32_8 = arith.constant 0 : i32
    %c0_i32_9 = arith.constant 0 : i32
    %6 = tpu.memref_slice %arg3[%c1_i32, %c0_i32_8, %c0_i32_9] : memref<9x256x256xbf16, #tpu.memory_space<any>> -> memref<1x256x256xbf16, #tpu.memory_space<any>>
    %7 = tpu.memref_squeeze %6 : memref<1x256x256xbf16, #tpu.memory_space<any>> -> memref<256x256xbf16, #tpu.memory_space<any>>
    %c0_i32_10 = arith.constant 0 : i32
    %c0_i32_11 = arith.constant 0 : i32
    %8 = tpu.memref_slice %arg6[%c1_i32_6, %c0_i32_10, %c0_i32_11] : memref<9x256x256xbf16, #tpu.memory_space<vmem>> -> memref<1x256x256xbf16, #tpu.memory_space<vmem>>
    %9 = tpu.memref_squeeze %8 : memref<1x256x256xbf16, #tpu.memory_space<vmem>> -> memref<256x256xbf16, #tpu.memory_space<vmem>>
    %10 = tpu.memref_slice %arg7[%c1_i32_7] : memref<9x!tpu.dma_semaphore, #tpu.memory_space<semaphore_mem>> -> memref<1x!tpu.dma_semaphore, #tpu.memory_space<semaphore_mem>>
    %11 = tpu.memref_squeeze %10 : memref<1x!tpu.dma_semaphore, #tpu.memory_space<semaphore_mem>> -> memref<!tpu.dma_semaphore, #tpu.memory_space<semaphore_mem>>
    tpu.enqueue_dma source(%7 : memref<256x256xbf16, #tpu.memory_space<any>>) target(%9 : memref<256x256xbf16, #tpu.memory_space<vmem>>) target_semaphore(%11 : memref<!tpu.dma_semaphore, #tpu.memory_space<semaphore_mem>>)
    %c2_i32 = arith.constant 2 : i32
    %c2_i32_12 = arith.constant 2 : i32
    %c2_i32_13 = arith.constant 2 : i32
    %c0_i32_14 = arith.constant 0 : i32
    %c0_i32_15 = arith.constant 0 : i32
    %12 = tpu.memref_slice %arg3[%c2_i32, %c0_i32_14, %c0_i32_15] : memref<9x256x256xbf16, #tpu.memory_space<any>> -> memref<1x256x256xbf16, #tpu.memory_space<any>>
    %13 = tpu.memref_squeeze %12 : memref<1x256x256xbf16, #tpu.memory_space<any>> -> memref<256x256xbf16, #tpu.memory_space<any>>
    %c0_i32_16 = arith.constant 0 : i32
    %c0_i32_17 = arith.constant 0 : i32
    %14 = tpu.memref_slice %arg6[%c2_i32_12, %c0_i32_16, %c0_i32_17] : memref<9x256x256xbf16, #tpu.memory_space<vmem>> -> memref<1x256x256xbf16, #tpu.memory_space<vmem>>
    %15 = tpu.memref_squeeze %14 : memref<1x256x256xbf16, #tpu.memory_space<vmem>> -> memref<256x256xbf16, #tpu.memory_space<vmem>>
    %16 = tpu.memref_slice %arg7[%c2_i32_13] : memref<9x!tpu.dma_semaphore, #tpu.memory_space<semaphore_mem>> -> memref<1x!tpu.dma_semaphore, #tpu.memory_space<semaphore_mem>>
    %17 = tpu.memref_squeeze %16 : memref<1x!tpu.dma_semaphore, #tpu.memory_space<semaphore_mem>> -> memref<!tpu.dma_semaphore, #tpu.memory_space<semaphore_mem>>
    tpu.enqueue_dma source(%13 : memref<256x256xbf16, #tpu.memory_space<any>>) target(%15 : memref<256x256xbf16, #tpu.memory_space<vmem>>) target_semaphore(%17 : memref<!tpu.dma_semaphore, #tpu.memory_space<semaphore_mem>>)
    %c3_i32 = arith.constant 3 : i32
    %c3_i32_18 = arith.constant 3 : i32
    %c3_i32_19 = arith.constant 3 : i32
    %c0_i32_20 = arith.constant 0 : i32
    %c0_i32_21 = arith.constant 0 : i32
    %18 = tpu.memref_slice %arg3[%c3_i32, %c0_i32_20, %c0_i32_21] : memref<9x256x256xbf16, #tpu.memory_space<any>> -> memref<1x256x256xbf16, #tpu.memory_space<any>>
    %19 = tpu.memref_squeeze %18 : memref<1x256x256xbf16, #tpu.memory_space<any>> -> memref<256x256xbf16, #tpu.memory_space<any>>
    %c0_i32_22 = arith.constant 0 : i32
    %c0_i32_23 = arith.constant 0 : i32
    %20 = tpu.memref_slice %arg6[%c3_i32_18, %c0_i32_22, %c0_i32_23] : memref<9x256x256xbf16, #tpu.memory_space<vmem>> -> memref<1x256x256xbf16, #tpu.memory_space<vmem>>
    %21 = tpu.memref_squeeze %20 : memref<1x256x256xbf16, #tpu.memory_space<vmem>> -> memref<256x256xbf16, #tpu.memory_space<vmem>>
    %22 = tpu.memref_slice %arg7[%c3_i32_19] : memref<9x!tpu.dma_semaphore, #tpu.memory_space<semaphore_mem>> -> memref<1x!tpu.dma_semaphore, #tpu.memory_space<semaphore_mem>>
    %23 = tpu.memref_squeeze %22 : memref<1x!tpu.dma_semaphore, #tpu.memory_space<semaphore_mem>> -> memref<!tpu.dma_semaphore, #tpu.memory_space<semaphore_mem>>
    tpu.enqueue_dma source(%19 : memref<256x256xbf16, #tpu.memory_space<any>>) target(%21 : memref<256x256xbf16, #tpu.memory_space<vmem>>) target_semaphore(%23 : memref<!tpu.dma_semaphore, #tpu.memory_space<semaphore_mem>>)
    %c4_i32 = arith.constant 4 : i32
    %c4_i32_24 = arith.constant 4 : i32
    %c4_i32_25 = arith.constant 4 : i32
    %c0_i32_26 = arith.constant 0 : i32
    %c0_i32_27 = arith.constant 0 : i32
    %24 = tpu.memref_slice %arg3[%c4_i32, %c0_i32_26, %c0_i32_27] : memref<9x256x256xbf16, #tpu.memory_space<any>> -> memref<1x256x256xbf16, #tpu.memory_space<any>>
    %25 = tpu.memref_squeeze %24 : memref<1x256x256xbf16, #tpu.memory_space<any>> -> memref<256x256xbf16, #tpu.memory_space<any>>
    %c0_i32_28 = arith.constant 0 : i32
    %c0_i32_29 = arith.constant 0 : i32
    %26 = tpu.memref_slice %arg6[%c4_i32_24, %c0_i32_28, %c0_i32_29] : memref<9x256x256xbf16, #tpu.memory_space<vmem>> -> memref<1x256x256xbf16, #tpu.memory_space<vmem>>
    %27 = tpu.memref_squeeze %26 : memref<1x256x256xbf16, #tpu.memory_space<vmem>> -> memref<256x256xbf16, #tpu.memory_space<vmem>>
    %28 = tpu.memref_slice %arg7[%c4_i32_25] : memref<9x!tpu.dma_semaphore, #tpu.memory_space<semaphore_mem>> -> memref<1x!tpu.dma_semaphore, #tpu.memory_space<semaphore_mem>>
    %29 = tpu.memref_squeeze %28 : memref<1x!tpu.dma_semaphore, #tpu.memory_space<semaphore_mem>> -> memref<!tpu.dma_semaphore, #tpu.memory_space<semaphore_mem>>
    tpu.enqueue_dma source(%25 : memref<256x256xbf16, #tpu.memory_space<any>>) target(%27 : memref<256x256xbf16, #tpu.memory_space<vmem>>) target_semaphore(%29 : memref<!tpu.dma_semaphore, #tpu.memory_space<semaphore_mem>>)
    %c5_i32 = arith.constant 5 : i32
    %c5_i32_30 = arith.constant 5 : i32
    %c5_i32_31 = arith.constant 5 : i32
    %c0_i32_32 = arith.constant 0 : i32
    %c0_i32_33 = arith.constant 0 : i32
    %30 = tpu.memref_slice %arg3[%c5_i32, %c0_i32_32, %c0_i32_33] : memref<9x256x256xbf16, #tpu.memory_space<any>> -> memref<1x256x256xbf16, #tpu.memory_space<any>>
    %31 = tpu.memref_squeeze %30 : memref<1x256x256xbf16, #tpu.memory_space<any>> -> memref<256x256xbf16, #tpu.memory_space<any>>
    %c0_i32_34 = arith.constant 0 : i32
    %c0_i32_35 = arith.constant 0 : i32
    %32 = tpu.memref_slice %arg6[%c5_i32_30, %c0_i32_34, %c0_i32_35] : memref<9x256x256xbf16, #tpu.memory_space<vmem>> -> memref<1x256x256xbf16, #tpu.memory_space<vmem>>
    %33 = tpu.memref_squeeze %32 : memref<1x256x256xbf16, #tpu.memory_space<vmem>> -> memref<256x256xbf16, #tpu.memory_space<vmem>>
    %34 = tpu.memref_slice %arg7[%c5_i32_31] : memref<9x!tpu.dma_semaphore, #tpu.memory_space<semaphore_mem>> -> memref<1x!tpu.dma_semaphore, #tpu.memory_space<semaphore_mem>>
    %35 = tpu.memref_squeeze %34 : memref<1x!tpu.dma_semaphore, #tpu.memory_space<semaphore_mem>> -> memref<!tpu.dma_semaphore, #tpu.memory_space<semaphore_mem>>
    tpu.enqueue_dma source(%31 : memref<256x256xbf16, #tpu.memory_space<any>>) target(%33 : memref<256x256xbf16, #tpu.memory_space<vmem>>) target_semaphore(%35 : memref<!tpu.dma_semaphore, #tpu.memory_space<semaphore_mem>>)
    %c6_i32 = arith.constant 6 : i32
    %c6_i32_36 = arith.constant 6 : i32
    %c6_i32_37 = arith.constant 6 : i32
    %c0_i32_38 = arith.constant 0 : i32
    %c0_i32_39 = arith.constant 0 : i32
    %36 = tpu.memref_slice %arg3[%c6_i32, %c0_i32_38, %c0_i32_39] : memref<9x256x256xbf16, #tpu.memory_space<any>> -> memref<1x256x256xbf16, #tpu.memory_space<any>>
    %37 = tpu.memref_squeeze %36 : memref<1x256x256xbf16, #tpu.memory_space<any>> -> memref<256x256xbf16, #tpu.memory_space<any>>
    %c0_i32_40 = arith.constant 0 : i32
    %c0_i32_41 = arith.constant 0 : i32
    %38 = tpu.memref_slice %arg6[%c6_i32_36, %c0_i32_40, %c0_i32_41] : memref<9x256x256xbf16, #tpu.memory_space<vmem>> -> memref<1x256x256xbf16, #tpu.memory_space<vmem>>
    %39 = tpu.memref_squeeze %38 : memref<1x256x256xbf16, #tpu.memory_space<vmem>> -> memref<256x256xbf16, #tpu.memory_space<vmem>>
    %40 = tpu.memref_slice %arg7[%c6_i32_37] : memref<9x!tpu.dma_semaphore, #tpu.memory_space<semaphore_mem>> -> memref<1x!tpu.dma_semaphore, #tpu.memory_space<semaphore_mem>>
    %41 = tpu.memref_squeeze %40 : memref<1x!tpu.dma_semaphore, #tpu.memory_space<semaphore_mem>> -> memref<!tpu.dma_semaphore, #tpu.memory_space<semaphore_mem>>
    tpu.enqueue_dma source(%37 : memref<256x256xbf16, #tpu.memory_space<any>>) target(%39 : memref<256x256xbf16, #tpu.memory_space<vmem>>) target_semaphore(%41 : memref<!tpu.dma_semaphore, #tpu.memory_space<semaphore_mem>>)
    %c7_i32 = arith.constant 7 : i32
    %c7_i32_42 = arith.constant 7 : i32
    %c7_i32_43 = arith.constant 7 : i32
    %c0_i32_44 = arith.constant 0 : i32
    %c0_i32_45 = arith.constant 0 : i32
    %42 = tpu.memref_slice %arg3[%c7_i32, %c0_i32_44, %c0_i32_45] : memref<9x256x256xbf16, #tpu.memory_space<any>> -> memref<1x256x256xbf16, #tpu.memory_space<any>>
    %43 = tpu.memref_squeeze %42 : memref<1x256x256xbf16, #tpu.memory_space<any>> -> memref<256x256xbf16, #tpu.memory_space<any>>
    %c0_i32_46 = arith.constant 0 : i32
    %c0_i32_47 = arith.constant 0 : i32
    %44 = tpu.memref_slice %arg6[%c7_i32_42, %c0_i32_46, %c0_i32_47] : memref<9x256x256xbf16, #tpu.memory_space<vmem>> -> memref<1x256x256xbf16, #tpu.memory_space<vmem>>
    %45 = tpu.memref_squeeze %44 : memref<1x256x256xbf16, #tpu.memory_space<vmem>> -> memref<256x256xbf16, #tpu.memory_space<vmem>>
    %46 = tpu.memref_slice %arg7[%c7_i32_43] : memref<9x!tpu.dma_semaphore, #tpu.memory_space<semaphore_mem>> -> memref<1x!tpu.dma_semaphore, #tpu.memory_space<semaphore_mem>>
    %47 = tpu.memref_squeeze %46 : memref<1x!tpu.dma_semaphore, #tpu.memory_space<semaphore_mem>> -> memref<!tpu.dma_semaphore, #tpu.memory_space<semaphore_mem>>
    tpu.enqueue_dma source(%43 : memref<256x256xbf16, #tpu.memory_space<any>>) target(%45 : memref<256x256xbf16, #tpu.memory_space<vmem>>) target_semaphore(%47 : memref<!tpu.dma_semaphore, #tpu.memory_space<semaphore_mem>>)
    %c8_i32 = arith.constant 8 : i32
    %c8_i32_48 = arith.constant 8 : i32
    %c8_i32_49 = arith.constant 8 : i32
    %c0_i32_50 = arith.constant 0 : i32
    %c0_i32_51 = arith.constant 0 : i32
    %48 = tpu.memref_slice %arg3[%c8_i32, %c0_i32_50, %c0_i32_51] : memref<9x256x256xbf16, #tpu.memory_space<any>> -> memref<1x256x256xbf16, #tpu.memory_space<any>>
    %49 = tpu.memref_squeeze %48 : memref<1x256x256xbf16, #tpu.memory_space<any>> -> memref<256x256xbf16, #tpu.memory_space<any>>
    %c0_i32_52 = arith.constant 0 : i32
    %c0_i32_53 = arith.constant 0 : i32
    %50 = tpu.memref_slice %arg6[%c8_i32_48, %c0_i32_52, %c0_i32_53] : memref<9x256x256xbf16, #tpu.memory_space<vmem>> -> memref<1x256x256xbf16, #tpu.memory_space<vmem>>
    %51 = tpu.memref_squeeze %50 : memref<1x256x256xbf16, #tpu.memory_space<vmem>> -> memref<256x256xbf16, #tpu.memory_space<vmem>>
    %52 = tpu.memref_slice %arg7[%c8_i32_49] : memref<9x!tpu.dma_semaphore, #tpu.memory_space<semaphore_mem>> -> memref<1x!tpu.dma_semaphore, #tpu.memory_space<semaphore_mem>>
    %53 = tpu.memref_squeeze %52 : memref<1x!tpu.dma_semaphore, #tpu.memory_space<semaphore_mem>> -> memref<!tpu.dma_semaphore, #tpu.memory_space<semaphore_mem>>
    tpu.enqueue_dma source(%49 : memref<256x256xbf16, #tpu.memory_space<any>>) target(%51 : memref<256x256xbf16, #tpu.memory_space<vmem>>) target_semaphore(%53 : memref<!tpu.dma_semaphore, #tpu.memory_space<semaphore_mem>>)
    %c0 = arith.constant 0 : index
    %c0_54 = arith.constant 0 : index
    %54 = vector.load %arg2[%c0, %c0_54] : memref<8x256xf32, #tpu.memory_space<vmem>>, vector<1x256xf32>
    %c1 = arith.constant 1 : index
    %c0_55 = arith.constant 0 : index
    %55 = vector.load %arg2[%c1, %c0_55] : memref<8x256xf32, #tpu.memory_space<vmem>>, vector<1x256xf32>
    %c2 = arith.constant 2 : index
    %c0_56 = arith.constant 0 : index
    %56 = vector.load %arg2[%c2, %c0_56] : memref<8x256xf32, #tpu.memory_space<vmem>>, vector<1x256xf32>
    %c3 = arith.constant 3 : index
    %c0_57 = arith.constant 0 : index
    %57 = vector.load %arg2[%c3, %c0_57] : memref<8x256xf32, #tpu.memory_space<vmem>>, vector<1x256xf32>
    %c0_58 = arith.constant 0 : index
    %c0_59 = arith.constant 0 : index
    %58 = vector.load %arg0[%c0_58, %c0_59] : memref<224x256xf32, #tpu.memory_space<vmem>>, vector<224x256xf32>
    %cst = arith.constant dense<0.000000e+00> : vector<256xf32>
    %59 = vector.multi_reduction <add>, %58, %cst [0] : vector<224x256xf32> to vector<256xf32>
    %60 = vector.shape_cast %59 : vector<256xf32> to vector<1x256xf32>
    %61 = arith.mulf %58, %58 : vector<224x256xf32>
    %cst_60 = arith.constant dense<0.000000e+00> : vector<256xf32>
    %62 = vector.multi_reduction <add>, %61, %cst_60 [0] : vector<224x256xf32> to vector<256xf32>
    %63 = vector.shape_cast %62 : vector<256xf32> to vector<1x256xf32>
    %cst_61 = arith.constant 0.00510204071 : f32
    %64 = vector.broadcast %cst_61 : f32 to vector<1x256xf32>
    %65 = arith.mulf %60, %64 : vector<1x256xf32>
    %cst_62 = arith.constant 0.00510204071 : f32
    %66 = vector.broadcast %cst_62 : f32 to vector<1x256xf32>
    %67 = arith.mulf %63, %66 : vector<1x256xf32>
    %68 = arith.mulf %65, %65 : vector<1x256xf32>
    %69 = arith.subf %67, %68 : vector<1x256xf32>
    %70 = vector.broadcast %65 : vector<1x256xf32> to vector<224x256xf32>
    %71 = arith.subf %58, %70 : vector<224x256xf32>
    %cst_63 = arith.constant 9.99999974E-6 : f32
    %72 = vector.broadcast %cst_63 : f32 to vector<1x256xf32>
    %73 = arith.addf %69, %72 : vector<1x256xf32>
    %74 = math.rsqrt %73 : vector<1x256xf32>
    %75 = vector.broadcast %74 : vector<1x256xf32> to vector<224x256xf32>
    %76 = arith.mulf %71, %75 : vector<224x256xf32>
    %77 = vector.broadcast %54 : vector<1x256xf32> to vector<224x256xf32>
    %78 = arith.mulf %76, %77 : vector<224x256xf32>
    %79 = vector.broadcast %55 : vector<1x256xf32> to vector<224x256xf32>
    %80 = arith.addf %78, %79 : vector<224x256xf32>
    %cst_64 = arith.constant 0.000000e+00 : f32
    %81 = vector.broadcast %cst_64 : f32 to vector<224x256xf32>
    %82 = arith.maximumf %80, %81 : vector<224x256xf32>
    %c0_65 = arith.constant 0 : index
    %c0_66 = arith.constant 0 : index
    %83 = vector.load %arg1[%c0_65, %c0_66] : memref<224x256xbf16, #tpu.memory_space<vmem>>, vector<224x256xbf16>
    %84 = arith.extf %83 : vector<224x256xbf16> to vector<224x256xf32>
    %85 = arith.mulf %82, %84 : vector<224x256xf32>
    %cst_67 = arith.constant 0.000000e+00 : f32
    %86 = vector.broadcast %cst_67 : f32 to vector<24x256xf32>
    %c0_68 = arith.constant 0 : index
    %c0_69 = arith.constant 0 : index
    %87 = vector.load %arg5[%c0_68, %c0_69] : memref<272x256xf32, #tpu.memory_space<vmem>>, vector<24x256xf32>
    tpu.vector_store %arg5[%c0_68, %c0_69], %86 {strides = array<i32>} : memref<272x256xf32, #tpu.memory_space<vmem>>, vector<24x256xf32>,
    %cst_70 = arith.constant 0.000000e+00 : f32
    %88 = vector.broadcast %cst_70 : f32 to vector<24x256xf32>
    %c248 = arith.constant 248 : index
    %c0_71 = arith.constant 0 : index
    %89 = vector.load %arg5[%c248, %c0_71] : memref<272x256xf32, #tpu.memory_space<vmem>>, vector<24x256xf32>
    tpu.vector_store %arg5[%c248, %c0_71], %88 {strides = array<i32>} : memref<272x256xf32, #tpu.memory_space<vmem>>, vector<24x256xf32>,
    %c24 = arith.constant 24 : index
    %c0_72 = arith.constant 0 : index
    %90 = vector.load %arg5[%c24, %c0_72] : memref<272x256xf32, #tpu.memory_space<vmem>>, vector<224x256xf32>
    tpu.vector_store %arg5[%c24, %c0_72], %85 {strides = array<i32>} : memref<272x256xf32, #tpu.memory_space<vmem>>, vector<224x256xf32>,
    %c0_i32_73 = arith.constant 0 : i32
    %c0_i32_74 = arith.constant 0 : i32
    %c0_i32_75 = arith.constant 0 : i32
    %c0_i32_76 = arith.constant 0 : i32
    %c0_i32_77 = arith.constant 0 : i32
    %91 = tpu.memref_slice %arg3[%c0_i32_73, %c0_i32_76, %c0_i32_77] : memref<9x256x256xbf16, #tpu.memory_space<any>> -> memref<1x256x256xbf16, #tpu.memory_space<any>>
    %92 = tpu.memref_squeeze %91 : memref<1x256x256xbf16, #tpu.memory_space<any>> -> memref<256x256xbf16, #tpu.memory_space<any>>
    %c0_i32_78 = arith.constant 0 : i32
    %c0_i32_79 = arith.constant 0 : i32
    %93 = tpu.memref_slice %arg6[%c0_i32_74, %c0_i32_78, %c0_i32_79] : memref<9x256x256xbf16, #tpu.memory_space<vmem>> -> memref<1x256x256xbf16, #tpu.memory_space<vmem>>
    %94 = tpu.memref_squeeze %93 : memref<1x256x256xbf16, #tpu.memory_space<vmem>> -> memref<256x256xbf16, #tpu.memory_space<vmem>>
    %95 = tpu.memref_slice %arg7[%c0_i32_75] : memref<9x!tpu.dma_semaphore, #tpu.memory_space<semaphore_mem>> -> memref<1x!tpu.dma_semaphore, #tpu.memory_space<semaphore_mem>>
    %96 = tpu.memref_squeeze %95 : memref<1x!tpu.dma_semaphore, #tpu.memory_space<semaphore_mem>> -> memref<!tpu.dma_semaphore, #tpu.memory_space<semaphore_mem>>
    tpu.wait_dma2 semaphore(%96 : memref<!tpu.dma_semaphore, #tpu.memory_space<semaphore_mem>>) src(%92 : memref<256x256xbf16, #tpu.memory_space<any>>) dst(%94 : memref<256x256xbf16, #tpu.memory_space<vmem>>)
    %c7 = arith.constant 7 : index
    %c0_80 = arith.constant 0 : index
    %97 = vector.load %arg5[%c7, %c0_80] : memref<272x256xf32, #tpu.memory_space<vmem>>, vector<224x256xf32>
    %98 = arith.truncf %97 : vector<224x256xf32> to vector<224x256xbf16>
    %c0_81 = arith.constant 0 : index
    %c0_82 = arith.constant 0 : index
    %c0_83 = arith.constant 0 : index
    %99 = vector.load %arg6[%c0_81, %c0_82, %c0_83] : memref<9x256x256xbf16, #tpu.memory_space<vmem>>, vector<1x256x256xbf16>
    %100 = vector.shape_cast %99 : vector<1x256x256xbf16> to vector<256x256xbf16>
    %cst_84 = arith.constant dense<0.000000e+00> : vector<224x256xf32>
    %101 = tpu.matmul %98, %100, %cst_84 {dimension_numbers = #tpu.dot_dimension_numbers<[1], [0], [0], [1], [0, 0, 1, 1], [], []>} : vector<224x256xbf16>, vector<256x256xbf16>, vector<224x256xf32> -> vector<224x256xf32>
    %c1_i32_85 = arith.constant 1 : i32
    %c1_i32_86 = arith.constant 1 : i32
    %c1_i32_87 = arith.constant 1 : i32
    %c0_i32_88 = arith.constant 0 : i32
    %c0_i32_89 = arith.constant 0 : i32
    %102 = tpu.memref_slice %arg3[%c1_i32_85, %c0_i32_88, %c0_i32_89] : memref<9x256x256xbf16, #tpu.memory_space<any>> -> memref<1x256x256xbf16, #tpu.memory_space<any>>
    %103 = tpu.memref_squeeze %102 : memref<1x256x256xbf16, #tpu.memory_space<any>> -> memref<256x256xbf16, #tpu.memory_space<any>>
    %c0_i32_90 = arith.constant 0 : i32
    %c0_i32_91 = arith.constant 0 : i32
    %104 = tpu.memref_slice %arg6[%c1_i32_86, %c0_i32_90, %c0_i32_91] : memref<9x256x256xbf16, #tpu.memory_space<vmem>> -> memref<1x256x256xbf16, #tpu.memory_space<vmem>>
    %105 = tpu.memref_squeeze %104 : memref<1x256x256xbf16, #tpu.memory_space<vmem>> -> memref<256x256xbf16, #tpu.memory_space<vmem>>
    %106 = tpu.memref_slice %arg7[%c1_i32_87] : memref<9x!tpu.dma_semaphore, #tpu.memory_space<semaphore_mem>> -> memref<1x!tpu.dma_semaphore, #tpu.memory_space<semaphore_mem>>
    %107 = tpu.memref_squeeze %106 : memref<1x!tpu.dma_semaphore, #tpu.memory_space<semaphore_mem>> -> memref<!tpu.dma_semaphore, #tpu.memory_space<semaphore_mem>>
    tpu.wait_dma2 semaphore(%107 : memref<!tpu.dma_semaphore, #tpu.memory_space<semaphore_mem>>) src(%103 : memref<256x256xbf16, #tpu.memory_space<any>>) dst(%105 : memref<256x256xbf16, #tpu.memory_space<vmem>>)
    %c8 = arith.constant 8 : index
    %c0_92 = arith.constant 0 : index
    %108 = vector.load %arg5[%c8, %c0_92] : memref<272x256xf32, #tpu.memory_space<vmem>>, vector<224x256xf32>
    %109 = arith.truncf %108 : vector<224x256xf32> to vector<224x256xbf16>
    %c1_93 = arith.constant 1 : index
    %c0_94 = arith.constant 0 : index
    %c0_95 = arith.constant 0 : index
    %110 = vector.load %arg6[%c1_93, %c0_94, %c0_95] : memref<9x256x256xbf16, #tpu.memory_space<vmem>>, vector<1x256x256xbf16>
    %111 = vector.shape_cast %110 : vector<1x256x256xbf16> to vector<256x256xbf16>
    %cst_96 = arith.constant dense<0.000000e+00> : vector<224x256xf32>
    %112 = tpu.matmul %109, %111, %cst_96 {dimension_numbers = #tpu.dot_dimension_numbers<[1], [0], [0], [1], [0, 0, 1, 1], [], []>} : vector<224x256xbf16>, vector<256x256xbf16>, vector<224x256xf32> -> vector<224x256xf32>
    %113 = arith.addf %101, %112 : vector<224x256xf32>
    %c2_i32_97 = arith.constant 2 : i32
    %c2_i32_98 = arith.constant 2 : i32
    %c2_i32_99 = arith.constant 2 : i32
    %c0_i32_100 = arith.constant 0 : i32
    %c0_i32_101 = arith.constant 0 : i32
    %114 = tpu.memref_slice %arg3[%c2_i32_97, %c0_i32_100, %c0_i32_101] : memref<9x256x256xbf16, #tpu.memory_space<any>> -> memref<1x256x256xbf16, #tpu.memory_space<any>>
    %115 = tpu.memref_squeeze %114 : memref<1x256x256xbf16, #tpu.memory_space<any>> -> memref<256x256xbf16, #tpu.memory_space<any>>
    %c0_i32_102 = arith.constant 0 : i32
    %c0_i32_103 = arith.constant 0 : i32
    %116 = tpu.memref_slice %arg6[%c2_i32_98, %c0_i32_102, %c0_i32_103] : memref<9x256x256xbf16, #tpu.memory_space<vmem>> -> memref<1x256x256xbf16, #tpu.memory_space<vmem>>
    %117 = tpu.memref_squeeze %116 : memref<1x256x256xbf16, #tpu.memory_space<vmem>> -> memref<256x256xbf16, #tpu.memory_space<vmem>>
    %118 = tpu.memref_slice %arg7[%c2_i32_99] : memref<9x!tpu.dma_semaphore, #tpu.memory_space<semaphore_mem>> -> memref<1x!tpu.dma_semaphore, #tpu.memory_space<semaphore_mem>>
    %119 = tpu.memref_squeeze %118 : memref<1x!tpu.dma_semaphore, #tpu.memory_space<semaphore_mem>> -> memref<!tpu.dma_semaphore, #tpu.memory_space<semaphore_mem>>
    tpu.wait_dma2 semaphore(%119 : memref<!tpu.dma_semaphore, #tpu.memory_space<semaphore_mem>>) src(%115 : memref<256x256xbf16, #tpu.memory_space<any>>) dst(%117 : memref<256x256xbf16, #tpu.memory_space<vmem>>)
    %c9 = arith.constant 9 : index
    %c0_104 = arith.constant 0 : index
    %120 = vector.load %arg5[%c9, %c0_104] : memref<272x256xf32, #tpu.memory_space<vmem>>, vector<224x256xf32>
    %121 = arith.truncf %120 : vector<224x256xf32> to vector<224x256xbf16>
    %c2_105 = arith.constant 2 : index
    %c0_106 = arith.constant 0 : index
    %c0_107 = arith.constant 0 : index
    %122 = vector.load %arg6[%c2_105, %c0_106, %c0_107] : memref<9x256x256xbf16, #tpu.memory_space<vmem>>, vector<1x256x256xbf16>
    %123 = vector.shape_cast %122 : vector<1x256x256xbf16> to vector<256x256xbf16>
    %cst_108 = arith.constant dense<0.000000e+00> : vector<224x256xf32>
    %124 = tpu.matmul %121, %123, %cst_108 {dimension_numbers = #tpu.dot_dimension_numbers<[1], [0], [0], [1], [0, 0, 1, 1], [], []>} : vector<224x256xbf16>, vector<256x256xbf16>, vector<224x256xf32> -> vector<224x256xf32>
    %125 = arith.addf %113, %124 : vector<224x256xf32>
    %c3_i32_109 = arith.constant 3 : i32
    %c3_i32_110 = arith.constant 3 : i32
    %c3_i32_111 = arith.constant 3 : i32
    %c0_i32_112 = arith.constant 0 : i32
    %c0_i32_113 = arith.constant 0 : i32
    %126 = tpu.memref_slice %arg3[%c3_i32_109, %c0_i32_112, %c0_i32_113] : memref<9x256x256xbf16, #tpu.memory_space<any>> -> memref<1x256x256xbf16, #tpu.memory_space<any>>
    %127 = tpu.memref_squeeze %126 : memref<1x256x256xbf16, #tpu.memory_space<any>> -> memref<256x256xbf16, #tpu.memory_space<any>>
    %c0_i32_114 = arith.constant 0 : i32
    %c0_i32_115 = arith.constant 0 : i32
    %128 = tpu.memref_slice %arg6[%c3_i32_110, %c0_i32_114, %c0_i32_115] : memref<9x256x256xbf16, #tpu.memory_space<vmem>> -> memref<1x256x256xbf16, #tpu.memory_space<vmem>>
    %129 = tpu.memref_squeeze %128 : memref<1x256x256xbf16, #tpu.memory_space<vmem>> -> memref<256x256xbf16, #tpu.memory_space<vmem>>
    %130 = tpu.memref_slice %arg7[%c3_i32_111] : memref<9x!tpu.dma_semaphore, #tpu.memory_space<semaphore_mem>> -> memref<1x!tpu.dma_semaphore, #tpu.memory_space<semaphore_mem>>
    %131 = tpu.memref_squeeze %130 : memref<1x!tpu.dma_semaphore, #tpu.memory_space<semaphore_mem>> -> memref<!tpu.dma_semaphore, #tpu.memory_space<semaphore_mem>>
    tpu.wait_dma2 semaphore(%131 : memref<!tpu.dma_semaphore, #tpu.memory_space<semaphore_mem>>) src(%127 : memref<256x256xbf16, #tpu.memory_space<any>>) dst(%129 : memref<256x256xbf16, #tpu.memory_space<vmem>>)
    %c23 = arith.constant 23 : index
    %c0_116 = arith.constant 0 : index
    %132 = vector.load %arg5[%c23, %c0_116] : memref<272x256xf32, #tpu.memory_space<vmem>>, vector<224x256xf32>
    %133 = arith.truncf %132 : vector<224x256xf32> to vector<224x256xbf16>
    %c3_117 = arith.constant 3 : index
    %c0_118 = arith.constant 0 : index
    %c0_119 = arith.constant 0 : index
    %134 = vector.load %arg6[%c3_117, %c0_118, %c0_119] : memref<9x256x256xbf16, #tpu.memory_space<vmem>>, vector<1x256x256xbf16>
    %135 = vector.shape_cast %134 : vector<1x256x256xbf16> to vector<256x256xbf16>
    %cst_120 = arith.constant dense<0.000000e+00> : vector<224x256xf32>
    %136 = tpu.matmul %133, %135, %cst_120 {dimension_numbers = #tpu.dot_dimension_numbers<[1], [0], [0], [1], [0, 0, 1, 1], [], []>} : vector<224x256xbf16>, vector<256x256xbf16>, vector<224x256xf32> -> vector<224x256xf32>
    %137 = arith.addf %125, %136 : vector<224x256xf32>
    %c4_i32_121 = arith.constant 4 : i32
    %c4_i32_122 = arith.constant 4 : i32
    %c4_i32_123 = arith.constant 4 : i32
    %c0_i32_124 = arith.constant 0 : i32
    %c0_i32_125 = arith.constant 0 : i32
    %138 = tpu.memref_slice %arg3[%c4_i32_121, %c0_i32_124, %c0_i32_125] : memref<9x256x256xbf16, #tpu.memory_space<any>> -> memref<1x256x256xbf16, #tpu.memory_space<any>>
    %139 = tpu.memref_squeeze %138 : memref<1x256x256xbf16, #tpu.memory_space<any>> -> memref<256x256xbf16, #tpu.memory_space<any>>
    %c0_i32_126 = arith.constant 0 : i32
    %c0_i32_127 = arith.constant 0 : i32
    %140 = tpu.memref_slice %arg6[%c4_i32_122, %c0_i32_126, %c0_i32_127] : memref<9x256x256xbf16, #tpu.memory_space<vmem>> -> memref<1x256x256xbf16, #tpu.memory_space<vmem>>
    %141 = tpu.memref_squeeze %140 : memref<1x256x256xbf16, #tpu.memory_space<vmem>> -> memref<256x256xbf16, #tpu.memory_space<vmem>>
    %142 = tpu.memref_slice %arg7[%c4_i32_123] : memref<9x!tpu.dma_semaphore, #tpu.memory_space<semaphore_mem>> -> memref<1x!tpu.dma_semaphore, #tpu.memory_space<semaphore_mem>>
    %143 = tpu.memref_squeeze %142 : memref<1x!tpu.dma_semaphore, #tpu.memory_space<semaphore_mem>> -> memref<!tpu.dma_semaphore, #tpu.memory_space<semaphore_mem>>
    tpu.wait_dma2 semaphore(%143 : memref<!tpu.dma_semaphore, #tpu.memory_space<semaphore_mem>>) src(%139 : memref<256x256xbf16, #tpu.memory_space<any>>) dst(%141 : memref<256x256xbf16, #tpu.memory_space<vmem>>)
    %c24_128 = arith.constant 24 : index
    %c0_129 = arith.constant 0 : index
    %144 = vector.load %arg5[%c24_128, %c0_129] : memref<272x256xf32, #tpu.memory_space<vmem>>, vector<224x256xf32>
    %145 = arith.truncf %144 : vector<224x256xf32> to vector<224x256xbf16>
    %c4 = arith.constant 4 : index
    %c0_130 = arith.constant 0 : index
    %c0_131 = arith.constant 0 : index
    %146 = vector.load %arg6[%c4, %c0_130, %c0_131] : memref<9x256x256xbf16, #tpu.memory_space<vmem>>, vector<1x256x256xbf16>
    %147 = vector.shape_cast %146 : vector<1x256x256xbf16> to vector<256x256xbf16>
    %cst_132 = arith.constant dense<0.000000e+00> : vector<224x256xf32>
    %148 = tpu.matmul %145, %147, %cst_132 {dimension_numbers = #tpu.dot_dimension_numbers<[1], [0], [0], [1], [0, 0, 1, 1], [], []>} : vector<224x256xbf16>, vector<256x256xbf16>, vector<224x256xf32> -> vector<224x256xf32>
    %149 = arith.addf %137, %148 : vector<224x256xf32>
    %c5_i32_133 = arith.constant 5 : i32
    %c5_i32_134 = arith.constant 5 : i32
    %c5_i32_135 = arith.constant 5 : i32
    %c0_i32_136 = arith.constant 0 : i32
    %c0_i32_137 = arith.constant 0 : i32
    %150 = tpu.memref_slice %arg3[%c5_i32_133, %c0_i32_136, %c0_i32_137] : memref<9x256x256xbf16, #tpu.memory_space<any>> -> memref<1x256x256xbf16, #tpu.memory_space<any>>
    %151 = tpu.memref_squeeze %150 : memref<1x256x256xbf16, #tpu.memory_space<any>> -> memref<256x256xbf16, #tpu.memory_space<any>>
    %c0_i32_138 = arith.constant 0 : i32
    %c0_i32_139 = arith.constant 0 : i32
    %152 = tpu.memref_slice %arg6[%c5_i32_134, %c0_i32_138, %c0_i32_139] : memref<9x256x256xbf16, #tpu.memory_space<vmem>> -> memref<1x256x256xbf16, #tpu.memory_space<vmem>>
    %153 = tpu.memref_squeeze %152 : memref<1x256x256xbf16, #tpu.memory_space<vmem>> -> memref<256x256xbf16, #tpu.memory_space<vmem>>
    %154 = tpu.memref_slice %arg7[%c5_i32_135] : memref<9x!tpu.dma_semaphore, #tpu.memory_space<semaphore_mem>> -> memref<1x!tpu.dma_semaphore, #tpu.memory_space<semaphore_mem>>
    %155 = tpu.memref_squeeze %154 : memref<1x!tpu.dma_semaphore, #tpu.memory_space<semaphore_mem>> -> memref<!tpu.dma_semaphore, #tpu.memory_space<semaphore_mem>>
    tpu.wait_dma2 semaphore(%155 : memref<!tpu.dma_semaphore, #tpu.memory_space<semaphore_mem>>) src(%151 : memref<256x256xbf16, #tpu.memory_space<any>>) dst(%153 : memref<256x256xbf16, #tpu.memory_space<vmem>>)
    %c25 = arith.constant 25 : index
    %c0_140 = arith.constant 0 : index
    %156 = vector.load %arg5[%c25, %c0_140] : memref<272x256xf32, #tpu.memory_space<vmem>>, vector<224x256xf32>
    %157 = arith.truncf %156 : vector<224x256xf32> to vector<224x256xbf16>
    %c5 = arith.constant 5 : index
    %c0_141 = arith.constant 0 : index
    %c0_142 = arith.constant 0 : index
    %158 = vector.load %arg6[%c5, %c0_141, %c0_142] : memref<9x256x256xbf16, #tpu.memory_space<vmem>>, vector<1x256x256xbf16>
    %159 = vector.shape_cast %158 : vector<1x256x256xbf16> to vector<256x256xbf16>
    %cst_143 = arith.constant dense<0.000000e+00> : vector<224x256xf32>
    %160 = tpu.matmul %157, %159, %cst_143 {dimension_numbers = #tpu.dot_dimension_numbers<[1], [0], [0], [1], [0, 0, 1, 1], [], []>} : vector<224x256xbf16>, vector<256x256xbf16>, vector<224x256xf32> -> vector<224x256xf32>
    %161 = arith.addf %149, %160 : vector<224x256xf32>
    %c6_i32_144 = arith.constant 6 : i32
    %c6_i32_145 = arith.constant 6 : i32
    %c6_i32_146 = arith.constant 6 : i32
    %c0_i32_147 = arith.constant 0 : i32
    %c0_i32_148 = arith.constant 0 : i32
    %162 = tpu.memref_slice %arg3[%c6_i32_144, %c0_i32_147, %c0_i32_148] : memref<9x256x256xbf16, #tpu.memory_space<any>> -> memref<1x256x256xbf16, #tpu.memory_space<any>>
    %163 = tpu.memref_squeeze %162 : memref<1x256x256xbf16, #tpu.memory_space<any>> -> memref<256x256xbf16, #tpu.memory_space<any>>
    %c0_i32_149 = arith.constant 0 : i32
    %c0_i32_150 = arith.constant 0 : i32
    %164 = tpu.memref_slice %arg6[%c6_i32_145, %c0_i32_149, %c0_i32_150] : memref<9x256x256xbf16, #tpu.memory_space<vmem>> -> memref<1x256x256xbf16, #tpu.memory_space<vmem>>
    %165 = tpu.memref_squeeze %164 : memref<1x256x256xbf16, #tpu.memory_space<vmem>> -> memref<256x256xbf16, #tpu.memory_space<vmem>>
    %166 = tpu.memref_slice %arg7[%c6_i32_146] : memref<9x!tpu.dma_semaphore, #tpu.memory_space<semaphore_mem>> -> memref<1x!tpu.dma_semaphore, #tpu.memory_space<semaphore_mem>>
    %167 = tpu.memref_squeeze %166 : memref<1x!tpu.dma_semaphore, #tpu.memory_space<semaphore_mem>> -> memref<!tpu.dma_semaphore, #tpu.memory_space<semaphore_mem>>
    tpu.wait_dma2 semaphore(%167 : memref<!tpu.dma_semaphore, #tpu.memory_space<semaphore_mem>>) src(%163 : memref<256x256xbf16, #tpu.memory_space<any>>) dst(%165 : memref<256x256xbf16, #tpu.memory_space<vmem>>)
    %c39 = arith.constant 39 : index
    %c0_151 = arith.constant 0 : index
    %168 = vector.load %arg5[%c39, %c0_151] : memref<272x256xf32, #tpu.memory_space<vmem>>, vector<224x256xf32>
    %169 = arith.truncf %168 : vector<224x256xf32> to vector<224x256xbf16>
    %c6 = arith.constant 6 : index
    %c0_152 = arith.constant 0 : index
    %c0_153 = arith.constant 0 : index
    %170 = vector.load %arg6[%c6, %c0_152, %c0_153] : memref<9x256x256xbf16, #tpu.memory_space<vmem>>, vector<1x256x256xbf16>
    %171 = vector.shape_cast %170 : vector<1x256x256xbf16> to vector<256x256xbf16>
    %cst_154 = arith.constant dense<0.000000e+00> : vector<224x256xf32>
    %172 = tpu.matmul %169, %171, %cst_154 {dimension_numbers = #tpu.dot_dimension_numbers<[1], [0], [0], [1], [0, 0, 1, 1], [], []>} : vector<224x256xbf16>, vector<256x256xbf16>, vector<224x256xf32> -> vector<224x256xf32>
    %173 = arith.addf %161, %172 : vector<224x256xf32>
    %c7_i32_155 = arith.constant 7 : i32
    %c7_i32_156 = arith.constant 7 : i32
    %c7_i32_157 = arith.constant 7 : i32
    %c0_i32_158 = arith.constant 0 : i32
    %c0_i32_159 = arith.constant 0 : i32
    %174 = tpu.memref_slice %arg3[%c7_i32_155, %c0_i32_158, %c0_i32_159] : memref<9x256x256xbf16, #tpu.memory_space<any>> -> memref<1x256x256xbf16, #tpu.memory_space<any>>
    %175 = tpu.memref_squeeze %174 : memref<1x256x256xbf16, #tpu.memory_space<any>> -> memref<256x256xbf16, #tpu.memory_space<any>>
    %c0_i32_160 = arith.constant 0 : i32
    %c0_i32_161 = arith.constant 0 : i32
    %176 = tpu.memref_slice %arg6[%c7_i32_156, %c0_i32_160, %c0_i32_161] : memref<9x256x256xbf16, #tpu.memory_space<vmem>> -> memref<1x256x256xbf16, #tpu.memory_space<vmem>>
    %177 = tpu.memref_squeeze %176 : memref<1x256x256xbf16, #tpu.memory_space<vmem>> -> memref<256x256xbf16, #tpu.memory_space<vmem>>
    %178 = tpu.memref_slice %arg7[%c7_i32_157] : memref<9x!tpu.dma_semaphore, #tpu.memory_space<semaphore_mem>> -> memref<1x!tpu.dma_semaphore, #tpu.memory_space<semaphore_mem>>
    %179 = tpu.memref_squeeze %178 : memref<1x!tpu.dma_semaphore, #tpu.memory_space<semaphore_mem>> -> memref<!tpu.dma_semaphore, #tpu.memory_space<semaphore_mem>>
    tpu.wait_dma2 semaphore(%179 : memref<!tpu.dma_semaphore, #tpu.memory_space<semaphore_mem>>) src(%175 : memref<256x256xbf16, #tpu.memory_space<any>>) dst(%177 : memref<256x256xbf16, #tpu.memory_space<vmem>>)
    %c40 = arith.constant 40 : index
    %c0_162 = arith.constant 0 : index
    %180 = vector.load %arg5[%c40, %c0_162] : memref<272x256xf32, #tpu.memory_space<vmem>>, vector<224x256xf32>
    %181 = arith.truncf %180 : vector<224x256xf32> to vector<224x256xbf16>
    %c7_163 = arith.constant 7 : index
    %c0_164 = arith.constant 0 : index
    %c0_165 = arith.constant 0 : index
    %182 = vector.load %arg6[%c7_163, %c0_164, %c0_165] : memref<9x256x256xbf16, #tpu.memory_space<vmem>>, vector<1x256x256xbf16>
    %183 = vector.shape_cast %182 : vector<1x256x256xbf16> to vector<256x256xbf16>
    %cst_166 = arith.constant dense<0.000000e+00> : vector<224x256xf32>
    %184 = tpu.matmul %181, %183, %cst_166 {dimension_numbers = #tpu.dot_dimension_numbers<[1], [0], [0], [1], [0, 0, 1, 1], [], []>} : vector<224x256xbf16>, vector<256x256xbf16>, vector<224x256xf32> -> vector<224x256xf32>
    %185 = arith.addf %173, %184 : vector<224x256xf32>
    %c8_i32_167 = arith.constant 8 : i32
    %c8_i32_168 = arith.constant 8 : i32
    %c8_i32_169 = arith.constant 8 : i32
    %c0_i32_170 = arith.constant 0 : i32
    %c0_i32_171 = arith.constant 0 : i32
    %186 = tpu.memref_slice %arg3[%c8_i32_167, %c0_i32_170, %c0_i32_171] : memref<9x256x256xbf16, #tpu.memory_space<any>> -> memref<1x256x256xbf16, #tpu.memory_space<any>>
    %187 = tpu.memref_squeeze %186 : memref<1x256x256xbf16, #tpu.memory_space<any>> -> memref<256x256xbf16, #tpu.memory_space<any>>
    %c0_i32_172 = arith.constant 0 : i32
    %c0_i32_173 = arith.constant 0 : i32
    %188 = tpu.memref_slice %arg6[%c8_i32_168, %c0_i32_172, %c0_i32_173] : memref<9x256x256xbf16, #tpu.memory_space<vmem>> -> memref<1x256x256xbf16, #tpu.memory_space<vmem>>
    %189 = tpu.memref_squeeze %188 : memref<1x256x256xbf16, #tpu.memory_space<vmem>> -> memref<256x256xbf16, #tpu.memory_space<vmem>>
    %190 = tpu.memref_slice %arg7[%c8_i32_169] : memref<9x!tpu.dma_semaphore, #tpu.memory_space<semaphore_mem>> -> memref<1x!tpu.dma_semaphore, #tpu.memory_space<semaphore_mem>>
    %191 = tpu.memref_squeeze %190 : memref<1x!tpu.dma_semaphore, #tpu.memory_space<semaphore_mem>> -> memref<!tpu.dma_semaphore, #tpu.memory_space<semaphore_mem>>
    tpu.wait_dma2 semaphore(%191 : memref<!tpu.dma_semaphore, #tpu.memory_space<semaphore_mem>>) src(%187 : memref<256x256xbf16, #tpu.memory_space<any>>) dst(%189 : memref<256x256xbf16, #tpu.memory_space<vmem>>)
    %c41 = arith.constant 41 : index
    %c0_174 = arith.constant 0 : index
    %192 = vector.load %arg5[%c41, %c0_174] : memref<272x256xf32, #tpu.memory_space<vmem>>, vector<224x256xf32>
    %193 = arith.truncf %192 : vector<224x256xf32> to vector<224x256xbf16>
    %c8_175 = arith.constant 8 : index
    %c0_176 = arith.constant 0 : index
    %c0_177 = arith.constant 0 : index
    %194 = vector.load %arg6[%c8_175, %c0_176, %c0_177] : memref<9x256x256xbf16, #tpu.memory_space<vmem>>, vector<1x256x256xbf16>
    %195 = vector.shape_cast %194 : vector<1x256x256xbf16> to vector<256x256xbf16>
    %cst_178 = arith.constant dense<0.000000e+00> : vector<224x256xf32>
    %196 = tpu.matmul %193, %195, %cst_178 {dimension_numbers = #tpu.dot_dimension_numbers<[1], [0], [0], [1], [0, 0, 1, 1], [], []>} : vector<224x256xbf16>, vector<256x256xbf16>, vector<224x256xf32> -> vector<224x256xf32>
    %197 = arith.addf %185, %196 : vector<224x256xf32>
    %198 = tpu.iota {dimensions = array<i32: 0>} : vector<224x256xi32>
    %c16_i32 = arith.constant 16 : i32
    %c0_i32_179 = arith.constant 0 : i32
    %199 = arith.cmpi eq, %c16_i32, %c0_i32_179 : i32
    %c1_i32_180 = arith.constant 1 : i32
    %200 = arith.select %199, %c1_i32_180, %c16_i32 : i32
    %201 = vector.broadcast %200 : i32 to vector<224x256xi32>
    %202 = arith.remsi %198, %201 : vector<224x256xi32>
    %c0_i32_181 = arith.constant 0 : i32
    %203 = vector.broadcast %c0_i32_181 : i32 to vector<224x256xi32>
    %204 = arith.cmpi ne, %202, %203 : vector<224x256xi32>
    %c0_i32_182 = arith.constant 0 : i32
    %205 = vector.broadcast %c0_i32_182 : i32 to vector<224x256xi32>
    %206 = arith.cmpi slt, %202, %205 : vector<224x256xi32>
    %c0_i32_183 = arith.constant 0 : i32
    %207 = arith.cmpi slt, %200, %c0_i32_183 : i32
    %208 = vector.broadcast %207 : i1 to vector<224x256xi1>
    %209 = vector.broadcast %208 : vector<224x256xi1> to vector<224x256xi1>
    %210 = arith.xori %206, %209 : vector<224x256xi1>
    %211 = arith.andi %210, %204 : vector<224x256xi1>
    %212 = vector.broadcast %200 : i32 to vector<224x256xi32>
    %213 = arith.addi %202, %212 : vector<224x256xi32>
    %214 = arith.select %211, %213, %202 : vector<224x256xi1>, vector<224x256xi32>
    %c14_i32 = arith.constant 14 : i32
    %215 = vector.broadcast %c14_i32 : i32 to vector<224x256xi32>
    %216 = arith.cmpi slt, %214, %215 : vector<224x256xi32>
    %217 = arith.extui %216 : vector<224x256xi1> to vector<224x256xi32>
    %218 = arith.sitofp %217 : vector<224x256xi32> to vector<224x256xf32>
    %219 = arith.mulf %197, %218 : vector<224x256xf32>
    %cst_184 = arith.constant dense<0.000000e+00> : vector<256xf32>
    %220 = vector.multi_reduction <add>, %219, %cst_184 [0] : vector<224x256xf32> to vector<256xf32>
    %221 = vector.shape_cast %220 : vector<256xf32> to vector<1x256xf32>
    %cst_185 = arith.constant 0.00510204071 : f32
    %222 = vector.broadcast %cst_185 : f32 to vector<1x256xf32>
    %223 = arith.mulf %221, %222 : vector<1x256xf32>
    %224 = vector.broadcast %223 : vector<1x256xf32> to vector<224x256xf32>
    %225 = arith.subf %197, %224 : vector<224x256xf32>
    %226 = arith.mulf %225, %225 : vector<224x256xf32>
    %227 = arith.mulf %226, %218 : vector<224x256xf32>
    %cst_186 = arith.constant dense<0.000000e+00> : vector<256xf32>
    %228 = vector.multi_reduction <add>, %227, %cst_186 [0] : vector<224x256xf32> to vector<256xf32>
    %229 = vector.shape_cast %228 : vector<256xf32> to vector<1x256xf32>
    %cst_187 = arith.constant 0.00510204071 : f32
    %230 = vector.broadcast %cst_187 : f32 to vector<1x256xf32>
    %231 = arith.mulf %229, %230 : vector<1x256xf32>
    %cst_188 = arith.constant 9.99999974E-6 : f32
    %232 = vector.broadcast %cst_188 : f32 to vector<1x256xf32>
    %233 = arith.addf %231, %232 : vector<1x256xf32>
    %234 = math.rsqrt %233 : vector<1x256xf32>
    %235 = vector.broadcast %234 : vector<1x256xf32> to vector<224x256xf32>
    %236 = arith.mulf %225, %235 : vector<224x256xf32>
    %237 = vector.broadcast %56 : vector<1x256xf32> to vector<224x256xf32>
    %238 = arith.mulf %236, %237 : vector<224x256xf32>
    %239 = vector.broadcast %57 : vector<1x256xf32> to vector<224x256xf32>
    %240 = arith.addf %238, %239 : vector<224x256xf32>
    %c0_189 = arith.constant 0 : index
    %c0_190 = arith.constant 0 : index
    %241 = vector.load %arg4[%c0_189, %c0_190] : memref<224x256xf32, #tpu.memory_space<vmem>>, vector<224x256xf32>
    tpu.vector_store %arg4[%c0_189, %c0_190], %240 {strides = array<i32>} : memref<224x256xf32, #tpu.memory_space<vmem>>, vector<224x256xf32>,
    return
  }
}

</mosaic_0001>

<bundles_post_ra>
// kernel: forward.1
= control target key start
LH: loop header
LB: loop body
LE: loop exit
PB: predicated region body
PF: predicated region fallthrough
CT: control target
= control target key end

     0   :  { %s9153_s15 = smov [#allocation3]   ;;  %v13276_v0 = vmov 0.0   ;;  %s9155_s22 = smov [#allocation3 + $0x100]   ;;  %s13271_s3 = inlined_call_operand.hbm [shape: bf16[9,256,256], index: 3, kind: input, shape index: {}]   ;;  %s13272_s4 = inlined_call_operand.vmem [shape: f32[224,256], index: 4, kind: output, shape index: {}]   ;;  %s13273_s0 = inlined_call_operand.vmem [shape: f32[224,256], index: 0, kind: input, shape index: {}]   ;;  %s13274_s2 = inlined_call_operand.vmem [shape: f32[8,256], index: 2, kind: input, shape index: {}]   ;;  %s13275_s1 = inlined_call_operand.vmem [shape: bf16[224,256], index: 1, kind: input, shape index: {}]  }
   0x1   :  { %s22_s16 = sshll.u32 %s9153_s15, 4  ;;  %s26_s19 = scalar_lea.hbm %s13271_s3, 4096  ;;  %843 = vst [vmem:[#allocation2 + $0x98] sm:$0xff] %v13276_v0  ;;  %844 = vst [vmem:[#allocation2 + $0x8] sm:$0xff] %v13276_v0  ;;  %v9206_v1 = vld [vmem:[%s13273_s0] sm:$0xff]  ;;  %v9213_v2 = vld [vmem:[%s13273_s0 + $0x10] sm:$0xff]  ;;  %s9208_s16 = int_to_ptr.vmem [resolvable:$true] %s22_s16 }
   0x2   :  { %845 = vst [vmem:[#allocation2 + $0x200] sm:$0xff] %v13276_v0  ;;  %846 = vst [vmem:[#allocation2 + $0x28] sm:$0xff] %v13276_v0  ;;  %s36_s23 = sshll.u32 %s9155_s22, 4  ;;  %v9218_v3 = vld [vmem:[%s13273_s0 + $0x20] sm:$0xff]  ;;  %v267_v4 = vmul.f32 %v9206_v1, %v9206_v1  ;;  %s8939_s28 = scalar_lea.vmem %s9208_s16, 4096  ;;  %s37_s23 = int_to_ptr.vmem [resolvable:$true] %s36_s23 }
   0x3   :  { %847 = vst [vmem:[#allocation2 + $0x130] sm:$0xff] %v13276_v0  ;;  %848 = vst [vmem:[#allocation2 + $0xc0] sm:$0xff] %v13276_v0  ;;  %p8940_p0 = scmp.ne.s32.totalorder %s9208_s16, %s8939_s28  ;;  %s9225_s29 = scalar_lea.vmem %s9208_s16, 36864 }
   0x4   :  { %849 = vst [vmem:[#allocation2 + $0xc8] sm:$0xff] %v13276_v0  ;;  %850 = vst [vmem:[#allocation2 + $0x48] sm:$0xff] %v13276_v0  ;;  %p8944_p1 = scmp.lt.s32.totalorder %s9208_s16, %s9208_s16  ;;  %p8945_p2 = scmp.lt.s32.totalorder %s9225_s29, %s8939_s28 }
   0x5   :  { %851 = vst [vmem:[#allocation2 + $0xd0] sm:$0xff] %v13276_v0  ;;  %852 = vst [vmem:[#allocation2 + $0x100] sm:$0xff] %v13276_v0 }
   0x6   :  { %853 = vst [vmem:[#allocation2 + $0xb8] sm:$0xff] %v13276_v0  ;;  %854 = vst [vmem:[#allocation2 + $0x10] sm:$0xff] %v13276_v0  ;;  %p8946_p3 = por %p8945_p2, %p8944_p1 }
   0x8   :  { %p8947_p4 = pnand %p8946_p3, %p8940_p0 }
   0xa   :  { %8950 = shalt.err (!%p8947_p4)  }
   0xb   :  { %25 = dma.hbm_to_vmem [thread:$0]  %s13271_s3, 4096, %s9208_s16, [#allocation4]  ;;  %v9237_v5 = vld [vmem:[%s13274_s2 + $0x2] ss:$8 sm:$0x3]  ;;  %v9242_v6 = vld [vmem:[%s13273_s0 + $0x30] sm:$0xff]  ;;  %v201_v7 = vadd.f32 %v9213_v2, %v9206_v1  ;;  %v269_v8 = vmul.f32 %v9213_v2, %v9213_v2  ;;  %v271_v10 = vmul.f32 %v9218_v3, %v9218_v3 }
   0xc   :  { %13459 = vst [vmem:[#allocation34_spill] sm:$0xff] %v9237_v5  ;;  %s40_s12 = scalar_lea.hbm %s13271_s3, 8192  ;;  %v9254_v9 = vld [vmem:[%s13274_s2 + $0x3] ss:$8 sm:$0x3]  ;;  %s8961_s15 = scalar_lea.vmem %s37_s23, 4096 }
   0xd   :  { %13460 = vst [vmem:[#allocation35_spill] sm:$0xff] %v9254_v9  ;;  %p8962_p5 = scmp.ne.s32.totalorder %s37_s23, %s8961_s15  ;;  %p8966_p6 = scmp.lt.s32.totalorder %s37_s23, %s9208_s16 }
   0xe   :  { %p8967_p7 = scmp.lt.s32.totalorder %s9225_s29, %s8961_s15 }
  0x10   :  { %p8968_p8 = por %p8967_p7, %p8966_p6 }
  0x12   :  { %p8969_p9 = pnand %p8968_p8, %p8962_p5 }
  0x14   :  { %8972 = shalt.err (!%p8969_p9)  }
  0x15   :  { %39 = dma.hbm_to_vmem [thread:$0]  %s26_s19, 4096, %s37_s23, [#allocation4 + $0x1]  ;;  %v9267_v11 = vld [vmem:[%s13273_s0 + $0x40] sm:$0xff]  ;;  %v202_v12 = vadd.f32 %v201_v7, %v9218_v3  ;;  %v323_v13 = vadd.f32 %v269_v8, %v267_v4  ;;  %v273_v14 = vmul.f32 %v9242_v6, %v9242_v6  ;;  %v9278_v15 = vld [vmem:[%s13273_s0 + $0x50] sm:$0xff] }
  0x16   :  { %s54_s25 = scalar_lea.hbm %s13271_s3, 12288  ;;  %s9156_s26 = smov [#allocation3 + $0x200]   ;;  %v275_v17 = vmul.f32 %v9267_v11, %v9267_v11 }
  0x17   :  { %s50_s27 = sshll.u32 %s9156_s26, 4  ;;  %v203_v16 = vadd.f32 %v202_v12, %v9242_v6  ;;  %s9157_s28 = smov [#allocation3 + $0x300]   ;;  %v324_v18 = vadd.f32 %v323_v13, %v271_v10  ;;  %s51_s27 = int_to_ptr.vmem [resolvable:$true] %s50_s27 }
  0x18   :  { %s64_s30 = sshll.u32 %s9157_s28, 4  ;;  %s8984_s5 = scalar_lea.vmem %s51_s27, 4096  ;;  %s65_s30 = int_to_ptr.vmem [resolvable:$true] %s64_s30 }
  0x19   :  { %p8985_p10 = scmp.ne.s32.totalorder %s51_s27, %s8984_s5  ;;  %p8989_p11 = scmp.lt.s32.totalorder %s51_s27, %s9208_s16 }
  0x1a   :  { %p8990_p12 = scmp.lt.s32.totalorder %s9225_s29, %s8984_s5 }
  0x1c   :  { %p8991_p13 = por %p8990_p12, %p8989_p11 }
  0x1e   :  { %p8992_p0 = pnand %p8991_p13, %p8985_p10 }
  0x20   :  { %8995 = shalt.err (!%p8992_p0)  }
  0x21   :  { %53 = dma.hbm_to_vmem [thread:$0]  %s40_s12, 4096, %s51_s27, [#allocation4 + $0x2]  ;;  %v9292_v19 = vld [vmem:[%s13273_s0 + $0x60] sm:$0xff]  ;;  %v204_v20 = vadd.f32 %v203_v16, %v9267_v11  ;;  %v277_v21 = vmul.f32 %v9278_v15, %v9278_v15  ;;  %v325_v22 = vadd.f32 %v324_v18, %v273_v14 }
  0x22   :  { %s68_s13 = scalar_lea.hbm %s13271_s3, 16384  ;;  %s9007_s14 = scalar_lea.vmem %s65_s30, 4096 }
  0x23   :  { %p9008_p1 = scmp.ne.s32.totalorder %s65_s30, %s9007_s14  ;;  %p9012_p2 = scmp.lt.s32.totalorder %s65_s30, %s9208_s16 }
  0x24   :  { %p9013_p3 = scmp.lt.s32.totalorder %s9225_s29, %s9007_s14 }
  0x26   :  { %p9014_p4 = por %p9013_p3, %p9012_p2 }
  0x28   :  { %p9015_p5 = pnand %p9014_p4, %p9008_p1 }
  0x2a   :  { %9018 = shalt.err (!%p9015_p5)  }
  0x2b   :  { %67 = dma.hbm_to_vmem [thread:$0]  %s54_s25, 4096, %s65_s30, [#allocation4 + $0x3]  ;;  %v9309_v23 = vld [vmem:[%s13273_s0 + $0x70] sm:$0xff]  ;;  %v205_v24 = vadd.f32 %v204_v20, %v9278_v15  ;;  %v279_v25 = vmul.f32 %v9292_v19, %v9292_v19  ;;  %v326_v26 = vadd.f32 %v325_v22, %v275_v17  ;;  %v9320_v27 = vld [vmem:[%s13273_s0 + $0x8] sm:$0xff]  ;;  %v9325_v28 = vld [vmem:[%s13273_s0 + $0x80] sm:$0xff] }
  0x2c   :  { %s82_s22 = scalar_lea.hbm %s13271_s3, 20480  ;;  %13461 = vst [vmem:[#allocation36_spill] sm:$0xff] %v9320_v27  ;;  %s9158_s25 = smov [#allocation3 + $0x400]   ;;  %13462 = vst [vmem:[#allocation37_spill] sm:$0xff] %v9325_v28  ;;  %v9331_v30 = vld [vmem:[%s13273_s0 + $0x18] sm:$0xff]  ;;  %v9336_v31 = vld [vmem:[%s13273_s0 + $0x28] sm:$0xff]  ;;  %v281_v32 = vmul.f32 %v9309_v23, %v9309_v23 }
  0x2d   :  { %s78_s27 = sshll.u32 %s9158_s25, 4  ;;  %v206_v29 = vadd.f32 %v205_v24, %v9292_v19  ;;  %13463 = vst [vmem:[#allocation38_spill] sm:$0xff] %v9331_v30  ;;  %13464 = vst [vmem:[#allocation39_spill] sm:$0xff] %v9336_v31  ;;  %s9159_s7 = smov [#allocation3 + $0x500]   ;;  %v327_v33 = vadd.f32 %v326_v26, %v277_v21  ;;  %v234_v34 = vadd.f32 %v9331_v30, %v9320_v27  ;;  %s79_s27 = int_to_ptr.vmem [resolvable:$true] %s78_s27 }
  0x2e   :  { %s92_s8 = sshll.u32 %s9159_s7, 4  ;;  %s9030_s9 = scalar_lea.vmem %s79_s27, 4096  ;;  %s93_s8 = int_to_ptr.vmem [resolvable:$true] %s92_s8 }
  0x2f   :  { %p9031_p6 = scmp.ne.s32.totalorder %s79_s27, %s9030_s9  ;;  %p9035_p7 = scmp.lt.s32.totalorder %s79_s27, %s9208_s16 }
  0x30   :  { %p9036_p8 = scmp.lt.s32.totalorder %s9225_s29, %s9030_s9 }
  0x32   :  { %p9037_p9 = por %p9036_p8, %p9035_p7 }
  0x34   :  { %p9038_p10 = pnand %p9037_p9, %p9031_p6 }
  0x36   :  { %9041 = shalt.err (!%p9038_p10)  }
  0x37   :  { %81 = dma.hbm_to_vmem [thread:$0]  %s68_s13, 4096, %s79_s27, [#allocation4 + $0x4]  ;;  %v9351_v35 = vld [vmem:[%s13273_s0 + $0x90] sm:$0xff]  ;;  %v207_v36 = vadd.f32 %v206_v29, %v9309_v23  ;;  %v9357_v37 = vld [vmem:[%s13273_s0 + $0x38] sm:$0xff]  ;;  %v283_v38 = vmul.f32 %v9325_v28, %v9325_v28  ;;  %v328_v39 = vadd.f32 %v327_v33, %v279_v25  ;;  %v235_v40 = vadd.f32 %v234_v34, %v9336_v31 }
  0x38   :  { %13465 = vst [vmem:[#allocation40_spill] sm:$0xff] %v9351_v35  ;;  %13466 = vst [vmem:[#allocation41_spill] sm:$0xff] %v9357_v37  ;;  %s96_s21 = scalar_lea.hbm %s13271_s3, 24576  ;;  %s9053_s13 = scalar_lea.vmem %s93_s8, 4096 }
  0x39   :  { %p9054_p11 = scmp.ne.s32.totalorder %s93_s8, %s9053_s13  ;;  %p9058_p12 = scmp.lt.s32.totalorder %s93_s8, %s9208_s16 }
  0x3a   :  { %p9059_p13 = scmp.lt.s32.totalorder %s9225_s29, %s9053_s13 }
  0x3c   :  { %p9060_p0 = por %p9059_p13, %p9058_p12 }
  0x3e   :  { %p9061_p1 = pnand %p9060_p0, %p9054_p11 }
  0x40   :  { %9064 = shalt.err (!%p9061_p1)  }
  0x41   :  { %95 = dma.hbm_to_vmem [thread:$0]  %s82_s22, 4096, %s93_s8, [#allocation4 + $0x5]  ;;  %v9374_v41 = vld [vmem:[%s13273_s0 + $0xa0] sm:$0xff]  ;;  %v208_v42 = vadd.f32 %v207_v36, %v9325_v28  ;;  %v9380_v43 = vld [vmem:[%s13273_s0 + $0x48] sm:$0xff]  ;;  %v9388_v44 = vld [vmem:[%s13273_s0 + $0xb0] sm:$0xff]  ;;  %v285_v45 = vmul.f32 %v9351_v35, %v9351_v35  ;;  %v329_v46 = vadd.f32 %v328_v39, %v281_v32  ;;  %v236_v47 = vadd.f32 %v235_v40, %v9357_v37 }
  0x42   :  { %13467 = vst [vmem:[#allocation42_spill] sm:$0xff] %v9374_v41  ;;  %13468 = vst [vmem:[#allocation43_spill] sm:$0xff] %v9380_v43  ;;  %s110_s5 = scalar_lea.hbm %s13271_s3, 28672  ;;  %s9160_s22 = smov [#allocation3 + $0x600]   ;;  %v514_v49 = vlaneseq  ;;  %v9397_v50 = vld [vmem:[%s13273_s0 + $0x58] sm:$0xff]  ;;  %v9402_v51 = vld [vmem:[%s13273_s0 + $0xc0] sm:$0xff]  ;;  %v287_v53 = vmul.f32 %v9374_v41, %v9374_v41 }
  0x43   :  { %13469 = vst [vmem:[#allocation44_spill] sm:$0xff] %v9388_v44  ;;  %s106_s8 = sshll.u32 %s9160_s22, 4  ;;  %v209_v48 = vadd.f32 %v208_v42, %v9351_v35  ;;  %13470 = vst [vmem:[#allocation45_spill] sm:$0xff] %v9397_v50  ;;  %s9161_s11 = smov [#allocation3 + $0x700]   ;;  %v9407_v52 = vld [vmem:[%s13273_s0 + $0xd0] sm:$0xff]  ;;  %v330_v54 = vadd.f32 %v329_v46, %v283_v38  ;;  %v237_v55 = vadd.f32 %v236_v47, %v9380_v43  ;;  %s107_s8 = int_to_ptr.vmem [resolvable:$true] %s106_s8 }
  0x44   :  { %s120_s14 = sshll.u32 %s9161_s11, 4  ;;  %13471 = vst [vmem:[#allocation46_spill] sm:$0xff] %v9402_v51  ;;  %13472 = vst [vmem:[#allocation47_spill] sm:$0xff] %v9407_v52  ;;  %s9076_s20 = scalar_lea.vmem %s107_s8, 4096  ;;  %s121_s14 = int_to_ptr.vmem [resolvable:$true] %s120_s14 }
  0x45   :  { %p9077_p2 = scmp.ne.s32.totalorder %s107_s8, %s9076_s20  ;;  %p9081_p3 = scmp.lt.s32.totalorder %s107_s8, %s9208_s16 }
  0x46   :  { %p9082_p4 = scmp.lt.s32.totalorder %s9225_s29, %s9076_s20 }
  0x48   :  { %p9083_p5 = por %p9082_p4, %p9081_p3 }
  0x4a   :  { %p9084_p6 = pnand %p9083_p5, %p9077_p2 }
  0x4c   :  { %9087 = shalt.err (!%p9084_p6)  }
  0x4d   :  { %109 = dma.hbm_to_vmem [thread:$0]  %s96_s21, 4096, %s107_s8, [#allocation4 + $0x6]  ;;  %v9421_v56 = vld [vmem:[%s13273_s0 + $0xe0] sm:$0xff]  ;;  %v210_v57 = vadd.f32 %v209_v48, %v9374_v41  ;;  %v289_v58 = vmul.f32 %v9388_v44, %v9388_v44  ;;  %v9429_v59 = vld [vmem:[%s13273_s0 + $0x68] sm:$0xff]  ;;  %v9434_v60 = vld [vmem:[%s13273_s0 + $0xf0] sm:$0xff]  ;;  %v331_v63 = vadd.f32 %v330_v54, %v285_v45  ;;  %v238_v4 = vadd.f32 %v237_v55, %v9397_v50 }
  0x4e   :  { %13473 = vst [vmem:[#allocation48_spill] sm:$0xff] %v9421_v56  ;;  %13474 = vst [vmem:[#allocation49_spill] sm:$0xff] %v9429_v59  ;;  %v9439_v61 = vld [vmem:[%s13273_s0 + $0x100] sm:$0xff]  ;;  %v9444_v62 = vld [vmem:[%s13273_s0 + $0x110] sm:$0xff]  ;;  %v268_v7 = vmul.f32 %v9320_v27, %v9320_v27  ;;  %v270_v8 = vmul.f32 %v9331_v30, %v9331_v30  ;;  %s9099_s22 = scalar_lea.vmem %s121_s14, 4096  ;;  %p9104_p8 = scmp.lt.s32.totalorder %s121_s14, %s9208_s16 }
  0x4f   :  { %13475 = vst [vmem:[#allocation50_spill] sm:$0xff] %v9434_v60  ;;  %13476 = vst [vmem:[#allocation51_spill] sm:$0xff] %v9439_v61  ;;  %p9100_p7 = scmp.ne.s32.totalorder %s121_s14, %s9099_s22  ;;  %p9105_p9 = scmp.lt.s32.totalorder %s9225_s29, %s9099_s22 }
  0x50   :  { %13477 = vst [vmem:[#allocation52_spill] sm:$0xff] %v9444_v62 }
  0x51   :  { %p9106_p10 = por %p9105_p9, %p9104_p8 }
  0x53   :  { %p9107_p11 = pnand %p9106_p10, %p9100_p7 }
  0x55   :  { %9110 = shalt.err (!%p9107_p11)  }
  0x56   :  { %123 = dma.hbm_to_vmem [thread:$0]  %s110_s5, 4096, %s121_s14, [#allocation4 + $0x7]  ;;  %v211_v10 = vadd.f32 %v210_v57, %v9388_v44  ;;  %v291_v12 = vmul.f32 %v9402_v51, %v9402_v51  ;;  %v293_v13 = vmul.f32 %v9407_v52, %v9407_v52  ;;  %v9462_v14 = vshrl.u32 %v514_v49, 7  ;;  %v9467_v16 = vld [vmem:[%s13273_s0 + $0x78] sm:$0xff]  ;;  %v9475_v17 = vld [vmem:[%s13273_s0 + $0x120] sm:$0xff]  ;;  %v9480_v18 = vld [vmem:[%s13273_s0 + $0x130] sm:$0xff] }
  0x57   :  { %13479 = vst [vmem:[#allocation54_spill] sm:$0xff] %v9467_v16  ;;  %s124_s17 = scalar_lea.hbm %s13271_s3, 32768  ;;  %13480 = vst [vmem:[#allocation55_spill] sm:$0xff] %v9475_v17  ;;  %v9485_v20 = vld [vmem:[%s13273_s0 + $0x140] sm:$0xff]  ;;  %v295_v21 = vmul.f32 %v9421_v56, %v9421_v56  ;;  %v332_v22 = vadd.f32 %v331_v63, %v287_v53  ;;  %v239_v24 = vadd.f32 %v238_v4, %v9429_v59  ;;  %s9162_s26 = smov [#allocation3 + $0x800]   ;;  %v9506_v34 = vld [vmem:[%s13273_s0 + $0x88] sm:$0xff] }
  0x58   :  { %13478 = vst [vmem:[#allocation53_spill] sm:$0xff] %v9462_v14  ;;  %13481 = vst [vmem:[#allocation56_spill] sm:$0xff] %v9480_v18  ;;  %v272_v25 = vmul.f32 %v9336_v31, %v9336_v31  ;;  %s134_s25 = sshll.u32 %s9162_s26, 4  ;;  %v212_v26 = vadd.f32 %v211_v10, %v9402_v51  ;;  %v297_v29 = vmul.f32 %v9434_v60, %v9434_v60  ;;  %v9511_v36 = vld [vmem:[%s13273_s0 + $0x150] sm:$0xff]  ;;  %v9516_v38 = vld [vmem:[%s13273_s0 + $0x160] sm:$0xff]  ;;  %s135_s25 = int_to_ptr.vmem [resolvable:$true] %s134_s25 }
  0x59   :  { %13482 = vst [vmem:[#allocation57_spill] sm:$0xff] %v9485_v20  ;;  %v9497_v32 = vmul.f32 %v9439_v61, %v9439_v61  ;;  %v9501_v33 = vmul.f32 %v9444_v62, %v9444_v62  ;;  %13483 = vst [vmem:[#allocation58_spill] sm:$0xff] %v9506_v34  ;;  %v9521_v39 = vld [vmem:[%s13273_s0 + $0x170] sm:$0xff]  ;;  %v333_v40 = vadd.f32 %v332_v22, %v289_v58  ;;  %s9122_s22 = scalar_lea.vmem %s135_s25, 4096  ;;  %p9127_p13 = scmp.lt.s32.totalorder %s135_s25, %s9208_s16 }
  0x5a   :  { %13484 = vst [vmem:[#allocation59_spill] sm:$0xff] %v9511_v36  ;;  %13485 = vst [vmem:[#allocation60_spill] sm:$0xff] %v9516_v38  ;;  %v240_v42 = vadd.f32 %v239_v24, %v9467_v16  ;;  %v274_v45 = vmul.f32 %v9357_v37, %v9357_v37  ;;  %v356_v46 = vadd.f32 %v270_v8, %v268_v7  ;;  %p9123_p12 = scmp.ne.s32.totalorder %s135_s25, %s9122_s22  ;;  %p9128_p0 = scmp.lt.s32.totalorder %s9225_s29, %s9122_s22 }
  0x5b   :  { %13486 = vst [vmem:[#allocation61_spill] sm:$0xff] %v9521_v39 }
  0x5c   :  { %p9129_p1 = por %p9128_p0, %p9127_p13 }
  0x5e   :  { %p9130_p2 = pnand %p9129_p1, %p9123_p12 }
  0x60   :  { %9133 = shalt.err (!%p9130_p2)  }
  0x61   :  { %137 = dma.hbm_to_vmem [thread:$0]  %s124_s17, 4096, %s135_s25, [#allocation4 + $0x8]  ;;  %v213_v47 = vadd.f32 %v212_v26, %v9407_v52  ;;  %v9535_v48 = vmul.f32 %v9475_v17, %v9475_v17  ;;  %v9539_v49 = vmul.f32 %v9480_v18, %v9480_v18  ;;  %v9543_v53 = vmul.f32 %v9485_v20, %v9485_v20  ;;  %v9548_v54 = vld [vmem:[%s13273_s0 + $0x98] sm:$0xff]  ;;  %v9553_v55 = vld [vmem:[%s13273_s0 + $0x180] sm:$0xff]  ;;  %v9558_v57 = vld [vmem:[%s13273_s0 + $0x190] sm:$0xff] }
  0x62   :  { %13487 = vst [vmem:[#allocation62_spill] sm:$0xff] %v9548_v54  ;;  %13488 = vst [vmem:[#allocation63_spill] sm:$0xff] %v9553_v55  ;;  %v334_v58 = vadd.f32 %v333_v40, %v291_v12  ;;  %v241_v63 = vadd.f32 %v240_v42, %v9506_v34  ;;  %v276_v4 = vmul.f32 %v9380_v43, %v9380_v43  ;;  %v9579_v12 = vld [vmem:[%s13273_s0 + $0xa8] sm:$0xff]  ;;  %v9589_v26 = vld [vmem:[%s13273_s0 + $0x1b0] sm:$0xff]  ;;  %v9796_v35 = vsub.s32 1, %v9462_v14 }
  0x63   :  { %13489 = vst [vmem:[#allocation64_spill] sm:$0xff] %v9558_v57  ;;  %v357_v7 = vadd.f32 %v356_v46, %v272_v25  ;;  %v214_v8 = vadd.f32 %v213_v47, %v9421_v56  ;;  %v9566_v10 = vmul.f32 %v9511_v36, %v9511_v36  ;;  %v9570_v22 = vmul.f32 %v9516_v38, %v9516_v38  ;;  %v9584_v25 = vld [vmem:[%s13273_s0 + $0x1a0] sm:$0xff] }
  0x64   :  { %v9574_v24 = vmul.f32 %v9521_v39, %v9521_v39  ;;  %13490 = vst [vmem:[#allocation65_spill] sm:$0xff] %v9579_v12  ;;  %13491 = vst [vmem:[#allocation66_spill] sm:$0xff] %v9584_v25  ;;  %v335_v40 = vadd.f32 %v334_v58, %v293_v13  ;;  %v9594_v42 = vld [vmem:[%s13275_s1] sm:$0xff]  ;;  %v242_v46 = vadd.f32 %v241_v63, %v9548_v54  ;;  %v9609_v58 = vsub.s32 0, %v9462_v14  ;;  %v9614_v63 = vld [vmem:[%s13273_s0 + $0xb8] sm:$0xff] }
  0x65   :  { %13492 = vst [vmem:[#allocation67_spill] sm:$0xff] %v9589_v26  ;;  %13493 = vst [vmem:[#allocation68_spill] sm:$0xff] %v9594_v42  ;;  %v278_v47 = vmul.f32 %v9397_v50, %v9397_v50  ;;  %v358_v0 = vadd.f32 %v357_v7, %v274_v45  ;;  %v215_v9 = vadd.f32 %v214_v8, %v9434_v60  ;;  %v9619_v45 = vld [vmem:[%s13274_s2] ss:$8 sm:$0x3] }
  0x66   :  { %v9602_v5 = vmul.f32 %v9553_v55, %v9553_v55  ;;  %v9606_v13 = vmul.f32 %v9558_v57, %v9558_v57  ;;  %13494 = vst [vmem:[#allocation69_spill] sm:$0xff] %v9609_v58  ;;  %13495 = vst [vmem:[#allocation70_spill] sm:$0xff] %v9614_v63  ;;  %v9624_v7 = vld [vmem:[%s13274_s2 + $0x1] ss:$8 sm:$0x3]  ;;  %v336_v8 = vadd.f32 %v335_v40, %v295_v21 }
  0x67   :  { %v243_v50 = vadd.f32 %v242_v46, %v9579_v12  ;;  %v280_v43 = vmul.f32 %v9429_v59, %v9429_v59  ;;  %v359_v37 = vadd.f32 %v358_v0, %v276_v4  ;;  %v216_v31 = vadd.f32 %v215_v9, %v9439_v61  ;;  %v9642_v21 = vld [vmem:[%s13273_s0 + $0xc8] sm:$0xff]  ;;  %13512 = vst [vmem:[#allocation87_spill] sm:$0xff] %v9796_v35 }
  0x68   :  { %v9632_v30 = vmul.f32 %v9584_v25, %v9584_v25  ;;  %v9636_v27 = vmul.f32 %v9589_v26, %v9589_v26  ;;  %13496 = vst [vmem:[#allocation71_spill] sm:$0xff] %v9642_v21  ;;  %v337_v40 = vadd.f32 %v336_v8, %v297_v29  ;;  %v282_v9 = vmul.f32 %v9467_v16, %v9467_v16  ;;  %v9659_v29 = vld [vmem:[%s13273_s0 + $0xd8] sm:$0xff]  ;;  %v9677_v8 = vld [vmem:[%s13273_s0 + $0x108] sm:$0xff] }
  0x69   :  { %v244_v0 = vadd.f32 %v243_v50, %v9614_v63  ;;  %v360_v4 = vadd.f32 %v359_v37, %v278_v47  ;;  %v217_v46 = vadd.f32 %v216_v31, %v9444_v62  ;;  %v9650_v59 = vrot.slane %v9619_v45, %v9609_v58  ;;  %13499 = vst [vmem:[#allocation74_spill] sm:$0xff] %v9659_v29  ;;  %v9667_v31 = vld [vmem:[%s13273_s0 + $0xe8] sm:$0xff]  ;;  %v9672_v47 = vld [vmem:[%s13273_s0 + $0xf8] sm:$0xff] }
  0x6a   :  { %v9654_v60 = vrot.slane %v9624_v7, %v9609_v58  ;;  %v284_v50 = vmul.f32 %v9506_v34, %v9506_v34  ;;  %v338_v37 = vadd.f32 %v337_v40, %v9497_v32  ;;  %13500 = vst [vmem:[#allocation75_spill] sm:$0xff] %v9667_v31  ;;  %13501 = vst [vmem:[#allocation76_spill] sm:$0xff] %v9672_v47 }
  0x6b   :  { %13497 = vst [vmem:[#allocation72_spill] sm:$0xff] %v9650_v59  ;;  %13502 = vst [vmem:[#allocation77_spill] sm:$0xff] %v9677_v8  ;;  %v245_v58 = vadd.f32 %v244_v0, %v9642_v21  ;;  %v286_v32 = vmul.f32 %v9548_v54, %v9548_v54  ;;  %v361_v40 = vadd.f32 %v360_v4, %v280_v43  ;;  %v9686_v59 = vld [vmem:[%s13273_s0 + $0x118] sm:$0xff]  ;;  %v9698_v43 = vld [vmem:[%s13273_s0 + $0x128] sm:$0xff] }
  0x6c   :  { %13498 = vst [vmem:[#allocation73_spill] sm:$0xff] %v9654_v60  ;;  %v218_v60 = vadd.f32 %v217_v46, %v9475_v17  ;;  %v288_v34 = vmul.f32 %v9579_v12, %v9579_v12  ;;  %v290_v16 = vmul.f32 %v9614_v63, %v9614_v63  ;;  %v292_v0 = vmul.f32 %v9642_v21, %v9642_v21  ;;  %v9703_v4 = vld [vmem:[%s13273_s0 + $0x138] sm:$0xff]  ;;  %v9708_v46 = vld [vmem:[%s13273_s0 + $0x148] sm:$0xff] }
  0x6d   :  { %v339_v62 = vadd.f32 %v338_v37, %v9501_v33  ;;  %13503 = vst [vmem:[#allocation78_spill] sm:$0xff] %v9703_v4  ;;  %13504 = vst [vmem:[#allocation79_spill] sm:$0xff] %v9708_v46  ;;  %v246_v63 = vadd.f32 %v245_v58, %v9659_v29  ;;  %v294_v33 = vmul.f32 %v9659_v29, %v9659_v29  ;;  %v9717_v12 = vld [vmem:[%s13273_s0 + $0x158] sm:$0xff] }
  0x6e   :  { %v362_v37 = vadd.f32 %v361_v40, %v282_v9  ;;  %v219_v21 = vadd.f32 %v218_v60, %v9480_v18  ;;  %13505 = vst [vmem:[#allocation80_spill] sm:$0xff] %v9717_v12  ;;  %v9721_v54 = vmul.f32 %v9667_v31, %v9667_v31  ;;  %v9725_v17 = vmul.f32 %v9672_v47, %v9672_v47  ;;  %v9735_v60 = vld [vmem:[%s13273_s0 + $0x168] sm:$0xff]  ;;  %v9740_v40 = vld [vmem:[%s13273_s0 + $0x178] sm:$0xff] }
  0x6f   :  { %v9729_v58 = vmul.f32 %v9677_v8, %v9677_v8  ;;  %v340_v9 = vadd.f32 %v339_v62, %v9535_v48  ;;  %13506 = vst [vmem:[#allocation81_spill] sm:$0xff] %v9735_v60  ;;  %13507 = vst [vmem:[#allocation82_spill] sm:$0xff] %v9740_v40  ;;  %v247_v29 = vadd.f32 %v246_v63, %v9667_v31  ;;  %v9751_v62 = vld [vmem:[%s13273_s0 + $0x188] sm:$0xff]  ;;  %v9779_v31 = vld [vmem:[%s13273_s0 + $0x1b8] sm:$0xff] }
  0x70   :  { %v9745_v18 = vmul.f32 %v9686_v59, %v9686_v59  ;;  %v363_v61 = vadd.f32 %v362_v37, %v284_v50  ;;  %v220_v56 = vadd.f32 %v219_v21, %v9485_v20  ;;  %13508 = vst [vmem:[#allocation83_spill] sm:$0xff] %v9751_v62  ;;  %v9755_v48 = vmul.f32 %v9698_v43, %v9698_v43  ;;  %v9769_v21 = vld [vmem:[%s13273_s0 + $0x198] sm:$0xff]  ;;  %v9774_v37 = vld [vmem:[%s13273_s0 + $0x1a8] sm:$0xff] }
  0x71   :  { %v9759_v52 = vmul.f32 %v9703_v4, %v9703_v4  ;;  %v9763_v63 = vmul.f32 %v9708_v46, %v9708_v46  ;;  %v341_v50 = vadd.f32 %v340_v9, %v9539_v49  ;;  %13509 = vst [vmem:[#allocation84_spill] sm:$0xff] %v9769_v21  ;;  %13510 = vst [vmem:[#allocation85_spill] sm:$0xff] %v9774_v37 }
  0x72   :  { %13511 = vst [vmem:[#allocation86_spill] sm:$0xff] %v9779_v31  ;;  %v248_v20 = vadd.f32 %v247_v29, %v9672_v47  ;;  %v9784_v49 = vmul.f32 %v9717_v12, %v9717_v12  ;;  %v364_v9 = vadd.f32 %v363_v61, %v286_v32  ;;  %v221_v51 = vadd.f32 %v220_v56, %v9511_v36  ;;  %v9807_v32 = vld [vmem:[%s13275_s1 + $0x8] sm:$0xff] }
  0x73   :  { %v9789_v44 = vmul.f32 %v9735_v60, %v9735_v60  ;;  %v9793_v41 = vmul.f32 %v9740_v40, %v9740_v40  ;;  %v342_v29 = vadd.f32 %v341_v50, %v9543_v53  ;;  %v9802_v61 = vmul.f32 %v9751_v62, %v9751_v62 }
  0x74   :  { %v249_v47 = vadd.f32 %v248_v20, %v9677_v8  ;;  %v365_v56 = vadd.f32 %v364_v9, %v288_v34  ;;  %v222_v36 = vadd.f32 %v221_v51, %v9516_v38  ;;  %v9812_v14 = vmul.f32 %v9769_v21, %v9769_v21  ;;  %v9828_v51 = vld [vmem:[%s13275_s1 + $0x10] sm:$0xff]  ;;  %v9833_v38 = vld [vmem:[%s13275_s1 + $0x18] sm:$0xff] }
  0x75   :  { %v9816_v53 = vmul.f32 %v9774_v37, %v9774_v37  ;;  %v9820_v20 = vmul.f32 %v9779_v31, %v9779_v31  ;;  %v343_v34 = vadd.f32 %v342_v29, %v9566_v10  ;;  %v9838_v10 = vrot.slane %v9619_v45, %v9796_v35  ;;  %v9856_v45 = vld [vmem:[%s13275_s1 + $0x28] sm:$0xff] }
  0x76   :  { %v250_v50 = vadd.f32 %v249_v47, %v9686_v59  ;;  %v366_v9 = vadd.f32 %v365_v56, %v290_v16  ;;  %v223_v28 = vadd.f32 %v222_v36, %v9521_v39  ;;  %v9846_v42 = vrot.slane %v9624_v7, %v9796_v35  ;;  %v9851_v36 = vld [vmem:[%s13275_s1 + $0x20] sm:$0xff]  ;;  %v9868_v35 = vld [vmem:[%s13275_s1 + $0x30] sm:$0xff] }
  0x77   :  { %13513 = vst [vmem:[#allocation88_spill] sm:$0xff] %v9838_v10  ;;  %v344_v29 = vadd.f32 %v343_v34, %v9570_v22  ;;  %v9886_v22 = vld [vmem:[%s13275_s1 + $0x40] sm:$0xff]  ;;  %v9904_v34 = vld [vmem:[%s13275_s1 + $0x50] sm:$0xff] }
  0x78   :  { %v251_v56 = vadd.f32 %v250_v50, %v9698_v43  ;;  %v367_v8 = vadd.f32 %v366_v9, %v292_v0  ;;  %13514 = vst [vmem:[#allocation89_spill] sm:$0xff] %v9846_v42  ;;  %v224_v47 = vadd.f32 %v223_v28, %v9553_v55  ;;  %v9873_v28 = vld [vmem:[%s13275_s1 + $0x38] sm:$0xff]  ;;  %v9955_v42 = vld [vmem:[%s13275_s1 + $0x80] sm:$0xff]  ;;  %v9971_v10 = vld [vmem:[%s13275_s1 + $0x90] sm:$0xff] }
  0x79   :  { %v345_v7 = vadd.f32 %v344_v29, %v9574_v24  ;;  %13517 = vst [vmem:[#allocation92_spill] sm:$0xff] %v9955_v42  ;;  %13519 = vst [vmem:[#allocation94_spill] sm:$0xff] %v9971_v10  ;;  %v13547_v42 = vld [vmem:[#allocation41_spill] sm:$0xff] }
  0x7a   :  { %v252_v50 = vadd.f32 %v251_v56, %v9703_v4  ;;  %v368_v9 = vadd.f32 %v367_v8, %v294_v33  ;;  %v225_v0 = vadd.f32 %v224_v47, %v9558_v57  ;;  %v9891_v47 = vld [vmem:[%s13275_s1 + $0x48] sm:$0xff]  ;;  %v13555_v57 = vld [vmem:[#allocation70_spill] sm:$0xff] }
  0x7b   :  { %v346_v33 = vadd.f32 %v345_v7, %v9602_v5  ;;  %v9922_v5 = vld [vmem:[%s13275_s1 + $0x60] sm:$0xff] }
  0x7c   :  { %v253_v29 = vadd.f32 %v252_v50, %v9708_v46  ;;  %v369_v56 = vadd.f32 %v368_v9, %v9721_v54  ;;  %v226_v24 = vadd.f32 %v225_v0, %v9584_v25  ;;  %v9909_v0 = vld [vmem:[%s13275_s1 + $0x58] sm:$0xff]  ;;  %v13556_v25 = vld [vmem:[#allocation71_spill] sm:$0xff] }
  0x7d   :  { %v347_v50 = vadd.f32 %v346_v33, %v9606_v13  ;;  %v9939_v13 = vld [vmem:[%s13275_s1 + $0x70] sm:$0xff] }
  0x7e   :  { %v254_v9 = vadd.f32 %v253_v29, %v9717_v12  ;;  %v370_v16 = vadd.f32 %v369_v56, %v9725_v17  ;;  %v227_v7 = vadd.f32 %v226_v24, %v9589_v26  ;;  %v9927_v24 = vld [vmem:[%s13275_s1 + $0x68] sm:$0xff]  ;;  %13515 = vst [vmem:[#allocation90_spill] sm:$0xff] %v9939_v13  ;;  %v9944_v17 = vld [vmem:[%s13275_s1 + $0x78] sm:$0xff]  ;;  %v13544_v13 = vld [vmem:[#allocation36_spill] sm:$0xff] }
  0x7f   :  { %v348_v29 = vadd.f32 %v347_v50, %v9632_v30  ;;  %13516 = vst [vmem:[#allocation91_spill] sm:$0xff] %v9944_v17  ;;  %v9987_v17 = vld [vmem:[%s13275_s1 + $0xa0] sm:$0xff]  ;;  %v13570_v12 = vld [vmem:[#allocation68_spill] sm:$0xff] }
  0x80   :  { %v255_v56 = vadd.f32 %v254_v9, %v9735_v60  ;;  %v371_v8 = vadd.f32 %v370_v16, %v9729_v58  ;;  %v228_v33 = vrot.slane %v227_v7, 4  ;;  %13521 = vst [vmem:[#allocation96_spill] sm:$0xff] %v9987_v17  ;;  %v10035_v17 = vld [vmem:[%s13275_s1 + $0xd0] sm:$0xff] }
  0x81   :  { %v349_v58 = vadd.f32 %v348_v29, %v9636_v27  ;;  %v9976_v27 = vld [vmem:[%s13275_s1 + $0x98] sm:$0xff]  ;;  %13527 = vst [vmem:[#allocation102_spill] sm:$0xff] %v10035_v17 }
  0x82   :  { %v256_v16 = vadd.f32 %v255_v56, %v9740_v40  ;;  %v372_v9 = vadd.f32 %v371_v8, %v9745_v18  ;;  %v229_v30 = vadd.f32 %v228_v33, %v227_v7  ;;  %v9960_v7 = vld [vmem:[%s13275_s1 + $0x88] sm:$0xff]  ;;  %13520 = vst [vmem:[#allocation95_spill] sm:$0xff] %v9976_v27  ;;  %v10018_v27 = vld [vmem:[%s13275_s1 + $0xc0] sm:$0xff] }
  0x83   :  { %v350_v18 = vrot.slane %v349_v58, 4  ;;  %13518 = vst [vmem:[#allocation93_spill] sm:$0xff] %v9960_v7  ;;  %v10003_v7 = vld [vmem:[%s13275_s1 + $0xb0] sm:$0xff]  ;;  %13525 = vst [vmem:[#allocation100_spill] sm:$0xff] %v10018_v27 }
  0x84   :  { %v257_v8 = vadd.f32 %v256_v16, %v9751_v62  ;;  %v373_v56 = vadd.f32 %v372_v9, %v9755_v48  ;;  %v230_v33 = vrot.slane %v229_v30, 2  ;;  %13523 = vst [vmem:[#allocation98_spill] sm:$0xff] %v10003_v7  ;;  %v13569_v62 = vld [vmem:[#allocation73_spill] sm:$0xff] }
  0x85   :  { %v351_v48 = vadd.f32 %v350_v18, %v349_v58  ;;  %v10008_v18 = vld [vmem:[%s13275_s1 + $0xb8] sm:$0xff] }
  0x86   :  { %v258_v9 = vadd.f32 %v257_v8, %v9769_v21  ;;  %v374_v54 = vadd.f32 %v373_v56, %v9759_v52  ;;  %v231_v29 = vadd.f32 %v230_v33, %v229_v30  ;;  %v9992_v30 = vld [vmem:[%s13275_s1 + $0xa8] sm:$0xff]  ;;  %13524 = vst [vmem:[#allocation99_spill] sm:$0xff] %v10008_v18 }
  0x87   :  { %v352_v52 = vrot.slane %v351_v48, 2  ;;  %13522 = vst [vmem:[#allocation97_spill] sm:$0xff] %v9992_v30  ;;  %v13530_v30 = vld [vmem:[#allocation40_spill] sm:$0xff] }
  0x88   :  { %v259_v8 = vadd.f32 %v258_v9, %v9774_v37  ;;  %v375_v56 = vadd.f32 %v374_v54, %v9763_v63  ;;  %v232_v33 = vrot.slane %v231_v29, 1 }
  0x89   :  { %v353_v63 = vadd.f32 %v352_v52, %v351_v48  ;;  %v13531_v52 = vld [vmem:[#allocation42_spill] sm:$0xff] }
  0x8a   :  { %v260_v54 = vadd.f32 %v259_v8, %v9779_v31  ;;  %v376_v50 = vadd.f32 %v375_v56, %v9784_v49  ;;  %v233_v58 = vadd.f32 %v232_v33, %v231_v29  ;;  %v10023_v29 = vld [vmem:[%s13275_s1 + $0xc8] sm:$0xff] }
  0x8b   :  { %v354_v49 = vrot.slane %v353_v63, 1  ;;  %13526 = vst [vmem:[#allocation101_spill] sm:$0xff] %v10023_v29 }
  0x8c   :  { %v261_v8 = vrot.slane %v260_v54, 4  ;;  %v377_v56 = vadd.f32 %v376_v50, %v9789_v44  ;;  %v10025_v33 = vmul.f32 0.0051020407, %v233_v58  ;;  %v10040_v58 = vld [vmem:[%s13275_s1 + $0xd8] sm:$0xff] }
  0x8d   :  { %v355_v50 = vadd.f32 %v354_v49, %v353_v63  ;;  %13528 = vst [vmem:[#allocation103_spill] sm:$0xff] %v10040_v58  ;;  %v13554_v58 = vld [vmem:[#allocation65_spill] sm:$0xff] }
  0x8e   :  { %v262_v16 = vadd.f32 %v261_v8, %v260_v54  ;;  %v378_v9 = vadd.f32 %v377_v56, %v9793_v41  ;;  %v393_v48 = vmul.f32 %v10025_v33, %v10025_v33  ;;  %v13536_v41 = vld [vmem:[#allocation50_spill] sm:$0xff]  ;;  %v13562_v27 = vsub.f32 %v9213_v2, %v10025_v33 }
  0x8f   :  { %v391_v49 = vmul.f32 0.0051020407, %v355_v50  ;;  %v13558_v50 = vld [vmem:[#allocation75_spill] sm:$0xff]  ;;  %v13563_v29 = vsub.f32 %v9218_v3, %v10025_v33  ;;  %v13566_v2 = vsub.f32 %v9278_v15, %v10025_v33  ;;  %v13567_v3 = vsub.f32 %v9292_v19, %v10025_v33 }
  0x90   :  { %v263_v8 = vrot.slane %v262_v16, 2  ;;  %v379_v56 = vadd.f32 %v378_v9, %v9802_v61  ;;  %v13559_v61 = vld [vmem:[#allocation76_spill] sm:$0xff] }
  0x91   :  { %v395_v63 = vsub.f32 %v391_v49, %v393_v48  ;;  %v13534_v49 = vld [vmem:[#allocation47_spill] sm:$0xff] }
  0x92   :  { %v264_v10 = vadd.f32 %v263_v8, %v262_v16  ;;  %v380_v54 = vadd.f32 %v379_v56, %v9812_v14  ;;  %v13529_v8 = vld [vmem:[#allocation37_spill] sm:$0xff]  ;;  %v13533_v14 = vld [vmem:[#allocation46_spill] sm:$0xff]  ;;  %v13535_v56 = vld [vmem:[#allocation48_spill] sm:$0xff] }
  0x93   :  { %v453_v7 = vadd.f32 1e-05, %v395_v63 }
  0x94   :  { %v265_v48 = vrot.slane %v264_v10, 1  ;;  %v381_v16 = vadd.f32 %v380_v54, %v9816_v53  ;;  %v13532_v53 = vld [vmem:[#allocation44_spill] sm:$0xff] }
  0x95   :  { %8539 = vrsqrt.f32 %v453_v7 }
  0x96   :  { %v266_v63 = vadd.f32 %v265_v48, %v264_v10  ;;  %v382_v18 = vadd.f32 %v381_v16, %v9820_v20  ;;  %v13545_v10 = vld [vmem:[#allocation38_spill] sm:$0xff]  ;;  %v13546_v16 = vld [vmem:[#allocation39_spill] sm:$0xff]  ;;  %v13560_v48 = vld [vmem:[#allocation77_spill] sm:$0xff] }
  0x98   :  { %v383_v9 = vrot.slane %v382_v18, 4  ;;  %v10087_v7 = vmul.f32 0.0051020407, %v266_v63 }
  0x9a   :  { %v384_v63 = vadd.f32 %v383_v9, %v382_v18  ;;  %v394_v54 = vmul.f32 %v10087_v7, %v10087_v7  ;;  %v13550_v18 = vld [vmem:[#allocation49_spill] sm:$0xff] }
  0x9c   :  { %v385_v9 = vrot.slane %v384_v63, 2 }
  0x9e   :  { %v386_v44 = vadd.f32 %v385_v9, %v384_v63  ;;  %v13561_v9 = vsub.f32 %v9206_v1, %v10025_v33  ;;  %v13565_v1 = vsub.f32 %v9267_v11, %v10025_v33 }
  0xa0   :  { %v387_v26 = vrot.slane %v386_v44, 1 }
  0xa2   :  { %v388_v63 = vadd.f32 %v387_v26, %v386_v44  ;;  %v10163_v20 = vpop.eup %8539  ;;  %v13564_v26 = vsub.f32 %v9242_v6, %v10025_v33 }
  0xa3   :  { %v457_v39 = vmul.f32 %v10163_v20, %v13561_v9  ;;  %v459_v17 = vmul.f32 %v10163_v20, %v13562_v27  ;;  %v461_v37 = vmul.f32 %v10163_v20, %v13563_v29  ;;  %v467_v27 = vmul.f32 %v10163_v20, %v13566_v2  ;;  %v13568_v9 = vld [vmem:[#allocation72_spill] sm:$0xff] }
  0xa4   :  { %v392_v55 = vmul.f32 0.0051020407, %v388_v63  ;;  %v463_v44 = vmul.f32 %v10163_v20, %v13564_v26  ;;  %v465_v63 = vmul.f32 %v10163_v20, %v13565_v1  ;;  %v469_v29 = vmul.f32 %v10163_v20, %v13567_v3 }
  0xa5   :  { %v524_v31 = vmul.f32 %v13568_v9, %v457_v39  ;;  %v526_v26 = vmul.f32 %v13568_v9, %v459_v17  ;;  %v528_v21 = vmul.f32 %v13568_v9, %v461_v37  ;;  %v534_v15 = vmul.f32 %v13568_v9, %v467_v27 }
  0xa6   :  { %v396_v6 = vsub.f32 %v392_v55, %v394_v54  ;;  %v530_v11 = vmul.f32 %v13568_v9, %v463_v44  ;;  %v532_v1 = vmul.f32 %v13568_v9, %v465_v63  ;;  %v536_v2 = vmul.f32 %v13568_v9, %v469_v29 }
  0xa7   :  { %v591_v40 = vadd.f32 %v13569_v62, %v524_v31  ;;  %v593_v3 = vadd.f32 %v13569_v62, %v526_v26  ;;  %v595_v39 = vadd.f32 %v13569_v62, %v528_v21  ;;  %v601_v37 = vadd.f32 %v13569_v62, %v534_v15 }
  0xa8   :  { %v454_v19 = vadd.f32 1e-05, %v396_v6  ;;  %v597_v55 = vadd.f32 %v13569_v62, %v530_v11  ;;  %v599_v17 = vadd.f32 %v13569_v62, %v532_v1  ;;  %v603_v54 = vadd.f32 %v13569_v62, %v536_v2 }
  0xa9   :  { %v647_v44 = vmax.f32 %v591_v40, 0.0  ;;  %v649_v63 = vmax.f32 %v593_v3, 0.0  ;;  %v651_v27 = vmax.f32 %v595_v39, 0.0  ;;  %v657_v31 = vmax.f32 %v601_v37, 0.0 }
  0xaa   :  { %8541 = vrsqrt.f32 %v454_v19  ;;  %v653_v29 = vmax.f32 %v597_v55, 0.0  ;;  %v655_v60 = vmax.f32 %v599_v17, 0.0  ;;  %v659_v6 = vmax.f32 %v603_v54, 0.0 }
  0xab   :  { %v13571_v26 = vunpack.c.l.bf16 %v13570_v12  ;;  %v13572_v21 = vunpack.c.l.bf16 %v9807_v32  ;;  %v13573_v1 = vunpack.c.l.bf16 %v9828_v51  ;;  %v13574_v15 = vsub.f32 %v9309_v23, %v10025_v33 }
  0xac   :  { %v13575_v2 = vunpack.c.l.bf16 %v9833_v38  ;;  %v13576_v3 = vunpack.c.l.bf16 %v9851_v36  ;;  %v13577_v55 = vunpack.c.l.bf16 %v9856_v45  ;;  %v13578_v37 = vunpack.c.l.bf16 %v9868_v35 }
  0xad   :  { %v787_v46 = vmul.f32 %v13571_v26, %v647_v44  ;;  %v789_v11 = vmul.f32 %v13572_v21, %v649_v63  ;;  %v791_v4 = vmul.f32 %v13573_v1, %v651_v27  ;;  %v471_v40 = vmul.f32 %v10163_v20, %v13574_v15 }
  0xae   :  { %v793_v19 = vmul.f32 %v13575_v2, %v653_v29  ;;  %v795_v39 = vmul.f32 %v13576_v3, %v655_v60  ;;  %v797_v17 = vmul.f32 %v13577_v55, %v657_v31  ;;  %v799_v54 = vmul.f32 %v13578_v37, %v659_v6 }
  0xaf   :  { %855 = vst [vmem:[#allocation2 + $0x90] sm:$0xff] %v787_v46  ;;  %857 = vst [vmem:[#allocation2 + $0xe8] sm:$0xff] %v789_v11  ;;  %v538_v44 = vmul.f32 %v13568_v9, %v471_v40  ;;  %v13579_v23 = vsub.f32 %v13529_v8, %v10025_v33  ;;  %v13580_v27 = vsub.f32 %v13530_v30, %v10025_v33 }
  0xb0   :  { %859 = vst [vmem:[#allocation2 + $0x1d8] sm:$0xff] %v791_v4  ;;  %v13581_v29 = vsub.f32 %v13531_v52, %v10025_v33  ;;  %861 = vst [vmem:[#allocation2 + $0x160] sm:$0xff] %v793_v19  ;;  %v13582_v4 = vsub.f32 %v13532_v53, %v10025_v33  ;;  %v13583_v8 = vsub.f32 %v13533_v14, %v10025_v33 }
  0xb1   :  { %v473_v63 = vmul.f32 %v10163_v20, %v13579_v23  ;;  %v475_v60 = vmul.f32 %v10163_v20, %v13580_v27  ;;  %863 = vst [vmem:[#allocation2 + $0x120] sm:$0xff] %v795_v39  ;;  %865 = vst [vmem:[#allocation2 + $0xb0] sm:$0xff] %v797_v17  ;;  %v13584_v6 = vsub.f32 %v13534_v49, %v10025_v33 }
  0xb2   :  { %v477_v31 = vmul.f32 %v10163_v20, %v13581_v29  ;;  %867 = vst [vmem:[#allocation2 + $0x40] sm:$0xff] %v799_v54  ;;  %v479_v46 = vmul.f32 %v10163_v20, %v13582_v4  ;;  %v481_v30 = vmul.f32 %v10163_v20, %v13583_v8  ;;  %v13585_v26 = vsub.f32 %v13535_v56, %v10025_v33 }
  0xb3   :  { %v483_v52 = vmul.f32 %v10163_v20, %v13584_v6  ;;  %v605_v11 = vadd.f32 %v13569_v62, %v538_v44  ;;  %v540_v53 = vmul.f32 %v13568_v9, %v473_v63  ;;  %v542_v1 = vmul.f32 %v13568_v9, %v475_v60 }
  0xb4   :  { %v485_v21 = vmul.f32 %v10163_v20, %v13585_v26  ;;  %v544_v14 = vmul.f32 %v13568_v9, %v477_v31  ;;  %v546_v15 = vmul.f32 %v13568_v9, %v479_v46  ;;  %v548_v40 = vmul.f32 %v13568_v9, %v481_v30 }
  0xb5   :  { %v550_v49 = vmul.f32 %v13568_v9, %v483_v52  ;;  %v661_v19 = vmax.f32 %v605_v11, 0.0  ;;  %v607_v56 = vadd.f32 %v13569_v62, %v540_v53  ;;  %v609_v3 = vadd.f32 %v13569_v62, %v542_v1 }
  0xb6   :  { %v552_v2 = vmul.f32 %v13568_v9, %v485_v21  ;;  %v611_v39 = vadd.f32 %v13569_v62, %v544_v14  ;;  %v613_v55 = vadd.f32 %v13569_v62, %v546_v15  ;;  %v615_v17 = vadd.f32 %v13569_v62, %v548_v40 }
  0xb7   :  { %v617_v37 = vadd.f32 %v13569_v62, %v550_v49  ;;  %v13586_v44 = vunpack.c.l.bf16 %v9873_v28  ;;  %v663_v63 = vmax.f32 %v607_v56, 0.0  ;;  %v665_v27 = vmax.f32 %v609_v3, 0.0  ;;  %v10291_v1 = vpop.eup %8541  ;;  %v13594_v56 = vld [vmem:[#allocation90_spill] sm:$0xff] }
  0xb8   :  { %v619_v54 = vadd.f32 %v13569_v62, %v552_v2  ;;  %v667_v60 = vmax.f32 %v611_v39, 0.0  ;;  %v669_v29 = vmax.f32 %v613_v55, 0.0  ;;  %v671_v31 = vmax.f32 %v615_v17, 0.0 }
  0xb9   :  { %v801_v23 = vmul.f32 %v13586_v44, %v661_v19  ;;  %v673_v4 = vmax.f32 %v617_v37, 0.0  ;;  %v13587_v8 = vunpack.c.l.bf16 %v9886_v22  ;;  %v13588_v6 = vunpack.c.l.bf16 %v9891_v47 }
  0xba   :  { %v675_v46 = vmax.f32 %v619_v54, 0.0  ;;  %v13589_v26 = vunpack.c.l.bf16 %v9904_v34  ;;  %v13590_v11 = vsub.f32 %v13536_v41, %v10025_v33  ;;  %v13591_v14 = vunpack.c.l.bf16 %v9909_v0 }
  0xbb   :  { %869 = vst [vmem:[#allocation2 + $0x68] sm:$0xff] %v801_v23  ;;  %v803_v30 = vmul.f32 %v13587_v8, %v663_v63  ;;  %v805_v52 = vmul.f32 %v13588_v6, %v665_v27  ;;  %v13592_v40 = vunpack.c.l.bf16 %v9922_v5  ;;  %v13593_v2 = vunpack.c.l.bf16 %v9927_v24 }
  0xbc   :  { %v807_v21 = vmul.f32 %v13589_v26, %v667_v60  ;;  %v10289_v53 = vmul.f32 %v10163_v20, %v13590_v11  ;;  %v809_v15 = vmul.f32 %v13591_v14, %v669_v29  ;;  %v13595_v3 = vunpack.c.l.bf16 %v13594_v56  ;;  %v13602_v60 = vld [vmem:[#allocation45_spill] sm:$0xff] }
  0xbd   :  { %v811_v49 = vmul.f32 %v13592_v40, %v671_v31  ;;  %v813_v19 = vmul.f32 %v13593_v2, %v673_v4  ;;  %v13596_v41 = vsub.f32 %v13544_v13, %v10087_v7  ;;  %v13597_v17 = vsub.f32 %v13545_v10, %v10087_v7  ;;  %871 = vst [vmem:[#allocation2 + $0x168] sm:$0xff] %v803_v30  ;;  %v13600_v13 = vld [vmem:[#allocation43_spill] sm:$0xff]  ;;  %v13605_v4 = vld [vmem:[#allocation54_spill] sm:$0xff]  ;;  %v13607_v30 = vld [vmem:[#allocation88_spill] sm:$0xff] }
  0xbe   :  { %v815_v39 = vmul.f32 %v13595_v3, %v675_v46  ;;  %v13598_v54 = vsub.f32 %v13546_v16, %v10087_v7  ;;  %v13599_v23 = vsub.f32 %v13547_v42, %v10087_v7  ;;  %873 = vst [vmem:[#allocation2 + $0x188] sm:$0xff] %v805_v52  ;;  %875 = vst [vmem:[#allocation2 + $0x78] sm:$0xff] %v807_v21 }
  0xbf   :  { %v458_v55 = vmul.f32 %v10291_v1, %v13596_v41  ;;  %v460_v37 = vmul.f32 %v10291_v1, %v13597_v17  ;;  %v13601_v27 = vsub.f32 %v13600_v13, %v10087_v7  ;;  %v13603_v29 = vsub.f32 %v13602_v60, %v10087_v7  ;;  %877 = vst [vmem:[#allocation2 + $0x218] sm:$0xff] %v809_v15  ;;  %v13608_v15 = vld [vmem:[#allocation89_spill] sm:$0xff] }
  0xc0   :  { %v462_v44 = vmul.f32 %v10291_v1, %v13598_v54  ;;  %v464_v63 = vmul.f32 %v10291_v1, %v13599_v23  ;;  %v13604_v31 = vsub.f32 %v13550_v18, %v10087_v7  ;;  %v13606_v46 = vsub.f32 %v13605_v4, %v10087_v7  ;;  %879 = vst [vmem:[#allocation2 + $0xd8] sm:$0xff] %v811_v49 }
  0xc1   :  { %v466_v10 = vmul.f32 %v10291_v1, %v13601_v27  ;;  %v468_v16 = vmul.f32 %v10291_v1, %v13603_v29  ;;  %881 = vst [vmem:[#allocation2 + $0xa0] sm:$0xff] %v813_v19  ;;  %883 = vst [vmem:[#allocation2 + $0x178] sm:$0xff] %v815_v39  ;;  %v525_v6 = vmul.f32 %v13607_v30, %v458_v55  ;;  %v13609_v60 = vunpack.c.h.bf16 %v13570_v12 }
  0xc2   :  { %v470_v42 = vmul.f32 %v10291_v1, %v13604_v31  ;;  %v472_v8 = vmul.f32 %v10291_v1, %v13606_v46  ;;  %v527_v52 = vmul.f32 %v13607_v30, %v460_v37  ;;  %v529_v26 = vmul.f32 %v13607_v30, %v462_v44 }
  0xc3   :  { %v531_v21 = vmul.f32 %v13607_v30, %v464_v63  ;;  %v533_v18 = vmul.f32 %v13607_v30, %v466_v10  ;;  %v535_v11 = vmul.f32 %v13607_v30, %v468_v16  ;;  %v592_v49 = vadd.f32 %v13608_v15, %v525_v6 }
  0xc4   :  { %v537_v14 = vmul.f32 %v13607_v30, %v470_v42  ;;  %v539_v40 = vmul.f32 %v13607_v30, %v472_v8  ;;  %v594_v2 = vadd.f32 %v13608_v15, %v527_v52  ;;  %v596_v19 = vadd.f32 %v13608_v15, %v529_v26 }
  0xc5   :  { %v598_v3 = vadd.f32 %v13608_v15, %v531_v21  ;;  %v600_v39 = vadd.f32 %v13608_v15, %v533_v18  ;;  %v602_v41 = vadd.f32 %v13608_v15, %v535_v11  ;;  %v648_v37 = vmax.f32 %v592_v49, 0.0 }
  0xc6   :  { %v604_v55 = vadd.f32 %v13608_v15, %v537_v14  ;;  %v606_v17 = vadd.f32 %v13608_v15, %v539_v40  ;;  %v650_v54 = vmax.f32 %v594_v2, 0.0  ;;  %v652_v44 = vmax.f32 %v596_v19, 0.0 }
  0xc7   :  { %v654_v23 = vmax.f32 %v598_v3, 0.0  ;;  %v656_v63 = vmax.f32 %v600_v39, 0.0  ;;  %v658_v13 = vmax.f32 %v602_v41, 0.0  ;;  %v788_v29 = vmul.f32 %v13609_v60, %v648_v37  ;;  %v13624_v39 = vld [vmem:[#allocation74_spill] sm:$0xff] }
  0xc8   :  { %v660_v27 = vmax.f32 %v604_v55, 0.0  ;;  %v662_v10 = vmax.f32 %v606_v17, 0.0  ;;  %v13610_v16 = vunpack.c.h.bf16 %v9807_v32  ;;  %v13611_v42 = vunpack.c.h.bf16 %v9828_v51  ;;  %v13617_v32 = vld [vmem:[#allocation58_spill] sm:$0xff] }
  0xc9   :  { %v13612_v46 = vunpack.c.h.bf16 %v9833_v38  ;;  %v13613_v6 = vunpack.c.h.bf16 %v9851_v36  ;;  %v13614_v26 = vunpack.c.h.bf16 %v9856_v45  ;;  %v13615_v18 = vunpack.c.h.bf16 %v9868_v35  ;;  %856 = vst [vmem:[#allocation2 + $0x138] sm:$0xff] %v788_v29  ;;  %v13619_v36 = vld [vmem:[#allocation62_spill] sm:$0xff] }
  0xca   :  { %v790_v31 = vmul.f32 %v13610_v16, %v650_v54  ;;  %v792_v4 = vmul.f32 %v13611_v42, %v652_v44  ;;  %v13616_v12 = vunpack.c.h.bf16 %v9873_v28  ;;  %v13618_v38 = vsub.f32 %v13617_v32, %v10087_v7 }
  0xcb   :  { %v794_v8 = vmul.f32 %v13612_v46, %v654_v23  ;;  %v796_v52 = vmul.f32 %v13613_v6, %v656_v63  ;;  %v798_v21 = vmul.f32 %v13614_v26, %v658_v13  ;;  %v800_v11 = vmul.f32 %v13615_v18, %v660_v27  ;;  %v13627_v18 = vld [vmem:[#allocation91_spill] sm:$0xff] }
  0xcc   :  { %v802_v14 = vmul.f32 %v13616_v12, %v662_v10  ;;  %858 = vst [vmem:[#allocation2 + $0xf0] sm:$0xff] %v790_v31  ;;  %860 = vst [vmem:[#allocation2] sm:$0xff] %v792_v4  ;;  %v474_v51 = vmul.f32 %v10291_v1, %v13618_v38  ;;  %v13620_v40 = vsub.f32 %v13619_v36, %v10087_v7  ;;  %v13630_v38 = vunpack.c.h.bf16 %v9891_v47 }
  0xcd   :  { %862 = vst [vmem:[#allocation2 + $0x170] sm:$0xff] %v794_v8  ;;  %v13621_v35 = vsub.f32 %v13554_v58, %v10087_v7  ;;  %v13622_v49 = vsub.f32 %v13555_v57, %v10087_v7  ;;  %864 = vst [vmem:[#allocation2 + $0x1a0] sm:$0xff] %v796_v52  ;;  %v13623_v19 = vsub.f32 %v13556_v25, %v10087_v7  ;;  %v13631_v36 = vunpack.c.h.bf16 %v9904_v34  ;;  %v13637_v34 = vld [vmem:[#allocation51_spill] sm:$0xff] }
  0xce   :  { %v476_v45 = vmul.f32 %v10291_v1, %v13620_v40  ;;  %866 = vst [vmem:[#allocation2 + $0x118] sm:$0xff] %v798_v21  ;;  %868 = vst [vmem:[#allocation2 + $0x198] sm:$0xff] %v800_v11  ;;  %v13625_v41 = vsub.f32 %v13624_v39, %v10087_v7  ;;  %v13626_v55 = vsub.f32 %v13558_v50, %v10087_v7  ;;  %v13628_v11 = vunpack.c.l.bf16 %v13627_v18 }
  0xcf   :  { %v478_v28 = vmul.f32 %v10291_v1, %v13621_v35  ;;  %v480_v2 = vmul.f32 %v10291_v1, %v13622_v49  ;;  %870 = vst [vmem:[#allocation2 + $0xa8] sm:$0xff] %v802_v14  ;;  %v482_v3 = vmul.f32 %v10291_v1, %v13623_v19  ;;  %v554_v17 = vmul.f32 %v13568_v9, %v10289_v53 }
  0xd0   :  { %v484_v58 = vmul.f32 %v10291_v1, %v13625_v41  ;;  %v486_v57 = vmul.f32 %v10291_v1, %v13626_v55  ;;  %v541_v37 = vmul.f32 %v13607_v30, %v474_v51  ;;  %v543_v54 = vmul.f32 %v13607_v30, %v476_v45  ;;  %v13640_v41 = vld [vmem:[#allocation52_spill] sm:$0xff] }
  0xd1   :  { %v545_v25 = vmul.f32 %v13607_v30, %v478_v28  ;;  %v547_v44 = vmul.f32 %v13607_v30, %v480_v2  ;;  %v549_v23 = vmul.f32 %v13607_v30, %v482_v3  ;;  %v621_v50 = vadd.f32 %v13569_v62, %v554_v17 }
  0xd2   :  { %v551_v63 = vmul.f32 %v13607_v30, %v484_v58  ;;  %v553_v13 = vmul.f32 %v13607_v30, %v486_v57  ;;  %v608_v27 = vadd.f32 %v13608_v15, %v541_v37  ;;  %v610_v53 = vadd.f32 %v13608_v15, %v543_v54  ;;  %v13643_v37 = vld [vmem:[#allocation55_spill] sm:$0xff] }
  0xd3   :  { %v612_v10 = vadd.f32 %v13608_v15, %v545_v25  ;;  %v614_v60 = vadd.f32 %v13608_v15, %v547_v44  ;;  %v616_v29 = vadd.f32 %v13608_v15, %v549_v23  ;;  %v677_v42 = vmax.f32 %v621_v50, 0.0  ;;  %v13646_v23 = vld [vmem:[#allocation56_spill] sm:$0xff] }
  0xd4   :  { %v618_v16 = vadd.f32 %v13608_v15, %v551_v63  ;;  %v620_v31 = vadd.f32 %v13608_v15, %v553_v13  ;;  %v664_v4 = vmax.f32 %v608_v27, 0.0  ;;  %v666_v46 = vmax.f32 %v610_v53, 0.0 }
  0xd5   :  { %v668_v8 = vmax.f32 %v612_v10, 0.0  ;;  %v670_v6 = vmax.f32 %v614_v60, 0.0  ;;  %v672_v52 = vmax.f32 %v616_v29, 0.0  ;;  %v817_v12 = vmul.f32 %v13628_v11, %v677_v42 }
  0xd6   :  { %v674_v26 = vmax.f32 %v618_v16, 0.0  ;;  %v676_v21 = vmax.f32 %v620_v31, 0.0  ;;  %v13629_v14 = vunpack.c.h.bf16 %v9886_v22  ;;  %v806_v51 = vmul.f32 %v13630_v38, %v666_v46 }
  0xd7   :  { %v808_v40 = vmul.f32 %v13631_v36, %v668_v8  ;;  %v13632_v45 = vunpack.c.h.bf16 %v9909_v0  ;;  %v13633_v28 = vunpack.c.h.bf16 %v9922_v5  ;;  %v13634_v2 = vunpack.c.h.bf16 %v9927_v24  ;;  %885 = vst [vmem:[#allocation2 + $0x108] sm:$0xff] %v817_v12 }
  0xd8   :  { %v804_v32 = vmul.f32 %v13629_v14, %v664_v4  ;;  %v13635_v3 = vunpack.c.h.bf16 %v13594_v56  ;;  %v13636_v22 = vsub.f32 %v13559_v61, %v10087_v7  ;;  %874 = vst [vmem:[#allocation2 + $0x1c0] sm:$0xff] %v806_v51  ;;  %v13638_v5 = vsub.f32 %v13637_v34, %v10025_v33 }
  0xd9   :  { %v810_v35 = vmul.f32 %v13632_v45, %v670_v6  ;;  %v812_v49 = vmul.f32 %v13633_v28, %v672_v52  ;;  %v814_v19 = vmul.f32 %v13634_v2, %v674_v26  ;;  %876 = vst [vmem:[#allocation2 + $0x158] sm:$0xff] %v808_v40  ;;  %v13639_v24 = vsub.f32 %v13560_v48, %v10087_v7  ;;  %v13649_v40 = vld [vmem:[#allocation92_spill] sm:$0xff]  ;;  %v13652_v2 = vld [vmem:[#allocation93_spill] sm:$0xff] }
  0xda   :  { %v816_v39 = vmul.f32 %v13635_v3, %v676_v21  ;;  %v488_v47 = vmul.f32 %v10291_v1, %v13636_v22  ;;  %872 = vst [vmem:[#allocation2 + $0x208] sm:$0xff] %v804_v32  ;;  %v489_v0 = vmul.f32 %v10163_v20, %v13638_v5  ;;  %v13641_v58 = vsub.f32 %v13640_v41, %v10025_v33 }
  0xdb   :  { %878 = vst [vmem:[#allocation2 + $0x190] sm:$0xff] %v810_v35  ;;  %v490_v56 = vmul.f32 %v10291_v1, %v13639_v24  ;;  %v13642_v55 = vsub.f32 %v9686_v59, %v10087_v7  ;;  %880 = vst [vmem:[#allocation2 + $0x70] sm:$0xff] %v812_v49  ;;  %v13644_v48 = vsub.f32 %v13643_v37, %v10025_v33  ;;  %v13648_v14 = vunpack.c.h.bf16 %v13627_v18  ;;  %v13658_v24 = vld [vmem:[#allocation95_spill] sm:$0xff] }
  0xdc   :  { %v491_v61 = vmul.f32 %v10163_v20, %v13641_v58  ;;  %882 = vst [vmem:[#allocation2 + $0x58] sm:$0xff] %v814_v19  ;;  %884 = vst [vmem:[#allocation2 + $0x210] sm:$0xff] %v816_v39  ;;  %v555_v17 = vmul.f32 %v13607_v30, %v488_v47  ;;  %v13645_v25 = vsub.f32 %v9698_v43, %v10087_v7  ;;  %v13650_v45 = vunpack.c.l.bf16 %v13649_v40  ;;  %v13655_v47 = vld [vmem:[#allocation94_spill] sm:$0xff] }
  0xdd   :  { %v492_v57 = vmul.f32 %v10291_v1, %v13642_v55  ;;  %v493_v54 = vmul.f32 %v10163_v20, %v13644_v48  ;;  %v13647_v59 = vsub.f32 %v13646_v23, %v10025_v33  ;;  %v556_v13 = vmul.f32 %v13568_v9, %v489_v0  ;;  %v13660_v58 = vld [vmem:[#allocation78_spill] sm:$0xff]  ;;  %v13664_v48 = vld [vmem:[#allocation79_spill] sm:$0xff] }
  0xde   :  { %v494_v44 = vmul.f32 %v10291_v1, %v13645_v25  ;;  %v557_v50 = vmul.f32 %v13607_v30, %v490_v56  ;;  %v558_v27 = vmul.f32 %v13568_v9, %v491_v61  ;;  %v622_v10 = vadd.f32 %v13608_v15, %v555_v17 }
  0xdf   :  { %v495_v63 = vmul.f32 %v10163_v20, %v13647_v59  ;;  %v559_v53 = vmul.f32 %v13607_v30, %v492_v57  ;;  %v560_v60 = vmul.f32 %v13568_v9, %v493_v54  ;;  %v623_v16 = vadd.f32 %v13569_v62, %v556_v13  ;;  %v13662_v57 = vld [vmem:[#allocation57_spill] sm:$0xff] }
  0xe0   :  { %v561_v43 = vmul.f32 %v13607_v30, %v494_v44  ;;  %v624_v31 = vadd.f32 %v13608_v15, %v557_v50  ;;  %v625_v42 = vadd.f32 %v13569_v62, %v558_v27  ;;  %v678_v46 = vmax.f32 %v622_v10, 0.0  ;;  %v13666_v44 = vld [vmem:[#allocation59_spill] sm:$0xff] }
  0xe1   :  { %v562_v29 = vmul.f32 %v13568_v9, %v495_v63  ;;  %v626_v4 = vadd.f32 %v13608_v15, %v559_v53  ;;  %v627_v8 = vadd.f32 %v13569_v62, %v560_v60  ;;  %v679_v26 = vmax.f32 %v623_v16, 0.0  ;;  %v13668_v63 = vld [vmem:[#allocation80_spill] sm:$0xff] }
  0xe2   :  { %v628_v6 = vadd.f32 %v13608_v15, %v561_v43  ;;  %v680_v21 = vmax.f32 %v624_v31, 0.0  ;;  %v681_v11 = vmax.f32 %v625_v42, 0.0  ;;  %v818_v32 = vmul.f32 %v13648_v14, %v678_v46  ;;  %v13670_v53 = vld [vmem:[#allocation60_spill] sm:$0xff]  ;;  %v13672_v43 = vld [vmem:[#allocation81_spill] sm:$0xff] }
  0xe3   :  { %v629_v52 = vadd.f32 %v13569_v62, %v562_v29  ;;  %v682_v12 = vmax.f32 %v626_v4, 0.0  ;;  %v683_v38 = vmax.f32 %v627_v8, 0.0  ;;  %v819_v35 = vmul.f32 %v13650_v45, %v679_v26  ;;  %v13674_v31 = vld [vmem:[#allocation61_spill] sm:$0xff] }
  0xe4   :  { %v684_v51 = vmax.f32 %v628_v6, 0.0  ;;  %v13651_v28 = vunpack.c.h.bf16 %v13649_v40  ;;  %v13653_v19 = vunpack.c.l.bf16 %v13652_v2  ;;  %v13654_v39 = vunpack.c.h.bf16 %v13652_v2  ;;  %886 = vst [vmem:[#allocation2 + $0x1a8] sm:$0xff] %v818_v32 }
  0xe5   :  { %v685_v36 = vmax.f32 %v629_v52, 0.0  ;;  %v13656_v34 = vunpack.c.l.bf16 %v13655_v47  ;;  %v13657_v5 = vunpack.c.h.bf16 %v13655_v47  ;;  %v13659_v56 = vunpack.c.l.bf16 %v13658_v24  ;;  %887 = vst [vmem:[#allocation2 + $0x1c8] sm:$0xff] %v819_v35 }
  0xe6   :  { %v820_v49 = vmul.f32 %v13651_v28, %v680_v21  ;;  %v821_v3 = vmul.f32 %v13653_v19, %v681_v11  ;;  %v822_v22 = vmul.f32 %v13654_v39, %v682_v12  ;;  %v13661_v61 = vsub.f32 %v13660_v58, %v10087_v7  ;;  %v13680_v58 = vld [vmem:[#allocation97_spill] sm:$0xff] }
  0xe7   :  { %v823_v18 = vmul.f32 %v13656_v34, %v683_v38  ;;  %v824_v0 = vmul.f32 %v13657_v5, %v684_v51  ;;  %v825_v41 = vmul.f32 %v13659_v56, %v685_v36  ;;  %v13663_v17 = vsub.f32 %v13662_v57, %v10025_v33 }
  0xe8   :  { %v496_v55 = vmul.f32 %v10291_v1, %v13661_v61  ;;  %888 = vst [vmem:[#allocation2 + $0x1e8] sm:$0xff] %v820_v49  ;;  %889 = vst [vmem:[#allocation2 + $0x38] sm:$0xff] %v821_v3  ;;  %v13665_v54 = vsub.f32 %v13664_v48, %v10087_v7  ;;  %v13667_v23 = vsub.f32 %v13666_v44, %v10025_v33  ;;  %v13676_v3 = vunpack.c.h.bf16 %v13658_v24  ;;  %v13686_v44 = vld [vmem:[#allocation99_spill] sm:$0xff] }
  0xe9   :  { %890 = vst [vmem:[#allocation2 + $0x1f0] sm:$0xff] %v822_v22  ;;  %v497_v37 = vmul.f32 %v10163_v20, %v13663_v17  ;;  %v13669_v13 = vsub.f32 %v13668_v63, %v10087_v7  ;;  %891 = vst [vmem:[#allocation2 + $0x1f8] sm:$0xff] %v823_v18  ;;  %v13671_v10 = vsub.f32 %v13670_v53, %v10025_v33  ;;  %v13677_v18 = vld [vmem:[#allocation96_spill] sm:$0xff]  ;;  %v13681_v61 = vunpack.c.l.bf16 %v13680_v58  ;;  %v13688_v63 = vld [vmem:[#allocation82_spill] sm:$0xff] }
  0xea   :  { %v498_v25 = vmul.f32 %v10291_v1, %v13665_v54  ;;  %v499_v59 = vmul.f32 %v10163_v20, %v13667_v23  ;;  %892 = vst [vmem:[#allocation2 + $0x148] sm:$0xff] %v824_v0  ;;  %893 = vst [vmem:[#allocation2 + $0x110] sm:$0xff] %v825_v41  ;;  %v563_v27 = vmul.f32 %v13607_v30, %v496_v55  ;;  %v13678_v5 = vunpack.c.l.bf16 %v13677_v18 }
  0xeb   :  { %v500_v50 = vmul.f32 %v10291_v1, %v13669_v13  ;;  %v501_v60 = vmul.f32 %v10163_v20, %v13671_v10  ;;  %v13673_v29 = vsub.f32 %v13672_v43, %v10087_v7  ;;  %v13675_v42 = vsub.f32 %v13674_v31, %v10025_v33 }
  0xec   :  { %v564_v46 = vmul.f32 %v13568_v9, %v497_v37  ;;  %v565_v8 = vmul.f32 %v13607_v30, %v498_v25  ;;  %v566_v6 = vmul.f32 %v13568_v9, %v499_v59  ;;  %v630_v26 = vadd.f32 %v13608_v15, %v563_v27  ;;  %v13683_v37 = vld [vmem:[#allocation98_spill] sm:$0xff]  ;;  %v13690_v27 = vld [vmem:[#allocation63_spill] sm:$0xff] }
  0xed   :  { %v502_v16 = vmul.f32 %v10291_v1, %v13673_v29  ;;  %v503_v4 = vmul.f32 %v10163_v20, %v13675_v42  ;;  %v567_v52 = vmul.f32 %v13607_v30, %v500_v50  ;;  %v568_v21 = vmul.f32 %v13568_v9, %v501_v60  ;;  %v13692_v60 = vld [vmem:[#allocation83_spill] sm:$0xff] }
  0xee   :  { %v631_v14 = vadd.f32 %v13569_v62, %v564_v46  ;;  %v632_v32 = vadd.f32 %v13608_v15, %v565_v8  ;;  %v633_v38 = vadd.f32 %v13569_v62, %v566_v6  ;;  %v686_v36 = vmax.f32 %v630_v26, 0.0 }
  0xef   :  { %v569_v11 = vmul.f32 %v13607_v30, %v502_v16  ;;  %v570_v12 = vmul.f32 %v13568_v9, %v503_v4  ;;  %v634_v51 = vadd.f32 %v13608_v15, %v567_v52  ;;  %v635_v40 = vadd.f32 %v13569_v62, %v568_v21  ;;  %v13694_v16 = vld [vmem:[#allocation64_spill] sm:$0xff]  ;;  %v13698_v52 = vld [vmem:[#allocation66_spill] sm:$0xff] }
  0xf0   :  { %v687_v28 = vmax.f32 %v631_v14, 0.0  ;;  %v688_v49 = vmax.f32 %v632_v32, 0.0  ;;  %v689_v2 = vmax.f32 %v633_v38, 0.0  ;;  %v826_v39 = vmul.f32 %v13676_v3, %v686_v36  ;;  %v13696_v4 = vld [vmem:[#allocation84_spill] sm:$0xff]  ;;  %v13702_v32 = vld [vmem:[#allocation67_spill] sm:$0xff] }
  0xf1   :  { %v636_v45 = vadd.f32 %v13608_v15, %v569_v11  ;;  %v637_v35 = vadd.f32 %v13569_v62, %v570_v12  ;;  %v690_v19 = vmax.f32 %v634_v51, 0.0  ;;  %v691_v22 = vmax.f32 %v635_v40, 0.0  ;;  %v13700_v11 = vld [vmem:[#allocation85_spill] sm:$0xff] }
  0xf2   :  { %v827_v0 = vmul.f32 %v13678_v5, %v687_v28  ;;  %v13679_v56 = vunpack.c.h.bf16 %v13677_v18  ;;  %v829_v55 = vmul.f32 %v13681_v61, %v689_v2  ;;  %v13682_v57 = vunpack.c.h.bf16 %v13680_v58  ;;  %894 = vst [vmem:[#allocation2 + $0xe0] sm:$0xff] %v826_v39 }
  0xf3   :  { %v692_v47 = vmax.f32 %v636_v45, 0.0  ;;  %v693_v34 = vmax.f32 %v637_v35, 0.0  ;;  %v13684_v48 = vunpack.c.l.bf16 %v13683_v37  ;;  %v13685_v54 = vunpack.c.h.bf16 %v13683_v37 }
  0xf4   :  { %v828_v41 = vmul.f32 %v13679_v56, %v688_v49  ;;  %v830_v17 = vmul.f32 %v13682_v57, %v690_v19  ;;  %v13687_v23 = vunpack.c.l.bf16 %v13686_v44  ;;  %v13689_v13 = vsub.f32 %v13688_v63, %v10087_v7  ;;  %895 = vst [vmem:[#allocation2 + $0x50] sm:$0xff] %v827_v0  ;;  %897 = vst [vmem:[#allocation2 + $0x128] sm:$0xff] %v829_v55 }
  0xf5   :  { %v831_v24 = vmul.f32 %v13684_v48, %v691_v22  ;;  %v832_v25 = vmul.f32 %v13685_v54, %v692_v47  ;;  %v13691_v53 = vsub.f32 %v13690_v27, %v10025_v33  ;;  %v13693_v43 = vsub.f32 %v13692_v60, %v10087_v7 }
  0xf6   :  { %v833_v59 = vmul.f32 %v13687_v23, %v693_v34  ;;  %v504_v50 = vmul.f32 %v10291_v1, %v13689_v13  ;;  %896 = vst [vmem:[#allocation2 + $0x1d0] sm:$0xff] %v828_v41  ;;  %898 = vst [vmem:[#allocation2 + $0x80] sm:$0xff] %v830_v17  ;;  %v13695_v31 = vsub.f32 %v13694_v16, %v10025_v33  ;;  %v13705_v17 = vld [vmem:[#allocation100_spill] sm:$0xff]  ;;  %v13711_v13 = vld [vmem:[#allocation102_spill] sm:$0xff] }
  0xf7   :  { %v505_v10 = vmul.f32 %v10163_v20, %v13691_v53  ;;  %v506_v29 = vmul.f32 %v10291_v1, %v13693_v43  ;;  %v13697_v46 = vsub.f32 %v13696_v4, %v10087_v7  ;;  %899 = vst [vmem:[#allocation2 + $0x20] sm:$0xff] %v831_v24  ;;  %900 = vst [vmem:[#allocation2 + $0x1b8] sm:$0xff] %v832_v25  ;;  %v13706_v37 = vunpack.c.l.bf16 %v13705_v17  ;;  %v13708_v25 = vld [vmem:[#allocation101_spill] sm:$0xff] }
  0xf8   :  { %v507_v42 = vmul.f32 %v10163_v20, %v13695_v31  ;;  %901 = vst [vmem:[#allocation2 + $0x18] sm:$0xff] %v833_v59  ;;  %v571_v6 = vmul.f32 %v13607_v30, %v504_v50  ;;  %v13699_v26 = vsub.f32 %v13698_v52, %v10025_v33  ;;  %v13701_v12 = vsub.f32 %v13700_v11, %v10087_v7 }
  0xf9   :  { %v508_v8 = vmul.f32 %v10291_v1, %v13697_v46  ;;  %v13703_v38 = vsub.f32 %v13702_v32, %v10025_v33  ;;  %v572_v36 = vmul.f32 %v13568_v9, %v505_v10  ;;  %v573_v40 = vmul.f32 %v13607_v30, %v506_v29  ;;  %v13714_v10 = vld [vmem:[#allocation103_spill] sm:$0xff]  ;;  %v13716_v29 = vld [vmem:[#allocation86_spill] sm:$0xff] }
  0xfa   :  { %v509_v21 = vmul.f32 %v10163_v20, %v13699_v26  ;;  %v510_v14 = vmul.f32 %v10291_v1, %v13701_v12  ;;  %v574_v45 = vmul.f32 %v13568_v9, %v507_v42  ;;  %v638_v28 = vadd.f32 %v13608_v15, %v571_v6 }
  0xfb   :  { %v511_v51 = vmul.f32 %v10163_v20, %v13703_v38  ;;  %v575_v35 = vmul.f32 %v13607_v30, %v508_v8  ;;  %v639_v33 = vadd.f32 %v13569_v62, %v572_v36  ;;  %v640_v20 = vadd.f32 %v13608_v15, %v573_v40 }
  0xfc   :  { %v576_v49 = vmul.f32 %v13568_v9, %v509_v21  ;;  %v577_v2 = vmul.f32 %v13607_v30, %v510_v14  ;;  %v641_v3 = vadd.f32 %v13569_v62, %v574_v45  ;;  %v694_v22 = vmax.f32 %v638_v28, 0.0 }
  0xfd   :  { %v578_v19 = vmul.f32 %v13568_v9, %v511_v51  ;;  %v642_v39 = vadd.f32 %v13608_v15, %v575_v35  ;;  %v695_v5 = vmax.f32 %v639_v33, 0.0  ;;  %v696_v0 = vmax.f32 %v640_v20, 0.0 }
  0xfe   :  { %v643_v47 = vadd.f32 %v13569_v62, %v576_v49  ;;  %v644_v34 = vadd.f32 %v13608_v15, %v577_v2  ;;  %v697_v56 = vmax.f32 %v641_v3, 0.0  ;;  %v13704_v9 = vunpack.c.h.bf16 %v13686_v44 }
  0xff   :  { %v645_v18 = vadd.f32 %v13569_v62, %v578_v19  ;;  %v698_v41 = vmax.f32 %v642_v39, 0.0  ;;  %v835_v48 = vmul.f32 %v13706_v37, %v695_v5  ;;  %v13707_v24 = vunpack.c.h.bf16 %v13705_v17 }
 0x100   :  { %v834_v58 = vmul.f32 %v13704_v9, %v694_v22  ;;  %v699_v61 = vmax.f32 %v643_v47, 0.0  ;;  %v700_v55 = vmax.f32 %v644_v34, 0.0  ;;  %v13709_v23 = vunpack.c.l.bf16 %v13708_v25 }
 0x101   :  { %v701_v57 = vmax.f32 %v645_v18, 0.0  ;;  %v836_v54 = vmul.f32 %v13707_v24, %v696_v0  ;;  %v13710_v62 = vunpack.c.h.bf16 %v13708_v25  ;;  %v13712_v50 = vunpack.c.l.bf16 %v13711_v13  ;;  %903 = vst [vmem:[#allocation2 + $0x1e0] sm:$0xff] %v835_v48 }
 0x102   :  { %v837_v59 = vmul.f32 %v13709_v23, %v697_v56  ;;  %902 = vst [vmem:[#allocation2 + $0x88] sm:$0xff] %v834_v58  ;;  %v13713_v27 = vunpack.c.h.bf16 %v13711_v13  ;;  %v13715_v60 = vunpack.c.l.bf16 %v13714_v10  ;;  %v13717_v16 = vsub.f32 %v13716_v29, %v10087_v7 }
 0x103   :  { %v838_v63 = vmul.f32 %v13710_v62, %v698_v41  ;;  %v839_v44 = vmul.f32 %v13712_v50, %v699_v61  ;;  %904 = vst [vmem:[#allocation2 + $0x140] sm:$0xff] %v836_v54  ;;  %v786_v46 = vunpack.c.h.bf16 %v13714_v10 }
 0x104   :  { %v840_v53 = vmul.f32 %v13713_v27, %v700_v55  ;;  %v841_v43 = vmul.f32 %v13715_v60, %v701_v57  ;;  %v512_v31 = vmul.f32 %v10291_v1, %v13717_v16  ;;  %905 = vst [vmem:[#allocation2 + $0xf8] sm:$0xff] %v837_v59 }
 0x105   :  { %906 = vst [vmem:[#allocation2 + $0x60] sm:$0xff] %v838_v63  ;;  %907 = vst [vmem:[#allocation2 + $0x180] sm:$0xff] %v839_v44 }
 0x106   :  { %908 = vst [vmem:[#allocation2 + $0x30] sm:$0xff] %v840_v53  ;;  %909 = vst [vmem:[#allocation2 + $0x150] sm:$0xff] %v841_v43  ;;  %v579_v42 = vmul.f32 %v13607_v30, %v512_v31 }
 0x108   :  { %v646_v4 = vadd.f32 %v13608_v15, %v579_v42 }
 0x10a   :  { %v702_v8 = vmax.f32 %v646_v4, 0.0 }
 0x10c   :  { %v842_v6 = vmul.f32 %v786_v46, %v702_v8 }
 0x10e   :  { %910 = vst [vmem:[#allocation2 + $0x1b0] sm:$0xff] %v842_v6 }
 0x10f   :  { %9135 = dma.done.wait [#allocation4], 4096 }
 0x110   :  { %9136 = vsyncadd [#allocation4], 4294963200  ;;  %v915_v7 = vld [vmem:[#allocation2 + $0x98] sm:$0x80]  ;;  %v916_v1 = vld [vmem:[#allocation2 + $0x8] sm:$0x80] }
 0x111   :  { %v917_v52 = vld [vmem:[#allocation2 + $0x200] sm:$0xff]  ;;  %v918_v26 = vld [vmem:[#allocation2 + $0x28] sm:$0xff]  ;;  %v919_v21 = vld [vmem:[#allocation2 + $0x130] sm:$0xff] }
 0x112   :  { %v920_v11 = vld [vmem:[#allocation2 + $0xc0] sm:$0xff]  ;;  %v10625_v12 = vpack.c.bf16 %v917_v52, %v915_v7  ;;  %v921_v14 = vld [vmem:[#allocation2 + $0x90] sm:$0xff]  ;;  %v922_v32 = vld [vmem:[#allocation2 + $0x138] sm:$0xff]  ;;  %v10627_v38 = vpack.c.bf16 %v918_v26, %v916_v1 }
 0x113   :  { %v923_v30 = vld [vmem:[#allocation2 + $0xe8] sm:$0xff]  ;;  %v924_v15 = vld [vmem:[#allocation2 + $0xf0] sm:$0xff]  ;;  %v925_v51 = vld [vmem:[#allocation2 + $0x1d8] sm:$0xff]  ;;  %v10629_v40 = vpack.c.bf16 %v921_v14, %v919_v21  ;;  %v10631_v45 = vpack.c.bf16 %v922_v32, %v920_v11 }
 0x114   :  { %v926_v36 = vld [vmem:[#allocation2] sm:$0xff]  ;;  %v928_v28 = vld [vmem:[#allocation2 + $0x170] sm:$0xff]  ;;  %v10633_v2 = vpack.c.bf16 %v925_v51, %v923_v30  ;;  %v932_v3 = vld [vmem:[#allocation2 + $0x118] sm:$0xff] }
 0x115   :  { %v927_v35 = vld [vmem:[#allocation2 + $0x160] sm:$0xff]  ;;  %v10635_v19 = vpack.c.bf16 %v926_v36, %v924_v15  ;;  %v931_v20 = vld [vmem:[#allocation2 + $0xb0] sm:$0xff]  ;;  %v934_v47 = vld [vmem:[#allocation2 + $0x198] sm:$0xff] }
 0x116   :  { %v929_v49 = vld [vmem:[#allocation2 + $0x120] sm:$0xff]  ;;  %v935_v34 = vld [vmem:[#allocation2 + $0x68] sm:$0xff]  ;;  %v10643_v9 = vpack.c.bf16 %v934_v47, %v932_v3  ;;  %v941_v55 = vld [vmem:[#allocation2 + $0x78] sm:$0xff] }
 0x117   :  { %v930_v33 = vld [vmem:[#allocation2 + $0x1a0] sm:$0xff]  ;;  %v10637_v39 = vpack.c.bf16 %v929_v49, %v927_v35  ;;  %v936_v5 = vld [vmem:[#allocation2 + $0xa8] sm:$0xff]  ;;  %v942_v37 = vld [vmem:[#allocation2 + $0x158] sm:$0xff] }
 0x118   :  { %v933_v22 = vld [vmem:[#allocation2 + $0x40] sm:$0xff]  ;;  %v10639_v18 = vpack.c.bf16 %v930_v33, %v928_v28  ;;  %v937_v0 = vld [vmem:[#allocation2 + $0x168] sm:$0xff]  ;;  %v943_v48 = vld [vmem:[#allocation2 + $0x218] sm:$0xff] }
 0x119   :  { %v938_v56 = vld [vmem:[#allocation2 + $0x208] sm:$0xff]  ;;  %v10641_v41 = vpack.c.bf16 %v933_v22, %v931_v20  ;;  %v940_v61 = vld [vmem:[#allocation2 + $0x1c0] sm:$0xff]  ;;  %v10645_v57 = vpack.c.bf16 %v937_v0, %v935_v34  ;;  %v944_v24 = vld [vmem:[#allocation2 + $0x190] sm:$0xff] }
 0x11a   :  { %v939_v58 = vld [vmem:[#allocation2 + $0x188] sm:$0xff]  ;;  %v10647_v17 = vpack.c.bf16 %v938_v56, %v936_v5  ;;  %v945_v25 = vld [vmem:[#allocation2 + $0xd8] sm:$0xff]  ;;  %v946_v23 = vld [vmem:[#allocation2 + $0x70] sm:$0xff]  ;;  %v10651_v62 = vpack.c.bf16 %v942_v37, %v940_v61 }
 0x11b   :  { %v10649_v54 = vpack.c.bf16 %v941_v55, %v939_v58  ;;  %v947_v59 = vld [vmem:[#allocation2 + $0xa0] sm:$0xff]  ;;  %v948_v63 = vld [vmem:[#allocation2 + $0x58] sm:$0xff]  ;;  %v950_v50 = vld [vmem:[#allocation2 + $0x210] sm:$0xff]  ;;  %v10653_v44 = vpack.c.bf16 %v945_v25, %v943_v48  ;;  %v10655_v27 = vpack.c.bf16 %v946_v23, %v944_v24 }
 0x11c   :  { %v949_v13 = vld [vmem:[#allocation2 + $0x178] sm:$0xff]  ;;  %v951_v53 = vld [vmem:[#allocation2 + $0x108] sm:$0xff]  ;;  %v10659_v29 = vpack.c.bf16 %v950_v50, %v948_v63  ;;  %v956_v42 = vld [vmem:[#allocation2 + $0x1f0] sm:$0xff] }
 0x11d   :  { %v952_v10 = vld [vmem:[#allocation2 + $0x1a8] sm:$0xff]  ;;  %v10657_v43 = vpack.c.bf16 %v949_v13, %v947_v59  ;;  %v955_v31 = vld [vmem:[#allocation2 + $0x38] sm:$0xff]  ;;  %v959_v6 = vld [vmem:[#allocation2 + $0x110] sm:$0xff] }
 0x11e   :  { %v953_v60 = vld [vmem:[#allocation2 + $0x1c8] sm:$0xff]  ;;  %v957_v46 = vld [vmem:[#allocation2 + $0x1f8] sm:$0xff]  ;;  %v960_v1 = vld [vmem:[#allocation2 + $0xe0] sm:$0xff] }
 0x11f   :  { %v954_v16 = vld [vmem:[#allocation2 + $0x1e8] sm:$0xff]  ;;  %v10661_v4 = vpack.c.bf16 %v953_v60, %v951_v53  ;;  %v961_v52 = vld [vmem:[#allocation2 + $0x50] sm:$0xff]  ;;  %v10665_v21 = vpack.c.bf16 %v957_v46, %v955_v31  ;;  %v964_v32 = vld [vmem:[#allocation2 + $0x80] sm:$0xff] }
 0x120   :  { %v958_v8 = vld [vmem:[#allocation2 + $0x148] sm:$0xff]  ;;  %v10663_v7 = vpack.c.bf16 %v954_v16, %v952_v10  ;;  %v962_v26 = vld [vmem:[#allocation2 + $0x1d0] sm:$0xff]  ;;  %v965_v30 = vld [vmem:[#allocation2 + $0x20] sm:$0xff]  ;;  %v10669_v15 = vpack.c.bf16 %v961_v52, %v959_v6 }
 0x121   :  { %13718 = vst [vmem:[#allocation37_spill] sm:$0xff] %v10665_v21  ;;  %v10667_v11 = vpack.c.bf16 %v958_v8, %v956_v42  ;;  %v963_v14 = vld [vmem:[#allocation2 + $0x128] sm:$0xff]  ;;  %v10671_v51 = vpack.c.bf16 %v962_v26, %v960_v1  ;;  %v966_v36 = vld [vmem:[#allocation2 + $0x1b8] sm:$0xff]  ;;  %v969_v33 = vld [vmem:[#allocation2 + $0x1e0] sm:$0xff] }
 0x122   :  { %13720 = vst [vmem:[#allocation42_spill] sm:$0xff] %v10669_v15  ;;  %v967_v35 = vld [vmem:[#allocation2 + $0x18] sm:$0xff]  ;;  %v968_v28 = vld [vmem:[#allocation2 + $0x88] sm:$0xff]  ;;  %v10673_v49 = vpack.c.bf16 %v965_v30, %v963_v14  ;;  %v970_v20 = vld [vmem:[#allocation2 + $0x140] sm:$0xff]  ;;  %v10675_v22 = vpack.c.bf16 %v966_v36, %v964_v32 }
 0x123   :  { %13719 = vst [vmem:[#allocation40_spill] sm:$0xff] %v10667_v11  ;;  %13721 = vst [vmem:[#allocation44_spill] sm:$0xff] %v10671_v51  ;;  %v971_v3 = vld [vmem:[#allocation2 + $0xf8] sm:$0x7f]  ;;  %v972_v47 = vld [vmem:[#allocation2 + $0x60] sm:$0x7f]  ;;  %v10677_v34 = vpack.c.bf16 %v969_v33, %v967_v35  ;;  %v10679_v5 = vpack.c.bf16 %v970_v20, %v968_v28 }
 0x124   :  { %13722 = vst [vmem:[#allocation46_spill] sm:$0xff] %v10673_v49  ;;  %13723 = vst [vmem:[#allocation47_spill] sm:$0xff] %v10675_v22  ;;  %v10681_v0 = vpack.c.bf16 %v971_v3, %v971_v3  ;;  %v10683_v56 = vld [vmem:[#allocation3] sm:$0xff]  ;;  %v10685_v58 = vld [vmem:[#allocation3 + $0x8] sm:$0xff]  ;;  %v10687_v61 = vpack.c.bf16 %v972_v47, %v972_v47 }
 0x125   :  { %13724 = vst [vmem:[#allocation48_spill] sm:$0xff] %v10677_v34  ;;  %13725 = vst [vmem:[#allocation50_spill] sm:$0xff] %v10679_v5  ;;  %v10689_v55 = vld [vmem:[#allocation3 + $0x10] sm:$0xff]  ;;  %v10691_v37 = vld [vmem:[#allocation3 + $0x18] sm:$0xff] }
 0x126   :  { %13726 = vst [vmem:[#allocation36_spill] sm:$0xff] %v10681_v0  ;;  %13727 = vst [vmem:[#allocation38_spill] sm:$0xff] %v10687_v61  ;;  %v10693_v48 = vld [vmem:[#allocation3 + $0x20] sm:$0xff]  ;;  %v10695_v24 = vld [vmem:[#allocation3 + $0x28] sm:$0xff] }
 0x127   :  { %v10697_v25 = vld [vmem:[#allocation3 + $0x30] sm:$0xff]  ;;  %v10699_v23 = vld [vmem:[#allocation3 + $0x38] sm:$0xff]  ;;  %v1011_v59 = vld [vmem:[#allocation3 + $0x40] sm:$0xff] }
 0x128   :  { %v1012_v63 = vld [vmem:[#allocation3 + $0x48] sm:$0xff]  ;;  %v1013_v13 = vld [vmem:[#allocation3 + $0x50] sm:$0xff]  ;;  %v1014_v50 = vld [vmem:[#allocation3 + $0x58] sm:$0xff] }
 0x129   :  { %v1015_v53 = vld [vmem:[#allocation3 + $0x60] sm:$0xff]  ;;  %v1016_v10 = vld [vmem:[#allocation3 + $0x68] sm:$0xff]  ;;  %v1017_v60 = vld [vmem:[#allocation3 + $0x70] sm:$0xff] }
 0x12a   :  { %v1018_v16 = vld [vmem:[#allocation3 + $0x78] sm:$0xff]  ;;  %v10701_v31 = vld [vmem:[#allocation3 + $0x80] sm:$0xff]  ;;  %v10703_v42 = vld [vmem:[#allocation3 + $0x88] sm:$0xff] }
 0x12b   :  { %v10705_v46 = vld [vmem:[#allocation3 + $0x90] sm:$0xff]  ;;  %v10707_v8 = vld [vmem:[#allocation3 + $0x98] sm:$0xff]  ;;  %v10709_v6 = vld [vmem:[#allocation3 + $0xa0] sm:$0xff] }
 0x12c   :  { %v10711_v1 = vld [vmem:[#allocation3 + $0xa8] sm:$0xff]  ;;  %v10713_v52 = vld [vmem:[#allocation3 + $0xb0] sm:$0xff]  ;;  %v10715_v26 = vld [vmem:[#allocation3 + $0xb8] sm:$0xff] }
 0x12d   :  { %v10717_v14 = vld [vmem:[#allocation3 + $0xc0] sm:$0xff]  ;;  %v10719_v32 = vld [vmem:[#allocation3 + $0xc8] sm:$0xff]  ;;  %v10721_v30 = vld [vmem:[#allocation3 + $0xd0] sm:$0xff] }
 0x12e   :  { %v10723_v36 = vld [vmem:[#allocation3 + $0xd8] sm:$0xff]  ;;  %v10725_v35 = vld [vmem:[#allocation3 + $0xe0] sm:$0xff]  ;;  %v10727_v28 = vld [vmem:[#allocation3 + $0xe8] sm:$0xff] }
 0x12f   :  { %v10729_v33 = vld [vmem:[#allocation3 + $0xf0] sm:$0xff]  ;;  %v10731_v20 = vld [vmem:[#allocation3 + $0xf8] sm:$0xff] }
 0x130   :  { %9137 = dma.done.wait [#allocation4 + $0x1], 4096 }
 0x131   :  { %9138 = vsyncadd [#allocation4 + $0x1], 4294963200  ;;  %v8233_v3 = vcombine.high %v1017_v60, %v1018_v16  ;;  %v8232_v47 = vcombine.low %v1017_v60, %v1018_v16  ;;  %v8231_v0 = vcombine.high %v1015_v53, %v1016_v10  ;;  %v8230_v61 = vcombine.low %v1015_v53, %v1016_v10  ;;  %v8543_v5 = vld [vmem:[#allocation3 + $0x174] ss:$8 sps:$4 sm:$0xff]   ;;  %v8545_v22 = vld [vmem:[#allocation3 + $0x170] ss:$8 sps:$4 sm:$0xff]  }
 0x132   :  { %v8229_v34 = vcombine.high %v1013_v13, %v1014_v50  ;;  %v8228_v49 = vcombine.low %v1013_v13, %v1014_v50  ;;  %v8227_v15 = vcombine.high %v1011_v59, %v1012_v63  ;;  %1313 = vmatprep.subr.bf16.mxu0 %v8543_v5  ;;  %v8546_v51 = vld [vmem:[#allocation3 + $0x164] ss:$8 sps:$4 sm:$0xff]   ;;  %v1505_v21 = vshrl.u32 %v10627_v38, 16  ;;  %v8548_v11 = vld [vmem:[#allocation3 + $0x160] ss:$8 sps:$4 sm:$0xff]  }
 0x133   :  { %1943 = vmatprep.subr.bf16.mxu1 %v8233_v3  ;;  %1314 = vmatpush1.bf16.msra.mxu0 %v8545_v22  ;;  %v1508_v60 = vshll.u32 %v10627_v38, 16  ;;  %v8226_v16 = vcombine.low %v1011_v59, %v1012_v63  ;;  %v8549_v53 = vld [vmem:[#allocation3 + $0x154] ss:$8 sps:$4 sm:$0xff]   ;;  %v1516_v5 = vshll.u32 %v10631_v45, 16  ;;  %v8551_v22 = vld [vmem:[#allocation3 + $0x150] ss:$8 sps:$4 sm:$0xff]   ;;  %v8224_v38 = vcombine.low %v10697_v25, %v10699_v23 }
 0x134   :  { %1944 = vmatpush1.bf16.msra.mxu1 %v8232_v47  ;;  %1315 = vmatprep.subr.bf16.mxu0 %v8546_v51  ;;  %vm1486_vm0 = vsmask.f32 4352  ;;  %v8555_v59 = vld [vmem:[#allocation3 + $0x134] ss:$8 sps:$4 sm:$0xff]   ;;  %v8220_v63 = vcombine.low %v10689_v55, %v10691_v37  ;;  %v8558_v47 = vld [vmem:[#allocation3 + $0x124] ss:$8 sps:$4 sm:$0xff]  }
 0x135   :  { %1945 = vmatprep.subr.bf16.mxu1 %v8231_v0  ;;  %v1507_v0 = vrot.slane %v1505_v21, 3  ;;  %v1510_v13 = vrot.slane %v1508_v60, 4  ;;  %v1518_v3 = vrot.slane %v1516_v5, 4  ;;  %v8552_v21 = vld [vmem:[#allocation3 + $0x144] ss:$8 sps:$4 sm:$0xff]   ;;  %v8219_v60 = vcombine.high %v10683_v56, %v10685_v58 }
 0x136   :  { %v8246_v5 = vcombine.low %v10725_v35, %v10727_v28 }
 0x137   :  { %1316 = vmatpush1.bf16.msra.mxu0 %v8548_v11  ;;  %v1511_v10 = vor.u32 %v1510_v13, %v1507_v0  ;;  %v1038_v0 = vld [vmem:[#allocation2 + $0x28] sm:$0xff] }
 0x138   :  { %1946 = vmatpush1.bf16.msra.mxu1 %v8230_v61  ;;  %v1513_v61 = vshrl.u32 %v10631_v45, 16  ;;  %1317 = vmatprep.subr.bf16.mxu0 %v8549_v53  ;;  %v8554_v45 = vld [vmem:[#allocation3 + $0x140] ss:$8 sps:$4 sm:$0xff]   ;;  %v8249_v53 = vcombine.high %v10729_v33, %v10731_v20  ;;  %v8564_v13 = vld [vmem:[#allocation3 + $0x104] ss:$8 sps:$4 sm:$0xff]  }
 0x139   :  { %1947 = vmatprep.subr.bf16.mxu1 %v8229_v34  ;;  %v8225_v34 = vcombine.high %v10697_v25, %v10699_v23  ;;  %v8221_v25 = vcombine.high %v10689_v55, %v10691_v37  ;;  %v8557_v23 = vld [vmem:[#allocation3 + $0x130] ss:$8 sps:$4 sm:$0xff]  }
 0x13a   :  { %v1515_v50 = vrot.slane %v1513_v61, 3  ;;  %v1040_v61 = vld [vmem:[#allocation2 + $0xc0] sm:$0xff]  ;;  %v8563_v37 = vld [vmem:[#allocation3 + $0x110] ss:$8 sps:$4 sm:$0xff]  }
 0x13b   :  { %1318 = vmatpush1.bf16.msra.mxu0 %v8551_v22  ;;  %v1094_v55 = vpack.c.bf16 %v1040_v61, %v1038_v0  ;;  %v8245_v22 = vcombine.high %v10721_v30, %v10723_v36  ;;  %v8234_v0 = vcombine.low %v10701_v31, %v10703_v42 }
 0x13c   :  { %1948 = vmatpush1.bf16.msra.mxu1 %v8228_v49  ;;  %v10743_v51 = vor.u32 %v1518_v3, %v1515_v50  ;;  %1319 = vmatprep.subr.bf16.mxu0 %v8552_v21  ;;  %v8222_v49 = vcombine.low %v10693_v48, %v10695_v24  ;;  %v8567_v50 = vld [vmem:[#allocation3 + $0x1f4] ss:$8 sps:$4 sm:$0xff]   ;;  %v8243_v3 = vcombine.high %v10717_v14, %v10719_v32 }
 0x13d   :  { %1949 = vmatprep.subr.bf16.mxu1 %v8227_v15  ;;  %v8223_v15 = vcombine.high %v10693_v48, %v10695_v24  ;;  %v8560_v48 = vld [vmem:[#allocation3 + $0x120] ss:$8 sps:$4 sm:$0xff]   ;;  %v8218_v24 = vcombine.low %v10683_v56, %v10685_v58  ;;  %v8247_v56 = vcombine.high %v10725_v35, %v10727_v28  ;;  %1345 = vmatprep.mubr.bf16.mxu0 %v1094_v55  ;;  %v8573_v28 = vld [vmem:[#allocation3 + $0x1d4] ss:$8 sps:$4 sm:$0xff]   ;;  %v1522_v55 = vshrl.u32 %v10633_v2, 16 }
 0x13e   :  { %v1520_v11 = vsel %vm1486_vm0, %v1511_v10, %v10743_v51  ;;  %v8566_v58 = vld [vmem:[#allocation3 + $0x100] ss:$8 sps:$4 sm:$0xff]   ;;  %v8570_v10 = vld [vmem:[#allocation3 + $0x1e4] ss:$8 sps:$4 sm:$0xff]   ;;  %v8242_v35 = vcombine.low %v10717_v14, %v10719_v32  ;;  %v8241_v21 = vcombine.high %v10713_v52, %v10715_v26  ;;  %v8238_v14 = vcombine.low %v10709_v6, %v10711_v1  ;;  %v8579_v32 = vld [vmem:[#allocation3 + $0x1b4] ss:$8 sps:$4 sm:$0xff]  }
 0x13f   :  { %1975 = vmatprep.mubr.bf16.mxu1 %v1520_v11  ;;  %1320 = vmatpush1.bf16.msra.mxu0 %v8554_v45  ;;  %v8239_v45 = vcombine.high %v10709_v6, %v10711_v1  ;;  %v8578_v11 = vld [vmem:[#allocation3 + $0x1c0] ss:$8 sps:$4 sm:$0xff]   ;;  %v8581_v6 = vld [vmem:[#allocation3 + $0x1b0] ss:$8 sps:$4 sm:$0xff]   ;;  %v8236_v1 = vcombine.low %v10705_v46, %v10707_v8 }
 0x140   :  { %1950 = vmatpush1.bf16.msra.mxu1 %v8226_v16  ;;  %1321 = vmatprep.subr.bf16.mxu0 %v8555_v59  ;;  %v8561_v16 = vld [vmem:[#allocation3 + $0x114] ss:$8 sps:$4 sm:$0xff]   ;;  %v1491_v59 = vshll.u32 %v10625_v12, 16 }
 0x141   :  { %1951 = vmatprep.subr.bf16.mxu1 %v8225_v34  ;;  %v8248_v34 = vcombine.low %v10729_v33, %v10731_v20  ;;  %v8569_v33 = vld [vmem:[#allocation3 + $0x1f0] ss:$8 sps:$4 sm:$0xff]   ;;  %v8244_v20 = vcombine.low %v10721_v30, %v10723_v36  ;;  %v8240_v30 = vcombine.low %v10713_v52, %v10715_v26  ;;  %v8576_v36 = vld [vmem:[#allocation3 + $0x1c4] ss:$8 sps:$4 sm:$0xff]   ;;  %v1499_v52 = vshll.u32 %v10629_v40, 16 }
 0x142   :  { %v8237_v26 = vcombine.high %v10705_v46, %v10707_v8  ;;  %v8585_v46 = vld [vmem:[#allocation3 + $0x194] ss:$8 sps:$4 sm:$0xff]  }
 0x143   :  { %1322 = vmatpush1.bf16.msra.mxu0 %v8557_v23  ;;  %v1531_v23 = vshrl.u32 %v10635_v19, 16 }
 0x144   :  { %1952 = vmatpush1.bf16.msra.mxu1 %v8224_v38  ;;  %1323 = vmatprep.subr.bf16.mxu0 %v8558_v47  ;;  %v8572_v38 = vld [vmem:[#allocation3 + $0x1e0] ss:$8 sps:$4 sm:$0xff]  }
 0x145   :  { %1953 = vmatprep.subr.bf16.mxu1 %v8223_v15  ;;  %v8575_v15 = vld [vmem:[#allocation3 + $0x1d0] ss:$8 sps:$4 sm:$0xff]  }
 0x147   :  { %1324 = vmatpush1.bf16.msra.mxu0 %v8560_v48 }
 0x148   :  { %1954 = vmatpush1.bf16.msra.mxu1 %v8222_v49  ;;  %1325 = vmatprep.subr.bf16.mxu0 %v8561_v16  ;;  %v1488_v49 = vshrl.u32 %v10625_v12, 16  ;;  %v8582_v12 = vld [vmem:[#allocation3 + $0x1a4] ss:$8 sps:$4 sm:$0xff]   ;;  %v1533_v16 = vrot.slane %v1531_v23, 3 }
 0x149   :  { %1955 = vmatprep.subr.bf16.mxu1 %v8221_v25  ;;  %v1496_v25 = vshrl.u32 %v10629_v40, 16  ;;  %v1501_v40 = vrot.slane %v1499_v52, 4  ;;  %v1043_v52 = vld [vmem:[#allocation2 + $0xe8] sm:$0xff]  ;;  %v1046_v23 = vld [vmem:[#allocation2] sm:$0xff] }
 0x14a   :  { %v1490_v47 = vrot.slane %v1488_v49, 3 }
 0x14b   :  { %1326 = vmatpush1.bf16.msra.mxu0 %v8563_v37  ;;  %v1498_v48 = vrot.slane %v1496_v25, 3  ;;  %v1525_v37 = vshll.u32 %v10633_v2, 16 }
 0x14c   :  { %1956 = vmatpush1.bf16.msra.mxu1 %v8220_v63  ;;  %1327 = vmatprep.subr.bf16.mxu0 %v8564_v13  ;;  %v1534_v63 = vshll.u32 %v10635_v19, 16  ;;  %v8584_v19 = vld [vmem:[#allocation3 + $0x1a0] ss:$8 sps:$4 sm:$0xff]   ;;  %v1549_v13 = vshrl.u32 %v10639_v18, 16 }
 0x14d   :  { %1957 = vmatprep.subr.bf16.mxu1 %v8219_v60  ;;  %v1493_v60 = vrot.slane %v1491_v59, 4  ;;  %v1502_v61 = vor.u32 %v1501_v40, %v1498_v48 }
 0x14f   :  { %1328 = vmatpush1.bf16.msra.mxu0 %v8566_v58  ;;  %v1494_v8 = vor.u32 %v1493_v60, %v1490_v47  ;;  %v8587_v58 = vld [vmem:[#allocation3 + $0x190] ss:$8 sps:$4 sm:$0xff]   ;;  %v1588_v47 = vshll.u32 %v10647_v17, 16 }
 0x150   :  { %1958 = vmatpush1.bf16.msra.mxu1 %v8218_v24  ;;  %1329 = vmatprep.subr.bf16.mxu0 %v8567_v50  ;;  %v8235_v24 = vcombine.high %v10701_v31, %v10703_v42  ;;  %v8588_v42 = vld [vmem:[#allocation3 + $0x184] ss:$8 sps:$4 sm:$0xff]   ;;  %v1527_v50 = vrot.slane %v1525_v37, 4  ;;  %v1579_v37 = vshll.u32 %v10645_v57, 16 }
 0x151   :  { %1959 = vmatprep.subr.bf16.mxu1 %v8249_v53  ;;  %v1536_v53 = vrot.slane %v1534_v63, 4  ;;  %v1503_v31 = vsel %vm1486_vm0, %v1494_v8, %v1502_v61  ;;  %v1558_v63 = vshrl.u32 %v10641_v41, 16 }
 0x153   :  { %1330 = vmatpush2.bf16.msra.mxu0 %v8569_v33  ;;  %v1551_v33 = vrot.slane %v1549_v13, 3  ;;  %v1603_v13 = vshrl.u32 %v10651_v62, 16 }
 0x154   :  { %1960 = vmatpush2.bf16.msra.mxu1 %v8248_v34  ;;  %1331 = vmatprep.subr.bf16.mxu0 %v8570_v10  ;;  %v1537_v34 = vor.u32 %v1536_v53, %v1533_v16  ;;  %v1037_v10 = vld [vmem:[#allocation2 + $0x200] sm:$0xff] }
 0x155   :  { %1961 = vmatprep.subr.bf16.mxu1 %v8247_v56  ;;  %v1552_v56 = vshll.u32 %v10639_v18, 16 }
 0x157   :  { %1332 = vmatpush2.bf16.msra.mxu0 %v8572_v38  ;;  %v1554_v2 = vrot.slane %v1552_v56, 4  ;;  %v1042_v38 = vld [vmem:[#allocation2 + $0x138] sm:$0xff]  ;;  %v1606_v56 = vshll.u32 %v10651_v62, 16  ;;  %v1594_v62 = vshrl.u32 %v10649_v54, 16 }
 0x158   :  { %1962 = vmatpush2.bf16.msra.mxu1 %v8246_v5  ;;  %1333 = vmatprep.subr.bf16.mxu0 %v8573_v28  ;;  %v1524_v5 = vrot.slane %v1522_v55, 3  ;;  %v1540_v28 = vshrl.u32 %v10637_v39, 16  ;;  %v1052_v55 = vld [vmem:[#allocation2 + $0x118] sm:$0xff] }
 0x159   :  { %1963 = vmatprep.subr.bf16.mxu1 %v8245_v22  ;;  %v1538_v22 = vsel %vm1486_vm0, %v10743_v51, %v1537_v34  ;;  %v1570_v51 = vshll.u32 %v10643_v9, 16 }
 0x15a   :  { %v1528_v18 = vor.u32 %v1527_v50, %v1524_v5  ;;  %v1581_v50 = vrot.slane %v1579_v37, 4 }
 0x15b   :  { %1334 = vmatpush2.bf16.msra.mxu0 %v8575_v15  ;;  %v1555_v15 = vor.u32 %v1554_v2, %v1551_v33  ;;  %v1572_v25 = vrot.slane %v1570_v51, 4  ;;  %v1605_v33 = vrot.slane %v1603_v13, 3  ;;  %v1608_v2 = vrot.slane %v1606_v56, 4 }
 0x15c   :  { %1964 = vmatpush2.bf16.msra.mxu1 %v8244_v20  ;;  %1335 = vmatprep.subr.bf16.mxu0 %v8576_v36  ;;  %v8590_v20 = vld [vmem:[#allocation3 + $0x180] ss:$8 sps:$4 sm:$0xff]  }
 0x15d   :  { %1965 = vmatprep.subr.bf16.mxu1 %v8243_v3  ;;  %v1039_v3 = vld [vmem:[#allocation2 + $0x130] sm:$0xff]  ;;  %v1556_v49 = vsel %vm1486_vm0, %v1537_v34, %v1555_v15 }
 0x15e   :  { %v1093_v36 = vpack.c.bf16 %v1039_v3, %v1037_v10  ;;  %v1054_v3 = vld [vmem:[#allocation2 + $0x198] sm:$0xff] }
 0x15f   :  { %1336 = vmatpush2.bf16.msra.mxu0 %v8578_v11  ;;  %v1529_v11 = vsel %vm1486_vm0, %v1502_v61, %v1528_v18  ;;  %v1050_v61 = vld [vmem:[#allocation2 + $0x1a0] sm:$0xff] }
 0x160   :  { %1966 = vmatpush2.bf16.msra.mxu1 %v8242_v35  ;;  %1337 = vmatprep.subr.bf16.mxu0 %v8579_v32  ;;  %v1044_v35 = vld [vmem:[#allocation2 + $0xf0] sm:$0xff] }
 0x161   :  { %1967 = vmatprep.subr.bf16.mxu1 %v8241_v21  ;;  %v1543_v21 = vshll.u32 %v10637_v39, 16  ;;  %v1041_v39 = vld [vmem:[#allocation2 + $0x90] sm:$0xff] }
 0x162   :  { %v1095_v60 = vpack.c.bf16 %v1043_v52, %v1041_v39  ;;  %v1060_v39 = vld [vmem:[#allocation2 + $0x1c0] sm:$0xff]  ;;  %v1615_v52 = vshll.u32 %v10653_v44, 16 }
 0x163   :  { %1338 = vmatpush2.bf16.msra.mxu0 %v8581_v6  ;;  %v1545_v32 = vrot.slane %v1543_v21, 4  ;;  %v1561_v6 = vshll.u32 %v10641_v41, 16  ;;  %v1047_v41 = vld [vmem:[#allocation2 + $0x160] sm:$0xff]  ;;  %v1624_v21 = vshll.u32 %v10655_v27, 16 }
 0x164   :  { %1968 = vmatpush2.bf16.msra.mxu1 %v8240_v30  ;;  %1339 = vmatprep.subr.bf16.mxu0 %v8582_v12  ;;  %v1567_v30 = vshrl.u32 %v10643_v9, 16  ;;  %v1048_v9 = vld [vmem:[#allocation2 + $0x170] sm:$0xff]  ;;  %v1585_v12 = vshrl.u32 %v10647_v17, 16  ;;  %v1576_v17 = vshrl.u32 %v10645_v57, 16 }
 0x165   :  { %1969 = vmatprep.subr.bf16.mxu1 %v8239_v45  ;;  %v1096_v45 = vpack.c.bf16 %v1044_v35, %v1042_v38  ;;  %v1098_v48 = vpack.c.bf16 %v1048_v9, %v1046_v23  ;;  %v1563_v16 = vrot.slane %v1561_v6, 4  ;;  %v1051_v57 = vld [vmem:[#allocation2 + $0xb0] sm:$0xff]  ;;  %v1597_v38 = vshll.u32 %v10649_v54, 16  ;;  %v1055_v54 = vld [vmem:[#allocation2 + $0x68] sm:$0xff] }
 0x166   :  { %v1569_v59 = vrot.slane %v1567_v30, 3  ;;  %v1578_v5 = vrot.slane %v1576_v17, 3  ;;  %v1609_v35 = vor.u32 %v1608_v2, %v1605_v33  ;;  %v1639_v23 = vshrl.u32 %v10659_v29, 16  ;;  %v13728_v2 = vld [vmem:[#allocation40_spill] sm:$0xff] }
 0x167   :  { %1340 = vmatpush2.bf16.msra.mxu0 %v8584_v19  ;;  %v1587_v19 = vrot.slane %v1585_v12, 3  ;;  %v1642_v9 = vshll.u32 %v10659_v29, 16  ;;  %v1630_v29 = vshrl.u32 %v10657_v43, 16 }
 0x168   :  { %1970 = vmatpush2.bf16.msra.mxu1 %v8238_v14  ;;  %1341 = vmatprep.subr.bf16.mxu0 %v8585_v46  ;;  %v1542_v14 = vrot.slane %v1540_v28, 3  ;;  %v1045_v46 = vld [vmem:[#allocation2 + $0x1d8] sm:$0xff]  ;;  %v1582_v10 = vor.u32 %v1581_v50, %v1578_v5  ;;  %v1621_v28 = vshrl.u32 %v10655_v27, 16  ;;  %v1612_v27 = vshrl.u32 %v10653_v44, 16  ;;  %v1059_v44 = vld [vmem:[#allocation2 + $0x188] sm:$0xff]  ;;  %v1066_v5 = vld [vmem:[#allocation2 + $0x70] sm:$0xff] }
 0x169   :  { %1971 = vmatprep.subr.bf16.mxu1 %v8237_v26  ;;  %v1632_v37 = vrot.slane %v1630_v29, 3  ;;  %v1068_v50 = vld [vmem:[#allocation2 + $0x58] sm:$0xff] }
 0x16a   :  { %v1546_v26 = vor.u32 %v1545_v32, %v1542_v14  ;;  %v1623_v14 = vrot.slane %v1621_v28, 3  ;;  %v1626_v32 = vrot.slane %v1624_v21, 4  ;;  %v1614_v12 = vrot.slane %v1612_v27, 3 }
 0x16b   :  { %1342 = vmatpush2.bf16.msra.mxu0 %v8587_v58  ;;  %v1097_v58 = vpack.c.bf16 %v1047_v41, %v1045_v46  ;;  %v1657_v41 = vshrl.u32 %v10663_v7, 16 }
 0x16c   :  { %1972 = vmatpush2.bf16.msra.mxu1 %v8236_v1  ;;  %1343 = vmatprep.subr.bf16.mxu0 %v8588_v42  ;;  %v1573_v1 = vor.u32 %v1572_v25, %v1569_v59  ;;  %v1547_v40 = vsel %vm1486_vm0, %v1528_v18, %v1546_v26  ;;  %v1056_v18 = vld [vmem:[#allocation2 + $0xa8] sm:$0xff] }
 0x16d   :  { %1973 = vmatprep.subr.bf16.mxu1 %v8235_v24  ;;  %v1560_v24 = vrot.slane %v1558_v63, 3  ;;  %v1102_v30 = vpack.c.bf16 %v1056_v18, %v1054_v3  ;;  %v1058_v25 = vld [vmem:[#allocation2 + $0x208] sm:$0xff]  ;;  %v1659_v56 = vrot.slane %v1657_v41, 3  ;;  %v1108_v3 = vpack.c.bf16 %v1068_v50, %v1066_v5  ;;  %v13734_v50 = vld [vmem:[#allocation50_spill] sm:$0xff] }
 0x16e   :  { %v1574_v53 = vsel %vm1486_vm0, %v1555_v15, %v1573_v1  ;;  %v1104_v6 = vpack.c.bf16 %v1060_v39, %v1058_v25 }
 0x16f   :  { %1344 = vmatpush2.bf16.msra.mxu0 %v8590_v20  ;;  %v1564_v8 = vor.u32 %v1563_v16, %v1560_v24  ;;  %v1049_v20 = vld [vmem:[#allocation2 + $0x120] sm:$0xff]  ;;  %v1057_v24 = vld [vmem:[#allocation2 + $0x168] sm:$0xff] }
 0x170   :  { %1974 = vmatpush2.bf16.msra.mxu1 %v8234_v0  ;;  %v1590_v0 = vrot.slane %v1588_v47, 4  ;;  %v1099_v15 = vpack.c.bf16 %v1051_v57, %v1049_v20  ;;  %v1617_v47 = vrot.slane %v1615_v52, 4  ;;  %v1675_v20 = vshrl.u32 %v13728_v2, 16 }
 0x171   :  { %v1565_v42 = vsel %vm1486_vm0, %v1546_v26, %v1564_v8  ;;  %v1583_v51 = vsel %vm1486_vm0, %v1564_v8, %v1582_v10  ;;  %v1627_v26 = vor.u32 %v1626_v32, %v1623_v14  ;;  %v1660_v8 = vshll.u32 %v10663_v7, 16 }
 0x172   :  { %1346 = vmatmul.mubr.bf16.vlgmr.msra.gmra.mxu0 %v1093_v36  ;;  %v1591_v34 = vor.u32 %v1590_v0, %v1587_v19  ;;  %v1596_v36 = vrot.slane %v1594_v62, 3  ;;  %v1618_v16 = vor.u32 %v1617_v47, %v1614_v12  ;;  %v1064_v19 = vld [vmem:[#allocation2 + $0x190] sm:$0xff]  ;;  %v1633_v0 = vshll.u32 %v10657_v43, 16  ;;  %v1063_v43 = vld [vmem:[#allocation2 + $0x218] sm:$0xff]  ;;  %v1074_v47 = vld [vmem:[#allocation2 + $0x1e8] sm:$0xff] }
 0x173   :  { %1976 = vmatmul.mubr.bf16.vlgmr.msra.gmra.mxu1 %v1503_v31  ;;  %1355 = vmatprep.mubr.bf16.mxu0 %v1096_v45  ;;  %v1100_v31 = vpack.c.bf16 %v1052_v55, %v1050_v61  ;;  %v1599_v45 = vrot.slane %v1597_v38, 4  ;;  %v1103_v61 = vpack.c.bf16 %v1059_v44, %v1057_v24  ;;  %v1648_v7 = vshrl.u32 %v10661_v4, 16 }
 0x174   :  { %1985 = vmatprep.mubr.bf16.mxu1 %v1538_v22  ;;  %v1592_v22 = vsel %vm1486_vm0, %v1573_v1, %v1591_v34  ;;  %v1678_v57 = vshll.u32 %v13728_v2, 16  ;;  %v1677_v28 = vrot.slane %v1675_v20, 3 }
 0x175   :  { %v1600_v59 = vor.u32 %v1599_v45, %v1596_v36  ;;  %v1650_v62 = vrot.slane %v1648_v7, 3  ;;  %v1072_v36 = vld [vmem:[#allocation2 + $0x1a8] sm:$0xff]  ;;  %v13729_v45 = vld [vmem:[#allocation37_spill] sm:$0xff]  ;;  %v1729_v7 = vshrl.u32 %v13734_v50, 16 }
 0x176   :  { %v1680_v21 = vrot.slane %v1678_v57, 4  ;;  %v1669_v14 = vshll.u32 %v13729_v45, 16 }
 0x177   :  { %v1601_v1 = vsel %vm1486_vm0, %v1582_v10, %v1600_v59  ;;  %v1619_v17 = vsel %vm1486_vm0, %v1600_v59, %v1618_v16 }
 0x178   :  { %v1681_v32 = vor.u32 %v1680_v21, %v1677_v28  ;;  %v1082_v21 = vld [vmem:[#allocation2 + $0x1d0] sm:$0xff] }
 0x17a   :  { %1356 = vmatmul.mubr.bf16.gmra.mxu0 %v1095_v60  ;;  %v1628_v60 = vsel %vm1486_vm0, %v1609_v35, %v1627_v26 }
 0x17b   :  { %1986 = vmatmul.mubr.bf16.gmra.mxu1 %v1529_v11  ;;  %1365 = vmatprep.mubr.bf16.mxu0 %v1098_v48  ;;  %v1610_v11 = vsel %vm1486_vm0, %v1591_v34, %v1609_v35  ;;  %v1641_v48 = vrot.slane %v1639_v23, 3  ;;  %v1635_v34 = vrot.slane %v1633_v0, 4 }
 0x17c   :  { %1995 = vmatprep.mubr.bf16.mxu1 %v1556_v49  ;;  %v1053_v49 = vld [vmem:[#allocation2 + $0x40] sm:$0xff] }
 0x17d   :  { %v1101_v63 = vpack.c.bf16 %v1055_v54, %v1053_v49  ;;  %v13730_v49 = vld [vmem:[#allocation44_spill] sm:$0xff] }
 0x17e   :  { %v1693_v54 = vshrl.u32 %v13730_v49, 16  ;;  %v1696_v59 = vshll.u32 %v13730_v49, 16 }
 0x182   :  { %1366 = vmatmul.mubr.bf16.gmra.mxu0 %v1097_v58  ;;  %v1662_v58 = vrot.slane %v1660_v8, 4 }
 0x183   :  { %1996 = vmatmul.mubr.bf16.gmra.mxu1 %v1547_v40  ;;  %1375 = vmatprep.mubr.bf16.mxu0 %v1100_v31  ;;  %v1644_v40 = vrot.slane %v1642_v9, 4  ;;  %v1061_v31 = vld [vmem:[#allocation2 + $0x78] sm:$0xff]  ;;  %v1695_v9 = vrot.slane %v1693_v54, 3 }
 0x184   :  { %2005 = vmatprep.mubr.bf16.mxu1 %v1574_v53  ;;  %v1062_v53 = vld [vmem:[#allocation2 + $0x158] sm:$0xff]  ;;  %v1663_v33 = vor.u32 %v1662_v58, %v1659_v56  ;;  %v1105_v10 = vpack.c.bf16 %v1063_v43, %v1061_v31  ;;  %v1078_v56 = vld [vmem:[#allocation2 + $0x148] sm:$0xff]  ;;  %v1080_v58 = vld [vmem:[#allocation2 + $0xe0] sm:$0xff] }
 0x185   :  { %v1645_v46 = vor.u32 %v1644_v40, %v1641_v48  ;;  %v1106_v55 = vpack.c.bf16 %v1064_v19, %v1062_v53  ;;  %v13731_v48 = vld [vmem:[#allocation42_spill] sm:$0xff]  ;;  %v1114_v2 = vpack.c.bf16 %v1080_v58, %v1078_v56 }
 0x186   :  { %v1682_v23 = vsel %vm1486_vm0, %v1663_v33, %v1681_v32  ;;  %v1684_v40 = vshrl.u32 %v13731_v48, 16  ;;  %v1687_v24 = vshll.u32 %v13731_v48, 16  ;;  %v13733_v31 = vld [vmem:[#allocation46_spill] sm:$0xff] }
 0x187   :  { %v1646_v13 = vsel %vm1486_vm0, %v1627_v26, %v1645_v46  ;;  %v1664_v35 = vsel %vm1486_vm0, %v1645_v46, %v1663_v33  ;;  %v1671_v26 = vrot.slane %v1669_v14, 4  ;;  %v1702_v43 = vshrl.u32 %v13733_v31, 16 }
 0x188   :  { %v1686_v41 = vrot.slane %v1684_v40, 3  ;;  %v1689_v8 = vrot.slane %v1687_v24, 4 }
 0x189   :  { %v1704_v57 = vrot.slane %v1702_v43, 3 }
 0x18a   :  { %1376 = vmatmul.mubr.bf16.gmra.mxu0 %v1099_v15  ;;  %v1065_v15 = vld [vmem:[#allocation2 + $0xd8] sm:$0xff] }
 0x18b   :  { %2006 = vmatmul.mubr.bf16.gmra.mxu1 %v1565_v42  ;;  %1385 = vmatprep.mubr.bf16.mxu0 %v1102_v30  ;;  %v1636_v42 = vor.u32 %v1635_v34, %v1632_v37  ;;  %v1073_v37 = vld [vmem:[#allocation2 + $0x1c8] sm:$0xff]  ;;  %v1075_v34 = vld [vmem:[#allocation2 + $0x38] sm:$0xff] }
 0x18c   :  { %2015 = vmatprep.mubr.bf16.mxu1 %v1592_v22  ;;  %v1651_v22 = vshll.u32 %v10661_v4, 16  ;;  %v1067_v4 = vld [vmem:[#allocation2 + $0xa0] sm:$0xff]  ;;  %v1111_v33 = vpack.c.bf16 %v1075_v34, %v1073_v37  ;;  %v1091_v37 = vld [vmem:[#allocation2 + $0xf8] sm:$0xff] }
 0x18d   :  { %v1637_v18 = vsel %vm1486_vm0, %v1618_v16, %v1636_v42  ;;  %v1107_v25 = vpack.c.bf16 %v1067_v4, %v1065_v15  ;;  %v13732_v16 = vld [vmem:[#allocation47_spill] sm:$0xff]  ;;  %v1084_v15 = vld [vmem:[#allocation2 + $0x80] sm:$0xff]  ;;  %v13735_v4 = vld [vmem:[#allocation48_spill] sm:$0xff] }
 0x18e   :  { %v1653_v38 = vrot.slane %v1651_v22, 4  ;;  %v1711_v53 = vshrl.u32 %v13732_v16, 16  ;;  %v1714_v19 = vshll.u32 %v13732_v16, 16  ;;  %v1732_v22 = vshll.u32 %v13734_v50, 16 }
 0x18f   :  { %v1116_v49 = vpack.c.bf16 %v1084_v15, %v1082_v21 }
 0x190   :  { %v1654_v30 = vor.u32 %v1653_v38, %v1650_v62  ;;  %v1734_v62 = vrot.slane %v1732_v22, 4  ;;  %v1077_v38 = vld [vmem:[#allocation2 + $0x1f8] sm:$0xff] }
 0x192   :  { %1386 = vmatmul.mubr.bf16.gmra.mxu0 %v1101_v63  ;;  %v1655_v27 = vsel %vm1486_vm0, %v1636_v42, %v1654_v30  ;;  %v1698_v63 = vrot.slane %v1696_v59, 4  ;;  %v1705_v42 = vshll.u32 %v13733_v31, 16 }
 0x193   :  { %2016 = vmatmul.mubr.bf16.gmra.mxu1 %v1583_v51  ;;  %1395 = vmatprep.mubr.bf16.mxu0 %v1104_v6  ;;  %v1070_v51 = vld [vmem:[#allocation2 + $0x210] sm:$0xff]  ;;  %v1069_v6 = vld [vmem:[#allocation2 + $0x178] sm:$0xff] }
 0x194   :  { %2025 = vmatprep.mubr.bf16.mxu1 %v1610_v11  ;;  %v1666_v11 = vshrl.u32 %v13729_v45, 16  ;;  %v1110_v39 = vpack.c.bf16 %v1072_v36, %v1070_v51  ;;  %v1699_v44 = vor.u32 %v1698_v63, %v1695_v9  ;;  %v1723_v51 = vshll.u32 %v13735_v4, 16  ;;  %v13736_v45 = vld [vmem:[#allocation38_spill] sm:$0xff]  ;;  %v1086_v63 = vld [vmem:[#allocation2 + $0x1b8] sm:$0xff] }
 0x195   :  { %v1750_v14 = vshll.u32 %v13736_v45, 16 }
 0x196   :  { %v1668_v52 = vrot.slane %v1666_v11, 3  ;;  %v1747_v11 = vshrl.u32 %v13736_v45, 16 }
 0x198   :  { %v1672_v12 = vor.u32 %v1671_v26, %v1668_v52  ;;  %v1752_v52 = vrot.slane %v1750_v14, 4  ;;  %v1081_v26 = vld [vmem:[#allocation2 + $0x50] sm:$0xff] }
 0x19a   :  { %1396 = vmatmul.mubr.bf16.gmra.mxu0 %v1103_v61  ;;  %v1673_v46 = vsel %vm1486_vm0, %v1654_v30, %v1672_v12  ;;  %v1700_v61 = vsel %vm1486_vm0, %v1681_v32, %v1699_v44  ;;  %v1720_v30 = vshrl.u32 %v13735_v4, 16 }
 0x19b   :  { %2026 = vmatmul.mubr.bf16.gmra.mxu1 %v1601_v1  ;;  %1405 = vmatprep.mubr.bf16.mxu0 %v1106_v55  ;;  %v1071_v1 = vld [vmem:[#allocation2 + $0x108] sm:$0xff]  ;;  %v1713_v55 = vrot.slane %v1711_v53, 3 }
 0x19c   :  { %2035 = vmatprep.mubr.bf16.mxu1 %v1628_v60  ;;  %v1076_v60 = vld [vmem:[#allocation2 + $0x1f0] sm:$0xff]  ;;  %v1109_v29 = vpack.c.bf16 %v1071_v1, %v1069_v6  ;;  %v1722_v59 = vrot.slane %v1720_v30, 3  ;;  %v1088_v6 = vld [vmem:[#allocation2 + $0x88] sm:$0xff] }
 0x19d   :  { %v1112_v0 = vpack.c.bf16 %v1076_v60, %v1074_v47  ;;  %v13737_v1 = vld [vmem:[#allocation36_spill] sm:$0xff]  ;;  %v1118_v40 = vpack.c.bf16 %v1088_v6, %v1086_v63 }
 0x19e   :  { %v1741_v47 = vshll.u32 %v13737_v1, 16 }
 0x1a0   :  { %v1743_v16 = vrot.slane %v1741_v47, 4 }
 0x1a2   :  { %1406 = vmatmul.mubr.bf16.gmra.mxu0 %v1105_v10  ;;  %v1707_v10 = vrot.slane %v1705_v42, 4 }
 0x1a3   :  { %2036 = vmatmul.mubr.bf16.gmra.mxu1 %v1619_v17  ;;  %1415 = vmatprep.mubr.bf16.mxu0 %v1108_v3  ;;  %v1716_v17 = vrot.slane %v1714_v19, 4  ;;  %v1085_v19 = vld [vmem:[#allocation2 + $0x20] sm:$0xff] }
 0x1a4   :  { %2045 = vmatprep.mubr.bf16.mxu1 %v1646_v13  ;;  %v1690_v13 = vor.u32 %v1689_v8, %v1686_v41  ;;  %v1708_v28 = vor.u32 %v1707_v10, %v1704_v57  ;;  %v1092_v41 = vld [vmem:[#allocation2 + $0x60] sm:$0xff] }
 0x1a5   :  { %v1717_v5 = vor.u32 %v1716_v17, %v1713_v55  ;;  %v1089_v17 = vld [vmem:[#allocation2 + $0x1e0] sm:$0xff] }
 0x1a6   :  { %v1691_v20 = vsel %vm1486_vm0, %v1672_v12, %v1690_v13  ;;  %v1709_v54 = vsel %vm1486_vm0, %v1690_v13, %v1708_v28  ;;  %v1738_v12 = vshrl.u32 %v13737_v1, 16  ;;  %v1119_v34 = vpack.c.bf16 %v1091_v37, %v1089_v17 }
 0x1a7   :  { %v1718_v3 = vsel %vm1486_vm0, %v1699_v44, %v1717_v5 }
 0x1a8   :  { %v1740_v44 = vrot.slane %v1738_v12, 3 }
 0x1aa   :  { %1416 = vmatmul.mubr.bf16.gmra.mxu0 %v1107_v25  ;;  %v1725_v25 = vrot.slane %v1723_v51, 4 }
 0x1ab   :  { %2046 = vmatmul.mubr.bf16.gmra.mxu1 %v1637_v18  ;;  %1425 = vmatprep.mubr.bf16.mxu0 %v1110_v39  ;;  %v1731_v18 = vrot.slane %v1729_v7, 3 }
 0x1ac   :  { %2055 = vmatprep.mubr.bf16.mxu1 %v1664_v35  ;;  %v1079_v35 = vld [vmem:[#allocation2 + $0x110] sm:$0xff]  ;;  %v1726_v9 = vor.u32 %v1725_v25, %v1722_v59 }
 0x1ad   :  { %v1735_v36 = vor.u32 %v1734_v62, %v1731_v18  ;;  %v1113_v32 = vpack.c.bf16 %v1079_v35, %v1077_v38 }
 0x1ae   :  { %v1727_v24 = vsel %vm1486_vm0, %v1708_v28, %v1726_v9 }
 0x1af   :  { %v1736_v39 = vsel %vm1486_vm0, %v1717_v5, %v1735_v36 }
 0x1b2   :  { %1426 = vmatmul.mubr.bf16.gmra.mxu0 %v1109_v29  ;;  %v1087_v29 = vld [vmem:[#allocation2 + $0x18] sm:$0xff] }
 0x1b3   :  { %2056 = vmatmul.mubr.bf16.gmra.mxu1 %v1655_v27  ;;  %1435 = vmatprep.mubr.bf16.mxu0 %v1112_v0  ;;  %v1749_v27 = vrot.slane %v1747_v11, 3  ;;  %v1744_v0 = vor.u32 %v1743_v16, %v1740_v44  ;;  %v1117_v8 = vpack.c.bf16 %v1087_v29, %v1085_v19 }
 0x1b4   :  { %2065 = vmatprep.mubr.bf16.mxu1 %v1682_v23  ;;  %v1083_v23 = vld [vmem:[#allocation2 + $0x128] sm:$0xff] }
 0x1b5   :  { %v1753_v60 = vor.u32 %v1752_v52, %v1749_v27  ;;  %v1115_v48 = vpack.c.bf16 %v1083_v23, %v1081_v26  ;;  %v1745_v55 = vsel %vm1486_vm0, %v1726_v9, %v1744_v0 }
 0x1b7   :  { %v1754_v53 = vsel %vm1486_vm0, %v1735_v36, %v1753_v60 }
 0x1ba   :  { %1436 = vmatmul.mubr.bf16.gmra.mxu0 %v1111_v33 }
 0x1bb   :  { %2066 = vmatmul.mubr.bf16.gmra.mxu1 %v1673_v46  ;;  %1445 = vmatprep.mubr.bf16.mxu0 %v1114_v2  ;;  %v1090_v46 = vld [vmem:[#allocation2 + $0x140] sm:$0xff] }
 0x1bc   :  { %2075 = vmatprep.mubr.bf16.mxu1 %v1700_v61  ;;  %v1120_v61 = vpack.c.bf16 %v1092_v41, %v1090_v46 }
 0x1c2   :  { %1446 = vmatmul.mubr.bf16.gmra.mxu0 %v1113_v32 }
 0x1c3   :  { %2076 = vmatmul.mubr.bf16.gmra.mxu1 %v1691_v20  ;;  %1455 = vmatprep.mubr.bf16.mxu0 %v1116_v49 }
 0x1c4   :  { %2085 = vmatprep.mubr.bf16.mxu1 %v1718_v3 }
 0x1ca   :  { %1456 = vmatmul.mubr.bf16.gmra.mxu0 %v1115_v48 }
 0x1cb   :  { %2086 = vmatmul.mubr.bf16.gmra.mxu1 %v1709_v54  ;;  %1465 = vmatprep.mubr.bf16.mxu0 %v1118_v40 }
 0x1cc   :  { %2095 = vmatprep.mubr.bf16.mxu1 %v1736_v39 }
 0x1d2   :  { %1466 = vmatmul.mubr.bf16.gmra.mxu0 %v1117_v8 }
 0x1d3   :  { %2096 = vmatmul.mubr.bf16.gmra.mxu1 %v1727_v24  ;;  %1475 = vmatprep.mubr.bf16.mxu0 %v1120_v61 }
 0x1d4   :  { %2105 = vmatprep.mubr.bf16.mxu1 %v1754_v53 }
 0x1da   :  { %1476 = vmatmul.mubr.bf16.gmra.mxu0 %v1119_v34 }
 0x1db   :  { %2106 = vmatmul.mubr.bf16.gmra.mxu1 %v1745_v55 }
 0x232   :  { %v1347_v43 = vpop.f32.mrf.mxu0 }
 0x233   :  { %v1977_v13 = vpop.f32.mrf.mxu1 }
 0x234   :  { %v10873_v42 = vadd.f32 %v1977_v13, %v1347_v43  ;;  %v1349_v50 = vpop.f32.mrf.mxu0 }
 0x235   :  { %v1979_v56 = vpop.f32.mrf.mxu1 }
 0x236   :  { %v10875_v7 = vadd.f32 %v1979_v56, %v1349_v50  ;;  %v1351_v33 = vpop.f32.mrf.mxu0 }
 0x237   :  { %v1981_v58 = vpop.f32.mrf.mxu1 }
 0x238   :  { %v10877_v2 = vadd.f32 %v1981_v58, %v1351_v33  ;;  %v1353_v57 = vpop.f32.mrf.mxu0 }
 0x239   :  { %v1983_v31 = vpop.f32.mrf.mxu1 }
 0x23a   :  { %v10879_v10 = vadd.f32 %v1983_v31, %v1353_v57  ;;  %v1357_v18 = vpop.f32.mrf.mxu0 }
 0x23b   :  { %v1987_v5 = vpop.f32.mrf.mxu1 }
 0x23c   :  { %v10881_v62 = vadd.f32 %v1987_v5, %v1357_v18  ;;  %v1359_v35 = vpop.f32.mrf.mxu0 }
 0x23d   :  { %v1989_v22 = vpop.f32.mrf.mxu1 }
 0x23e   :  { %v10883_v28 = vadd.f32 %v1989_v22, %v1359_v35  ;;  %v1361_v15 = vpop.f32.mrf.mxu0 }
 0x23f   :  { %v1991_v20 = vpop.f32.mrf.mxu1 }
 0x240   :  { %v10885_v4 = vadd.f32 %v1991_v20, %v1361_v15  ;;  %v1363_v51 = vpop.f32.mrf.mxu0 }
 0x241   :  { %v1993_v3 = vpop.f32.mrf.mxu1 }
 0x242   :  { %v10887_v36 = vadd.f32 %v1993_v3, %v1363_v51  ;;  %v1367_v11 = vpop.f32.mrf.mxu0 }
 0x243   :  { %v1997_v38 = vpop.f32.mrf.mxu1 }
 0x244   :  { %v10889_v14 = vadd.f32 %v1997_v38, %v1367_v11  ;;  %v1369_v49 = vpop.f32.mrf.mxu0 }
 0x245   :  { %v1999_v21 = vpop.f32.mrf.mxu1 }
 0x246   :  { %v10891_v54 = vadd.f32 %v1999_v21, %v1369_v49  ;;  %v1371_v25 = vpop.f32.mrf.mxu0 }
 0x247   :  { %v2001_v30 = vpop.f32.mrf.mxu1 }
 0x248   :  { %v10893_v39 = vadd.f32 %v2001_v30, %v1371_v25  ;;  %v1373_v52 = vpop.f32.mrf.mxu0 }
 0x249   :  { %v2003_v45 = vpop.f32.mrf.mxu1 }
 0x24a   :  { %v10895_v26 = vadd.f32 %v2003_v45, %v1373_v52  ;;  %v1377_v9 = vpop.f32.mrf.mxu0 }
 0x24b   :  { %v2007_v32 = vpop.f32.mrf.mxu1 }
 0x24c   :  { %v10897_v63 = vadd.f32 %v2007_v32, %v1377_v9  ;;  %v1379_v1 = vpop.f32.mrf.mxu0 }
 0x24d   :  { %v2009_v59 = vpop.f32.mrf.mxu1 }
 0x24e   :  { %v10899_v12 = vadd.f32 %v2009_v59, %v1379_v1  ;;  %v1381_v60 = vpop.f32.mrf.mxu0 }
 0x24f   :  { %v2011_v27 = vpop.f32.mrf.mxu1 }
 0x250   :  { %v10901_v48 = vadd.f32 %v2011_v27, %v1381_v60  ;;  %v1383_v24 = vpop.f32.mrf.mxu0 }
 0x251   :  { %v2013_v23 = vpop.f32.mrf.mxu1 }
 0x252   :  { %v10903_v44 = vadd.f32 %v2013_v23, %v1383_v24  ;;  %v1387_v53 = vpop.f32.mrf.mxu0 }
 0x253   :  { %v2017_v6 = vpop.f32.mrf.mxu1 }
 0x254   :  { %v10905_v19 = vadd.f32 %v2017_v6, %v1387_v53  ;;  %v1389_v0 = vpop.f32.mrf.mxu0 }
 0x255   :  { %v2019_v47 = vpop.f32.mrf.mxu1 }
 0x256   :  { %v10907_v46 = vadd.f32 %v2019_v47, %v1389_v0  ;;  %v1391_v8 = vpop.f32.mrf.mxu0 }
 0x257   :  { %v2021_v40 = vpop.f32.mrf.mxu1 }
 0x258   :  { %v10909_v61 = vadd.f32 %v2021_v40, %v1391_v8  ;;  %v1393_v17 = vpop.f32.mrf.mxu0 }
 0x259   :  { %v2023_v16 = vpop.f32.mrf.mxu1 }
 0x25a   :  { %v10911_v37 = vadd.f32 %v2023_v16, %v1393_v17  ;;  %v1397_v13 = vpop.f32.mrf.mxu0 }
 0x25b   :  { %v2027_v29 = vpop.f32.mrf.mxu1 }
 0x25c   :  { %v10913_v56 = vadd.f32 %v2027_v29, %v1397_v13  ;;  %v1399_v31 = vpop.f32.mrf.mxu0 }
 0x25d   :  { %v2029_v41 = vpop.f32.mrf.mxu1 }
 0x25e   :  { %v10915_v43 = vadd.f32 %v2029_v41, %v1399_v31  ;;  %v1401_v50 = vpop.f32.mrf.mxu0 }
 0x25f   :  { %v2031_v55 = vpop.f32.mrf.mxu1 }
 0x260   :  { %v10917_v22 = vadd.f32 %v2031_v55, %v1401_v50  ;;  %v1403_v20 = vpop.f32.mrf.mxu0 }
 0x261   :  { %v2033_v34 = vpop.f32.mrf.mxu1 }
 0x262   :  { %v10919_v57 = vadd.f32 %v2033_v34, %v1403_v20  ;;  %v1407_v18 = vpop.f32.mrf.mxu0 }
 0x263   :  { %v2037_v58 = vpop.f32.mrf.mxu1 }
 0x264   :  { %v10921_v38 = vadd.f32 %v2037_v58, %v1407_v18  ;;  %v1409_v21 = vpop.f32.mrf.mxu0 }
 0x265   :  { %v2039_v5 = vpop.f32.mrf.mxu1 }
 0x266   :  { %v10923_v15 = vadd.f32 %v2039_v5, %v1409_v21  ;;  %v1411_v51 = vpop.f32.mrf.mxu0 }
 0x267   :  { %v2041_v33 = vpop.f32.mrf.mxu1 }
 0x268   :  { %v10925_v45 = vadd.f32 %v2041_v33, %v1411_v51  ;;  %v1413_v32 = vpop.f32.mrf.mxu0 }
 0x269   :  { %v2043_v3 = vpop.f32.mrf.mxu1 }
 0x26a   :  { %v10927_v49 = vadd.f32 %v2043_v3, %v1413_v32  ;;  %v1417_v25 = vpop.f32.mrf.mxu0 }
 0x26b   :  { %v2047_v35 = vpop.f32.mrf.mxu1 }
 0x26c   :  { %v10929_v27 = vadd.f32 %v2047_v35, %v1417_v25  ;;  %v1419_v23 = vpop.f32.mrf.mxu0 }
 0x26d   :  { %v2049_v30 = vpop.f32.mrf.mxu1 }
 0x26e   :  { %v10931_v9 = vadd.f32 %v2049_v30, %v1419_v23  ;;  %v1421_v1 = vpop.f32.mrf.mxu0 }
 0x26f   :  { %v2051_v11 = vpop.f32.mrf.mxu1 }
 0x270   :  { %v10933_v47 = vadd.f32 %v2051_v11, %v1421_v1  ;;  %v1423_v40 = vpop.f32.mrf.mxu0 }
 0x271   :  { %v2053_v59 = vpop.f32.mrf.mxu1 }
 0x272   :  { %v10935_v24 = vadd.f32 %v2053_v59, %v1423_v40  ;;  %v1427_v53 = vpop.f32.mrf.mxu0 }
 0x273   :  { %v2057_v52 = vpop.f32.mrf.mxu1 }
 0x274   :  { %v10937_v29 = vadd.f32 %v2057_v52, %v1427_v53  ;;  %v1429_v41 = vpop.f32.mrf.mxu0 }
 0x275   :  { %v2059_v6 = vpop.f32.mrf.mxu1 }
 0x276   :  { %v10939_v8 = vadd.f32 %v2059_v6, %v1429_v41  ;;  %v1431_v17 = vpop.f32.mrf.mxu0 }
 0x277   :  { %v2061_v60 = vpop.f32.mrf.mxu1 }
 0x278   :  { %v10941_v34 = vadd.f32 %v2061_v60, %v1431_v17  ;;  %v1433_v58 = vpop.f32.mrf.mxu0 }
 0x279   :  { %v2063_v16 = vpop.f32.mrf.mxu1 }
 0x27a   :  { %13738 = vst [vmem:[#allocation39_spill] sm:$0xff] %v10941_v34  ;;  %v10943_v31 = vadd.f32 %v2063_v16, %v1433_v58  ;;  %v1437_v50 = vpop.f32.mrf.mxu0 }
 0x27b   :  { %v2067_v0 = vpop.f32.mrf.mxu1 }
 0x27c   :  { %13739 = vst [vmem:[#allocation41_spill] sm:$0xff] %v10943_v31  ;;  %v10945_v33 = vadd.f32 %v2067_v0, %v1437_v50  ;;  %v1439_v3 = vpop.f32.mrf.mxu0 }
 0x27d   :  { %v2069_v55 = vpop.f32.mrf.mxu1 }
 0x27e   :  { %13740 = vst [vmem:[#allocation49_spill] sm:$0xff] %v10945_v33  ;;  %v10947_v18 = vadd.f32 %v2069_v55, %v1439_v3  ;;  %v1441_v21 = vpop.f32.mrf.mxu0 }
 0x27f   :  { %v2071_v13 = vpop.f32.mrf.mxu1 }
 0x280   :  { %13741 = vst [vmem:[#allocation65_spill] sm:$0xff] %v10947_v18  ;;  %v10949_v30 = vadd.f32 %v2071_v13, %v1441_v21  ;;  %v1443_v11 = vpop.f32.mrf.mxu0 }
 0x281   :  { %v2073_v5 = vpop.f32.mrf.mxu1 }
 0x282   :  { %13742 = vst [vmem:[#allocation70_spill] sm:$0xff] %v10949_v30  ;;  %v10951_v32 = vadd.f32 %v2073_v5, %v1443_v11  ;;  %v1447_v25 = vpop.f32.mrf.mxu0 }
 0x283   :  { %v2077_v20 = vpop.f32.mrf.mxu1 }
 0x284   :  { %13743 = vst [vmem:[#allocation71_spill] sm:$0xff] %v10951_v32  ;;  %v10953_v52 = vadd.f32 %v2077_v20, %v1447_v25  ;;  %v1449_v6 = vpop.f32.mrf.mxu0 }
 0x285   :  { %v2079_v35 = vpop.f32.mrf.mxu1 }
 0x286   :  { %13744 = vst [vmem:[#allocation75_spill] sm:$0xff] %v10953_v52  ;;  %v10955_v1 = vadd.f32 %v2079_v35, %v1449_v6  ;;  %v1451_v40 = vpop.f32.mrf.mxu0 }
 0x287   :  { %v2081_v51 = vpop.f32.mrf.mxu1 }
 0x288   :  { %13745 = vst [vmem:[#allocation76_spill] sm:$0xff] %v10955_v1  ;;  %v10957_v16 = vadd.f32 %v2081_v51, %v1451_v40  ;;  %v1453_v0 = vpop.f32.mrf.mxu0 }
 0x289   :  { %v2083_v59 = vpop.f32.mrf.mxu1 }
 0x28a   :  { %13746 = vst [vmem:[#allocation77_spill] sm:$0xff] %v10957_v16  ;;  %v10959_v41 = vadd.f32 %v2083_v59, %v1453_v0  ;;  %v1457_v17 = vpop.f32.mrf.mxu0 }
 0x28b   :  { %v2087_v23 = vpop.f32.mrf.mxu1 }
 0x28c   :  { %13747 = vst [vmem:[#allocation72_spill] sm:$0xff] %v10959_v41  ;;  %v10961_v13 = vadd.f32 %v2087_v23, %v1457_v17  ;;  %v1459_v5 = vpop.f32.mrf.mxu0 }
 0x28d   :  { %v2089_v60 = vpop.f32.mrf.mxu1 }
 0x28e   :  { %13748 = vst [vmem:[#allocation73_spill] sm:$0xff] %v10961_v13  ;;  %v10963_v50 = vadd.f32 %v2089_v60, %v1459_v5  ;;  %v1461_v3 = vpop.f32.mrf.mxu0 }
 0x28f   :  { %v2091_v53 = vpop.f32.mrf.mxu1 }
 0x290   :  { %13749 = vst [vmem:[#allocation68_spill] sm:$0xff] %v10963_v50  ;;  %v10965_v35 = vadd.f32 %v2091_v53, %v1461_v3  ;;  %v1463_v11 = vpop.f32.mrf.mxu0 }
 0x291   :  { %v2093_v55 = vpop.f32.mrf.mxu1 }
 0x292   :  { %13750 = vst [vmem:[#allocation90_spill] sm:$0xff] %v10965_v35  ;;  %v10967_v51 = vadd.f32 %v2093_v55, %v1463_v11  ;;  %v1467_v6 = vpop.f32.mrf.mxu0 }
 0x293   :  { %v2097_v58 = vpop.f32.mrf.mxu1 }
 0x294   :  { %13751 = vst [vmem:[#allocation43_spill] sm:$0xff] %v10967_v51  ;;  %v10969_v59 = vadd.f32 %v2097_v58, %v1467_v6  ;;  %v1469_v40 = vpop.f32.mrf.mxu0 }
 0x295   :  { %v2099_v20 = vpop.f32.mrf.mxu1 }
 0x296   :  { %13752 = vst [vmem:[#allocation45_spill] sm:$0xff] %v10969_v59  ;;  %v10971_v23 = vadd.f32 %v2099_v20, %v1469_v40  ;;  %v1471_v17 = vpop.f32.mrf.mxu0 }
 0x297   :  { %v2101_v21 = vpop.f32.mrf.mxu1 }
 0x298   :  { %13753 = vst [vmem:[#allocation54_spill] sm:$0xff] %v10971_v23  ;;  %v10973_v13 = vadd.f32 %v2101_v21, %v1471_v17  ;;  %v1473_v5 = vpop.f32.mrf.mxu0 }
 0x299   :  { %v2103_v25 = vpop.f32.mrf.mxu1 }
 0x29a   :  { %13754 = vst [vmem:[#allocation88_spill] sm:$0xff] %v10973_v13  ;;  %v10975_v50 = vadd.f32 %v2103_v25, %v1473_v5  ;;  %v1477_v53 = vpop.f32.mrf.mxu0 }
 0x29b   :  { %v2107_v0 = vpop.f32.mrf.mxu1 }
 0x29c   :  { %13755 = vst [vmem:[#allocation89_spill] sm:$0xff] %v10975_v50  ;;  %v10977_v3 = vadd.f32 %v2107_v0, %v1477_v53  ;;  %v1479_v11 = vpop.f32.mrf.mxu0 }
 0x29d   :  { %v2109_v60 = vpop.f32.mrf.mxu1 }
 0x29e   :  { %13756 = vst [vmem:[#allocation58_spill] sm:$0xff] %v10977_v3  ;;  %v10979_v51 = vadd.f32 %v2109_v60, %v1479_v11  ;;  %v1481_v58 = vpop.f32.mrf.mxu0 }
 0x29f   :  { %v2111_v55 = vpop.f32.mrf.mxu1 }
 0x2a0   :  { %13757 = vst [vmem:[#allocation62_spill] sm:$0xff] %v10979_v51  ;;  %v10981_v6 = vadd.f32 %v2111_v55, %v1481_v58  ;;  %v1483_v20 = vpop.f32.mrf.mxu0 }
 0x2a1   :  { %v2113_v59 = vpop.f32.mrf.mxu1 }
 0x2a2   :  { %13758 = vst [vmem:[#allocation74_spill] sm:$0xff] %v10981_v6  ;;  %v10983_v40 = vadd.f32 %v2113_v59, %v1483_v20 }
 0x2a4   :  { %13759 = vst [vmem:[#allocation91_spill] sm:$0xff] %v10983_v40 }
 0x2a5   :  { %9139 = dma.done.wait [#allocation4 + $0x2], 4096 }
 0x2a6   :  { %9140 = vsyncadd [#allocation4 + $0x2], 4294963200  ;;  %v8591_v21 = vld [vmem:[#allocation3 + $0x274] ss:$8 sps:$4 sm:$0xff]   ;;  %v8593_v17 = vld [vmem:[#allocation3 + $0x270] ss:$8 sps:$4 sm:$0xff]  }
 0x2a7   :  { %2659 = vmatprep.subr.bf16.mxu0 %v8591_v21  ;;  %v8594_v25 = vld [vmem:[#allocation3 + $0x264] ss:$8 sps:$4 sm:$0xff]   ;;  %v8596_v0 = vld [vmem:[#allocation3 + $0x260] ss:$8 sps:$4 sm:$0xff]   ;;  %v8597_v5 = vld [vmem:[#allocation3 + $0x254] ss:$8 sps:$4 sm:$0xff]  }
 0x2a8   :  { %2660 = vmatpush1.bf16.msra.mxu0 %v8593_v17  ;;  %v8599_v60 = vld [vmem:[#allocation3 + $0x250] ss:$8 sps:$4 sm:$0xff]   ;;  %v8600_v53 = vld [vmem:[#allocation3 + $0x244] ss:$8 sps:$4 sm:$0xff]   ;;  %v8602_v55 = vld [vmem:[#allocation3 + $0x240] ss:$8 sps:$4 sm:$0xff]  }
 0x2a9   :  { %2661 = vmatprep.subr.bf16.mxu0 %v8594_v25  ;;  %v8603_v11 = vld [vmem:[#allocation3 + $0x234] ss:$8 sps:$4 sm:$0xff]   ;;  %v8605_v59 = vld [vmem:[#allocation3 + $0x230] ss:$8 sps:$4 sm:$0xff]   ;;  %v8606_v58 = vld [vmem:[#allocation3 + $0x224] ss:$8 sps:$4 sm:$0xff]  }
 0x2aa   :  { %v8608_v20 = vld [vmem:[#allocation3 + $0x220] ss:$8 sps:$4 sm:$0xff]   ;;  %v8609_v21 = vld [vmem:[#allocation3 + $0x214] ss:$8 sps:$4 sm:$0xff]   ;;  %vm2238_vm1 = vsmask.f32 7424 }
 0x2ab   :  { %v2119_v17 = vld [vmem:[#allocation2 + $0x28] sm:$0xfe]  ;;  %v2121_v40 = vld [vmem:[#allocation2 + $0xc0] sm:$0xff]  ;;  %v2123_v25 = vld [vmem:[#allocation2 + $0x138] sm:$0xff] }
 0x2ac   :  { %2662 = vmatpush1.bf16.msra.mxu0 %v8596_v0  ;;  %v2125_v6 = vld [vmem:[#allocation2 + $0xf0] sm:$0xff]  ;;  %v2177_v0 = vpack.c.bf16 %v2121_v40, %v2119_v17  ;;  %v2126_v16 = vld [vmem:[#allocation2 + $0x1d8] sm:$0xff]  ;;  %v2128_v1 = vld [vmem:[#allocation2 + $0x160] sm:$0xff] }
 0x2ad   :  { %2663 = vmatprep.subr.bf16.mxu0 %v8597_v5  ;;  %v8611_v5 = vld [vmem:[#allocation3 + $0x210] ss:$8 sps:$4 sm:$0xff]   ;;  %v10985_v51 = vpack.c.bf16 %v2125_v6, %v2123_v25  ;;  %v8615_v50 = vld [vmem:[#allocation3 + $0x2f4] ss:$8 sps:$4 sm:$0xff]   ;;  %v8618_v6 = vld [vmem:[#allocation3 + $0x2e4] ss:$8 sps:$4 sm:$0xff]   ;;  %v2180_v32 = vpack.c.bf16 %v2128_v1, %v2126_v16 }
 0x2ae   :  { %v8621_v17 = vld [vmem:[#allocation3 + $0x2d4] ss:$8 sps:$4 sm:$0xff]   ;;  %v8623_v25 = vld [vmem:[#allocation3 + $0x2d0] ss:$8 sps:$4 sm:$0xff]   ;;  %v2131_v52 = vld [vmem:[#allocation2 + $0x1a0] sm:$0xff] }
 0x2af   :  { %v2130_v33 = vld [vmem:[#allocation2 + $0x120] sm:$0xff]  ;;  %v2132_v31 = vld [vmem:[#allocation2 + $0xb0] sm:$0xff]  ;;  %v2137_v34 = vld [vmem:[#allocation2 + $0xa8] sm:$0xff] }
 0x2b0   :  { %2664 = vmatpush1.bf16.msra.mxu0 %v8599_v60  ;;  %v8612_v60 = vld [vmem:[#allocation3 + $0x204] ss:$8 sps:$4 sm:$0xff]  }
 0x2b1   :  { %2665 = vmatprep.subr.bf16.mxu0 %v8600_v53  ;;  %v2252_v53 = vshrl.u32 %v2177_v0, 16 }
 0x2b4   :  { %2666 = vmatpush1.bf16.msra.mxu0 %v8602_v55  ;;  %v2254_v55 = vshll.u32 %v2177_v0, 16  ;;  %v8624_v0 = vld [vmem:[#allocation3 + $0x2c4] ss:$8 sps:$4 sm:$0xff]  }
 0x2b5   :  { %2667 = vmatprep.subr.bf16.mxu0 %v8603_v11  ;;  %v2259_v11 = vshll.u32 %v10985_v51, 16 }
 0x2b6   :  { %v2256_v3 = vrot.slane %v2254_v55, 1 }
 0x2b8   :  { %2668 = vmatpush1.bf16.msra.mxu0 %v8605_v59  ;;  %v8614_v59 = vld [vmem:[#allocation3 + $0x200] ss:$8 sps:$4 sm:$0xff]   ;;  %v2257_v13 = vor.u32 %v2256_v3, %v2252_v53  ;;  %v2120_v53 = vld [vmem:[#allocation2 + $0x130] sm:$0xff] }
 0x2b9   :  { %2669 = vmatprep.subr.bf16.mxu0 %v8606_v58  ;;  %v2261_v58 = vrot.slane %v2259_v11, 1  ;;  %v2118_v3 = vld [vmem:[#allocation2 + $0x200] sm:$0xfe]  ;;  %v2122_v11 = vld [vmem:[#allocation2 + $0x90] sm:$0xff] }
 0x2ba   :  { %v2176_v55 = vpack.c.bf16 %v2120_v53, %v2118_v3  ;;  %v8636_v3 = vld [vmem:[#allocation3 + $0x284] ss:$8 sps:$4 sm:$0xff]  }
 0x2bb   :  { %v2262_v40 = vsel %vm2238_vm1, %v2257_v13, %v2261_v58  ;;  %v8629_v13 = vld [vmem:[#allocation3 + $0x2b0] ss:$8 sps:$4 sm:$0xff]  }
 0x2bc   :  { %2670 = vmatpush1.bf16.msra.mxu0 %v8608_v20  ;;  %v8617_v20 = vld [vmem:[#allocation3 + $0x2f0] ss:$8 sps:$4 sm:$0xff]   ;;  %2691 = vmatprep.mubr.bf16.mxu0 %v2262_v40  ;;  %v2127_v40 = vld [vmem:[#allocation2] sm:$0xff]  ;;  %v2240_v35 = vshrl.u32 %v2176_v55, 16 }
 0x2bd   :  { %2671 = vmatprep.subr.bf16.mxu0 %v8609_v21  ;;  %v8620_v21 = vld [vmem:[#allocation3 + $0x2e0] ss:$8 sps:$4 sm:$0xff]  }
 0x2c0   :  { %2672 = vmatpush1.bf16.msra.mxu0 %v8611_v5  ;;  %v8626_v5 = vld [vmem:[#allocation3 + $0x2c0] ss:$8 sps:$4 sm:$0xff]  }
 0x2c1   :  { %2673 = vmatprep.subr.bf16.mxu0 %v8612_v60  ;;  %v8627_v60 = vld [vmem:[#allocation3 + $0x2b4] ss:$8 sps:$4 sm:$0xff]  }
 0x2c4   :  { %2674 = vmatpush1.bf16.msra.mxu0 %v8614_v59  ;;  %v2124_v59 = vld [vmem:[#allocation2 + $0xe8] sm:$0xff] }
 0x2c5   :  { %2675 = vmatprep.subr.bf16.mxu0 %v8615_v50  ;;  %v8630_v50 = vld [vmem:[#allocation3 + $0x2a4] ss:$8 sps:$4 sm:$0xff]  }
 0x2c8   :  { %2676 = vmatpush2.bf16.msra.mxu0 %v8617_v20  ;;  %v2129_v20 = vld [vmem:[#allocation2 + $0x170] sm:$0xff] }
 0x2c9   :  { %2677 = vmatprep.subr.bf16.mxu0 %v8618_v6  ;;  %v8632_v6 = vld [vmem:[#allocation3 + $0x2a0] ss:$8 sps:$4 sm:$0xff]   ;;  %v2181_v23 = vpack.c.bf16 %v2129_v20, %v2127_v40 }
 0x2cb   :  { %v2275_v53 = vshll.u32 %v2181_v23, 16  ;;  %v2287_v30 = vshrl.u32 %v2181_v23, 16 }
 0x2cc   :  { %2678 = vmatpush2.bf16.msra.mxu0 %v8620_v21  ;;  %v2178_v21 = vpack.c.bf16 %v2124_v59, %v2122_v11  ;;  %v8638_v11 = vld [vmem:[#allocation3 + $0x280] ss:$8 sps:$4 sm:$0xff]  }
 0x2cd   :  { %2679 = vmatprep.subr.bf16.mxu0 %v8621_v17  ;;  %v2242_v17 = vshll.u32 %v2176_v55, 16  ;;  %v2277_v20 = vrot.slane %v2275_v53, 1 }
 0x2cf   :  { %v2244_v41 = vrot.slane %v2242_v17, 1  ;;  %v2263_v17 = vshrl.u32 %v2178_v21, 16 }
 0x2d0   :  { %2680 = vmatpush2.bf16.msra.mxu0 %v8623_v25  ;;  %v8633_v25 = vld [vmem:[#allocation3 + $0x294] ss:$8 sps:$4 sm:$0xff]  }
 0x2d1   :  { %2681 = vmatprep.subr.bf16.mxu0 %v8624_v0  ;;  %v8635_v0 = vld [vmem:[#allocation3 + $0x290] ss:$8 sps:$4 sm:$0xff]   ;;  %v2245_v59 = vor.u32 %v2244_v41, %v2240_v35  ;;  %v2182_v41 = vpack.c.bf16 %v2132_v31, %v2130_v33  ;;  %v2289_v35 = vor.u32 %v2287_v30, %v2277_v20 }
 0x2d4   :  { %2682 = vmatpush2.bf16.msra.mxu0 %v8626_v5  ;;  %v2247_v5 = vshll.u32 %v2178_v21, 16  ;;  %v2279_v21 = vshrl.u32 %v2180_v32, 16 }
 0x2d5   :  { %2683 = vmatprep.subr.bf16.mxu0 %v8627_v60  ;;  %v2271_v60 = vshrl.u32 %v10985_v51, 16 }
 0x2d7   :  { %v2273_v40 = vor.u32 %v2271_v60, %v2261_v58 }
 0x2d8   :  { %2684 = vmatpush2.bf16.msra.mxu0 %v8629_v13  ;;  %v2133_v13 = vld [vmem:[#allocation2 + $0x118] sm:$0xff] }
 0x2d9   :  { %2685 = vmatprep.subr.bf16.mxu0 %v8630_v50  ;;  %v2249_v50 = vrot.slane %v2247_v5, 1  ;;  %v2183_v55 = vpack.c.bf16 %v2133_v13, %v2131_v52  ;;  %v2278_v51 = vsel %vm2238_vm1, %v2273_v40, %v2277_v20  ;;  %v2134_v13 = vld [vmem:[#allocation2 + $0x40] sm:$0xff] }
 0x2da   :  { %v2141_v40 = vld [vmem:[#allocation2 + $0x1c0] sm:$0xff] }
 0x2db   :  { %v2291_v18 = vshll.u32 %v2183_v55, 16  ;;  %v2265_v1 = vor.u32 %v2263_v17, %v2249_v50  ;;  %v2303_v23 = vshrl.u32 %v2183_v55, 16 }
 0x2dc   :  { %2686 = vmatpush2.bf16.msra.mxu0 %v8632_v6  ;;  %v2250_v6 = vsel %vm2238_vm1, %v2245_v59, %v2249_v50  ;;  %v2139_v59 = vld [vmem:[#allocation2 + $0x208] sm:$0xff] }
 0x2dd   :  { %2687 = vmatprep.subr.bf16.mxu0 %v8633_v25  ;;  %v2267_v25 = vshll.u32 %v2180_v32, 16  ;;  %v2293_v52 = vrot.slane %v2291_v18, 1  ;;  %v2295_v32 = vshrl.u32 %v2182_v41, 16 }
 0x2df   :  { %v2269_v16 = vrot.slane %v2267_v25, 1  ;;  %v2294_v60 = vsel %vm2238_vm1, %v2289_v35, %v2293_v52  ;;  %v2305_v33 = vor.u32 %v2303_v23, %v2293_v52  ;;  %v2145_v35 = vld [vmem:[#allocation2 + $0x190] sm:$0xff] }
 0x2e0   :  { %2688 = vmatpush2.bf16.msra.mxu0 %v8635_v0  ;;  %v2135_v0 = vld [vmem:[#allocation2 + $0x198] sm:$0xff] }
 0x2e1   :  { %2689 = vmatprep.subr.bf16.mxu0 %v8636_v3  ;;  %v2185_v58 = vpack.c.bf16 %v2137_v34, %v2135_v0  ;;  %v2270_v5 = vsel %vm2238_vm1, %v2265_v1, %v2269_v16  ;;  %v2283_v3 = vshll.u32 %v2182_v41, 16  ;;  %v2281_v50 = vor.u32 %v2279_v21, %v2269_v16  ;;  %v2140_v0 = vld [vmem:[#allocation2 + $0x188] sm:$0xff]  ;;  %v2143_v1 = vld [vmem:[#allocation2 + $0x158] sm:$0xff] }
 0x2e2   :  { %v2187_v34 = vpack.c.bf16 %v2141_v40, %v2139_v59  ;;  %v2142_v59 = vld [vmem:[#allocation2 + $0x78] sm:$0xff] }
 0x2e3   :  { %v2307_v53 = vshll.u32 %v2185_v58, 16  ;;  %v2319_v55 = vshrl.u32 %v2185_v58, 16  ;;  %v2144_v40 = vld [vmem:[#allocation2 + $0x218] sm:$0xff] }
 0x2e4   :  { %2690 = vmatpush2.bf16.msra.mxu0 %v8638_v11  ;;  %v2136_v11 = vld [vmem:[#allocation2 + $0x68] sm:$0xff]  ;;  %v2323_v25 = vshll.u32 %v2187_v34, 16  ;;  %v2335_v58 = vshrl.u32 %v2187_v34, 16 }
 0x2e5   :  { %v2184_v31 = vpack.c.bf16 %v2136_v11, %v2134_v13  ;;  %v2309_v18 = vrot.slane %v2307_v53, 1 }
 0x2e7   :  { %2692 = vmatmul.mubr.bf16.vlgmr.msra.gmra.mxu0 %v2250_v6  ;;  %v2285_v6 = vrot.slane %v2283_v3, 1  ;;  %v2299_v20 = vshll.u32 %v2184_v31, 16  ;;  %v2310_v17 = vsel %vm2238_vm1, %v2305_v33, %v2309_v18  ;;  %v2321_v52 = vor.u32 %v2319_v55, %v2309_v18  ;;  %v2149_v33 = vld [vmem:[#allocation2 + $0x58] sm:$0xff] }
 0x2e8   :  { %2701 = vmatprep.mubr.bf16.mxu0 %v2278_v51  ;;  %v2138_v51 = vld [vmem:[#allocation2 + $0x168] sm:$0xff]  ;;  %v2325_v3 = vrot.slane %v2323_v25, 1  ;;  %v2311_v41 = vshrl.u32 %v2184_v31, 16 }
 0x2e9   :  { %v2286_v30 = vsel %vm2238_vm1, %v2281_v50, %v2285_v6  ;;  %v2297_v16 = vor.u32 %v2295_v32, %v2285_v6  ;;  %v2186_v21 = vpack.c.bf16 %v2140_v0, %v2138_v51  ;;  %v2147_v50 = vld [vmem:[#allocation2 + $0x70] sm:$0xff]  ;;  %v2188_v32 = vpack.c.bf16 %v2144_v40, %v2142_v59 }
 0x2ea   :  { %v2326_v13 = vsel %vm2238_vm1, %v2321_v52, %v2325_v3  ;;  %v2337_v18 = vor.u32 %v2335_v58, %v2325_v3  ;;  %v2153_v52 = vld [vmem:[#allocation2 + $0x1a8] sm:$0xff] }
 0x2eb   :  { %v2315_v53 = vshll.u32 %v2186_v21, 16  ;;  %v2327_v31 = vshrl.u32 %v2186_v21, 16  ;;  %v2331_v25 = vshll.u32 %v2188_v32, 16  ;;  %v2343_v21 = vshrl.u32 %v2188_v32, 16 }
 0x2ef   :  { %2702 = vmatmul.mubr.bf16.gmra.mxu0 %v2270_v5  ;;  %v2301_v5 = vrot.slane %v2299_v20, 1 }
 0x2f0   :  { %2711 = vmatprep.mubr.bf16.mxu0 %v2294_v60  ;;  %v2189_v60 = vpack.c.bf16 %v2145_v35, %v2143_v1  ;;  %v2146_v1 = vld [vmem:[#allocation2 + $0xd8] sm:$0xff]  ;;  %v2148_v35 = vld [vmem:[#allocation2 + $0xa0] sm:$0xff] }
 0x2f1   :  { %v2302_v23 = vsel %vm2238_vm1, %v2297_v16, %v2301_v5  ;;  %v2313_v6 = vor.u32 %v2311_v41, %v2301_v5  ;;  %v2151_v16 = vld [vmem:[#allocation2 + $0x210] sm:$0xff]  ;;  %v2190_v41 = vpack.c.bf16 %v2148_v35, %v2146_v1 }
 0x2f2   :  { %v2339_v11 = vshll.u32 %v2189_v60, 16  ;;  %v2351_v34 = vshrl.u32 %v2189_v60, 16 }
 0x2f3   :  { %v2359_v32 = vshrl.u32 %v2190_v41, 16 }
 0x2f4   :  { %v2341_v20 = vrot.slane %v2339_v11, 1  ;;  %v2347_v11 = vshll.u32 %v2190_v41, 16 }
 0x2f6   :  { %v2342_v51 = vsel %vm2238_vm1, %v2337_v18, %v2341_v20  ;;  %v2353_v3 = vor.u32 %v2351_v34, %v2341_v20  ;;  %v2157_v18 = vld [vmem:[#allocation2 + $0x1f0] sm:$0xff] }
 0x2f7   :  { %2712 = vmatmul.mubr.bf16.gmra.mxu0 %v2286_v30  ;;  %v2317_v30 = vrot.slane %v2315_v53, 1 }
 0x2f8   :  { %2721 = vmatprep.mubr.bf16.mxu0 %v2310_v17  ;;  %v2191_v17 = vpack.c.bf16 %v2149_v33, %v2147_v50  ;;  %v2150_v50 = vld [vmem:[#allocation2 + $0x178] sm:$0xff]  ;;  %v2152_v33 = vld [vmem:[#allocation2 + $0x108] sm:$0xff] }
 0x2f9   :  { %v2318_v55 = vsel %vm2238_vm1, %v2313_v6, %v2317_v30  ;;  %v2329_v5 = vor.u32 %v2327_v31, %v2317_v30  ;;  %v2155_v6 = vld [vmem:[#allocation2 + $0x1e8] sm:$0xff]  ;;  %v2192_v31 = vpack.c.bf16 %v2152_v33, %v2150_v50 }
 0x2fa   :  { %v2355_v0 = vshll.u32 %v2191_v17, 16  ;;  %v2367_v60 = vshrl.u32 %v2191_v17, 16 }
 0x2fb   :  { %v2375_v41 = vshrl.u32 %v2192_v31, 16 }
 0x2fc   :  { %v2357_v53 = vrot.slane %v2355_v0, 1  ;;  %v2363_v0 = vshll.u32 %v2192_v31, 16 }
 0x2fe   :  { %v2358_v59 = vsel %vm2238_vm1, %v2353_v3, %v2357_v53  ;;  %v2369_v20 = vor.u32 %v2367_v60, %v2357_v53  ;;  %v2161_v3 = vld [vmem:[#allocation2 + $0xe0] sm:$0xff] }
 0x2ff   :  { %2722 = vmatmul.mubr.bf16.gmra.mxu0 %v2302_v23  ;;  %v2333_v23 = vrot.slane %v2331_v25, 1 }
 0x300   :  { %2731 = vmatprep.mubr.bf16.mxu0 %v2326_v13  ;;  %v2193_v13 = vpack.c.bf16 %v2153_v52, %v2151_v16  ;;  %v2154_v16 = vld [vmem:[#allocation2 + $0x1c8] sm:$0xff]  ;;  %v2156_v52 = vld [vmem:[#allocation2 + $0x38] sm:$0xff] }
 0x301   :  { %v2334_v58 = vsel %vm2238_vm1, %v2329_v5, %v2333_v23  ;;  %v2345_v30 = vor.u32 %v2343_v21, %v2333_v23  ;;  %v2159_v5 = vld [vmem:[#allocation2 + $0x148] sm:$0xff]  ;;  %v2194_v21 = vpack.c.bf16 %v2156_v52, %v2154_v16 }
 0x302   :  { %v2371_v40 = vshll.u32 %v2193_v13, 16  ;;  %v2383_v17 = vshrl.u32 %v2193_v13, 16 }
 0x303   :  { %v2391_v31 = vshrl.u32 %v2194_v21, 16 }
 0x304   :  { %v2373_v25 = vrot.slane %v2371_v40, 1  ;;  %v2379_v40 = vshll.u32 %v2194_v21, 16 }
 0x306   :  { %v2374_v1 = vsel %vm2238_vm1, %v2369_v20, %v2373_v25  ;;  %v2385_v53 = vor.u32 %v2383_v17, %v2373_v25  ;;  %v2165_v20 = vld [vmem:[#allocation2 + $0x80] sm:$0xff] }
 0x307   :  { %2732 = vmatmul.mubr.bf16.gmra.mxu0 %v2318_v55  ;;  %v2349_v55 = vrot.slane %v2347_v11, 1 }
 0x308   :  { %2741 = vmatprep.mubr.bf16.mxu0 %v2342_v51  ;;  %v2195_v51 = vpack.c.bf16 %v2157_v18, %v2155_v6  ;;  %v2158_v6 = vld [vmem:[#allocation2 + $0x1f8] sm:$0xff]  ;;  %v2160_v18 = vld [vmem:[#allocation2 + $0x110] sm:$0xff] }
 0x309   :  { %v2350_v34 = vsel %vm2238_vm1, %v2345_v30, %v2349_v55  ;;  %v2361_v23 = vor.u32 %v2359_v32, %v2349_v55  ;;  %v2163_v30 = vld [vmem:[#allocation2 + $0x1d0] sm:$0xff]  ;;  %v2196_v32 = vpack.c.bf16 %v2160_v18, %v2158_v6 }
 0x30a   :  { %v2387_v35 = vshll.u32 %v2195_v51, 16  ;;  %v2399_v13 = vshrl.u32 %v2195_v51, 16 }
 0x30b   :  { %v2407_v21 = vshrl.u32 %v2196_v32, 16 }
 0x30c   :  { %v2389_v11 = vrot.slane %v2387_v35, 1  ;;  %v2395_v35 = vshll.u32 %v2196_v32, 16 }
 0x30e   :  { %v2390_v50 = vsel %vm2238_vm1, %v2385_v53, %v2389_v11  ;;  %v2401_v25 = vor.u32 %v2399_v13, %v2389_v11  ;;  %v2169_v53 = vld [vmem:[#allocation2 + $0x88] sm:$0xff] }
 0x30f   :  { %2742 = vmatmul.mubr.bf16.gmra.mxu0 %v2334_v58  ;;  %v2365_v58 = vrot.slane %v2363_v0, 1 }
 0x310   :  { %2751 = vmatprep.mubr.bf16.mxu0 %v2358_v59  ;;  %v2197_v59 = vpack.c.bf16 %v2161_v3, %v2159_v5  ;;  %v2162_v5 = vld [vmem:[#allocation2 + $0x50] sm:$0xff]  ;;  %v2164_v3 = vld [vmem:[#allocation2 + $0x128] sm:$0xff] }
 0x311   :  { %v2366_v60 = vsel %vm2238_vm1, %v2361_v23, %v2365_v58  ;;  %v2377_v55 = vor.u32 %v2375_v41, %v2365_v58  ;;  %v2167_v23 = vld [vmem:[#allocation2 + $0x1b8] sm:$0xff]  ;;  %v2198_v41 = vpack.c.bf16 %v2164_v3, %v2162_v5 }
 0x312   :  { %v2403_v33 = vshll.u32 %v2197_v59, 16  ;;  %v2415_v51 = vshrl.u32 %v2197_v59, 16 }
 0x313   :  { %v2423_v32 = vshrl.u32 %v2198_v41, 16 }
 0x314   :  { %v2405_v0 = vrot.slane %v2403_v33, 1  ;;  %v2411_v33 = vshll.u32 %v2198_v41, 16 }
 0x316   :  { %v2406_v16 = vsel %vm2238_vm1, %v2401_v25, %v2405_v0  ;;  %v2417_v11 = vor.u32 %v2415_v51, %v2405_v0  ;;  %v2173_v25 = vld [vmem:[#allocation2 + $0x60] sm:$0xff] }
 0x317   :  { %2752 = vmatmul.mubr.bf16.gmra.mxu0 %v2350_v34  ;;  %v2381_v34 = vrot.slane %v2379_v40, 1 }
 0x318   :  { %2761 = vmatprep.mubr.bf16.mxu0 %v2374_v1  ;;  %v2199_v1 = vpack.c.bf16 %v2165_v20, %v2163_v30  ;;  %v2166_v30 = vld [vmem:[#allocation2 + $0x20] sm:$0xff]  ;;  %v2168_v20 = vld [vmem:[#allocation2 + $0x18] sm:$0xff] }
 0x319   :  { %v2382_v17 = vsel %vm2238_vm1, %v2377_v55, %v2381_v34  ;;  %v2393_v58 = vor.u32 %v2391_v31, %v2381_v34  ;;  %v2171_v55 = vld [vmem:[#allocation2 + $0x140] sm:$0xff]  ;;  %v2200_v31 = vpack.c.bf16 %v2168_v20, %v2166_v30 }
 0x31a   :  { %v2419_v52 = vshll.u32 %v2199_v1, 16  ;;  %v2431_v59 = vshrl.u32 %v2199_v1, 16  ;;  %v2174_v20 = vld [vmem:[#allocation2 + $0x180] sm:$0x1] }
 0x31c   :  { %v2421_v40 = vrot.slane %v2419_v52, 1  ;;  %v2427_v52 = vshll.u32 %v2200_v31, 16 }
 0x31e   :  { %v2422_v6 = vsel %vm2238_vm1, %v2417_v11, %v2421_v40  ;;  %v2433_v0 = vor.u32 %v2431_v59, %v2421_v40  ;;  %v2439_v59 = vshrl.u32 %v2200_v31, 16 }
 0x31f   :  { %2762 = vmatmul.mubr.bf16.gmra.mxu0 %v2366_v60  ;;  %v2397_v60 = vrot.slane %v2395_v35, 1 }
 0x320   :  { %2771 = vmatprep.mubr.bf16.mxu0 %v2390_v50  ;;  %v2201_v50 = vpack.c.bf16 %v2169_v53, %v2167_v23  ;;  %v2170_v23 = vld [vmem:[#allocation2 + $0x1e0] sm:$0xff]  ;;  %v2172_v53 = vld [vmem:[#allocation2 + $0xf8] sm:$0xff] }
 0x321   :  { %v2398_v13 = vsel %vm2238_vm1, %v2393_v58, %v2397_v60  ;;  %v2409_v34 = vor.u32 %v2407_v21, %v2397_v60  ;;  %v2175_v58 = vld [vmem:[#allocation2 + $0x30] sm:$0x1]  ;;  %v2429_v60 = vrot.slane %v2427_v52, 1 }
 0x322   :  { %v2435_v18 = vshll.u32 %v2201_v50, 16  ;;  %v2447_v1 = vshrl.u32 %v2201_v50, 16 }
 0x324   :  { %v2437_v35 = vrot.slane %v2435_v18, 1 }
 0x326   :  { %v2438_v5 = vsel %vm2238_vm1, %v2433_v0, %v2437_v35  ;;  %v2449_v21 = vor.u32 %v2447_v1, %v2437_v35 }
 0x327   :  { %2772 = vmatmul.mubr.bf16.gmra.mxu0 %v2382_v17  ;;  %v2413_v17 = vrot.slane %v2411_v33, 1  ;;  %v2205_v33 = vpack.c.bf16 %v2175_v58, %v2175_v58 }
 0x328   :  { %2781 = vmatprep.mubr.bf16.mxu0 %v2406_v16  ;;  %v2203_v16 = vpack.c.bf16 %v2173_v25, %v2171_v55  ;;  %v2441_v55 = vor.u32 %v2439_v59, %v2429_v60 }
 0x329   :  { %v2414_v51 = vsel %vm2238_vm1, %v2409_v34, %v2413_v17  ;;  %v2425_v11 = vor.u32 %v2423_v32, %v2413_v17  ;;  %v2467_v50 = vshll.u32 %v2205_v33, 16  ;;  %v2204_v34 = vpack.c.bf16 %v2174_v20, %v2174_v20 }
 0x32a   :  { %v2451_v3 = vshll.u32 %v2203_v16, 16  ;;  %v2463_v30 = vshrl.u32 %v2203_v16, 16 }
 0x32b   :  { %v2469_v0 = vrot.slane %v2467_v50, 1  ;;  %v2459_v32 = vshll.u32 %v2204_v34, 16 }
 0x32c   :  { %v2453_v40 = vrot.slane %v2451_v3, 1 }
 0x32e   :  { %v2454_v18 = vsel %vm2238_vm1, %v2449_v21, %v2453_v40  ;;  %v2465_v17 = vor.u32 %v2463_v30, %v2453_v40 }
 0x32f   :  { %2782 = vmatmul.mubr.bf16.gmra.mxu0 %v2398_v13  ;;  %v2202_v13 = vpack.c.bf16 %v2172_v53, %v2170_v23 }
 0x330   :  { %2791 = vmatprep.mubr.bf16.mxu0 %v2422_v6  ;;  %v2430_v6 = vsel %vm2238_vm1, %v2425_v11, %v2429_v60  ;;  %v2470_v52 = vsel %vm2238_vm1, %v2465_v17, %v2469_v0 }
 0x331   :  { %v2443_v41 = vshll.u32 %v2202_v13, 16 }
 0x333   :  { %v2445_v25 = vrot.slane %v2443_v41, 1 }
 0x335   :  { %v2446_v35 = vsel %vm2238_vm1, %v2441_v55, %v2445_v25 }
 0x337   :  { %2792 = vmatmul.mubr.bf16.gmra.mxu0 %v2414_v51  ;;  %v2455_v51 = vshrl.u32 %v2202_v13, 16 }
 0x338   :  { %2801 = vmatprep.mubr.bf16.mxu0 %v2438_v5  ;;  %v2461_v5 = vrot.slane %v2459_v32, 1 }
 0x339   :  { %v2457_v31 = vor.u32 %v2455_v51, %v2445_v25 }
 0x33b   :  { %v2462_v16 = vsel %vm2238_vm1, %v2457_v31, %v2461_v5 }
 0x33f   :  { %2802 = vmatmul.mubr.bf16.gmra.mxu0 %v2430_v6 }
 0x340   :  { %2811 = vmatprep.mubr.bf16.mxu0 %v2454_v18 }
 0x347   :  { %2812 = vmatmul.mubr.bf16.gmra.mxu0 %v2446_v35 }
 0x348   :  { %2821 = vmatprep.mubr.bf16.mxu0 %v2470_v52 }
 0x34f   :  { %2822 = vmatmul.mubr.bf16.gmra.mxu0 %v2462_v16 }
 0x3a7   :  { %v2693_v1 = vpop.f32.mrf.mxu0 }
 0x3a8   :  { %v11018_v3 = vadd.f32 %v2693_v1, %v10873_v42 }
 0x3a9   :  { %v2695_v23 = vpop.f32.mrf.mxu0 }
 0x3aa   :  { %v11021_v53 = vadd.f32 %v2695_v23, %v10875_v7 }
 0x3ab   :  { %v2697_v58 = vpop.f32.mrf.mxu0 }
 0x3ac   :  { %v11024_v11 = vadd.f32 %v2697_v58, %v10877_v2 }
 0x3ad   :  { %v2699_v60 = vpop.f32.mrf.mxu0 }
 0x3ae   :  { %v11027_v13 = vadd.f32 %v2699_v60, %v10879_v10 }
 0x3af   :  { %v2703_v21 = vpop.f32.mrf.mxu0 }
 0x3b0   :  { %v11030_v40 = vadd.f32 %v2703_v21, %v10881_v62 }
 0x3b1   :  { %v2705_v33 = vpop.f32.mrf.mxu0 }
 0x3b2   :  { %v11033_v42 = vadd.f32 %v2705_v33, %v10883_v28 }
 0x3b3   :  { %v2707_v6 = vpop.f32.mrf.mxu0 }
 0x3b4   :  { %v11036_v7 = vadd.f32 %v2707_v6, %v10885_v4 }
 0x3b5   :  { %v2709_v59 = vpop.f32.mrf.mxu0 }
 0x3b6   :  { %v11039_v2 = vadd.f32 %v2709_v59, %v10887_v36 }
 0x3b7   :  { %v2713_v41 = vpop.f32.mrf.mxu0 }
 0x3b8   :  { %v11042_v10 = vadd.f32 %v2713_v41, %v10889_v14 }
 0x3b9   :  { %v2715_v18 = vpop.f32.mrf.mxu0 }
 0x3ba   :  { %v11045_v62 = vadd.f32 %v2715_v18, %v10891_v54 }
 0x3bb   :  { %v2717_v30 = vpop.f32.mrf.mxu0 }
 0x3bc   :  { %v11048_v28 = vadd.f32 %v2717_v30, %v10893_v39  ;;  %v13760_v30 = vld [vmem:[#allocation39_spill] sm:$0xff] }
 0x3bd   :  { %v2719_v50 = vpop.f32.mrf.mxu0 }
 0x3be   :  { %v11051_v4 = vadd.f32 %v2719_v50, %v10895_v26 }
 0x3bf   :  { %v2723_v20 = vpop.f32.mrf.mxu0 }
 0x3c0   :  { %v11054_v36 = vadd.f32 %v2723_v20, %v10897_v63  ;;  %v13762_v20 = vld [vmem:[#allocation41_spill] sm:$0xff] }
 0x3c1   :  { %v2725_v55 = vpop.f32.mrf.mxu0 }
 0x3c2   :  { %v11057_v14 = vadd.f32 %v2725_v55, %v10899_v12 }
 0x3c3   :  { %v2727_v25 = vpop.f32.mrf.mxu0 }
 0x3c4   :  { %v11060_v54 = vadd.f32 %v2727_v25, %v10901_v48  ;;  %v13764_v25 = vld [vmem:[#allocation49_spill] sm:$0xff] }
 0x3c5   :  { %v2729_v34 = vpop.f32.mrf.mxu0 }
 0x3c6   :  { %v11063_v39 = vadd.f32 %v2729_v34, %v10903_v44 }
 0x3c7   :  { %v2733_v17 = vpop.f32.mrf.mxu0 }
 0x3c8   :  { %v11066_v26 = vadd.f32 %v2733_v17, %v10905_v19  ;;  %v13766_v17 = vld [vmem:[#allocation65_spill] sm:$0xff] }
 0x3c9   :  { %v2735_v0 = vpop.f32.mrf.mxu0 }
 0x3ca   :  { %v11069_v63 = vadd.f32 %v2735_v0, %v10907_v46 }
 0x3cb   :  { %v2737_v35 = vpop.f32.mrf.mxu0 }
 0x3cc   :  { %v11072_v12 = vadd.f32 %v2737_v35, %v10909_v61  ;;  %v13768_v35 = vld [vmem:[#allocation70_spill] sm:$0xff] }
 0x3cd   :  { %v2739_v51 = vpop.f32.mrf.mxu0 }
 0x3ce   :  { %v11075_v48 = vadd.f32 %v2739_v51, %v10911_v37 }
 0x3cf   :  { %v2743_v32 = vpop.f32.mrf.mxu0 }
 0x3d0   :  { %v11078_v44 = vadd.f32 %v2743_v32, %v10913_v56  ;;  %v13770_v32 = vld [vmem:[#allocation71_spill] sm:$0xff] }
 0x3d1   :  { %v2745_v52 = vpop.f32.mrf.mxu0 }
 0x3d2   :  { %v11081_v19 = vadd.f32 %v2745_v52, %v10915_v43 }
 0x3d3   :  { %v2747_v31 = vpop.f32.mrf.mxu0 }
 0x3d4   :  { %v11084_v46 = vadd.f32 %v2747_v31, %v10917_v22 }
 0x3d5   :  { %v2749_v5 = vpop.f32.mrf.mxu0 }
 0x3d6   :  { %v11087_v61 = vadd.f32 %v2749_v5, %v10919_v57  ;;  %v13772_v5 = vld [vmem:[#allocation75_spill] sm:$0xff] }
 0x3d7   :  { %v2753_v16 = vpop.f32.mrf.mxu0 }
 0x3d8   :  { %v11090_v37 = vadd.f32 %v2753_v16, %v10921_v38 }
 0x3d9   :  { %v2755_v1 = vpop.f32.mrf.mxu0 }
 0x3da   :  { %v11093_v56 = vadd.f32 %v2755_v1, %v10923_v15 }
 0x3db   :  { %v2757_v23 = vpop.f32.mrf.mxu0 }
 0x3dc   :  { %v11096_v43 = vadd.f32 %v2757_v23, %v10925_v45  ;;  %v13774_v23 = vld [vmem:[#allocation76_spill] sm:$0xff] }
 0x3dd   :  { %v2759_v58 = vpop.f32.mrf.mxu0 }
 0x3de   :  { %v11099_v22 = vadd.f32 %v2759_v58, %v10927_v49 }
 0x3df   :  { %v2763_v60 = vpop.f32.mrf.mxu0 }
 0x3e0   :  { %v11102_v57 = vadd.f32 %v2763_v60, %v10929_v27 }
 0x3e1   :  { %v2765_v21 = vpop.f32.mrf.mxu0 }
 0x3e2   :  { %v11105_v38 = vadd.f32 %v2765_v21, %v10931_v9  ;;  %v13776_v21 = vld [vmem:[#allocation77_spill] sm:$0xff] }
 0x3e3   :  { %v2767_v33 = vpop.f32.mrf.mxu0 }
 0x3e4   :  { %v11108_v15 = vadd.f32 %v2767_v33, %v10933_v47 }
 0x3e5   :  { %v2769_v6 = vpop.f32.mrf.mxu0 }
 0x3e6   :  { %v11111_v45 = vadd.f32 %v2769_v6, %v10935_v24 }
 0x3e7   :  { %v2773_v59 = vpop.f32.mrf.mxu0 }
 0x3e8   :  { %v11114_v49 = vadd.f32 %v2773_v59, %v10937_v29  ;;  %v13778_v59 = vld [vmem:[#allocation72_spill] sm:$0xff] }
 0x3e9   :  { %v2775_v41 = vpop.f32.mrf.mxu0 }
 0x3ea   :  { %v11117_v27 = vadd.f32 %v2775_v41, %v10939_v8 }
 0x3eb   :  { %v2777_v18 = vpop.f32.mrf.mxu0 }
 0x3ec   :  { %v11120_v9 = vadd.f32 %v2777_v18, %v13760_v30  ;;  %v13780_v30 = vld [vmem:[#allocation73_spill] sm:$0xff] }
 0x3ed   :  { %v2779_v50 = vpop.f32.mrf.mxu0 }
 0x3ee   :  { %13761 = vst [vmem:[#allocation51_spill] sm:$0xff] %v11120_v9  ;;  %v11123_v47 = vadd.f32 %v2779_v50, %v13762_v20 }
 0x3ef   :  { %v2783_v55 = vpop.f32.mrf.mxu0 }
 0x3f0   :  { %13763 = vst [vmem:[#allocation52_spill] sm:$0xff] %v11123_v47  ;;  %v11126_v24 = vadd.f32 %v2783_v55, %v13764_v25  ;;  %v13782_v55 = vld [vmem:[#allocation68_spill] sm:$0xff] }
 0x3f1   :  { %v2785_v34 = vpop.f32.mrf.mxu0 }
 0x3f2   :  { %13765 = vst [vmem:[#allocation55_spill] sm:$0xff] %v11126_v24  ;;  %v11129_v29 = vadd.f32 %v2785_v34, %v13766_v17  ;;  %v13784_v17 = vld [vmem:[#allocation90_spill] sm:$0xff] }
 0x3f3   :  { %v2787_v0 = vpop.f32.mrf.mxu0 }
 0x3f4   :  { %13767 = vst [vmem:[#allocation56_spill] sm:$0xff] %v11129_v29  ;;  %v11132_v8 = vadd.f32 %v2787_v0, %v13768_v35 }
 0x3f5   :  { %v2789_v51 = vpop.f32.mrf.mxu0 }
 0x3f6   :  { %13769 = vst [vmem:[#allocation92_spill] sm:$0xff] %v11132_v8  ;;  %v11135_v52 = vadd.f32 %v2789_v51, %v13770_v32  ;;  %v13786_v51 = vld [vmem:[#allocation43_spill] sm:$0xff] }
 0x3f7   :  { %v2793_v31 = vpop.f32.mrf.mxu0 }
 0x3f8   :  { %13771 = vst [vmem:[#allocation93_spill] sm:$0xff] %v11135_v52  ;;  %v11138_v16 = vadd.f32 %v2793_v31, %v13772_v5  ;;  %v13788_v5 = vld [vmem:[#allocation45_spill] sm:$0xff] }
 0x3f9   :  { %v2795_v1 = vpop.f32.mrf.mxu0 }
 0x3fa   :  { %13773 = vst [vmem:[#allocation94_spill] sm:$0xff] %v11138_v16  ;;  %v11141_v58 = vadd.f32 %v2795_v1, %v13774_v23 }
 0x3fb   :  { %v2797_v60 = vpop.f32.mrf.mxu0 }
 0x3fc   :  { %13775 = vst [vmem:[#allocation95_spill] sm:$0xff] %v11141_v58  ;;  %v11144_v33 = vadd.f32 %v2797_v60, %v13776_v21  ;;  %v13790_v60 = vld [vmem:[#allocation54_spill] sm:$0xff] }
 0x3fd   :  { %v2799_v6 = vpop.f32.mrf.mxu0 }
 0x3fe   :  { %13777 = vst [vmem:[#allocation78_spill] sm:$0xff] %v11144_v33  ;;  %v11147_v41 = vadd.f32 %v2799_v6, %v13778_v59  ;;  %v13792_v59 = vld [vmem:[#allocation88_spill] sm:$0xff] }
 0x3ff   :  { %v2803_v18 = vpop.f32.mrf.mxu0 }
 0x400   :  { %13779 = vst [vmem:[#allocation57_spill] sm:$0xff] %v11147_v41  ;;  %v11150_v50 = vadd.f32 %v2803_v18, %v13780_v30 }
 0x401   :  { %v2805_v20 = vpop.f32.mrf.mxu0 }
 0x402   :  { %13781 = vst [vmem:[#allocation79_spill] sm:$0xff] %v11150_v50  ;;  %v11153_v25 = vadd.f32 %v2805_v20, %v13782_v55  ;;  %v13794_v20 = vld [vmem:[#allocation89_spill] sm:$0xff] }
 0x403   :  { %v2807_v34 = vpop.f32.mrf.mxu0 }
 0x404   :  { %13783 = vst [vmem:[#allocation59_spill] sm:$0xff] %v11153_v25  ;;  %v11156_v0 = vadd.f32 %v2807_v34, %v13784_v17  ;;  %v13796_v17 = vld [vmem:[#allocation58_spill] sm:$0xff] }
 0x405   :  { %v2809_v35 = vpop.f32.mrf.mxu0 }
 0x406   :  { %13785 = vst [vmem:[#allocation80_spill] sm:$0xff] %v11156_v0  ;;  %v11159_v32 = vadd.f32 %v2809_v35, %v13786_v51 }
 0x407   :  { %v2813_v31 = vpop.f32.mrf.mxu0 }
 0x408   :  { %13787 = vst [vmem:[#allocation60_spill] sm:$0xff] %v11159_v32  ;;  %v11162_v1 = vadd.f32 %v2813_v31, %v13788_v5  ;;  %v13798_v32 = vld [vmem:[#allocation62_spill] sm:$0xff] }
 0x409   :  { %v2815_v23 = vpop.f32.mrf.mxu0 }
 0x40a   :  { %13789 = vst [vmem:[#allocation81_spill] sm:$0xff] %v11162_v1  ;;  %v11165_v21 = vadd.f32 %v2815_v23, %v13790_v60  ;;  %v13800_v1 = vld [vmem:[#allocation74_spill] sm:$0xff] }
 0x40b   :  { %v2817_v6 = vpop.f32.mrf.mxu0 }
 0x40c   :  { %13791 = vst [vmem:[#allocation61_spill] sm:$0xff] %v11165_v21  ;;  %v11168_v18 = vadd.f32 %v2817_v6, %v13792_v59  ;;  %v13802_v21 = vld [vmem:[#allocation91_spill] sm:$0xff] }
 0x40d   :  { %v2819_v30 = vpop.f32.mrf.mxu0 }
 0x40e   :  { %13793 = vst [vmem:[#allocation96_spill] sm:$0xff] %v11168_v18  ;;  %v11171_v55 = vadd.f32 %v2819_v30, %v13794_v20 }
 0x40f   :  { %v2823_v34 = vpop.f32.mrf.mxu0 }
 0x410   :  { %13795 = vst [vmem:[#allocation97_spill] sm:$0xff] %v11171_v55  ;;  %v11174_v35 = vadd.f32 %v2823_v34, %v13796_v17 }
 0x411   :  { %v2825_v51 = vpop.f32.mrf.mxu0 }
 0x412   :  { %13797 = vst [vmem:[#allocation98_spill] sm:$0xff] %v11174_v35  ;;  %v11177_v31 = vadd.f32 %v2825_v51, %v13798_v32 }
 0x413   :  { %v2827_v5 = vpop.f32.mrf.mxu0 }
 0x414   :  { %13799 = vst [vmem:[#allocation99_spill] sm:$0xff] %v11177_v31  ;;  %v11180_v23 = vadd.f32 %v2827_v5, %v13800_v1 }
 0x415   :  { %v2829_v60 = vpop.f32.mrf.mxu0 }
 0x416   :  { %13801 = vst [vmem:[#allocation82_spill] sm:$0xff] %v11180_v23  ;;  %v11183_v6 = vadd.f32 %v2829_v60, %v13802_v21 }
 0x418   :  { %13803 = vst [vmem:[#allocation63_spill] sm:$0xff] %v11183_v6 }
 0x419   :  { %9141 = dma.done.wait [#allocation4 + $0x3], 4096 }
 0x41a   :  { %9142 = vsyncadd [#allocation4 + $0x3], 4294963200  ;;  %v8639_v59 = vld [vmem:[#allocation3 + $0x374] ss:$8 sps:$4 sm:$0xff]   ;;  %v8641_v30 = vld [vmem:[#allocation3 + $0x370] ss:$8 sps:$4 sm:$0xff]  }
 0x41b   :  { %3466 = vmatprep.subr.bf16.mxu1 %v8639_v59  ;;  %v8642_v20 = vld [vmem:[#allocation3 + $0x364] ss:$8 sps:$4 sm:$0xff]   ;;  %v8644_v34 = vld [vmem:[#allocation3 + $0x360] ss:$8 sps:$4 sm:$0xff]   ;;  %v8645_v17 = vld [vmem:[#allocation3 + $0x354] ss:$8 sps:$4 sm:$0xff]  }
 0x41c   :  { %3467 = vmatpush1.bf16.msra.mxu1 %v8641_v30  ;;  %v8647_v32 = vld [vmem:[#allocation3 + $0x350] ss:$8 sps:$4 sm:$0xff]   ;;  %v8648_v51 = vld [vmem:[#allocation3 + $0x344] ss:$8 sps:$4 sm:$0xff]   ;;  %v8650_v1 = vld [vmem:[#allocation3 + $0x340] ss:$8 sps:$4 sm:$0xff]  }
 0x41d   :  { %3468 = vmatprep.subr.bf16.mxu1 %v8642_v20  ;;  %v8651_v5 = vld [vmem:[#allocation3 + $0x334] ss:$8 sps:$4 sm:$0xff]   ;;  %v8653_v21 = vld [vmem:[#allocation3 + $0x330] ss:$8 sps:$4 sm:$0xff]   ;;  %v8654_v60 = vld [vmem:[#allocation3 + $0x324] ss:$8 sps:$4 sm:$0xff]  }
 0x41e   :  { %v8656_v6 = vld [vmem:[#allocation3 + $0x320] ss:$8 sps:$4 sm:$0xff]   ;;  %v8657_v59 = vld [vmem:[#allocation3 + $0x314] ss:$8 sps:$4 sm:$0xff]   ;;  %v2891_v30 = vld [vmem:[#allocation2 + $0xc0] sm:$0x80] }
 0x41f   :  { %v2893_v23 = vld [vmem:[#allocation2 + $0x138] sm:$0xff]  ;;  %v2895_v20 = vld [vmem:[#allocation2 + $0xf0] sm:$0xff]  ;;  %v2897_v31 = vld [vmem:[#allocation2] sm:$0xff] }
 0x420   :  { %3469 = vmatpush1.bf16.msra.mxu1 %v8644_v34  ;;  %v2949_v34 = vpack.c.bf16 %v2893_v23, %v2891_v30  ;;  %v2951_v35 = vpack.c.bf16 %v2897_v31, %v2895_v20  ;;  %v8663_v50 = vld [vmem:[#allocation3 + $0x3f4] ss:$8 sps:$4 sm:$0xff]   ;;  %v8665_v23 = vld [vmem:[#allocation3 + $0x3f0] ss:$8 sps:$4 sm:$0xff]   ;;  %v2898_v58 = vld [vmem:[#allocation2 + $0x160] sm:$0xff] }
 0x421   :  { %3470 = vmatprep.subr.bf16.mxu1 %v8645_v17  ;;  %v8659_v17 = vld [vmem:[#allocation3 + $0x310] ss:$8 sps:$4 sm:$0xff]   ;;  %v8675_v20 = vld [vmem:[#allocation3 + $0x3b4] ss:$8 sps:$4 sm:$0xff]   ;;  %v2900_v16 = vld [vmem:[#allocation2 + $0x120] sm:$0xff] }
 0x422   :  { %v3031_v55 = vshll.u32 %v2949_v34, 16  ;;  %v3039_v18 = vshll.u32 %v2951_v35, 16  ;;  %v2892_v30 = vld [vmem:[#allocation2 + $0x90] sm:$0xff]  ;;  %v2903_v52 = vld [vmem:[#allocation2 + $0x118] sm:$0xff] }
 0x423   :  { %v2902_v9 = vld [vmem:[#allocation2 + $0xb0] sm:$0xff] }
 0x424   :  { %3471 = vmatpush1.bf16.msra.mxu1 %v8647_v32  ;;  %v8660_v32 = vld [vmem:[#allocation3 + $0x304] ss:$8 sps:$4 sm:$0xff]   ;;  %v3033_v0 = vrot.slane %v3031_v55, 4  ;;  %v3041_v25 = vrot.slane %v3039_v18, 4  ;;  %v8669_v55 = vld [vmem:[#allocation3 + $0x3d4] ss:$8 sps:$4 sm:$0xff]  }
 0x425   :  { %3472 = vmatprep.subr.bf16.mxu1 %v8648_v51  ;;  %v3028_v51 = vshrl.u32 %v2949_v34, 16  ;;  %v8672_v18 = vld [vmem:[#allocation3 + $0x3c4] ss:$8 sps:$4 sm:$0xff]  }
 0x426   :  { %v2894_v34 = vld [vmem:[#allocation2 + $0xe8] sm:$0xff] }
 0x428   :  { %3473 = vmatpush1.bf16.msra.mxu1 %v8650_v1  ;;  %v3036_v1 = vshrl.u32 %v2951_v35, 16  ;;  %v8668_v35 = vld [vmem:[#allocation3 + $0x3e0] ss:$8 sps:$4 sm:$0xff]  }
 0x429   :  { %3474 = vmatprep.subr.bf16.mxu1 %v8651_v5  ;;  %v3030_v5 = vrot.slane %v3028_v51, 3  ;;  %v8677_v51 = vld [vmem:[#allocation3 + $0x3b0] ss:$8 sps:$4 sm:$0xff]  }
 0x42b   :  { %v3034_v41 = vor.u32 %v3033_v0, %v3030_v5  ;;  %v8674_v0 = vld [vmem:[#allocation3 + $0x3c0] ss:$8 sps:$4 sm:$0xff]   ;;  %v8678_v5 = vld [vmem:[#allocation3 + $0x3a4] ss:$8 sps:$4 sm:$0xff]  }
 0x42c   :  { %3475 = vmatpush1.bf16.msra.mxu1 %v8653_v21  ;;  %v8662_v21 = vld [vmem:[#allocation3 + $0x300] ss:$8 sps:$4 sm:$0xff]  }
 0x42d   :  { %3476 = vmatprep.subr.bf16.mxu1 %v8654_v60  ;;  %v3038_v60 = vrot.slane %v3036_v1, 3 }
 0x42f   :  { %v11185_v33 = vor.u32 %v3041_v25, %v3038_v60  ;;  %v2890_v25 = vld [vmem:[#allocation2 + $0x130] sm:$0x80] }
 0x430   :  { %3477 = vmatpush1.bf16.msra.mxu1 %v8656_v6  ;;  %v8666_v6 = vld [vmem:[#allocation3 + $0x3e4] ss:$8 sps:$4 sm:$0xff]  }
 0x431   :  { %3478 = vmatprep.subr.bf16.mxu1 %v8657_v59  ;;  %v3043_v31 = vsel %vm1486_vm0, %v3034_v41, %v11185_v33  ;;  %v8671_v59 = vld [vmem:[#allocation3 + $0x3d0] ss:$8 sps:$4 sm:$0xff]  }
 0x432   :  { %3498 = vmatprep.mubr.bf16.mxu1 %v3043_v31  ;;  %v2899_v41 = vld [vmem:[#allocation2 + $0x170] sm:$0xff] }
 0x434   :  { %3479 = vmatpush1.bf16.msra.mxu1 %v8659_v17  ;;  %v2896_v17 = vld [vmem:[#allocation2 + $0x1d8] sm:$0xff] }
 0x435   :  { %3480 = vmatprep.subr.bf16.mxu1 %v8660_v32  ;;  %v2948_v32 = vpack.c.bf16 %v2892_v30, %v2890_v25  ;;  %v2950_v1 = vpack.c.bf16 %v2896_v17, %v2894_v34  ;;  %v2905_v25 = vld [vmem:[#allocation2 + $0x198] sm:$0xff] }
 0x436   :  { %v8683_v30 = vld [vmem:[#allocation3 + $0x390] ss:$8 sps:$4 sm:$0xff]  }
 0x437   :  { %v3011_v60 = vshrl.u32 %v2948_v32, 16  ;;  %v3014_v31 = vshll.u32 %v2948_v32, 16 }
 0x438   :  { %3481 = vmatpush1.bf16.msra.mxu1 %v8662_v21 }
 0x439   :  { %3482 = vmatprep.subr.bf16.mxu1 %v8663_v50  ;;  %v2901_v50 = vld [vmem:[#allocation2 + $0x1a0] sm:$0xff] }
 0x43a   :  { %v2953_v21 = vpack.c.bf16 %v2901_v50, %v2899_v41  ;;  %v2952_v41 = vpack.c.bf16 %v2900_v16, %v2898_v58  ;;  %v8684_v50 = vld [vmem:[#allocation3 + $0x384] ss:$8 sps:$4 sm:$0xff]  }
 0x43c   :  { %3483 = vmatpush2.bf16.msra.mxu1 %v8665_v23  ;;  %v8680_v23 = vld [vmem:[#allocation3 + $0x3a0] ss:$8 sps:$4 sm:$0xff]   ;;  %v3045_v29 = vshrl.u32 %v2952_v41, 16  ;;  %v3048_v24 = vshll.u32 %v2952_v41, 16 }
 0x43d   :  { %3484 = vmatprep.subr.bf16.mxu1 %v8666_v6  ;;  %v3019_v6 = vshrl.u32 %v2950_v1, 16 }
 0x43e   :  { %v3047_v58 = vrot.slane %v3045_v29, 3  ;;  %v2913_v29 = vld [vmem:[#allocation2 + $0x158] sm:$0xff] }
 0x43f   :  { %v3021_v34 = vrot.slane %v3019_v6, 3  ;;  %v2907_v6 = vld [vmem:[#allocation2 + $0xa8] sm:$0xff] }
 0x440   :  { %3485 = vmatpush2.bf16.msra.mxu1 %v8668_v35  ;;  %v3022_v35 = vshll.u32 %v2950_v1, 16  ;;  %v2955_v1 = vpack.c.bf16 %v2905_v25, %v2903_v52 }
 0x441   :  { %3486 = vmatprep.subr.bf16.mxu1 %v8669_v55  ;;  %v8681_v55 = vld [vmem:[#allocation3 + $0x394] ss:$8 sps:$4 sm:$0xff]  }
 0x442   :  { %v3024_v17 = vrot.slane %v3022_v35, 4  ;;  %v2909_v35 = vld [vmem:[#allocation2 + $0x208] sm:$0xff] }
 0x444   :  { %3487 = vmatpush2.bf16.msra.mxu1 %v8671_v59  ;;  %v3054_v59 = vshrl.u32 %v2953_v21, 16 }
 0x445   :  { %3488 = vmatprep.subr.bf16.mxu1 %v8672_v18  ;;  %v3057_v18 = vshll.u32 %v2953_v21, 16  ;;  %v3025_v21 = vor.u32 %v3024_v17, %v3021_v34 }
 0x446   :  { %v3056_v32 = vrot.slane %v3054_v59, 3 }
 0x448   :  { %3489 = vmatpush2.bf16.msra.mxu1 %v8674_v0  ;;  %v3013_v0 = vrot.slane %v3011_v60, 3  ;;  %v3072_v60 = vshrl.u32 %v2955_v1, 16 }
 0x449   :  { %3490 = vmatprep.subr.bf16.mxu1 %v8675_v20  ;;  %v3016_v20 = vrot.slane %v3014_v31, 4  ;;  %v2904_v31 = vld [vmem:[#allocation2 + $0x40] sm:$0xff] }
 0x44a   :  { %v2954_v52 = vpack.c.bf16 %v2904_v31, %v2902_v9 }
 0x44b   :  { %v3017_v8 = vor.u32 %v3016_v20, %v3013_v0  ;;  %v2957_v0 = vpack.c.bf16 %v2909_v35, %v2907_v6 }
 0x44c   :  { %3491 = vmatpush2.bf16.msra.mxu1 %v8677_v51  ;;  %v3059_v51 = vrot.slane %v3057_v18, 4  ;;  %v3074_v18 = vrot.slane %v3072_v60, 3  ;;  %v3063_v20 = vshrl.u32 %v2954_v52, 16  ;;  %v3066_v34 = vshll.u32 %v2954_v52, 16 }
 0x44d   :  { %3492 = vmatprep.subr.bf16.mxu1 %v8678_v5  ;;  %v8686_v5 = vld [vmem:[#allocation3 + $0x380] ss:$8 sps:$4 sm:$0xff]   ;;  %v3026_v16 = vsel %vm1486_vm0, %v3017_v8, %v3025_v21  ;;  %v3090_v41 = vshrl.u32 %v2957_v0, 16 }
 0x44e   :  { %v3060_v47 = vor.u32 %v3059_v51, %v3056_v32  ;;  %v2906_v32 = vld [vmem:[#allocation2 + $0x68] sm:$0xff]  ;;  %v2911_v8 = vld [vmem:[#allocation2 + $0x1c0] sm:$0xff] }
 0x44f   :  { %v2908_v51 = vld [vmem:[#allocation2 + $0x168] sm:$0xff]  ;;  %v3092_v60 = vrot.slane %v3090_v41, 3  ;;  %v2959_v31 = vpack.c.bf16 %v2913_v29, %v2911_v8 }
 0x450   :  { %3493 = vmatpush2.bf16.msra.mxu1 %v8680_v23  ;;  %v3075_v23 = vshll.u32 %v2955_v1, 16  ;;  %v3061_v59 = vsel %vm1486_vm0, %v11185_v33, %v3060_v47  ;;  %v3068_v1 = vrot.slane %v3066_v34, 4  ;;  %v2956_v33 = vpack.c.bf16 %v2908_v51, %v2906_v32 }
 0x451   :  { %3494 = vmatprep.subr.bf16.mxu1 %v8681_v55  ;;  %v3050_v55 = vrot.slane %v3048_v24, 4  ;;  %v3065_v24 = vrot.slane %v3063_v20, 3  ;;  %v3111_v52 = vshll.u32 %v2959_v31, 16 }
 0x452   :  { %v3077_v25 = vrot.slane %v3075_v23, 4  ;;  %v3081_v35 = vshrl.u32 %v2956_v33, 16 }
 0x453   :  { %v3069_v6 = vor.u32 %v3068_v1, %v3065_v24  ;;  %v3113_v32 = vrot.slane %v3111_v52, 4 }
 0x454   :  { %3495 = vmatpush2.bf16.msra.mxu1 %v8683_v30  ;;  %v3051_v30 = vor.u32 %v3050_v55, %v3047_v58  ;;  %v3078_v17 = vor.u32 %v3077_v25, %v3074_v18  ;;  %v3108_v55 = vshrl.u32 %v2959_v31, 16  ;;  %v2912_v18 = vld [vmem:[#allocation2 + $0x78] sm:$0xff]  ;;  %v2915_v25 = vld [vmem:[#allocation2 + $0x190] sm:$0xff]  ;;  %v3083_v20 = vrot.slane %v3081_v35, 3 }
 0x455   :  { %3496 = vmatprep.subr.bf16.mxu1 %v8684_v50  ;;  %v3093_v50 = vshll.u32 %v2957_v0, 16 }
 0x456   :  { %v3052_v9 = vsel %vm1486_vm0, %v3025_v21, %v3051_v30  ;;  %v2917_v21 = vld [vmem:[#allocation2 + $0x70] sm:$0xff]  ;;  %v3070_v0 = vsel %vm1486_vm0, %v3051_v30, %v3069_v6 }
 0x457   :  { %v3095_v23 = vrot.slane %v3093_v50, 4  ;;  %v3110_v50 = vrot.slane %v3108_v55, 3  ;;  %v2961_v51 = vpack.c.bf16 %v2917_v21, %v2915_v25  ;;  %v2921_v30 = vld [vmem:[#allocation2 + $0x210] sm:$0xff] }
 0x458   :  { %3497 = vmatpush2.bf16.msra.mxu1 %v8686_v5  ;;  %v3079_v5 = vsel %vm1486_vm0, %v3060_v47, %v3078_v17 }
 0x459   :  { %v3096_v58 = vor.u32 %v3095_v23, %v3092_v60  ;;  %v3114_v24 = vor.u32 %v3113_v32, %v3110_v50  ;;  %v3126_v1 = vshrl.u32 %v2961_v51, 16  ;;  %v2916_v60 = vld [vmem:[#allocation2 + $0xd8] sm:$0xff]  ;;  %v2923_v32 = vld [vmem:[#allocation2 + $0x1a8] sm:$0xff] }
 0x45a   :  { %v2919_v23 = vld [vmem:[#allocation2 + $0x58] sm:$0xff] }
 0x45b   :  { %3499 = vmatmul.mubr.bf16.vlgmr.msra.gmra.mxu1 %v3026_v16  ;;  %v3084_v16 = vshll.u32 %v2956_v33, 16  ;;  %v3097_v41 = vsel %vm1486_vm0, %v3078_v17, %v3096_v58  ;;  %v3129_v33 = vshll.u32 %v2961_v51, 16  ;;  %v3115_v55 = vsel %vm1486_vm0, %v3096_v58, %v3114_v24  ;;  %v2920_v50 = vld [vmem:[#allocation2 + $0x178] sm:$0xff] }
 0x45c   :  { %3508 = vmatprep.mubr.bf16.mxu1 %v3061_v59  ;;  %v2910_v59 = vld [vmem:[#allocation2 + $0x188] sm:$0xff]  ;;  %v3128_v52 = vrot.slane %v3126_v1, 3 }
 0x45d   :  { %v3086_v34 = vrot.slane %v3084_v16, 4  ;;  %v2958_v47 = vpack.c.bf16 %v2912_v18, %v2910_v59  ;;  %v3131_v59 = vrot.slane %v3129_v33, 4  ;;  %v2963_v18 = vpack.c.bf16 %v2921_v30, %v2919_v23 }
 0x45f   :  { %v3087_v8 = vor.u32 %v3086_v34, %v3083_v20  ;;  %v3099_v29 = vshrl.u32 %v2958_v47, 16  ;;  %v3132_v20 = vor.u32 %v3131_v59, %v3128_v52  ;;  %v3144_v34 = vshrl.u32 %v2963_v18, 16  ;;  %v2924_v52 = vld [vmem:[#allocation2 + $0x1c8] sm:$0xff]  ;;  %v2927_v59 = vld [vmem:[#allocation2 + $0x1f0] sm:$0xff] }
 0x461   :  { %v3088_v31 = vsel %vm1486_vm0, %v3069_v6, %v3087_v8  ;;  %v3101_v35 = vrot.slane %v3099_v29, 3  ;;  %v2925_v6 = vld [vmem:[#allocation2 + $0x1e8] sm:$0xff]  ;;  %v3133_v1 = vsel %vm1486_vm0, %v3114_v24, %v3132_v20  ;;  %v3146_v33 = vrot.slane %v3144_v34, 3 }
 0x463   :  { %3509 = vmatmul.mubr.bf16.gmra.mxu1 %v3052_v9  ;;  %v3102_v9 = vshll.u32 %v2958_v47, 16  ;;  %v3147_v47 = vshll.u32 %v2963_v18, 16 }
 0x464   :  { %3518 = vmatprep.mubr.bf16.mxu1 %v3079_v5  ;;  %v2914_v5 = vld [vmem:[#allocation2 + $0x218] sm:$0xff] }
 0x465   :  { %v3104_v16 = vrot.slane %v3102_v9, 4  ;;  %v2960_v17 = vpack.c.bf16 %v2916_v60, %v2914_v5  ;;  %v3149_v5 = vrot.slane %v3147_v47, 4  ;;  %v2965_v60 = vpack.c.bf16 %v2925_v6, %v2923_v32 }
 0x467   :  { %v3105_v25 = vor.u32 %v3104_v16, %v3101_v35  ;;  %v3117_v21 = vshrl.u32 %v2960_v17, 16  ;;  %v3150_v35 = vor.u32 %v3149_v5, %v3146_v33  ;;  %v3162_v16 = vshrl.u32 %v2965_v60, 16  ;;  %v2928_v33 = vld [vmem:[#allocation2 + $0x1f8] sm:$0xff]  ;;  %v2931_v5 = vld [vmem:[#allocation2 + $0xe0] sm:$0xff] }
 0x469   :  { %v3106_v51 = vsel %vm1486_vm0, %v3087_v8, %v3105_v25  ;;  %v3119_v29 = vrot.slane %v3117_v21, 3  ;;  %v2929_v8 = vld [vmem:[#allocation2 + $0x148] sm:$0xff]  ;;  %v3151_v34 = vsel %vm1486_vm0, %v3132_v20, %v3150_v35  ;;  %v3164_v47 = vrot.slane %v3162_v16, 3 }
 0x46b   :  { %3519 = vmatmul.mubr.bf16.gmra.mxu1 %v3070_v0  ;;  %v3120_v0 = vshll.u32 %v2960_v17, 16  ;;  %v3165_v17 = vshll.u32 %v2965_v60, 16 }
 0x46c   :  { %3528 = vmatprep.mubr.bf16.mxu1 %v3097_v41  ;;  %v2918_v41 = vld [vmem:[#allocation2 + $0xa0] sm:$0xff] }
 0x46d   :  { %v3122_v9 = vrot.slane %v3120_v0, 4  ;;  %v2962_v58 = vpack.c.bf16 %v2920_v50, %v2918_v41  ;;  %v3167_v41 = vrot.slane %v3165_v17, 4  ;;  %v2967_v50 = vpack.c.bf16 %v2929_v8, %v2927_v59 }
 0x46f   :  { %v3123_v23 = vor.u32 %v3122_v9, %v3119_v29  ;;  %v3135_v30 = vshrl.u32 %v2962_v58, 16  ;;  %v3168_v29 = vor.u32 %v3167_v41, %v3164_v47  ;;  %v3180_v9 = vshrl.u32 %v2967_v50, 16  ;;  %v2932_v47 = vld [vmem:[#allocation2 + $0x50] sm:$0xff]  ;;  %v2935_v41 = vld [vmem:[#allocation2 + $0x80] sm:$0xff] }
 0x471   :  { %v3124_v18 = vsel %vm1486_vm0, %v3105_v25, %v3123_v23  ;;  %v3137_v21 = vrot.slane %v3135_v30, 3  ;;  %v2933_v25 = vld [vmem:[#allocation2 + $0x1d0] sm:$0xff]  ;;  %v3169_v16 = vsel %vm1486_vm0, %v3150_v35, %v3168_v29  ;;  %v3182_v17 = vrot.slane %v3180_v9, 3 }
 0x473   :  { %3529 = vmatmul.mubr.bf16.gmra.mxu1 %v3088_v31  ;;  %v3138_v31 = vshll.u32 %v2962_v58, 16  ;;  %v3183_v58 = vshll.u32 %v2967_v50, 16 }
 0x474   :  { %3538 = vmatprep.mubr.bf16.mxu1 %v3115_v55  ;;  %v2922_v55 = vld [vmem:[#allocation2 + $0x108] sm:$0xff] }
 0x475   :  { %v3140_v0 = vrot.slane %v3138_v31, 4  ;;  %v2964_v24 = vpack.c.bf16 %v2924_v52, %v2922_v55  ;;  %v3185_v55 = vrot.slane %v3183_v58, 4  ;;  %v2969_v52 = vpack.c.bf16 %v2933_v25, %v2931_v5 }
 0x477   :  { %v3141_v32 = vor.u32 %v3140_v0, %v3137_v21  ;;  %v3153_v6 = vshrl.u32 %v2964_v24, 16  ;;  %v3186_v21 = vor.u32 %v3185_v55, %v3182_v17  ;;  %v3198_v0 = vshrl.u32 %v2969_v52, 16  ;;  %v2936_v17 = vld [vmem:[#allocation2 + $0x20] sm:$0xff]  ;;  %v2939_v55 = vld [vmem:[#allocation2 + $0x88] sm:$0xff] }
 0x479   :  { %v3142_v60 = vsel %vm1486_vm0, %v3123_v23, %v3141_v32  ;;  %v3155_v30 = vrot.slane %v3153_v6, 3  ;;  %v2937_v23 = vld [vmem:[#allocation2 + $0x1b8] sm:$0xff]  ;;  %v3187_v9 = vsel %vm1486_vm0, %v3168_v29, %v3186_v21  ;;  %v3200_v58 = vrot.slane %v3198_v0, 3 }
 0x47b   :  { %3539 = vmatmul.mubr.bf16.gmra.mxu1 %v3106_v51  ;;  %v3156_v51 = vshll.u32 %v2964_v24, 16  ;;  %v3201_v24 = vshll.u32 %v2969_v52, 16 }
 0x47c   :  { %3548 = vmatprep.mubr.bf16.mxu1 %v3133_v1  ;;  %v2926_v1 = vld [vmem:[#allocation2 + $0x38] sm:$0xff] }
 0x47d   :  { %v3158_v31 = vrot.slane %v3156_v51, 4  ;;  %v2966_v20 = vpack.c.bf16 %v2928_v33, %v2926_v1  ;;  %v3203_v1 = vrot.slane %v3201_v24, 4  ;;  %v2971_v33 = vpack.c.bf16 %v2937_v23, %v2935_v41 }
 0x47f   :  { %v3159_v59 = vor.u32 %v3158_v31, %v3155_v30  ;;  %v3171_v8 = vshrl.u32 %v2966_v20, 16  ;;  %v3204_v30 = vor.u32 %v3203_v1, %v3200_v58  ;;  %v3216_v31 = vshrl.u32 %v2971_v33, 16  ;;  %v2940_v58 = vld [vmem:[#allocation2 + $0x1e0] sm:$0xff] }
 0x480   :  { %v2943_v1 = vld [vmem:[#allocation2 + $0x60] sm:$0xff] }
 0x481   :  { %v3160_v50 = vsel %vm1486_vm0, %v3141_v32, %v3159_v59  ;;  %v3173_v6 = vrot.slane %v3171_v8, 3  ;;  %v2941_v32 = vld [vmem:[#allocation2 + $0x140] sm:$0xff]  ;;  %v3205_v0 = vsel %vm1486_vm0, %v3186_v21, %v3204_v30  ;;  %v3218_v24 = vrot.slane %v3216_v31, 3 }
 0x483   :  { %3549 = vmatmul.mubr.bf16.gmra.mxu1 %v3124_v18  ;;  %v3174_v18 = vshll.u32 %v2966_v20, 16  ;;  %v3219_v20 = vshll.u32 %v2971_v33, 16 }
 0x484   :  { %3558 = vmatprep.mubr.bf16.mxu1 %v3151_v34  ;;  %v2930_v34 = vld [vmem:[#allocation2 + $0x110] sm:$0xff] }
 0x485   :  { %v3176_v51 = vrot.slane %v3174_v18, 4  ;;  %v2968_v35 = vpack.c.bf16 %v2932_v47, %v2930_v34  ;;  %v3221_v34 = vrot.slane %v3219_v20, 4  ;;  %v2973_v47 = vpack.c.bf16 %v2941_v32, %v2939_v55 }
 0x487   :  { %v3177_v5 = vor.u32 %v3176_v51, %v3173_v6  ;;  %v3189_v25 = vshrl.u32 %v2968_v35, 16  ;;  %v3222_v6 = vor.u32 %v3221_v34, %v3218_v24  ;;  %v3234_v51 = vshrl.u32 %v2973_v47, 16  ;;  %v2944_v24 = vld [vmem:[#allocation2 + $0x180] sm:$0xff]  ;;  %v2947_v34 = vld [vmem:[#allocation2 + $0x1b0] sm:$0x7f] }
 0x489   :  { %v3178_v52 = vsel %vm1486_vm0, %v3159_v59, %v3177_v5  ;;  %v3191_v8 = vrot.slane %v3189_v25, 3  ;;  %v2945_v59 = vld [vmem:[#allocation2 + $0x30] sm:$0xff]  ;;  %v3223_v31 = vsel %vm1486_vm0, %v3204_v30, %v3222_v6  ;;  %v3236_v20 = vrot.slane %v3234_v51, 3 }
 0x48b   :  { %3559 = vmatmul.mubr.bf16.gmra.mxu1 %v3142_v60  ;;  %v3192_v60 = vshll.u32 %v2968_v35, 16  ;;  %v3237_v35 = vshll.u32 %v2973_v47, 16 }
 0x48c   :  { %3568 = vmatprep.mubr.bf16.mxu1 %v3169_v16  ;;  %v2934_v16 = vld [vmem:[#allocation2 + $0x128] sm:$0xff] }
 0x48d   :  { %v3194_v18 = vrot.slane %v3192_v60, 4  ;;  %v2970_v29 = vpack.c.bf16 %v2936_v17, %v2934_v16  ;;  %v3239_v16 = vrot.slane %v3237_v35, 4  ;;  %v2975_v17 = vpack.c.bf16 %v2945_v59, %v2943_v1 }
 0x48f   :  { %v3195_v41 = vor.u32 %v3194_v18, %v3191_v8  ;;  %v3207_v23 = vshrl.u32 %v2970_v29, 16  ;;  %v3240_v8 = vor.u32 %v3239_v16, %v3236_v20  ;;  %v3252_v18 = vshrl.u32 %v2975_v17, 16 }
 0x491   :  { %v3196_v33 = vsel %vm1486_vm0, %v3177_v5, %v3195_v41  ;;  %v3209_v25 = vrot.slane %v3207_v23, 3  ;;  %v3241_v30 = vsel %vm1486_vm0, %v3222_v6, %v3240_v8  ;;  %v3254_v51 = vrot.slane %v3252_v18, 3 }
 0x493   :  { %3569 = vmatmul.mubr.bf16.gmra.mxu1 %v3160_v50  ;;  %v3210_v50 = vshll.u32 %v2970_v29, 16  ;;  %v3255_v29 = vshll.u32 %v2975_v17, 16 }
 0x494   :  { %3578 = vmatprep.mubr.bf16.mxu1 %v3187_v9  ;;  %v2938_v9 = vld [vmem:[#allocation2 + $0x18] sm:$0xff] }
 0x495   :  { %v3212_v60 = vrot.slane %v3210_v50, 4  ;;  %v2972_v21 = vpack.c.bf16 %v2940_v58, %v2938_v9  ;;  %v3257_v35 = vrot.slane %v3255_v29, 4  ;;  %v2977_v9 = vpack.c.bf16 %v2947_v34, %v2947_v34 }
 0x497   :  { %v3213_v55 = vor.u32 %v3212_v60, %v3209_v25  ;;  %v3225_v32 = vshrl.u32 %v2972_v21, 16  ;;  %v3270_v25 = vshrl.u32 %v2977_v9, 16  ;;  %v3273_v60 = vshll.u32 %v2977_v9, 16 }
 0x499   :  { %v3214_v5 = vsel %vm1486_vm0, %v3195_v41, %v3213_v55  ;;  %v3227_v47 = vrot.slane %v3225_v32, 3  ;;  %v3272_v6 = vrot.slane %v3270_v25, 3  ;;  %v3275_v32 = vrot.slane %v3273_v60, 4 }
 0x49b   :  { %3579 = vmatmul.mubr.bf16.gmra.mxu1 %v3178_v52  ;;  %v3228_v52 = vshll.u32 %v2972_v21, 16  ;;  %v2946_v21 = vld [vmem:[#allocation2 + $0x150] sm:$0x7f] }
 0x49c   :  { %3588 = vmatprep.mubr.bf16.mxu1 %v3205_v0  ;;  %v2942_v0 = vld [vmem:[#allocation2 + $0xf8] sm:$0xff]  ;;  %v2976_v16 = vpack.c.bf16 %v2946_v21, %v2946_v21 }
 0x49d   :  { %v3230_v23 = vrot.slane %v3228_v52, 4  ;;  %v2974_v50 = vpack.c.bf16 %v2944_v24, %v2942_v0  ;;  %v3276_v0 = vor.u32 %v3275_v32, %v3272_v6 }
 0x49e   :  { %v3261_v18 = vshrl.u32 %v2976_v16, 16  ;;  %v3264_v29 = vshll.u32 %v2976_v16, 16 }
 0x49f   :  { %v3231_v58 = vor.u32 %v3230_v23, %v3227_v47  ;;  %v3243_v1 = vshrl.u32 %v2974_v50, 16  ;;  %v3246_v59 = vshll.u32 %v2974_v50, 16 }
 0x4a0   :  { %v3263_v34 = vrot.slane %v3261_v18, 3 }
 0x4a1   :  { %v3245_v41 = vrot.slane %v3243_v1, 3  ;;  %v3248_v20 = vrot.slane %v3246_v59, 4 }
 0x4a3   :  { %3589 = vmatmul.mubr.bf16.gmra.mxu1 %v3196_v33  ;;  %v3258_v33 = vor.u32 %v3257_v35, %v3254_v51  ;;  %v3249_v52 = vor.u32 %v3248_v20, %v3245_v41 }
 0x4a4   :  { %3598 = vmatprep.mubr.bf16.mxu1 %v3223_v31  ;;  %v3232_v31 = vsel %vm1486_vm0, %v3213_v55, %v3231_v58 }
 0x4a5   :  { %v3259_v17 = vsel %vm1486_vm0, %v3240_v8, %v3258_v33  ;;  %v3250_v24 = vsel %vm1486_vm0, %v3231_v58, %v3249_v52  ;;  %v3277_v47 = vsel %vm1486_vm0, %v3258_v33, %v3276_v0 }
 0x4ab   :  { %3599 = vmatmul.mubr.bf16.gmra.mxu1 %v3214_v5  ;;  %v3266_v5 = vrot.slane %v3264_v29, 4 }
 0x4ac   :  { %3608 = vmatprep.mubr.bf16.mxu1 %v3241_v30 }
 0x4ad   :  { %v3267_v55 = vor.u32 %v3266_v5, %v3263_v34 }
 0x4af   :  { %v3268_v23 = vsel %vm1486_vm0, %v3249_v52, %v3267_v55 }
 0x4b3   :  { %3609 = vmatmul.mubr.bf16.gmra.mxu1 %v3232_v31 }
 0x4b4   :  { %3618 = vmatprep.mubr.bf16.mxu1 %v3259_v17 }
 0x4bb   :  { %3619 = vmatmul.mubr.bf16.gmra.mxu1 %v3250_v24 }
 0x4bc   :  { %3628 = vmatprep.mubr.bf16.mxu1 %v3277_v47 }
 0x4c3   :  { %3629 = vmatmul.mubr.bf16.gmra.mxu1 %v3268_v23 }
 0x51b   :  { %v3500_v8 = vpop.f32.mrf.mxu1 }
 0x51c   :  { %v11218_v50 = vadd.f32 %v3500_v8, %v11018_v3 }
 0x51d   :  { %v3502_v30 = vpop.f32.mrf.mxu1 }
 0x51e   :  { %v11221_v51 = vadd.f32 %v3502_v30, %v11021_v53 }
 0x51f   :  { %v3504_v35 = vpop.f32.mrf.mxu1 }
 0x520   :  { %v11224_v9 = vadd.f32 %v3504_v35, %v11024_v11 }
 0x521   :  { %v3506_v58 = vpop.f32.mrf.mxu1 }
 0x522   :  { %v11227_v1 = vadd.f32 %v3506_v58, %v11027_v13 }
 0x523   :  { %v3510_v59 = vpop.f32.mrf.mxu1 }
 0x524   :  { %v11230_v33 = vadd.f32 %v3510_v59, %v11030_v40 }
 0x525   :  { %v3512_v25 = vpop.f32.mrf.mxu1 }
 0x526   :  { %v11233_v3 = vadd.f32 %v3512_v25, %v11033_v42 }
 0x527   :  { %v3514_v60 = vpop.f32.mrf.mxu1 }
 0x528   :  { %v11236_v53 = vadd.f32 %v3514_v60, %v11036_v7 }
 0x529   :  { %v3516_v21 = vpop.f32.mrf.mxu1 }
 0x52a   :  { %v11239_v11 = vadd.f32 %v3516_v21, %v11039_v2 }
 0x52b   :  { %v3520_v31 = vpop.f32.mrf.mxu1 }
 0x52c   :  { %v11242_v13 = vadd.f32 %v3520_v31, %v11042_v10 }
 0x52d   :  { %v3522_v41 = vpop.f32.mrf.mxu1 }
 0x52e   :  { %v11245_v40 = vadd.f32 %v3522_v41, %v11045_v62 }
 0x52f   :  { %v3524_v20 = vpop.f32.mrf.mxu1 }
 0x530   :  { %v11248_v42 = vadd.f32 %v3524_v20, %v11048_v28  ;;  %v13804_v20 = vld [vmem:[#allocation51_spill] sm:$0xff] }
 0x531   :  { %v3526_v16 = vpop.f32.mrf.mxu1 }
 0x532   :  { %v11251_v7 = vadd.f32 %v3526_v16, %v11051_v4 }
 0x533   :  { %v3530_v17 = vpop.f32.mrf.mxu1 }
 0x534   :  { %v11254_v2 = vadd.f32 %v3530_v17, %v11054_v36  ;;  %v13805_v17 = vld [vmem:[#allocation52_spill] sm:$0xff] }
 0x535   :  { %v3532_v6 = vpop.f32.mrf.mxu1 }
 0x536   :  { %v11257_v10 = vadd.f32 %v3532_v6, %v11057_v14 }
 0x537   :  { %v3534_v32 = vpop.f32.mrf.mxu1 }
 0x538   :  { %v11260_v62 = vadd.f32 %v3534_v32, %v11060_v54  ;;  %v13806_v32 = vld [vmem:[#allocation55_spill] sm:$0xff] }
 0x539   :  { %v3536_v52 = vpop.f32.mrf.mxu1 }
 0x53a   :  { %v11263_v28 = vadd.f32 %v3536_v52, %v11063_v39 }
 0x53b   :  { %v3540_v18 = vpop.f32.mrf.mxu1 }
 0x53c   :  { %v11266_v4 = vadd.f32 %v3540_v18, %v11066_v26  ;;  %v13807_v18 = vld [vmem:[#allocation56_spill] sm:$0xff] }
 0x53d   :  { %v3542_v29 = vpop.f32.mrf.mxu1 }
 0x53e   :  { %v11269_v36 = vadd.f32 %v3542_v29, %v11069_v63 }
 0x53f   :  { %v3544_v0 = vpop.f32.mrf.mxu1 }
 0x540   :  { %v11272_v14 = vadd.f32 %v3544_v0, %v11072_v12  ;;  %v13808_v0 = vld [vmem:[#allocation92_spill] sm:$0xff] }
 0x541   :  { %v3546_v24 = vpop.f32.mrf.mxu1 }
 0x542   :  { %v11275_v54 = vadd.f32 %v3546_v24, %v11075_v48 }
 0x543   :  { %v3550_v34 = vpop.f32.mrf.mxu1 }
 0x544   :  { %v11278_v39 = vadd.f32 %v3550_v34, %v11078_v44  ;;  %v13809_v34 = vld [vmem:[#allocation93_spill] sm:$0xff] }
 0x545   :  { %v3552_v5 = vpop.f32.mrf.mxu1 }
 0x546   :  { %v11281_v26 = vadd.f32 %v3552_v5, %v11081_v19 }
 0x547   :  { %v3554_v47 = vpop.f32.mrf.mxu1 }
 0x548   :  { %v11284_v63 = vadd.f32 %v3554_v47, %v11084_v46 }
 0x549   :  { %v3556_v55 = vpop.f32.mrf.mxu1 }
 0x54a   :  { %v11287_v12 = vadd.f32 %v3556_v55, %v11087_v61  ;;  %v13810_v55 = vld [vmem:[#allocation94_spill] sm:$0xff] }
 0x54b   :  { %v3560_v23 = vpop.f32.mrf.mxu1 }
 0x54c   :  { %v11290_v48 = vadd.f32 %v3560_v23, %v11090_v37 }
 0x54d   :  { %v3562_v8 = vpop.f32.mrf.mxu1 }
 0x54e   :  { %v11293_v44 = vadd.f32 %v3562_v8, %v11093_v56 }
 0x54f   :  { %v3564_v30 = vpop.f32.mrf.mxu1 }
 0x550   :  { %v11296_v19 = vadd.f32 %v3564_v30, %v11096_v43  ;;  %v13811_v30 = vld [vmem:[#allocation95_spill] sm:$0xff] }
 0x551   :  { %v3566_v35 = vpop.f32.mrf.mxu1 }
 0x552   :  { %v11299_v46 = vadd.f32 %v3566_v35, %v11099_v22 }
 0x553   :  { %v3570_v58 = vpop.f32.mrf.mxu1 }
 0x554   :  { %v11302_v61 = vadd.f32 %v3570_v58, %v11102_v57 }
 0x555   :  { %v3572_v59 = vpop.f32.mrf.mxu1 }
 0x556   :  { %v11305_v37 = vadd.f32 %v3572_v59, %v11105_v38  ;;  %v13812_v59 = vld [vmem:[#allocation78_spill] sm:$0xff] }
 0x557   :  { %v3574_v25 = vpop.f32.mrf.mxu1 }
 0x558   :  { %v11308_v56 = vadd.f32 %v3574_v25, %v11108_v15 }
 0x559   :  { %v3576_v60 = vpop.f32.mrf.mxu1 }
 0x55a   :  { %v11311_v43 = vadd.f32 %v3576_v60, %v11111_v45 }
 0x55b   :  { %v3580_v21 = vpop.f32.mrf.mxu1 }
 0x55c   :  { %v11314_v22 = vadd.f32 %v3580_v21, %v11114_v49  ;;  %v13813_v21 = vld [vmem:[#allocation57_spill] sm:$0xff] }
 0x55d   :  { %v3582_v31 = vpop.f32.mrf.mxu1 }
 0x55e   :  { %v11317_v57 = vadd.f32 %v3582_v31, %v11117_v27 }
 0x55f   :  { %v3584_v41 = vpop.f32.mrf.mxu1 }
 0x560   :  { %v11320_v38 = vadd.f32 %v3584_v41, %v13804_v20  ;;  %v13814_v20 = vld [vmem:[#allocation79_spill] sm:$0xff] }
 0x561   :  { %v3586_v16 = vpop.f32.mrf.mxu1 }
 0x562   :  { %v11323_v15 = vadd.f32 %v3586_v16, %v13805_v17 }
 0x563   :  { %v3590_v6 = vpop.f32.mrf.mxu1 }
 0x564   :  { %v11326_v45 = vadd.f32 %v3590_v6, %v13806_v32  ;;  %v13815_v6 = vld [vmem:[#allocation59_spill] sm:$0xff] }
 0x565   :  { %v3592_v52 = vpop.f32.mrf.mxu1 }
 0x566   :  { %v11329_v49 = vadd.f32 %v3592_v52, %v13807_v18  ;;  %v13817_v18 = vld [vmem:[#allocation80_spill] sm:$0xff] }
 0x567   :  { %v3594_v29 = vpop.f32.mrf.mxu1 }
 0x568   :  { %v11332_v27 = vadd.f32 %v3594_v29, %v13808_v0 }
 0x569   :  { %v3596_v24 = vpop.f32.mrf.mxu1 }
 0x56a   :  { %v11335_v5 = vadd.f32 %v3596_v24, %v13809_v34  ;;  %v13819_v24 = vld [vmem:[#allocation60_spill] sm:$0xff] }
 0x56b   :  { %v3600_v47 = vpop.f32.mrf.mxu1 }
 0x56c   :  { %v11338_v23 = vadd.f32 %v3600_v47, %v13810_v55  ;;  %v13821_v55 = vld [vmem:[#allocation81_spill] sm:$0xff] }
 0x56d   :  { %v3602_v8 = vpop.f32.mrf.mxu1 }
 0x56e   :  { %v11341_v35 = vadd.f32 %v3602_v8, %v13811_v30 }
 0x56f   :  { %v3604_v58 = vpop.f32.mrf.mxu1 }
 0x570   :  { %v11344_v25 = vadd.f32 %v3604_v58, %v13812_v59  ;;  %v13823_v58 = vld [vmem:[#allocation61_spill] sm:$0xff] }
 0x571   :  { %v3606_v60 = vpop.f32.mrf.mxu1 }
 0x572   :  { %v11347_v31 = vadd.f32 %v3606_v60, %v13813_v21  ;;  %v13825_v21 = vld [vmem:[#allocation96_spill] sm:$0xff] }
 0x573   :  { %v3610_v41 = vpop.f32.mrf.mxu1 }
 0x574   :  { %v11350_v16 = vadd.f32 %v3610_v41, %v13814_v20 }
 0x575   :  { %v3612_v17 = vpop.f32.mrf.mxu1 }
 0x576   :  { %v11353_v32 = vadd.f32 %v3612_v17, %v13815_v6  ;;  %v13827_v17 = vld [vmem:[#allocation97_spill] sm:$0xff] }
 0x577   :  { %v3614_v52 = vpop.f32.mrf.mxu1 }
 0x578   :  { %13816 = vst [vmem:[#allocation83_spill] sm:$0xff] %v11353_v32  ;;  %v11356_v29 = vadd.f32 %v3614_v52, %v13817_v18  ;;  %v13829_v18 = vld [vmem:[#allocation98_spill] sm:$0xff] }
 0x579   :  { %v3616_v0 = vpop.f32.mrf.mxu1 }
 0x57a   :  { %13818 = vst [vmem:[#allocation64_spill] sm:$0xff] %v11356_v29  ;;  %v11359_v34 = vadd.f32 %v3616_v0, %v13819_v24 }
 0x57b   :  { %v3620_v47 = vpop.f32.mrf.mxu1 }
 0x57c   :  { %13820 = vst [vmem:[#allocation84_spill] sm:$0xff] %v11359_v34  ;;  %v11362_v8 = vadd.f32 %v3620_v47, %v13821_v55  ;;  %v13831_v34 = vld [vmem:[#allocation99_spill] sm:$0xff] }
 0x57d   :  { %v3622_v30 = vpop.f32.mrf.mxu1 }
 0x57e   :  { %13822 = vst [vmem:[#allocation66_spill] sm:$0xff] %v11362_v8  ;;  %v11365_v59 = vadd.f32 %v3622_v30, %v13823_v58  ;;  %v13833_v8 = vld [vmem:[#allocation82_spill] sm:$0xff] }
 0x57f   :  { %v3624_v60 = vpop.f32.mrf.mxu1 }
 0x580   :  { %13824 = vst [vmem:[#allocation85_spill] sm:$0xff] %v11365_v59  ;;  %v11368_v41 = vadd.f32 %v3624_v60, %v13825_v21  ;;  %v13835_v59 = vld [vmem:[#allocation63_spill] sm:$0xff] }
 0x581   :  { %v3626_v20 = vpop.f32.mrf.mxu1 }
 0x582   :  { %13826 = vst [vmem:[#allocation67_spill] sm:$0xff] %v11368_v41  ;;  %v11371_v6 = vadd.f32 %v3626_v20, %v13827_v17 }
 0x583   :  { %v3630_v52 = vpop.f32.mrf.mxu1 }
 0x584   :  { %13828 = vst [vmem:[#allocation100_spill] sm:$0xff] %v11371_v6  ;;  %v11374_v0 = vadd.f32 %v3630_v52, %v13829_v18 }
 0x585   :  { %v3632_v24 = vpop.f32.mrf.mxu1 }
 0x586   :  { %13830 = vst [vmem:[#allocation101_spill] sm:$0xff] %v11374_v0  ;;  %v11377_v47 = vadd.f32 %v3632_v24, %v13831_v34 }
 0x587   :  { %v3634_v55 = vpop.f32.mrf.mxu1 }
 0x588   :  { %13832 = vst [vmem:[#allocation102_spill] sm:$0xff] %v11377_v47  ;;  %v11380_v30 = vadd.f32 %v3634_v55, %v13833_v8 }
 0x589   :  { %v3636_v58 = vpop.f32.mrf.mxu1 }
 0x58a   :  { %13834 = vst [vmem:[#allocation103_spill] sm:$0xff] %v11380_v30  ;;  %v11383_v60 = vadd.f32 %v3636_v58, %v13835_v59 }
 0x58c   :  { %13836 = vst [vmem:[#allocation86_spill] sm:$0xff] %v11383_v60 }
 0x58d   :  { %9143 = dma.done.wait [#allocation4 + $0x4], 4096 }
 0x58e   :  { %9144 = vsyncadd [#allocation4 + $0x4], 4294963200  ;;  %v8687_v21 = vld [vmem:[#allocation3 + $0x474] ss:$8 sps:$4 sm:$0xff]   ;;  %v8689_v20 = vld [vmem:[#allocation3 + $0x470] ss:$8 sps:$4 sm:$0xff]  }
 0x58f   :  { %3973 = vmatprep.subr.bf16.mxu0 %v8687_v21  ;;  %v8690_v17 = vld [vmem:[#allocation3 + $0x464] ss:$8 sps:$4 sm:$0xff]   ;;  %v8692_v52 = vld [vmem:[#allocation3 + $0x460] ss:$8 sps:$4 sm:$0xff]   ;;  %v8693_v18 = vld [vmem:[#allocation3 + $0x454] ss:$8 sps:$4 sm:$0xff]  }
 0x590   :  { %3974 = vmatpush1.bf16.msra.mxu0 %v8689_v20  ;;  %v8695_v34 = vld [vmem:[#allocation3 + $0x450] ss:$8 sps:$4 sm:$0xff]   ;;  %v8696_v24 = vld [vmem:[#allocation3 + $0x444] ss:$8 sps:$4 sm:$0xff]   ;;  %v8698_v8 = vld [vmem:[#allocation3 + $0x440] ss:$8 sps:$4 sm:$0xff]  }
 0x591   :  { %3975 = vmatprep.subr.bf16.mxu0 %v8690_v17  ;;  %v8699_v55 = vld [vmem:[#allocation3 + $0x434] ss:$8 sps:$4 sm:$0xff]   ;;  %v8701_v59 = vld [vmem:[#allocation3 + $0x430] ss:$8 sps:$4 sm:$0xff]   ;;  %v8702_v58 = vld [vmem:[#allocation3 + $0x424] ss:$8 sps:$4 sm:$0xff]  }
 0x592   :  { %v8704_v60 = vld [vmem:[#allocation3 + $0x420] ss:$8 sps:$4 sm:$0xff]   ;;  %v8705_v21 = vld [vmem:[#allocation3 + $0x414] ss:$8 sps:$4 sm:$0xff]   ;;  %v8719_v47 = vld [vmem:[#allocation3 + $0x4d0] ss:$8 sps:$4 sm:$0xff]  }
 0x593   :  { %v3698_v20 = vld [vmem:[#allocation2 + $0x138] sm:$0xff]  ;;  %v3700_v30 = vld [vmem:[#allocation2 + $0xf0] sm:$0xff]  ;;  %v3712_v29 = vld [vmem:[#allocation2 + $0xa8] sm:$0xff] }
 0x594   :  { %3976 = vmatpush1.bf16.msra.mxu0 %v8692_v52  ;;  %v3754_v17 = vpack.c.bf16 %v3700_v30, %v3698_v20  ;;  %v8707_v52 = vld [vmem:[#allocation3 + $0x410] ss:$8 sps:$4 sm:$0xff]   ;;  %v8720_v30 = vld [vmem:[#allocation3 + $0x4c4] ss:$8 sps:$4 sm:$0xff]  }
 0x595   :  { %3977 = vmatprep.subr.bf16.mxu0 %v8693_v18  ;;  %v8708_v18 = vld [vmem:[#allocation3 + $0x404] ss:$8 sps:$4 sm:$0xff]   ;;  %v8725_v20 = vld [vmem:[#allocation3 + $0x4b0] ss:$8 sps:$4 sm:$0xff]  }
 0x596   :  { %4005 = vmatprep.mubr.bf16.mxu0 %v3754_v17  ;;  %v8726_v17 = vld [vmem:[#allocation3 + $0x4a4] ss:$8 sps:$4 sm:$0xff]   ;;  %v3708_v0 = vld [vmem:[#allocation2 + $0x118] sm:$0xff] }
 0x597   :  { %v3710_v41 = vld [vmem:[#allocation2 + $0x198] sm:$0xff] }
 0x598   :  { %3978 = vmatpush1.bf16.msra.mxu0 %v8695_v34  ;;  %v8710_v34 = vld [vmem:[#allocation3 + $0x400] ss:$8 sps:$4 sm:$0xff]   ;;  %v3760_v32 = vpack.c.bf16 %v3712_v29, %v3710_v41  ;;  %v3719_v29 = vld [vmem:[#allocation2 + $0x218] sm:$0xff]  ;;  %v3722_v41 = vld [vmem:[#allocation2 + $0x70] sm:$0xff] }
 0x599   :  { %3979 = vmatprep.subr.bf16.mxu0 %v8696_v24  ;;  %v8711_v24 = vld [vmem:[#allocation3 + $0x4f4] ss:$8 sps:$4 sm:$0xff]  }
 0x59c   :  { %3980 = vmatpush1.bf16.msra.mxu0 %v8698_v8  ;;  %v8713_v8 = vld [vmem:[#allocation3 + $0x4f0] ss:$8 sps:$4 sm:$0xff]  }
 0x59d   :  { %3981 = vmatprep.subr.bf16.mxu0 %v8699_v55  ;;  %v8714_v55 = vld [vmem:[#allocation3 + $0x4e4] ss:$8 sps:$4 sm:$0xff]  }
 0x5a0   :  { %3982 = vmatpush1.bf16.msra.mxu0 %v8701_v59  ;;  %v8716_v59 = vld [vmem:[#allocation3 + $0x4e0] ss:$8 sps:$4 sm:$0xff]  }
 0x5a1   :  { %3983 = vmatprep.subr.bf16.mxu0 %v8702_v58  ;;  %v8717_v58 = vld [vmem:[#allocation3 + $0x4d4] ss:$8 sps:$4 sm:$0xff]  }
 0x5a4   :  { %3984 = vmatpush1.bf16.msra.mxu0 %v8704_v60  ;;  %v8722_v60 = vld [vmem:[#allocation3 + $0x4c0] ss:$8 sps:$4 sm:$0xff]  }
 0x5a5   :  { %3985 = vmatprep.subr.bf16.mxu0 %v8705_v21  ;;  %v8723_v21 = vld [vmem:[#allocation3 + $0x4b4] ss:$8 sps:$4 sm:$0xff]  }
 0x5a8   :  { %3986 = vmatpush1.bf16.msra.mxu0 %v8707_v52  ;;  %v8728_v52 = vld [vmem:[#allocation3 + $0x4a0] ss:$8 sps:$4 sm:$0xff]  }
 0x5a9   :  { %3987 = vmatprep.subr.bf16.mxu0 %v8708_v18  ;;  %v8729_v18 = vld [vmem:[#allocation3 + $0x494] ss:$8 sps:$4 sm:$0xff]  }
 0x5ac   :  { %3988 = vmatpush1.bf16.msra.mxu0 %v8710_v34  ;;  %v8731_v34 = vld [vmem:[#allocation3 + $0x490] ss:$8 sps:$4 sm:$0xff]  }
 0x5ad   :  { %3989 = vmatprep.subr.bf16.mxu0 %v8711_v24  ;;  %v8732_v24 = vld [vmem:[#allocation3 + $0x484] ss:$8 sps:$4 sm:$0xff]  }
 0x5b0   :  { %3990 = vmatpush2.bf16.msra.mxu0 %v8713_v8  ;;  %v8734_v8 = vld [vmem:[#allocation3 + $0x480] ss:$8 sps:$4 sm:$0xff]  }
 0x5b1   :  { %3991 = vmatprep.subr.bf16.mxu0 %v8714_v55  ;;  %v3697_v55 = vld [vmem:[#allocation2 + $0x90] sm:$0xff] }
 0x5b4   :  { %3992 = vmatpush2.bf16.msra.mxu0 %v8716_v59  ;;  %v3699_v59 = vld [vmem:[#allocation2 + $0xe8] sm:$0xff] }
 0x5b5   :  { %3993 = vmatprep.subr.bf16.mxu0 %v8717_v58  ;;  %v3704_v58 = vld [vmem:[#allocation2 + $0x170] sm:$0xff] }
 0x5b8   :  { %3994 = vmatpush2.bf16.msra.mxu0 %v8719_v47  ;;  %v3702_v47 = vld [vmem:[#allocation2] sm:$0xff] }
 0x5b9   :  { %3995 = vmatprep.subr.bf16.mxu0 %v8720_v30  ;;  %v3753_v30 = vpack.c.bf16 %v3699_v59, %v3697_v55  ;;  %v3711_v55 = vld [vmem:[#allocation2 + $0x68] sm:$0xff] }
 0x5ba   :  { %v3714_v59 = vld [vmem:[#allocation2 + $0x208] sm:$0xff] }
 0x5bc   :  { %3996 = vmatpush2.bf16.msra.mxu0 %v8722_v60  ;;  %v3756_v60 = vpack.c.bf16 %v3704_v58, %v3702_v47  ;;  %v3716_v47 = vld [vmem:[#allocation2 + $0x1c0] sm:$0xff] }
 0x5bd   :  { %3997 = vmatprep.subr.bf16.mxu0 %v8723_v21  ;;  %v3701_v21 = vld [vmem:[#allocation2 + $0x1d8] sm:$0xff] }
 0x5c0   :  { %3998 = vmatpush2.bf16.msra.mxu0 %v8725_v20  ;;  %v3703_v20 = vld [vmem:[#allocation2 + $0x160] sm:$0xff] }
 0x5c1   :  { %3999 = vmatprep.subr.bf16.mxu0 %v8726_v17  ;;  %v3706_v17 = vld [vmem:[#allocation2 + $0x1a0] sm:$0xff] }
 0x5c2   :  { %v3758_v6 = vpack.c.bf16 %v3708_v0, %v3706_v17  ;;  %v3715_v0 = vld [vmem:[#allocation2 + $0x188] sm:$0xff] }
 0x5c4   :  { %4000 = vmatpush2.bf16.msra.mxu0 %v8728_v52  ;;  %v3755_v52 = vpack.c.bf16 %v3703_v20, %v3701_v21  ;;  %v3718_v21 = vld [vmem:[#allocation2 + $0x158] sm:$0xff] }
 0x5c5   :  { %4001 = vmatprep.subr.bf16.mxu0 %v8729_v18  ;;  %v3705_v18 = vld [vmem:[#allocation2 + $0x120] sm:$0xff] }
 0x5c8   :  { %4002 = vmatpush2.bf16.msra.mxu0 %v8731_v34  ;;  %v3707_v34 = vld [vmem:[#allocation2 + $0xb0] sm:$0xff] }
 0x5c9   :  { %4003 = vmatprep.subr.bf16.mxu0 %v8732_v24  ;;  %v3757_v24 = vpack.c.bf16 %v3707_v34, %v3705_v18 }
 0x5cc   :  { %4004 = vmatpush2.bf16.msra.mxu0 %v8734_v8  ;;  %v3709_v8 = vld [vmem:[#allocation2 + $0x40] sm:$0xff] }
 0x5cd   :  { %v3759_v58 = vpack.c.bf16 %v3711_v55, %v3709_v8  ;;  %v3723_v8 = vld [vmem:[#allocation2 + $0xa0] sm:$0xff]  ;;  %v3726_v55 = vld [vmem:[#allocation2 + $0x210] sm:$0xff] }
 0x5cf   :  { %4006 = vmatmul.mubr.bf16.vlgmr.msra.gmra.mxu0 %v3753_v30  ;;  %v3762_v30 = vpack.c.bf16 %v3716_v47, %v3714_v59  ;;  %v3728_v59 = vld [vmem:[#allocation2 + $0x1a8] sm:$0xff] }
 0x5d0   :  { %4015 = vmatprep.mubr.bf16.mxu0 %v3756_v60  ;;  %v3713_v60 = vld [vmem:[#allocation2 + $0x168] sm:$0xff] }
 0x5d1   :  { %v3761_v20 = vpack.c.bf16 %v3715_v0, %v3713_v60  ;;  %v3727_v60 = vld [vmem:[#allocation2 + $0x108] sm:$0xff] }
 0x5d2   :  { %v3730_v0 = vld [vmem:[#allocation2 + $0x1e8] sm:$0xff] }
 0x5d7   :  { %4016 = vmatmul.mubr.bf16.gmra.mxu0 %v3755_v52  ;;  %v3717_v52 = vld [vmem:[#allocation2 + $0x78] sm:$0xff] }
 0x5d8   :  { %4025 = vmatprep.mubr.bf16.mxu0 %v3758_v6  ;;  %v3720_v6 = vld [vmem:[#allocation2 + $0x190] sm:$0xff]  ;;  %v3763_v18 = vpack.c.bf16 %v3719_v29, %v3717_v52  ;;  %v3731_v52 = vld [vmem:[#allocation2 + $0x38] sm:$0xff]  ;;  %v3734_v29 = vld [vmem:[#allocation2 + $0x148] sm:$0xff] }
 0x5d9   :  { %v3764_v17 = vpack.c.bf16 %v3720_v6, %v3718_v21  ;;  %v3732_v21 = vld [vmem:[#allocation2 + $0x1f0] sm:$0xff] }
 0x5df   :  { %4026 = vmatmul.mubr.bf16.gmra.mxu0 %v3757_v24  ;;  %v3721_v24 = vld [vmem:[#allocation2 + $0xd8] sm:$0xff] }
 0x5e0   :  { %4035 = vmatprep.mubr.bf16.mxu0 %v3760_v32  ;;  %v3724_v32 = vld [vmem:[#allocation2 + $0x58] sm:$0xff]  ;;  %v3765_v47 = vpack.c.bf16 %v3723_v8, %v3721_v24  ;;  %v3735_v24 = vld [vmem:[#allocation2 + $0x110] sm:$0xff] }
 0x5e1   :  { %v3766_v34 = vpack.c.bf16 %v3724_v32, %v3722_v41  ;;  %v3736_v41 = vld [vmem:[#allocation2 + $0xe0] sm:$0xff]  ;;  %v3738_v8 = vld [vmem:[#allocation2 + $0x1d0] sm:$0xff] }
 0x5e7   :  { %4036 = vmatmul.mubr.bf16.gmra.mxu0 %v3759_v58  ;;  %v3768_v58 = vpack.c.bf16 %v3728_v59, %v3726_v55  ;;  %v3740_v55 = vld [vmem:[#allocation2 + $0x80] sm:$0xff] }
 0x5e8   :  { %4045 = vmatprep.mubr.bf16.mxu0 %v3762_v30  ;;  %v3725_v30 = vld [vmem:[#allocation2 + $0x178] sm:$0xff] }
 0x5e9   :  { %v3767_v6 = vpack.c.bf16 %v3727_v60, %v3725_v30  ;;  %v3739_v30 = vld [vmem:[#allocation2 + $0x128] sm:$0xff]  ;;  %v3742_v60 = vld [vmem:[#allocation2 + $0x1b8] sm:$0xff] }
 0x5ef   :  { %4046 = vmatmul.mubr.bf16.gmra.mxu0 %v3761_v20  ;;  %v3770_v20 = vpack.c.bf16 %v3732_v21, %v3730_v0  ;;  %v3744_v0 = vld [vmem:[#allocation2 + $0x88] sm:$0xff] }
 0x5f0   :  { %4055 = vmatprep.mubr.bf16.mxu0 %v3764_v17  ;;  %v3729_v17 = vld [vmem:[#allocation2 + $0x1c8] sm:$0xff] }
 0x5f1   :  { %v3769_v32 = vpack.c.bf16 %v3731_v52, %v3729_v17  ;;  %v3743_v17 = vld [vmem:[#allocation2 + $0x18] sm:$0xff]  ;;  %v3746_v52 = vld [vmem:[#allocation2 + $0x140] sm:$0xff] }
 0x5f7   :  { %4056 = vmatmul.mubr.bf16.gmra.mxu0 %v3763_v18  ;;  %v3772_v18 = vpack.c.bf16 %v3736_v41, %v3734_v29  ;;  %v3748_v29 = vld [vmem:[#allocation2 + $0x60] sm:$0xff] }
 0x5f8   :  { %4065 = vmatprep.mubr.bf16.mxu0 %v3766_v34  ;;  %v3733_v34 = vld [vmem:[#allocation2 + $0x1f8] sm:$0xff] }
 0x5f9   :  { %v3771_v59 = vpack.c.bf16 %v3735_v24, %v3733_v34  ;;  %v3747_v34 = vld [vmem:[#allocation2 + $0xf8] sm:$0xff]  ;;  %v3750_v24 = vld [vmem:[#allocation2 + $0x30] sm:$0xff] }
 0x5ff   :  { %4066 = vmatmul.mubr.bf16.gmra.mxu0 %v3765_v47  ;;  %v3774_v47 = vpack.c.bf16 %v3740_v55, %v3738_v8  ;;  %v3752_v8 = vld [vmem:[#allocation2 + $0x1b0] sm:$0xff] }
 0x600   :  { %4075 = vmatprep.mubr.bf16.mxu0 %v3768_v58  ;;  %v3737_v58 = vld [vmem:[#allocation2 + $0x50] sm:$0xff] }
 0x601   :  { %v3773_v21 = vpack.c.bf16 %v3739_v30, %v3737_v58  ;;  %v3751_v58 = vld [vmem:[#allocation2 + $0x150] sm:$0xff] }
 0x607   :  { %4076 = vmatmul.mubr.bf16.gmra.mxu0 %v3767_v6  ;;  %v3776_v6 = vpack.c.bf16 %v3744_v0, %v3742_v60 }
 0x608   :  { %4085 = vmatprep.mubr.bf16.mxu0 %v3770_v20  ;;  %v3741_v20 = vld [vmem:[#allocation2 + $0x20] sm:$0xff] }
 0x609   :  { %v3775_v41 = vpack.c.bf16 %v3743_v17, %v3741_v20 }
 0x60f   :  { %4086 = vmatmul.mubr.bf16.gmra.mxu0 %v3769_v32  ;;  %v3778_v32 = vpack.c.bf16 %v3748_v29, %v3746_v52 }
 0x610   :  { %4095 = vmatprep.mubr.bf16.mxu0 %v3772_v18  ;;  %v3745_v18 = vld [vmem:[#allocation2 + $0x1e0] sm:$0xff] }
 0x611   :  { %v3777_v55 = vpack.c.bf16 %v3747_v34, %v3745_v18 }
 0x617   :  { %4096 = vmatmul.mubr.bf16.gmra.mxu0 %v3771_v59  ;;  %v3780_v59 = vpack.c.bf16 %v3752_v8, %v3750_v24 }
 0x618   :  { %4105 = vmatprep.mubr.bf16.mxu0 %v3774_v47  ;;  %v3749_v47 = vld [vmem:[#allocation2 + $0x180] sm:$0xff] }
 0x619   :  { %v3779_v30 = vpack.c.bf16 %v3751_v58, %v3749_v47 }
 0x61f   :  { %4106 = vmatmul.mubr.bf16.gmra.mxu0 %v3773_v21 }
 0x620   :  { %4115 = vmatprep.mubr.bf16.mxu0 %v3776_v6 }
 0x627   :  { %4116 = vmatmul.mubr.bf16.gmra.mxu0 %v3775_v41 }
 0x628   :  { %4125 = vmatprep.mubr.bf16.mxu0 %v3778_v32 }
 0x62f   :  { %4126 = vmatmul.mubr.bf16.gmra.mxu0 %v3777_v55 }
 0x630   :  { %4135 = vmatprep.mubr.bf16.mxu0 %v3780_v59 }
 0x637   :  { %4136 = vmatmul.mubr.bf16.gmra.mxu0 %v3779_v30 }
 0x68f   :  { %v4007_v60 = vpop.f32.mrf.mxu0 }
 0x690   :  { %v11386_v0 = vadd.f32 %v4007_v60, %v11218_v50 }
 0x691   :  { %v4009_v21 = vpop.f32.mrf.mxu0 }
 0x692   :  { %v11389_v6 = vadd.f32 %v4009_v21, %v11221_v51 }
 0x693   :  { %v4011_v20 = vpop.f32.mrf.mxu0 }
 0x694   :  { %v11392_v17 = vadd.f32 %v4011_v20, %v11224_v9 }
 0x695   :  { %v4013_v52 = vpop.f32.mrf.mxu0 }
 0x696   :  { %v11395_v29 = vadd.f32 %v4013_v52, %v11227_v1 }
 0x697   :  { %v4017_v41 = vpop.f32.mrf.mxu0 }
 0x698   :  { %v11398_v32 = vadd.f32 %v4017_v41, %v11230_v33 }
 0x699   :  { %v4019_v18 = vpop.f32.mrf.mxu0 }
 0x69a   :  { %v11401_v50 = vadd.f32 %v4019_v18, %v11233_v3 }
 0x69b   :  { %v4021_v34 = vpop.f32.mrf.mxu0 }
 0x69c   :  { %v11404_v51 = vadd.f32 %v4021_v34, %v11236_v53 }
 0x69d   :  { %v4023_v24 = vpop.f32.mrf.mxu0 }
 0x69e   :  { %v11407_v9 = vadd.f32 %v4023_v24, %v11239_v11 }
 0x69f   :  { %v4027_v8 = vpop.f32.mrf.mxu0 }
 0x6a0   :  { %v11410_v1 = vadd.f32 %v4027_v8, %v11242_v13 }
 0x6a1   :  { %v4029_v55 = vpop.f32.mrf.mxu0 }
 0x6a2   :  { %v11413_v33 = vadd.f32 %v4029_v55, %v11245_v40 }
 0x6a3   :  { %v4031_v59 = vpop.f32.mrf.mxu0 }
 0x6a4   :  { %v11416_v3 = vadd.f32 %v4031_v59, %v11248_v42 }
 0x6a5   :  { %v4033_v47 = vpop.f32.mrf.mxu0 }
 0x6a6   :  { %v11419_v53 = vadd.f32 %v4033_v47, %v11251_v7 }
 0x6a7   :  { %v4037_v58 = vpop.f32.mrf.mxu0 }
 0x6a8   :  { %v11422_v11 = vadd.f32 %v4037_v58, %v11254_v2 }
 0x6a9   :  { %v4039_v30 = vpop.f32.mrf.mxu0 }
 0x6aa   :  { %v11425_v13 = vadd.f32 %v4039_v30, %v11257_v10 }
 0x6ab   :  { %v4041_v60 = vpop.f32.mrf.mxu0 }
 0x6ac   :  { %v11428_v40 = vadd.f32 %v4041_v60, %v11260_v62 }
 0x6ad   :  { %v4043_v21 = vpop.f32.mrf.mxu0 }
 0x6ae   :  { %v11431_v42 = vadd.f32 %v4043_v21, %v11263_v28 }
 0x6af   :  { %v4047_v20 = vpop.f32.mrf.mxu0 }
 0x6b0   :  { %v11434_v7 = vadd.f32 %v4047_v20, %v11266_v4 }
 0x6b1   :  { %v4049_v52 = vpop.f32.mrf.mxu0 }
 0x6b2   :  { %v11437_v2 = vadd.f32 %v4049_v52, %v11269_v36 }
 0x6b3   :  { %v4051_v41 = vpop.f32.mrf.mxu0 }
 0x6b4   :  { %v11440_v10 = vadd.f32 %v4051_v41, %v11272_v14 }
 0x6b5   :  { %v4053_v18 = vpop.f32.mrf.mxu0 }
 0x6b6   :  { %v11443_v62 = vadd.f32 %v4053_v18, %v11275_v54 }
 0x6b7   :  { %v4057_v34 = vpop.f32.mrf.mxu0 }
 0x6b8   :  { %v11446_v28 = vadd.f32 %v4057_v34, %v11278_v39 }
 0x6b9   :  { %v4059_v24 = vpop.f32.mrf.mxu0 }
 0x6ba   :  { %v11449_v4 = vadd.f32 %v4059_v24, %v11281_v26 }
 0x6bb   :  { %v4061_v8 = vpop.f32.mrf.mxu0 }
 0x6bc   :  { %v11452_v36 = vadd.f32 %v4061_v8, %v11284_v63 }
 0x6bd   :  { %v4063_v55 = vpop.f32.mrf.mxu0 }
 0x6be   :  { %v11455_v14 = vadd.f32 %v4063_v55, %v11287_v12 }
 0x6bf   :  { %v4067_v59 = vpop.f32.mrf.mxu0 }
 0x6c0   :  { %v11458_v54 = vadd.f32 %v4067_v59, %v11290_v48 }
 0x6c1   :  { %v4069_v47 = vpop.f32.mrf.mxu0 }
 0x6c2   :  { %v11461_v39 = vadd.f32 %v4069_v47, %v11293_v44 }
 0x6c3   :  { %v4071_v58 = vpop.f32.mrf.mxu0 }
 0x6c4   :  { %v11464_v26 = vadd.f32 %v4071_v58, %v11296_v19 }
 0x6c5   :  { %v4073_v30 = vpop.f32.mrf.mxu0 }
 0x6c6   :  { %v11467_v63 = vadd.f32 %v4073_v30, %v11299_v46 }
 0x6c7   :  { %v4077_v60 = vpop.f32.mrf.mxu0 }
 0x6c8   :  { %v11470_v12 = vadd.f32 %v4077_v60, %v11302_v61 }
 0x6c9   :  { %v4079_v21 = vpop.f32.mrf.mxu0 }
 0x6ca   :  { %v11473_v48 = vadd.f32 %v4079_v21, %v11305_v37 }
 0x6cb   :  { %v4081_v20 = vpop.f32.mrf.mxu0 }
 0x6cc   :  { %v11476_v44 = vadd.f32 %v4081_v20, %v11308_v56 }
 0x6cd   :  { %v4083_v52 = vpop.f32.mrf.mxu0 }
 0x6ce   :  { %v11479_v19 = vadd.f32 %v4083_v52, %v11311_v43 }
 0x6cf   :  { %v4087_v41 = vpop.f32.mrf.mxu0 }
 0x6d0   :  { %v11482_v46 = vadd.f32 %v4087_v41, %v11314_v22  ;;  %v13848_v41 = vld [vmem:[#allocation83_spill] sm:$0xff] }
 0x6d1   :  { %v4089_v18 = vpop.f32.mrf.mxu0 }
 0x6d2   :  { %v11485_v61 = vadd.f32 %v4089_v18, %v11317_v57 }
 0x6d3   :  { %v4091_v34 = vpop.f32.mrf.mxu0 }
 0x6d4   :  { %v11488_v37 = vadd.f32 %v4091_v34, %v11320_v38  ;;  %v13850_v34 = vld [vmem:[#allocation64_spill] sm:$0xff] }
 0x6d5   :  { %v4093_v24 = vpop.f32.mrf.mxu0 }
 0x6d6   :  { %13837 = vst [vmem:[#allocation40_spill] sm:$0xff] %v11488_v37  ;;  %v11491_v56 = vadd.f32 %v4093_v24, %v11323_v15 }
 0x6d7   :  { %v4097_v8 = vpop.f32.mrf.mxu0 }
 0x6d8   :  { %13838 = vst [vmem:[#allocation37_spill] sm:$0xff] %v11491_v56  ;;  %v11494_v43 = vadd.f32 %v4097_v8, %v11326_v45  ;;  %v13852_v8 = vld [vmem:[#allocation84_spill] sm:$0xff] }
 0x6d9   :  { %v4099_v55 = vpop.f32.mrf.mxu0 }
 0x6da   :  { %13839 = vst [vmem:[#allocation44_spill] sm:$0xff] %v11494_v43  ;;  %v11497_v22 = vadd.f32 %v4099_v55, %v11329_v49 }
 0x6db   :  { %v4101_v59 = vpop.f32.mrf.mxu0 }
 0x6dc   :  { %13840 = vst [vmem:[#allocation42_spill] sm:$0xff] %v11497_v22  ;;  %v11500_v57 = vadd.f32 %v4101_v59, %v11332_v27  ;;  %v13854_v59 = vld [vmem:[#allocation66_spill] sm:$0xff] }
 0x6dd   :  { %v4103_v47 = vpop.f32.mrf.mxu0 }
 0x6de   :  { %13841 = vst [vmem:[#allocation47_spill] sm:$0xff] %v11500_v57  ;;  %v11503_v38 = vadd.f32 %v4103_v47, %v11335_v5 }
 0x6df   :  { %v4107_v58 = vpop.f32.mrf.mxu0 }
 0x6e0   :  { %13842 = vst [vmem:[#allocation46_spill] sm:$0xff] %v11503_v38  ;;  %v11506_v15 = vadd.f32 %v4107_v58, %v11338_v23  ;;  %v13856_v58 = vld [vmem:[#allocation85_spill] sm:$0xff] }
 0x6e1   :  { %v4109_v30 = vpop.f32.mrf.mxu0 }
 0x6e2   :  { %13843 = vst [vmem:[#allocation50_spill] sm:$0xff] %v11506_v15  ;;  %v11509_v45 = vadd.f32 %v4109_v30, %v11341_v35 }
 0x6e3   :  { %v4111_v60 = vpop.f32.mrf.mxu0 }
 0x6e4   :  { %13844 = vst [vmem:[#allocation48_spill] sm:$0xff] %v11509_v45  ;;  %v11512_v49 = vadd.f32 %v4111_v60, %v11344_v25  ;;  %v13858_v60 = vld [vmem:[#allocation67_spill] sm:$0xff] }
 0x6e5   :  { %v4113_v21 = vpop.f32.mrf.mxu0 }
 0x6e6   :  { %13845 = vst [vmem:[#allocation38_spill] sm:$0xff] %v11512_v49  ;;  %v11515_v27 = vadd.f32 %v4113_v21, %v11347_v31 }
 0x6e7   :  { %v4117_v20 = vpop.f32.mrf.mxu0 }
 0x6e8   :  { %13846 = vst [vmem:[#allocation36_spill] sm:$0xff] %v11515_v27  ;;  %v11518_v5 = vadd.f32 %v4117_v20, %v11350_v16 }
 0x6e9   :  { %v4119_v52 = vpop.f32.mrf.mxu0 }
 0x6ea   :  { %13847 = vst [vmem:[#allocation39_spill] sm:$0xff] %v11518_v5  ;;  %v11521_v23 = vadd.f32 %v4119_v52, %v13848_v41  ;;  %v13860_v52 = vld [vmem:[#allocation100_spill] sm:$0xff] }
 0x6eb   :  { %v4121_v18 = vpop.f32.mrf.mxu0 }
 0x6ec   :  { %13849 = vst [vmem:[#allocation41_spill] sm:$0xff] %v11521_v23  ;;  %v11524_v35 = vadd.f32 %v4121_v18, %v13850_v34  ;;  %v13862_v34 = vld [vmem:[#allocation101_spill] sm:$0xff] }
 0x6ed   :  { %v4123_v24 = vpop.f32.mrf.mxu0 }
 0x6ee   :  { %13851 = vst [vmem:[#allocation49_spill] sm:$0xff] %v11524_v35  ;;  %v11527_v25 = vadd.f32 %v4123_v24, %v13852_v8 }
 0x6ef   :  { %v4127_v55 = vpop.f32.mrf.mxu0 }
 0x6f0   :  { %13853 = vst [vmem:[#allocation65_spill] sm:$0xff] %v11527_v25  ;;  %v11530_v31 = vadd.f32 %v4127_v55, %v13854_v59  ;;  %v13864_v25 = vld [vmem:[#allocation102_spill] sm:$0xff] }
 0x6f1   :  { %v4129_v47 = vpop.f32.mrf.mxu0 }
 0x6f2   :  { %13855 = vst [vmem:[#allocation70_spill] sm:$0xff] %v11530_v31  ;;  %v11533_v16 = vadd.f32 %v4129_v47, %v13856_v58  ;;  %v13866_v31 = vld [vmem:[#allocation103_spill] sm:$0xff] }
 0x6f3   :  { %v4131_v30 = vpop.f32.mrf.mxu0 }
 0x6f4   :  { %13857 = vst [vmem:[#allocation71_spill] sm:$0xff] %v11533_v16  ;;  %v11536_v21 = vadd.f32 %v4131_v30, %v13858_v60  ;;  %v13868_v16 = vld [vmem:[#allocation86_spill] sm:$0xff] }
 0x6f5   :  { %v4133_v20 = vpop.f32.mrf.mxu0 }
 0x6f6   :  { %13859 = vst [vmem:[#allocation75_spill] sm:$0xff] %v11536_v21  ;;  %v11539_v41 = vadd.f32 %v4133_v20, %v13860_v52 }
 0x6f7   :  { %v4137_v18 = vpop.f32.mrf.mxu0 }
 0x6f8   :  { %13861 = vst [vmem:[#allocation76_spill] sm:$0xff] %v11539_v41  ;;  %v11542_v24 = vadd.f32 %v4137_v18, %v13862_v34 }
 0x6f9   :  { %v4139_v8 = vpop.f32.mrf.mxu0 }
 0x6fa   :  { %13863 = vst [vmem:[#allocation77_spill] sm:$0xff] %v11542_v24  ;;  %v11545_v55 = vadd.f32 %v4139_v8, %v13864_v25 }
 0x6fb   :  { %v4141_v59 = vpop.f32.mrf.mxu0 }
 0x6fc   :  { %13865 = vst [vmem:[#allocation72_spill] sm:$0xff] %v11545_v55  ;;  %v11548_v47 = vadd.f32 %v4141_v59, %v13866_v31 }
 0x6fd   :  { %v4143_v58 = vpop.f32.mrf.mxu0 }
 0x6fe   :  { %13867 = vst [vmem:[#allocation73_spill] sm:$0xff] %v11548_v47  ;;  %v11551_v30 = vadd.f32 %v4143_v58, %v13868_v16 }
 0x700   :  { %13869 = vst [vmem:[#allocation68_spill] sm:$0xff] %v11551_v30 }
 0x701   :  { %9145 = dma.done.wait [#allocation4 + $0x5], 4096 }
 0x702   :  { %9146 = vsyncadd [#allocation4 + $0x5], 4294963200  ;;  %v8735_v60 = vld [vmem:[#allocation3 + $0x574] ss:$8 sps:$4 sm:$0xff]   ;;  %v8737_v20 = vld [vmem:[#allocation3 + $0x570] ss:$8 sps:$4 sm:$0xff]  }
 0x703   :  { %4744 = vmatprep.subr.bf16.mxu1 %v8735_v60  ;;  %v8738_v52 = vld [vmem:[#allocation3 + $0x564] ss:$8 sps:$4 sm:$0xff]   ;;  %v8740_v18 = vld [vmem:[#allocation3 + $0x560] ss:$8 sps:$4 sm:$0xff]   ;;  %v8741_v34 = vld [vmem:[#allocation3 + $0x554] ss:$8 sps:$4 sm:$0xff]  }
 0x704   :  { %4745 = vmatpush1.bf16.msra.mxu1 %v8737_v20  ;;  %v8743_v25 = vld [vmem:[#allocation3 + $0x550] ss:$8 sps:$4 sm:$0xff]   ;;  %v8744_v8 = vld [vmem:[#allocation3 + $0x544] ss:$8 sps:$4 sm:$0xff]   ;;  %v8746_v31 = vld [vmem:[#allocation3 + $0x540] ss:$8 sps:$4 sm:$0xff]  }
 0x705   :  { %4746 = vmatprep.subr.bf16.mxu1 %v8738_v52  ;;  %v8747_v59 = vld [vmem:[#allocation3 + $0x534] ss:$8 sps:$4 sm:$0xff]   ;;  %v8749_v16 = vld [vmem:[#allocation3 + $0x530] ss:$8 sps:$4 sm:$0xff]   ;;  %v8750_v58 = vld [vmem:[#allocation3 + $0x524] ss:$8 sps:$4 sm:$0xff]  }
 0x706   :  { %v8752_v30 = vld [vmem:[#allocation3 + $0x520] ss:$8 sps:$4 sm:$0xff]   ;;  %v8753_v60 = vld [vmem:[#allocation3 + $0x514] ss:$8 sps:$4 sm:$0xff]  }
 0x707   :  { %v4205_v20 = vld [vmem:[#allocation2 + $0x138] sm:$0xfe]  ;;  %v4207_v47 = vld [vmem:[#allocation2 + $0xf0] sm:$0xff]  ;;  %v4209_v52 = vld [vmem:[#allocation2] sm:$0xff] }
 0x708   :  { %4747 = vmatpush1.bf16.msra.mxu1 %v8740_v18  ;;  %v4211_v55 = vld [vmem:[#allocation2 + $0x170] sm:$0xff]  ;;  %v4263_v18 = vpack.c.bf16 %v4207_v47, %v4205_v20  ;;  %v4212_v49 = vld [vmem:[#allocation2 + $0x120] sm:$0xff]  ;;  %v4217_v15 = vld [vmem:[#allocation2 + $0x198] sm:$0xff] }
 0x709   :  { %4748 = vmatprep.subr.bf16.mxu1 %v8741_v34  ;;  %v8755_v34 = vld [vmem:[#allocation3 + $0x510] ss:$8 sps:$4 sm:$0xff]   ;;  %v11553_v24 = vpack.c.bf16 %v4211_v55, %v4209_v52  ;;  %v8759_v21 = vld [vmem:[#allocation3 + $0x5f4] ss:$8 sps:$4 sm:$0xff]   ;;  %v8762_v55 = vld [vmem:[#allocation3 + $0x5e4] ss:$8 sps:$4 sm:$0xff]  }
 0x70a   :  { %v8761_v47 = vld [vmem:[#allocation3 + $0x5f0] ss:$8 sps:$4 sm:$0xff]   ;;  %v8768_v52 = vld [vmem:[#allocation3 + $0x5c4] ss:$8 sps:$4 sm:$0xff]  }
 0x70b   :  { %v8767_v20 = vld [vmem:[#allocation3 + $0x5d0] ss:$8 sps:$4 sm:$0xff]   ;;  %v4216_v43 = vld [vmem:[#allocation2 + $0x40] sm:$0xff]  ;;  %v4218_v56 = vld [vmem:[#allocation2 + $0x68] sm:$0xff] }
 0x70c   :  { %4749 = vmatpush1.bf16.msra.mxu1 %v8743_v25  ;;  %v8756_v25 = vld [vmem:[#allocation3 + $0x504] ss:$8 sps:$4 sm:$0xff]   ;;  %v4214_v45 = vld [vmem:[#allocation2 + $0xb0] sm:$0xff] }
 0x70d   :  { %4750 = vmatprep.subr.bf16.mxu1 %v8744_v8  ;;  %v4337_v8 = vshrl.u32 %v4263_v18, 16  ;;  %v4266_v38 = vpack.c.bf16 %v4214_v45, %v4212_v49  ;;  %v4223_v37 = vld [vmem:[#allocation2 + $0x1c0] sm:$0xff] }
 0x710   :  { %4751 = vmatpush1.bf16.msra.mxu1 %v8746_v31  ;;  %v4339_v31 = vshll.u32 %v4263_v18, 16  ;;  %v8770_v18 = vld [vmem:[#allocation3 + $0x5c0] ss:$8 sps:$4 sm:$0xff]  }
 0x711   :  { %4752 = vmatprep.subr.bf16.mxu1 %v8747_v59  ;;  %v4344_v59 = vshll.u32 %v11553_v24, 16 }
 0x712   :  { %v4341_v41 = vrot.slane %v4339_v31, 1  ;;  %v4210_v31 = vld [vmem:[#allocation2 + $0x160] sm:$0xff] }
 0x714   :  { %4753 = vmatpush1.bf16.msra.mxu1 %v8749_v16  ;;  %v8758_v16 = vld [vmem:[#allocation3 + $0x500] ss:$8 sps:$4 sm:$0xff]   ;;  %v4342_v35 = vor.u32 %v4341_v41, %v4337_v8  ;;  %v4204_v41 = vld [vmem:[#allocation2 + $0x90] sm:$0xfe] }
 0x715   :  { %4754 = vmatprep.subr.bf16.mxu1 %v8750_v58  ;;  %v4346_v58 = vrot.slane %v4344_v59, 1  ;;  %v4213_v59 = vld [vmem:[#allocation2 + $0x1a0] sm:$0xff] }
 0x717   :  { %v4347_v23 = vsel %vm2238_vm1, %v4342_v35, %v4346_v58  ;;  %v8773_v35 = vld [vmem:[#allocation3 + $0x5b0] ss:$8 sps:$4 sm:$0xff]  }
 0x718   :  { %4755 = vmatpush1.bf16.msra.mxu1 %v8752_v30  ;;  %4776 = vmatprep.mubr.bf16.mxu1 %v4347_v23  ;;  %v8764_v30 = vld [vmem:[#allocation3 + $0x5e0] ss:$8 sps:$4 sm:$0xff]   ;;  %v8774_v23 = vld [vmem:[#allocation3 + $0x5a4] ss:$8 sps:$4 sm:$0xff]  }
 0x719   :  { %4756 = vmatprep.subr.bf16.mxu1 %v8753_v60  ;;  %v8765_v60 = vld [vmem:[#allocation3 + $0x5d4] ss:$8 sps:$4 sm:$0xff]  }
 0x71c   :  { %4757 = vmatpush1.bf16.msra.mxu1 %v8755_v34  ;;  %v8771_v34 = vld [vmem:[#allocation3 + $0x5b4] ss:$8 sps:$4 sm:$0xff]  }
 0x71d   :  { %4758 = vmatprep.subr.bf16.mxu1 %v8756_v25  ;;  %v4206_v25 = vld [vmem:[#allocation2 + $0xe8] sm:$0xff] }
 0x71e   :  { %v4262_v8 = vpack.c.bf16 %v4206_v25, %v4204_v41  ;;  %v8780_v41 = vld [vmem:[#allocation3 + $0x584] ss:$8 sps:$4 sm:$0xff]  }
 0x720   :  { %4759 = vmatpush1.bf16.msra.mxu1 %v8758_v16  ;;  %v4215_v16 = vld [vmem:[#allocation2 + $0x118] sm:$0xff]  ;;  %v4325_v5 = vshrl.u32 %v4262_v8, 16 }
 0x721   :  { %4760 = vmatprep.subr.bf16.mxu1 %v8759_v21  ;;  %v4208_v21 = vld [vmem:[#allocation2 + $0x1d8] sm:$0xff] }
 0x724   :  { %4761 = vmatpush2.bf16.msra.mxu1 %v8761_v47  ;;  %v8776_v47 = vld [vmem:[#allocation3 + $0x5a0] ss:$8 sps:$4 sm:$0xff]  }
 0x725   :  { %4762 = vmatprep.subr.bf16.mxu1 %v8762_v55  ;;  %v4264_v55 = vpack.c.bf16 %v4210_v31, %v4208_v21  ;;  %v8782_v21 = vld [vmem:[#allocation3 + $0x580] ss:$8 sps:$4 sm:$0xff]  }
 0x728   :  { %4763 = vmatpush2.bf16.msra.mxu1 %v8764_v30  ;;  %v4327_v30 = vshll.u32 %v4262_v8, 16 }
 0x729   :  { %4764 = vmatprep.subr.bf16.mxu1 %v8765_v60  ;;  %v8777_v60 = vld [vmem:[#allocation3 + $0x594] ss:$8 sps:$4 sm:$0xff]  }
 0x72a   :  { %v4329_v27 = vrot.slane %v4327_v30, 1  ;;  %v4348_v30 = vshrl.u32 %v4264_v55, 16 }
 0x72c   :  { %4765 = vmatpush2.bf16.msra.mxu1 %v8767_v20  ;;  %v4267_v20 = vpack.c.bf16 %v4215_v16, %v4213_v59  ;;  %v4330_v31 = vor.u32 %v4329_v27, %v4325_v5  ;;  %v4268_v27 = vpack.c.bf16 %v4218_v56, %v4216_v43 }
 0x72d   :  { %4766 = vmatprep.subr.bf16.mxu1 %v8768_v52  ;;  %v8779_v52 = vld [vmem:[#allocation3 + $0x590] ss:$8 sps:$4 sm:$0xff]  }
 0x72e   :  { %v4360_v25 = vshll.u32 %v4267_v20, 16  ;;  %v4372_v57 = vshrl.u32 %v4267_v20, 16 }
 0x730   :  { %4767 = vmatpush2.bf16.msra.mxu1 %v8770_v18  ;;  %v4332_v18 = vshll.u32 %v4264_v55, 16  ;;  %v4362_v16 = vrot.slane %v4360_v25, 1  ;;  %v4364_v55 = vshrl.u32 %v4266_v38, 16 }
 0x731   :  { %4768 = vmatprep.subr.bf16.mxu1 %v8771_v34  ;;  %v4356_v34 = vshrl.u32 %v11553_v24, 16 }
 0x732   :  { %v4374_v5 = vor.u32 %v4372_v57, %v4362_v16 }
 0x733   :  { %v4358_v59 = vor.u32 %v4356_v34, %v4346_v58 }
 0x734   :  { %4769 = vmatpush2.bf16.msra.mxu1 %v8773_v35  ;;  %v4219_v35 = vld [vmem:[#allocation2 + $0xa8] sm:$0xff] }
 0x735   :  { %4770 = vmatprep.subr.bf16.mxu1 %v8774_v23  ;;  %v4334_v23 = vrot.slane %v4332_v18, 1  ;;  %v4269_v8 = vpack.c.bf16 %v4219_v35, %v4217_v15  ;;  %v4363_v24 = vsel %vm2238_vm1, %v4358_v59, %v4362_v16  ;;  %v4220_v35 = vld [vmem:[#allocation2 + $0x168] sm:$0xff]  ;;  %v4227_v59 = vld [vmem:[#allocation2 + $0x190] sm:$0xff] }
 0x737   :  { %v4376_v22 = vshll.u32 %v4269_v8, 16  ;;  %v4350_v45 = vor.u32 %v4348_v30, %v4334_v23  ;;  %v4388_v20 = vshrl.u32 %v4269_v8, 16 }
 0x738   :  { %4771 = vmatpush2.bf16.msra.mxu1 %v8776_v47  ;;  %v4335_v47 = vsel %vm2238_vm1, %v4330_v31, %v4334_v23  ;;  %v4225_v31 = vld [vmem:[#allocation2 + $0x158] sm:$0xff] }
 0x739   :  { %4772 = vmatprep.subr.bf16.mxu1 %v8777_v60  ;;  %v4352_v60 = vshll.u32 %v4266_v38, 16  ;;  %v4378_v15 = vrot.slane %v4376_v22, 1  ;;  %v4380_v38 = vshrl.u32 %v4268_v27, 16 }
 0x73b   :  { %v4354_v49 = vrot.slane %v4352_v60, 1  ;;  %v4379_v34 = vsel %vm2238_vm1, %v4374_v5, %v4378_v15  ;;  %v4390_v43 = vor.u32 %v4388_v20, %v4378_v15  ;;  %v4231_v5 = vld [vmem:[#allocation2 + $0x58] sm:$0xff] }
 0x73c   :  { %4773 = vmatpush2.bf16.msra.mxu1 %v8779_v52  ;;  %v4221_v52 = vld [vmem:[#allocation2 + $0x208] sm:$0xff] }
 0x73d   :  { %4774 = vmatprep.subr.bf16.mxu1 %v8780_v41  ;;  %v4271_v58 = vpack.c.bf16 %v4223_v37, %v4221_v52  ;;  %v4355_v18 = vsel %vm2238_vm1, %v4350_v45, %v4354_v49  ;;  %v4368_v41 = vshll.u32 %v4268_v27, 16  ;;  %v4366_v23 = vor.u32 %v4364_v55, %v4354_v49  ;;  %v4226_v52 = vld [vmem:[#allocation2 + $0x218] sm:$0xff]  ;;  %v4229_v45 = vld [vmem:[#allocation2 + $0x70] sm:$0xff] }
 0x73e   :  { %v4273_v37 = vpack.c.bf16 %v4227_v59, %v4225_v31  ;;  %v4228_v31 = vld [vmem:[#allocation2 + $0xd8] sm:$0xff]  ;;  %v4230_v59 = vld [vmem:[#allocation2 + $0xa0] sm:$0xff] }
 0x73f   :  { %v4392_v25 = vshll.u32 %v4271_v58, 16  ;;  %v4404_v8 = vshrl.u32 %v4271_v58, 16 }
 0x740   :  { %4775 = vmatpush2.bf16.msra.mxu1 %v8782_v21  ;;  %v4222_v21 = vld [vmem:[#allocation2 + $0x188] sm:$0xff]  ;;  %v4408_v60 = vshll.u32 %v4273_v37, 16  ;;  %v4420_v58 = vshrl.u32 %v4273_v37, 16 }
 0x741   :  { %v4270_v56 = vpack.c.bf16 %v4222_v21, %v4220_v35  ;;  %v4394_v22 = vrot.slane %v4392_v25, 1 }
 0x743   :  { %4777 = vmatmul.mubr.bf16.vlgmr.msra.gmra.mxu1 %v4335_v47  ;;  %v4370_v47 = vrot.slane %v4368_v41, 1  ;;  %v4384_v16 = vshll.u32 %v4270_v56, 16  ;;  %v4395_v30 = vsel %vm2238_vm1, %v4390_v43, %v4394_v22  ;;  %v4406_v15 = vor.u32 %v4404_v8, %v4394_v22  ;;  %v4235_v43 = vld [vmem:[#allocation2 + $0x1a8] sm:$0xff] }
 0x744   :  { %4786 = vmatprep.mubr.bf16.mxu1 %v4363_v24  ;;  %v4224_v24 = vld [vmem:[#allocation2 + $0x78] sm:$0xff]  ;;  %v4410_v41 = vrot.slane %v4408_v60, 1  ;;  %v4396_v27 = vshrl.u32 %v4270_v56, 16 }
 0x745   :  { %v4371_v57 = vsel %vm2238_vm1, %v4366_v23, %v4370_v47  ;;  %v4382_v49 = vor.u32 %v4380_v38, %v4370_v47  ;;  %v4272_v55 = vpack.c.bf16 %v4226_v52, %v4224_v24  ;;  %v4233_v23 = vld [vmem:[#allocation2 + $0x210] sm:$0xff]  ;;  %v4274_v38 = vpack.c.bf16 %v4230_v59, %v4228_v31 }
 0x746   :  { %v4411_v35 = vsel %vm2238_vm1, %v4406_v15, %v4410_v41  ;;  %v4422_v22 = vor.u32 %v4420_v58, %v4410_v41  ;;  %v4239_v15 = vld [vmem:[#allocation2 + $0x1f0] sm:$0xff] }
 0x747   :  { %v4400_v25 = vshll.u32 %v4272_v55, 16  ;;  %v4412_v56 = vshrl.u32 %v4272_v55, 16  ;;  %v4416_v60 = vshll.u32 %v4274_v38, 16  ;;  %v4428_v55 = vshrl.u32 %v4274_v38, 16 }
 0x74b   :  { %4787 = vmatmul.mubr.bf16.gmra.mxu1 %v4355_v18  ;;  %v4386_v18 = vrot.slane %v4384_v16, 1 }
 0x74c   :  { %4796 = vmatprep.mubr.bf16.mxu1 %v4379_v34  ;;  %v4275_v34 = vpack.c.bf16 %v4231_v5, %v4229_v45  ;;  %v4232_v45 = vld [vmem:[#allocation2 + $0x178] sm:$0xff]  ;;  %v4234_v5 = vld [vmem:[#allocation2 + $0x108] sm:$0xff] }
 0x74d   :  { %v4387_v20 = vsel %vm2238_vm1, %v4382_v49, %v4386_v18  ;;  %v4398_v47 = vor.u32 %v4396_v27, %v4386_v18  ;;  %v4237_v49 = vld [vmem:[#allocation2 + $0x1e8] sm:$0xff]  ;;  %v4276_v27 = vpack.c.bf16 %v4234_v5, %v4232_v45 }
 0x74e   :  { %v4424_v21 = vshll.u32 %v4275_v34, 16  ;;  %v4436_v37 = vshrl.u32 %v4275_v34, 16 }
 0x74f   :  { %v4444_v38 = vshrl.u32 %v4276_v27, 16 }
 0x750   :  { %v4426_v16 = vrot.slane %v4424_v21, 1  ;;  %v4432_v21 = vshll.u32 %v4276_v27, 16 }
 0x752   :  { %v4427_v24 = vsel %vm2238_vm1, %v4422_v22, %v4426_v16  ;;  %v4438_v41 = vor.u32 %v4436_v37, %v4426_v16  ;;  %v4243_v22 = vld [vmem:[#allocation2 + $0xe0] sm:$0xff] }
 0x753   :  { %4797 = vmatmul.mubr.bf16.gmra.mxu1 %v4371_v57  ;;  %v4402_v57 = vrot.slane %v4400_v25, 1 }
 0x754   :  { %4806 = vmatprep.mubr.bf16.mxu1 %v4395_v30  ;;  %v4277_v30 = vpack.c.bf16 %v4235_v43, %v4233_v23  ;;  %v4236_v23 = vld [vmem:[#allocation2 + $0x1c8] sm:$0xff]  ;;  %v4238_v43 = vld [vmem:[#allocation2 + $0x38] sm:$0xff] }
 0x755   :  { %v4403_v8 = vsel %vm2238_vm1, %v4398_v47, %v4402_v57  ;;  %v4414_v18 = vor.u32 %v4412_v56, %v4402_v57  ;;  %v4241_v47 = vld [vmem:[#allocation2 + $0x148] sm:$0xff]  ;;  %v4278_v56 = vpack.c.bf16 %v4238_v43, %v4236_v23 }
 0x756   :  { %v4440_v52 = vshll.u32 %v4277_v30, 16  ;;  %v4452_v34 = vshrl.u32 %v4277_v30, 16 }
 0x757   :  { %v4460_v27 = vshrl.u32 %v4278_v56, 16 }
 0x758   :  { %v4442_v25 = vrot.slane %v4440_v52, 1  ;;  %v4448_v52 = vshll.u32 %v4278_v56, 16 }
 0x75a   :  { %v4443_v31 = vsel %vm2238_vm1, %v4438_v41, %v4442_v25  ;;  %v4454_v16 = vor.u32 %v4452_v34, %v4442_v25  ;;  %v4247_v41 = vld [vmem:[#allocation2 + $0x80] sm:$0xff] }
 0x75b   :  { %4807 = vmatmul.mubr.bf16.gmra.mxu1 %v4387_v20  ;;  %v4418_v20 = vrot.slane %v4416_v60, 1 }
 0x75c   :  { %4816 = vmatprep.mubr.bf16.mxu1 %v4411_v35  ;;  %v4279_v35 = vpack.c.bf16 %v4239_v15, %v4237_v49  ;;  %v4240_v49 = vld [vmem:[#allocation2 + $0x1f8] sm:$0xff]  ;;  %v4242_v15 = vld [vmem:[#allocation2 + $0x110] sm:$0xff] }
 0x75d   :  { %v4419_v58 = vsel %vm2238_vm1, %v4414_v18, %v4418_v20  ;;  %v4430_v57 = vor.u32 %v4428_v55, %v4418_v20  ;;  %v4245_v18 = vld [vmem:[#allocation2 + $0x1d0] sm:$0xff]  ;;  %v4280_v55 = vpack.c.bf16 %v4242_v15, %v4240_v49 }
 0x75e   :  { %v4456_v59 = vshll.u32 %v4279_v35, 16  ;;  %v4468_v30 = vshrl.u32 %v4279_v35, 16 }
 0x75f   :  { %v4476_v56 = vshrl.u32 %v4280_v55, 16 }
 0x760   :  { %v4458_v60 = vrot.slane %v4456_v59, 1  ;;  %v4464_v59 = vshll.u32 %v4280_v55, 16 }
 0x762   :  { %v4459_v45 = vsel %vm2238_vm1, %v4454_v16, %v4458_v60  ;;  %v4470_v25 = vor.u32 %v4468_v30, %v4458_v60  ;;  %v4251_v16 = vld [vmem:[#allocation2 + $0x88] sm:$0xff] }
 0x763   :  { %4817 = vmatmul.mubr.bf16.gmra.mxu1 %v4403_v8  ;;  %v4434_v8 = vrot.slane %v4432_v21, 1 }
 0x764   :  { %4826 = vmatprep.mubr.bf16.mxu1 %v4427_v24  ;;  %v4281_v24 = vpack.c.bf16 %v4243_v22, %v4241_v47  ;;  %v4244_v47 = vld [vmem:[#allocation2 + $0x50] sm:$0xff]  ;;  %v4246_v22 = vld [vmem:[#allocation2 + $0x128] sm:$0xff] }
 0x765   :  { %v4435_v37 = vsel %vm2238_vm1, %v4430_v57, %v4434_v8  ;;  %v4446_v20 = vor.u32 %v4444_v38, %v4434_v8  ;;  %v4249_v57 = vld [vmem:[#allocation2 + $0x1b8] sm:$0xff]  ;;  %v4282_v38 = vpack.c.bf16 %v4246_v22, %v4244_v47 }
 0x766   :  { %v4472_v5 = vshll.u32 %v4281_v24, 16  ;;  %v4484_v35 = vshrl.u32 %v4281_v24, 16 }
 0x767   :  { %v4492_v55 = vshrl.u32 %v4282_v38, 16 }
 0x768   :  { %v4474_v21 = vrot.slane %v4472_v5, 1  ;;  %v4480_v5 = vshll.u32 %v4282_v38, 16 }
 0x76a   :  { %v4475_v23 = vsel %vm2238_vm1, %v4470_v25, %v4474_v21  ;;  %v4486_v60 = vor.u32 %v4484_v35, %v4474_v21  ;;  %v4255_v25 = vld [vmem:[#allocation2 + $0x60] sm:$0xff] }
 0x76b   :  { %4827 = vmatmul.mubr.bf16.gmra.mxu1 %v4419_v58  ;;  %v4450_v58 = vrot.slane %v4448_v52, 1 }
 0x76c   :  { %4836 = vmatprep.mubr.bf16.mxu1 %v4443_v31  ;;  %v4283_v31 = vpack.c.bf16 %v4247_v41, %v4245_v18  ;;  %v4248_v18 = vld [vmem:[#allocation2 + $0x20] sm:$0xff]  ;;  %v4250_v41 = vld [vmem:[#allocation2 + $0x18] sm:$0xff] }
 0x76d   :  { %v4451_v34 = vsel %vm2238_vm1, %v4446_v20, %v4450_v58  ;;  %v4462_v8 = vor.u32 %v4460_v27, %v4450_v58  ;;  %v4253_v20 = vld [vmem:[#allocation2 + $0x140] sm:$0xff]  ;;  %v4284_v27 = vpack.c.bf16 %v4250_v41, %v4248_v18 }
 0x76e   :  { %v4488_v43 = vshll.u32 %v4283_v31, 16  ;;  %v4500_v24 = vshrl.u32 %v4283_v31, 16 }
 0x76f   :  { %v4508_v38 = vshrl.u32 %v4284_v27, 16 }
 0x770   :  { %v4490_v52 = vrot.slane %v4488_v43, 1  ;;  %v4496_v43 = vshll.u32 %v4284_v27, 16 }
 0x772   :  { %v4491_v49 = vsel %vm2238_vm1, %v4486_v60, %v4490_v52  ;;  %v4502_v21 = vor.u32 %v4500_v24, %v4490_v52  ;;  %v4259_v60 = vld [vmem:[#allocation2 + $0x1b0] sm:$0xff] }
 0x773   :  { %4837 = vmatmul.mubr.bf16.gmra.mxu1 %v4435_v37  ;;  %v4466_v37 = vrot.slane %v4464_v59, 1 }
 0x774   :  { %4846 = vmatprep.mubr.bf16.mxu1 %v4459_v45  ;;  %v4285_v45 = vpack.c.bf16 %v4251_v16, %v4249_v57  ;;  %v4252_v57 = vld [vmem:[#allocation2 + $0x1e0] sm:$0xff]  ;;  %v4254_v16 = vld [vmem:[#allocation2 + $0xf8] sm:$0xff] }
 0x775   :  { %v4467_v30 = vsel %vm2238_vm1, %v4462_v8, %v4466_v37  ;;  %v4478_v58 = vor.u32 %v4476_v56, %v4466_v37  ;;  %v4257_v8 = vld [vmem:[#allocation2 + $0x30] sm:$0xff]  ;;  %v4286_v56 = vpack.c.bf16 %v4254_v16, %v4252_v57  ;;  %v4260_v16 = vld [vmem:[#allocation2 + $0xc8] sm:$0x1] }
 0x776   :  { %v4504_v15 = vshll.u32 %v4285_v45, 16  ;;  %v4516_v31 = vshrl.u32 %v4285_v45, 16 }
 0x778   :  { %v4506_v59 = vrot.slane %v4504_v15, 1  ;;  %v4512_v15 = vshll.u32 %v4286_v56, 16 }
 0x77a   :  { %v4507_v47 = vsel %vm2238_vm1, %v4502_v21, %v4506_v59  ;;  %v4518_v52 = vor.u32 %v4516_v31, %v4506_v59  ;;  %v4524_v31 = vshrl.u32 %v4286_v56, 16 }
 0x77b   :  { %4847 = vmatmul.mubr.bf16.gmra.mxu1 %v4451_v34  ;;  %v4482_v34 = vrot.slane %v4480_v5, 1 }
 0x77c   :  { %4856 = vmatprep.mubr.bf16.mxu1 %v4475_v23  ;;  %v4287_v23 = vpack.c.bf16 %v4255_v25, %v4253_v20  ;;  %v4256_v20 = vld [vmem:[#allocation2 + $0x180] sm:$0xff]  ;;  %v4258_v25 = vld [vmem:[#allocation2 + $0x150] sm:$0xff] }
 0x77d   :  { %v4483_v35 = vsel %vm2238_vm1, %v4478_v58, %v4482_v34  ;;  %v4494_v37 = vor.u32 %v4492_v55, %v4482_v34  ;;  %v4261_v58 = vld [vmem:[#allocation2 + $0x48] sm:$0x1]  ;;  %v4514_v34 = vrot.slane %v4512_v15, 1 }
 0x77e   :  { %v4520_v22 = vshll.u32 %v4287_v23, 16  ;;  %v4532_v45 = vshrl.u32 %v4287_v23, 16 }
 0x780   :  { %v4522_v5 = vrot.slane %v4520_v22, 1 }
 0x782   :  { %v4523_v18 = vsel %vm2238_vm1, %v4518_v52, %v4522_v5  ;;  %v4534_v55 = vor.u32 %v4532_v45, %v4522_v5 }
 0x783   :  { %4857 = vmatmul.mubr.bf16.gmra.mxu1 %v4467_v30  ;;  %v4498_v30 = vrot.slane %v4496_v43, 1  ;;  %v4291_v43 = vpack.c.bf16 %v4261_v58, %v4261_v58 }
 0x784   :  { %4866 = vmatprep.mubr.bf16.mxu1 %v4491_v49  ;;  %v4289_v49 = vpack.c.bf16 %v4259_v60, %v4257_v8  ;;  %v4526_v8 = vor.u32 %v4524_v31, %v4514_v34 }
 0x785   :  { %v4499_v24 = vsel %vm2238_vm1, %v4494_v37, %v4498_v30  ;;  %v4510_v21 = vor.u32 %v4508_v38, %v4498_v30  ;;  %v4552_v23 = vshll.u32 %v4291_v43, 16  ;;  %v4290_v37 = vpack.c.bf16 %v4260_v16, %v4260_v16 }
 0x786   :  { %v4536_v41 = vshll.u32 %v4289_v49, 16  ;;  %v4548_v57 = vshrl.u32 %v4289_v49, 16 }
 0x787   :  { %v4554_v52 = vrot.slane %v4552_v23, 1  ;;  %v4544_v38 = vshll.u32 %v4290_v37, 16 }
 0x788   :  { %v4538_v59 = vrot.slane %v4536_v41, 1 }
 0x78a   :  { %v4539_v22 = vsel %vm2238_vm1, %v4534_v55, %v4538_v59  ;;  %v4550_v30 = vor.u32 %v4548_v57, %v4538_v59 }
 0x78b   :  { %4867 = vmatmul.mubr.bf16.gmra.mxu1 %v4483_v35  ;;  %v4288_v35 = vpack.c.bf16 %v4258_v25, %v4256_v20 }
 0x78c   :  { %4876 = vmatprep.mubr.bf16.mxu1 %v4507_v47  ;;  %v4515_v47 = vsel %vm2238_vm1, %v4510_v21, %v4514_v34  ;;  %v4555_v15 = vsel %vm2238_vm1, %v4550_v30, %v4554_v52 }
 0x78d   :  { %v4528_v27 = vshll.u32 %v4288_v35, 16 }
 0x78f   :  { %v4530_v60 = vrot.slane %v4528_v27, 1 }
 0x791   :  { %v4531_v5 = vsel %vm2238_vm1, %v4526_v8, %v4530_v60 }
 0x793   :  { %4877 = vmatmul.mubr.bf16.gmra.mxu1 %v4499_v24  ;;  %v4540_v24 = vshrl.u32 %v4288_v35, 16 }
 0x794   :  { %4886 = vmatprep.mubr.bf16.mxu1 %v4523_v18  ;;  %v4546_v18 = vrot.slane %v4544_v38, 1 }
 0x795   :  { %v4542_v56 = vor.u32 %v4540_v24, %v4530_v60 }
 0x797   :  { %v4547_v49 = vsel %vm2238_vm1, %v4542_v56, %v4546_v18 }
 0x79b   :  { %4887 = vmatmul.mubr.bf16.gmra.mxu1 %v4515_v47 }
 0x79c   :  { %4896 = vmatprep.mubr.bf16.mxu1 %v4539_v22 }
 0x7a3   :  { %4897 = vmatmul.mubr.bf16.gmra.mxu1 %v4531_v5 }
 0x7a4   :  { %4906 = vmatprep.mubr.bf16.mxu1 %v4555_v15 }
 0x7ab   :  { %4907 = vmatmul.mubr.bf16.gmra.mxu1 %v4547_v49 }
 0x803   :  { %v4778_v45 = vpop.f32.mrf.mxu1 }
 0x804   :  { %v11586_v41 = vadd.f32 %v4778_v45, %v11386_v0 }
 0x805   :  { %v4780_v20 = vpop.f32.mrf.mxu1 }
 0x806   :  { %v11589_v25 = vadd.f32 %v4780_v20, %v11389_v6 }
 0x807   :  { %v4782_v58 = vpop.f32.mrf.mxu1 }
 0x808   :  { %v11592_v21 = vadd.f32 %v4782_v58, %v11392_v17 }
 0x809   :  { %v4784_v34 = vpop.f32.mrf.mxu1 }
 0x80a   :  { %v11595_v35 = vadd.f32 %v4784_v34, %v11395_v29 }
 0x80b   :  { %v4788_v55 = vpop.f32.mrf.mxu1 }
 0x80c   :  { %v11598_v59 = vadd.f32 %v4788_v55, %v11398_v32 }
 0x80d   :  { %v4790_v43 = vpop.f32.mrf.mxu1 }
 0x80e   :  { %v11601_v0 = vadd.f32 %v4790_v43, %v11401_v50 }
 0x80f   :  { %v4792_v47 = vpop.f32.mrf.mxu1 }
 0x810   :  { %v11604_v6 = vadd.f32 %v4792_v47, %v11404_v51 }
 0x811   :  { %v4794_v31 = vpop.f32.mrf.mxu1 }
 0x812   :  { %v11607_v17 = vadd.f32 %v4794_v31, %v11407_v9 }
 0x813   :  { %v4798_v27 = vpop.f32.mrf.mxu1 }
 0x814   :  { %v11610_v29 = vadd.f32 %v4798_v27, %v11410_v1 }
 0x815   :  { %v4800_v22 = vpop.f32.mrf.mxu1 }
 0x816   :  { %v11613_v32 = vadd.f32 %v4800_v22, %v11413_v33 }
 0x817   :  { %v4802_v57 = vpop.f32.mrf.mxu1 }
 0x818   :  { %v11616_v50 = vadd.f32 %v4802_v57, %v11416_v3  ;;  %v13870_v57 = vld [vmem:[#allocation40_spill] sm:$0xff] }
 0x819   :  { %v4804_v23 = vpop.f32.mrf.mxu1 }
 0x81a   :  { %v11619_v51 = vadd.f32 %v4804_v23, %v11419_v53 }
 0x81b   :  { %v4808_v16 = vpop.f32.mrf.mxu1 }
 0x81c   :  { %v11622_v9 = vadd.f32 %v4808_v16, %v11422_v11  ;;  %v13872_v16 = vld [vmem:[#allocation37_spill] sm:$0xff] }
 0x81d   :  { %v4810_v8 = vpop.f32.mrf.mxu1 }
 0x81e   :  { %v11625_v1 = vadd.f32 %v4810_v8, %v11425_v13 }
 0x81f   :  { %v4812_v60 = vpop.f32.mrf.mxu1 }
 0x820   :  { %v11628_v33 = vadd.f32 %v4812_v60, %v11428_v40  ;;  %v13874_v60 = vld [vmem:[#allocation44_spill] sm:$0xff] }
 0x821   :  { %v4814_v37 = vpop.f32.mrf.mxu1 }
 0x822   :  { %v11631_v3 = vadd.f32 %v4814_v37, %v11431_v42 }
 0x823   :  { %v4818_v30 = vpop.f32.mrf.mxu1 }
 0x824   :  { %v11634_v53 = vadd.f32 %v4818_v30, %v11434_v7  ;;  %v13876_v30 = vld [vmem:[#allocation42_spill] sm:$0xff] }
 0x825   :  { %v4820_v52 = vpop.f32.mrf.mxu1 }
 0x826   :  { %v11637_v11 = vadd.f32 %v4820_v52, %v11437_v2 }
 0x827   :  { %v4822_v5 = vpop.f32.mrf.mxu1 }
 0x828   :  { %v11640_v13 = vadd.f32 %v4822_v5, %v11440_v10  ;;  %v13878_v5 = vld [vmem:[#allocation47_spill] sm:$0xff] }
 0x829   :  { %v4824_v24 = vpop.f32.mrf.mxu1 }
 0x82a   :  { %v11643_v40 = vadd.f32 %v4824_v24, %v11443_v62 }
 0x82b   :  { %v4828_v38 = vpop.f32.mrf.mxu1 }
 0x82c   :  { %v11646_v42 = vadd.f32 %v4828_v38, %v11446_v28  ;;  %v13880_v38 = vld [vmem:[#allocation46_spill] sm:$0xff] }
 0x82d   :  { %v4830_v15 = vpop.f32.mrf.mxu1 }
 0x82e   :  { %v11649_v7 = vadd.f32 %v4830_v15, %v11449_v4 }
 0x82f   :  { %v4832_v56 = vpop.f32.mrf.mxu1 }
 0x830   :  { %v11652_v2 = vadd.f32 %v4832_v56, %v11452_v36 }
 0x831   :  { %v4834_v18 = vpop.f32.mrf.mxu1 }
 0x832   :  { %v11655_v10 = vadd.f32 %v4834_v18, %v11455_v14  ;;  %v13882_v18 = vld [vmem:[#allocation50_spill] sm:$0xff] }
 0x833   :  { %v4838_v49 = vpop.f32.mrf.mxu1 }
 0x834   :  { %v11658_v62 = vadd.f32 %v4838_v49, %v11458_v54 }
 0x835   :  { %v4840_v45 = vpop.f32.mrf.mxu1 }
 0x836   :  { %v11661_v28 = vadd.f32 %v4840_v45, %v11461_v39 }
 0x837   :  { %v4842_v20 = vpop.f32.mrf.mxu1 }
 0x838   :  { %v11664_v4 = vadd.f32 %v4842_v20, %v11464_v26  ;;  %v13884_v20 = vld [vmem:[#allocation48_spill] sm:$0xff] }
 0x839   :  { %v4844_v58 = vpop.f32.mrf.mxu1 }
 0x83a   :  { %v11667_v36 = vadd.f32 %v4844_v58, %v11467_v63 }
 0x83b   :  { %v4848_v34 = vpop.f32.mrf.mxu1 }
 0x83c   :  { %v11670_v14 = vadd.f32 %v4848_v34, %v11470_v12 }
 0x83d   :  { %v4850_v55 = vpop.f32.mrf.mxu1 }
 0x83e   :  { %v11673_v54 = vadd.f32 %v4850_v55, %v11473_v48  ;;  %v13886_v55 = vld [vmem:[#allocation38_spill] sm:$0xff] }
 0x83f   :  { %v4852_v43 = vpop.f32.mrf.mxu1 }
 0x840   :  { %v11676_v39 = vadd.f32 %v4852_v43, %v11476_v44 }
 0x841   :  { %v4854_v47 = vpop.f32.mrf.mxu1 }
 0x842   :  { %v11679_v26 = vadd.f32 %v4854_v47, %v11479_v19 }
 0x843   :  { %v4858_v31 = vpop.f32.mrf.mxu1 }
 0x844   :  { %v11682_v63 = vadd.f32 %v4858_v31, %v11482_v46  ;;  %v13888_v31 = vld [vmem:[#allocation36_spill] sm:$0xff] }
 0x845   :  { %v4860_v27 = vpop.f32.mrf.mxu1 }
 0x846   :  { %v11685_v12 = vadd.f32 %v4860_v27, %v11485_v61 }
 0x847   :  { %v4862_v22 = vpop.f32.mrf.mxu1 }
 0x848   :  { %v11688_v48 = vadd.f32 %v4862_v22, %v13870_v57  ;;  %v13890_v57 = vld [vmem:[#allocation39_spill] sm:$0xff] }
 0x849   :  { %v4864_v23 = vpop.f32.mrf.mxu1 }
 0x84a   :  { %13871 = vst [vmem:[#allocation90_spill] sm:$0xff] %v11688_v48  ;;  %v11691_v44 = vadd.f32 %v4864_v23, %v13872_v16 }
 0x84b   :  { %v4868_v8 = vpop.f32.mrf.mxu1 }
 0x84c   :  { %13873 = vst [vmem:[#allocation43_spill] sm:$0xff] %v11691_v44  ;;  %v11694_v19 = vadd.f32 %v4868_v8, %v13874_v60  ;;  %v13892_v8 = vld [vmem:[#allocation41_spill] sm:$0xff] }
 0x84d   :  { %v4870_v37 = vpop.f32.mrf.mxu1 }
 0x84e   :  { %13875 = vst [vmem:[#allocation45_spill] sm:$0xff] %v11694_v19  ;;  %v11697_v46 = vadd.f32 %v4870_v37, %v13876_v30  ;;  %v13894_v30 = vld [vmem:[#allocation49_spill] sm:$0xff] }
 0x84f   :  { %v4872_v52 = vpop.f32.mrf.mxu1 }
 0x850   :  { %13877 = vst [vmem:[#allocation54_spill] sm:$0xff] %v11697_v46  ;;  %v11700_v61 = vadd.f32 %v4872_v52, %v13878_v5 }
 0x851   :  { %v4874_v24 = vpop.f32.mrf.mxu1 }
 0x852   :  { %13879 = vst [vmem:[#allocation88_spill] sm:$0xff] %v11700_v61  ;;  %v11703_v15 = vadd.f32 %v4874_v24, %v13880_v38  ;;  %v13896_v24 = vld [vmem:[#allocation65_spill] sm:$0xff] }
 0x853   :  { %v4878_v56 = vpop.f32.mrf.mxu1 }
 0x854   :  { %13881 = vst [vmem:[#allocation89_spill] sm:$0xff] %v11703_v15  ;;  %v11706_v49 = vadd.f32 %v4878_v56, %v13882_v18  ;;  %v13898_v18 = vld [vmem:[#allocation70_spill] sm:$0xff] }
 0x855   :  { %v4880_v45 = vpop.f32.mrf.mxu1 }
 0x856   :  { %13883 = vst [vmem:[#allocation58_spill] sm:$0xff] %v11706_v49  ;;  %v11709_v58 = vadd.f32 %v4880_v45, %v13884_v20 }
 0x857   :  { %v4882_v34 = vpop.f32.mrf.mxu1 }
 0x858   :  { %13885 = vst [vmem:[#allocation62_spill] sm:$0xff] %v11709_v58  ;;  %v11712_v43 = vadd.f32 %v4882_v34, %v13886_v55  ;;  %v13900_v34 = vld [vmem:[#allocation71_spill] sm:$0xff] }
 0x859   :  { %v4884_v47 = vpop.f32.mrf.mxu1 }
 0x85a   :  { %13887 = vst [vmem:[#allocation74_spill] sm:$0xff] %v11712_v43  ;;  %v11715_v27 = vadd.f32 %v4884_v47, %v13888_v31  ;;  %v13902_v31 = vld [vmem:[#allocation75_spill] sm:$0xff] }
 0x85b   :  { %v4888_v22 = vpop.f32.mrf.mxu1 }
 0x85c   :  { %13889 = vst [vmem:[#allocation91_spill] sm:$0xff] %v11715_v27  ;;  %v11718_v23 = vadd.f32 %v4888_v22, %v13890_v57 }
 0x85d   :  { %v4890_v16 = vpop.f32.mrf.mxu1 }
 0x85e   :  { %13891 = vst [vmem:[#allocation51_spill] sm:$0xff] %v11718_v23  ;;  %v11721_v60 = vadd.f32 %v4890_v16, %v13892_v8  ;;  %v13904_v16 = vld [vmem:[#allocation76_spill] sm:$0xff] }
 0x85f   :  { %v4892_v37 = vpop.f32.mrf.mxu1 }
 0x860   :  { %13893 = vst [vmem:[#allocation52_spill] sm:$0xff] %v11721_v60  ;;  %v11724_v52 = vadd.f32 %v4892_v37, %v13894_v30  ;;  %v13906_v30 = vld [vmem:[#allocation77_spill] sm:$0xff] }
 0x861   :  { %v4894_v5 = vpop.f32.mrf.mxu1 }
 0x862   :  { %13895 = vst [vmem:[#allocation55_spill] sm:$0xff] %v11724_v52  ;;  %v11727_v38 = vadd.f32 %v4894_v5, %v13896_v24 }
 0x863   :  { %v4898_v56 = vpop.f32.mrf.mxu1 }
 0x864   :  { %13897 = vst [vmem:[#allocation56_spill] sm:$0xff] %v11727_v38  ;;  %v11730_v45 = vadd.f32 %v4898_v56, %v13898_v18  ;;  %v13908_v38 = vld [vmem:[#allocation72_spill] sm:$0xff] }
 0x865   :  { %v4900_v20 = vpop.f32.mrf.mxu1 }
 0x866   :  { %13899 = vst [vmem:[#allocation92_spill] sm:$0xff] %v11730_v45  ;;  %v11733_v55 = vadd.f32 %v4900_v20, %v13900_v34  ;;  %v13910_v45 = vld [vmem:[#allocation73_spill] sm:$0xff] }
 0x867   :  { %v4902_v47 = vpop.f32.mrf.mxu1 }
 0x868   :  { %13901 = vst [vmem:[#allocation93_spill] sm:$0xff] %v11733_v55  ;;  %v11736_v22 = vadd.f32 %v4902_v47, %v13902_v31  ;;  %v13912_v55 = vld [vmem:[#allocation68_spill] sm:$0xff] }
 0x869   :  { %v4904_v57 = vpop.f32.mrf.mxu1 }
 0x86a   :  { %13903 = vst [vmem:[#allocation94_spill] sm:$0xff] %v11736_v22  ;;  %v11739_v8 = vadd.f32 %v4904_v57, %v13904_v16 }
 0x86b   :  { %v4908_v37 = vpop.f32.mrf.mxu1 }
 0x86c   :  { %13905 = vst [vmem:[#allocation95_spill] sm:$0xff] %v11739_v8  ;;  %v11742_v5 = vadd.f32 %v4908_v37, %v13906_v30 }
 0x86d   :  { %v4910_v24 = vpop.f32.mrf.mxu1 }
 0x86e   :  { %13907 = vst [vmem:[#allocation78_spill] sm:$0xff] %v11742_v5  ;;  %v11745_v56 = vadd.f32 %v4910_v24, %v13908_v38 }
 0x86f   :  { %v4912_v18 = vpop.f32.mrf.mxu1 }
 0x870   :  { %13909 = vst [vmem:[#allocation57_spill] sm:$0xff] %v11745_v56  ;;  %v11748_v20 = vadd.f32 %v4912_v18, %v13910_v45 }
 0x871   :  { %v4914_v34 = vpop.f32.mrf.mxu1 }
 0x872   :  { %13911 = vst [vmem:[#allocation79_spill] sm:$0xff] %v11748_v20  ;;  %v11751_v47 = vadd.f32 %v4914_v34, %v13912_v55 }
 0x874   :  { %13913 = vst [vmem:[#allocation59_spill] sm:$0xff] %v11751_v47 }
 0x875   :  { %9147 = dma.done.wait [#allocation4 + $0x6], 4096 }
 0x876   :  { %9148 = vsyncadd [#allocation4 + $0x6], 4294963200  ;;  %v8783_v31 = vld [vmem:[#allocation3 + $0x674] ss:$8 sps:$4 sm:$0xff]   ;;  %v8785_v57 = vld [vmem:[#allocation3 + $0x670] ss:$8 sps:$4 sm:$0xff]  }
 0x877   :  { %5551 = vmatprep.subr.bf16.mxu0 %v8783_v31  ;;  %v8786_v16 = vld [vmem:[#allocation3 + $0x664] ss:$8 sps:$4 sm:$0xff]   ;;  %v8788_v37 = vld [vmem:[#allocation3 + $0x660] ss:$8 sps:$4 sm:$0xff]   ;;  %v8789_v30 = vld [vmem:[#allocation3 + $0x654] ss:$8 sps:$4 sm:$0xff]  }
 0x878   :  { %5552 = vmatpush1.bf16.msra.mxu0 %v8785_v57  ;;  %v8791_v38 = vld [vmem:[#allocation3 + $0x650] ss:$8 sps:$4 sm:$0xff]   ;;  %v8792_v24 = vld [vmem:[#allocation3 + $0x644] ss:$8 sps:$4 sm:$0xff]   ;;  %v8794_v45 = vld [vmem:[#allocation3 + $0x640] ss:$8 sps:$4 sm:$0xff]  }
 0x879   :  { %5553 = vmatprep.subr.bf16.mxu0 %v8786_v16  ;;  %v8795_v18 = vld [vmem:[#allocation3 + $0x634] ss:$8 sps:$4 sm:$0xff]   ;;  %v8797_v55 = vld [vmem:[#allocation3 + $0x630] ss:$8 sps:$4 sm:$0xff]   ;;  %v8798_v34 = vld [vmem:[#allocation3 + $0x624] ss:$8 sps:$4 sm:$0xff]  }
 0x87a   :  { %v8800_v47 = vld [vmem:[#allocation3 + $0x620] ss:$8 sps:$4 sm:$0xff]   ;;  %v8801_v31 = vld [vmem:[#allocation3 + $0x614] ss:$8 sps:$4 sm:$0xff]  }
 0x87b   :  { %v4976_v57 = vld [vmem:[#allocation2 + $0xf0] sm:$0x80]  ;;  %v4978_v20 = vld [vmem:[#allocation2] sm:$0xff]  ;;  %v4988_v15 = vld [vmem:[#allocation2 + $0xa8] sm:$0xff] }
 0x87c   :  { %5554 = vmatpush1.bf16.msra.mxu0 %v8788_v37  ;;  %v4980_v16 = vld [vmem:[#allocation2 + $0x170] sm:$0xff]  ;;  %v4982_v56 = vld [vmem:[#allocation2 + $0x1a0] sm:$0xff]  ;;  %v5034_v37 = vpack.c.bf16 %v4978_v20, %v4976_v57  ;;  %v4977_v57 = vld [vmem:[#allocation2 + $0x1d8] sm:$0xff] }
 0x87d   :  { %5555 = vmatprep.subr.bf16.mxu0 %v8789_v30  ;;  %v8803_v30 = vld [vmem:[#allocation3 + $0x610] ss:$8 sps:$4 sm:$0xff]   ;;  %v5036_v5 = vpack.c.bf16 %v4982_v56, %v4980_v16  ;;  %v8807_v23 = vld [vmem:[#allocation3 + $0x6f4] ss:$8 sps:$4 sm:$0xff]   ;;  %v4985_v49 = vld [vmem:[#allocation2 + $0x40] sm:$0xff] }
 0x87e   :  { %v5116_v8 = vshll.u32 %v5034_v37, 16  ;;  %v8809_v20 = vld [vmem:[#allocation3 + $0x6f0] ss:$8 sps:$4 sm:$0xff]   ;;  %v8819_v16 = vld [vmem:[#allocation3 + $0x6b4] ss:$8 sps:$4 sm:$0xff]   ;;  %v4987_v48 = vld [vmem:[#allocation2 + $0x68] sm:$0xff] }
 0x87f   :  { %v5124_v22 = vshll.u32 %v5036_v5, 16  ;;  %v4983_v58 = vld [vmem:[#allocation2 + $0xb0] sm:$0xff] }
 0x880   :  { %5556 = vmatpush1.bf16.msra.mxu0 %v8791_v38  ;;  %v8804_v38 = vld [vmem:[#allocation3 + $0x604] ss:$8 sps:$4 sm:$0xff]   ;;  %v5118_v52 = vrot.slane %v5116_v8, 4  ;;  %v8813_v8 = vld [vmem:[#allocation3 + $0x6d4] ss:$8 sps:$4 sm:$0xff]  }
 0x881   :  { %5557 = vmatprep.subr.bf16.mxu0 %v8792_v24  ;;  %v5113_v24 = vshrl.u32 %v5034_v37, 16  ;;  %v5126_v60 = vrot.slane %v5124_v22, 4  ;;  %v8816_v22 = vld [vmem:[#allocation3 + $0x6c4] ss:$8 sps:$4 sm:$0xff]  }
 0x882   :  { %v4979_v37 = vld [vmem:[#allocation2 + $0x160] sm:$0xff] }
 0x884   :  { %5558 = vmatpush1.bf16.msra.mxu0 %v8794_v45  ;;  %v5121_v45 = vshrl.u32 %v5036_v5, 16  ;;  %v8812_v5 = vld [vmem:[#allocation3 + $0x6e0] ss:$8 sps:$4 sm:$0xff]  }
 0x885   :  { %5559 = vmatprep.subr.bf16.mxu0 %v8795_v18  ;;  %v5115_v18 = vrot.slane %v5113_v24, 3  ;;  %v8821_v24 = vld [vmem:[#allocation3 + $0x6b0] ss:$8 sps:$4 sm:$0xff]  }
 0x887   :  { %v5119_v27 = vor.u32 %v5118_v52, %v5115_v18  ;;  %v8818_v52 = vld [vmem:[#allocation3 + $0x6c0] ss:$8 sps:$4 sm:$0xff]   ;;  %v8822_v18 = vld [vmem:[#allocation3 + $0x6a4] ss:$8 sps:$4 sm:$0xff]  }
 0x888   :  { %5560 = vmatpush1.bf16.msra.mxu0 %v8797_v55  ;;  %v8806_v55 = vld [vmem:[#allocation3 + $0x600] ss:$8 sps:$4 sm:$0xff]  }
 0x889   :  { %5561 = vmatprep.subr.bf16.mxu0 %v8798_v34  ;;  %v5123_v34 = vrot.slane %v5121_v45, 3 }
 0x88b   :  { %v11753_v43 = vor.u32 %v5126_v60, %v5123_v34  ;;  %v4975_v60 = vld [vmem:[#allocation2 + $0xe8] sm:$0x80] }
 0x88c   :  { %5562 = vmatpush1.bf16.msra.mxu0 %v8800_v47  ;;  %v8810_v47 = vld [vmem:[#allocation3 + $0x6e4] ss:$8 sps:$4 sm:$0xff]  }
 0x88d   :  { %5563 = vmatprep.subr.bf16.mxu0 %v8801_v31  ;;  %v5128_v56 = vsel %vm1486_vm0, %v5119_v27, %v11753_v43  ;;  %v8815_v31 = vld [vmem:[#allocation3 + $0x6d0] ss:$8 sps:$4 sm:$0xff]  }
 0x88e   :  { %5583 = vmatprep.mubr.bf16.mxu0 %v5128_v56  ;;  %v4984_v27 = vld [vmem:[#allocation2 + $0x118] sm:$0xff] }
 0x890   :  { %5564 = vmatpush1.bf16.msra.mxu0 %v8803_v30  ;;  %v4981_v30 = vld [vmem:[#allocation2 + $0x120] sm:$0xff] }
 0x891   :  { %5565 = vmatprep.subr.bf16.mxu0 %v8804_v38  ;;  %v5033_v38 = vpack.c.bf16 %v4977_v57, %v4975_v60  ;;  %v5035_v45 = vpack.c.bf16 %v4981_v30, %v4979_v37  ;;  %v4990_v60 = vld [vmem:[#allocation2 + $0x208] sm:$0xff]  ;;  %v8827_v57 = vld [vmem:[#allocation3 + $0x690] ss:$8 sps:$4 sm:$0xff]  }
 0x893   :  { %v5096_v34 = vshrl.u32 %v5033_v38, 16  ;;  %v5099_v56 = vshll.u32 %v5033_v38, 16 }
 0x894   :  { %5566 = vmatpush1.bf16.msra.mxu0 %v8806_v55 }
 0x895   :  { %5567 = vmatprep.subr.bf16.mxu0 %v8807_v23  ;;  %v4986_v23 = vld [vmem:[#allocation2 + $0x198] sm:$0xff] }
 0x896   :  { %v5038_v55 = vpack.c.bf16 %v4986_v23, %v4984_v27  ;;  %v5037_v27 = vpack.c.bf16 %v4985_v49, %v4983_v58  ;;  %v8828_v23 = vld [vmem:[#allocation3 + $0x684] ss:$8 sps:$4 sm:$0xff]  }
 0x898   :  { %5568 = vmatpush2.bf16.msra.mxu0 %v8809_v20  ;;  %v8824_v20 = vld [vmem:[#allocation3 + $0x6a0] ss:$8 sps:$4 sm:$0xff]   ;;  %v5130_v46 = vshrl.u32 %v5037_v27, 16  ;;  %v5133_v19 = vshll.u32 %v5037_v27, 16 }
 0x899   :  { %5569 = vmatprep.subr.bf16.mxu0 %v8810_v47  ;;  %v5104_v47 = vshrl.u32 %v5035_v45, 16 }
 0x89a   :  { %v5132_v58 = vrot.slane %v5130_v46, 3  ;;  %v4998_v46 = vld [vmem:[#allocation2 + $0x70] sm:$0xff] }
 0x89b   :  { %v5106_v37 = vrot.slane %v5104_v47, 3  ;;  %v4992_v47 = vld [vmem:[#allocation2 + $0x1c0] sm:$0xff] }
 0x89c   :  { %5570 = vmatpush2.bf16.msra.mxu0 %v8812_v5  ;;  %v5107_v5 = vshll.u32 %v5035_v45, 16  ;;  %v5040_v45 = vpack.c.bf16 %v4990_v60, %v4988_v15 }
 0x89d   :  { %5571 = vmatprep.subr.bf16.mxu0 %v8813_v8  ;;  %v8825_v8 = vld [vmem:[#allocation3 + $0x694] ss:$8 sps:$4 sm:$0xff]  }
 0x89e   :  { %v5109_v30 = vrot.slane %v5107_v5, 4  ;;  %v4994_v5 = vld [vmem:[#allocation2 + $0x158] sm:$0xff] }
 0x8a0   :  { %5572 = vmatpush2.bf16.msra.mxu0 %v8815_v31  ;;  %v5139_v31 = vshrl.u32 %v5038_v55, 16 }
 0x8a1   :  { %5573 = vmatprep.subr.bf16.mxu0 %v8816_v22  ;;  %v5142_v22 = vshll.u32 %v5038_v55, 16  ;;  %v5110_v55 = vor.u32 %v5109_v30, %v5106_v37 }
 0x8a2   :  { %v5141_v38 = vrot.slane %v5139_v31, 3 }
 0x8a4   :  { %5574 = vmatpush2.bf16.msra.mxu0 %v8818_v52  ;;  %v5098_v52 = vrot.slane %v5096_v34, 3  ;;  %v5157_v34 = vshrl.u32 %v5040_v45, 16 }
 0x8a5   :  { %5575 = vmatprep.subr.bf16.mxu0 %v8819_v16  ;;  %v5101_v16 = vrot.slane %v5099_v56, 4  ;;  %v4989_v56 = vld [vmem:[#allocation2 + $0x168] sm:$0xff] }
 0x8a6   :  { %v5039_v15 = vpack.c.bf16 %v4989_v56, %v4987_v48 }
 0x8a7   :  { %v5102_v61 = vor.u32 %v5101_v16, %v5098_v52  ;;  %v5042_v52 = vpack.c.bf16 %v4994_v5, %v4992_v47 }
 0x8a8   :  { %5576 = vmatpush2.bf16.msra.mxu0 %v8821_v24  ;;  %v5144_v24 = vrot.slane %v5142_v22, 4  ;;  %v5159_v22 = vrot.slane %v5157_v34, 3  ;;  %v5148_v16 = vshrl.u32 %v5039_v15, 16  ;;  %v5151_v37 = vshll.u32 %v5039_v15, 16 }
 0x8a9   :  { %5577 = vmatprep.subr.bf16.mxu0 %v8822_v18  ;;  %v8830_v18 = vld [vmem:[#allocation3 + $0x680] ss:$8 sps:$4 sm:$0xff]   ;;  %v5111_v49 = vsel %vm1486_vm0, %v5102_v61, %v5110_v55  ;;  %v5175_v27 = vshrl.u32 %v5042_v52, 16  ;;  %v4996_v61 = vld [vmem:[#allocation2 + $0x190] sm:$0xff] }
 0x8aa   :  { %v5145_v44 = vor.u32 %v5144_v24, %v5141_v38  ;;  %v4991_v38 = vld [vmem:[#allocation2 + $0x188] sm:$0xff]  ;;  %v4993_v24 = vld [vmem:[#allocation2 + $0x78] sm:$0xff]  ;;  %v5044_v56 = vpack.c.bf16 %v4998_v46, %v4996_v61 }
 0x8ab   :  { %v5177_v34 = vrot.slane %v5175_v27, 3 }
 0x8ac   :  { %5578 = vmatpush2.bf16.msra.mxu0 %v8824_v20  ;;  %v5160_v20 = vshll.u32 %v5040_v45, 16  ;;  %v5146_v31 = vsel %vm1486_vm0, %v11753_v43, %v5145_v44  ;;  %v5153_v45 = vrot.slane %v5151_v37, 4  ;;  %v5041_v43 = vpack.c.bf16 %v4993_v24, %v4991_v38 }
 0x8ad   :  { %5579 = vmatprep.subr.bf16.mxu0 %v8825_v8  ;;  %v5135_v8 = vrot.slane %v5133_v19, 4  ;;  %v5150_v19 = vrot.slane %v5148_v16, 3  ;;  %v5196_v15 = vshll.u32 %v5044_v56, 16 }
 0x8ae   :  { %v5162_v60 = vrot.slane %v5160_v20, 4  ;;  %v5166_v5 = vshrl.u32 %v5041_v43, 16 }
 0x8af   :  { %v5154_v47 = vor.u32 %v5153_v45, %v5150_v19  ;;  %v5198_v38 = vrot.slane %v5196_v15, 4 }
 0x8b0   :  { %5580 = vmatpush2.bf16.msra.mxu0 %v8827_v57  ;;  %v5136_v57 = vor.u32 %v5135_v8, %v5132_v58  ;;  %v5163_v30 = vor.u32 %v5162_v60, %v5159_v22  ;;  %v5193_v8 = vshrl.u32 %v5044_v56, 16  ;;  %v4997_v22 = vld [vmem:[#allocation2 + $0xd8] sm:$0xff]  ;;  %v5168_v16 = vrot.slane %v5166_v5, 3 }
 0x8b1   :  { %5581 = vmatprep.subr.bf16.mxu0 %v8828_v23  ;;  %v5178_v23 = vshll.u32 %v5042_v52, 16  ;;  %v5000_v60 = vld [vmem:[#allocation2 + $0x58] sm:$0xff] }
 0x8b2   :  { %v5137_v48 = vsel %vm1486_vm0, %v5110_v55, %v5136_v57  ;;  %v5002_v55 = vld [vmem:[#allocation2 + $0x210] sm:$0xff]  ;;  %v5155_v52 = vsel %vm1486_vm0, %v5136_v57, %v5154_v47  ;;  %v5006_v57 = vld [vmem:[#allocation2 + $0x1e8] sm:$0xff] }
 0x8b3   :  { %v5180_v20 = vrot.slane %v5178_v23, 4  ;;  %v5195_v23 = vrot.slane %v5193_v8, 3  ;;  %v5046_v24 = vpack.c.bf16 %v5002_v55, %v5000_v60 }
 0x8b4   :  { %5582 = vmatpush2.bf16.msra.mxu0 %v8830_v18  ;;  %v5164_v18 = vsel %vm1486_vm0, %v5145_v44, %v5163_v30 }
 0x8b5   :  { %v5181_v58 = vor.u32 %v5180_v20, %v5177_v34  ;;  %v5199_v19 = vor.u32 %v5198_v38, %v5195_v23  ;;  %v5211_v45 = vshrl.u32 %v5046_v24, 16  ;;  %v5001_v34 = vld [vmem:[#allocation2 + $0x178] sm:$0xff]  ;;  %v5004_v20 = vld [vmem:[#allocation2 + $0x1a8] sm:$0xff]  ;;  %v5008_v38 = vld [vmem:[#allocation2 + $0x1f0] sm:$0xff] }
 0x8b6   :  { %v5005_v23 = vld [vmem:[#allocation2 + $0x1c8] sm:$0xff] }
 0x8b7   :  { %5584 = vmatmul.mubr.bf16.vlgmr.msra.gmra.mxu0 %v5111_v49  ;;  %v5169_v49 = vshll.u32 %v5041_v43, 16  ;;  %v5182_v27 = vsel %vm1486_vm0, %v5163_v30, %v5181_v58  ;;  %v5214_v43 = vshll.u32 %v5046_v24, 16  ;;  %v5200_v8 = vsel %vm1486_vm0, %v5181_v58, %v5199_v19 }
 0x8b8   :  { %5593 = vmatprep.mubr.bf16.mxu0 %v5146_v31  ;;  %v4995_v31 = vld [vmem:[#allocation2 + $0x218] sm:$0xff]  ;;  %v5213_v15 = vrot.slane %v5211_v45, 3 }
 0x8b9   :  { %v5171_v37 = vrot.slane %v5169_v49, 4  ;;  %v5043_v44 = vpack.c.bf16 %v4997_v22, %v4995_v31  ;;  %v5216_v31 = vrot.slane %v5214_v43, 4  ;;  %v5048_v22 = vpack.c.bf16 %v5006_v57, %v5004_v20 }
 0x8bb   :  { %v5172_v61 = vor.u32 %v5171_v37, %v5168_v16  ;;  %v5184_v46 = vshrl.u32 %v5043_v44, 16  ;;  %v5217_v16 = vor.u32 %v5216_v31, %v5213_v15  ;;  %v5229_v37 = vshrl.u32 %v5048_v22, 16  ;;  %v5009_v15 = vld [vmem:[#allocation2 + $0x1f8] sm:$0xff]  ;;  %v5012_v31 = vld [vmem:[#allocation2 + $0xe0] sm:$0xff] }
 0x8bd   :  { %v5173_v56 = vsel %vm1486_vm0, %v5154_v47, %v5172_v61  ;;  %v5186_v5 = vrot.slane %v5184_v46, 3  ;;  %v5010_v47 = vld [vmem:[#allocation2 + $0x148] sm:$0xff]  ;;  %v5218_v45 = vsel %vm1486_vm0, %v5199_v19, %v5217_v16  ;;  %v5231_v43 = vrot.slane %v5229_v37, 3 }
 0x8bf   :  { %5594 = vmatmul.mubr.bf16.gmra.mxu0 %v5137_v48  ;;  %v5187_v48 = vshll.u32 %v5043_v44, 16  ;;  %v5232_v44 = vshll.u32 %v5048_v22, 16 }
 0x8c0   :  { %5603 = vmatprep.mubr.bf16.mxu0 %v5164_v18  ;;  %v4999_v18 = vld [vmem:[#allocation2 + $0xa0] sm:$0xff] }
 0x8c1   :  { %v5189_v49 = vrot.slane %v5187_v48, 4  ;;  %v5045_v30 = vpack.c.bf16 %v5001_v34, %v4999_v18  ;;  %v5234_v18 = vrot.slane %v5232_v44, 4  ;;  %v5050_v34 = vpack.c.bf16 %v5010_v47, %v5008_v38 }
 0x8c3   :  { %v5190_v60 = vor.u32 %v5189_v49, %v5186_v5  ;;  %v5202_v55 = vshrl.u32 %v5045_v30, 16  ;;  %v5235_v5 = vor.u32 %v5234_v18, %v5231_v43  ;;  %v5247_v49 = vshrl.u32 %v5050_v34, 16  ;;  %v5013_v43 = vld [vmem:[#allocation2 + $0x50] sm:$0xff]  ;;  %v5016_v18 = vld [vmem:[#allocation2 + $0x80] sm:$0xff] }
 0x8c5   :  { %v5191_v24 = vsel %vm1486_vm0, %v5172_v61, %v5190_v60  ;;  %v5204_v46 = vrot.slane %v5202_v55, 3  ;;  %v5014_v61 = vld [vmem:[#allocation2 + $0x1d0] sm:$0xff]  ;;  %v5236_v37 = vsel %vm1486_vm0, %v5217_v16, %v5235_v5  ;;  %v5249_v44 = vrot.slane %v5247_v49, 3 }
 0x8c7   :  { %5604 = vmatmul.mubr.bf16.gmra.mxu0 %v5155_v52  ;;  %v5205_v52 = vshll.u32 %v5045_v30, 16  ;;  %v5250_v30 = vshll.u32 %v5050_v34, 16 }
 0x8c8   :  { %5613 = vmatprep.mubr.bf16.mxu0 %v5182_v27  ;;  %v5003_v27 = vld [vmem:[#allocation2 + $0x108] sm:$0xff] }
 0x8c9   :  { %v5207_v48 = vrot.slane %v5205_v52, 4  ;;  %v5047_v58 = vpack.c.bf16 %v5005_v23, %v5003_v27  ;;  %v5252_v27 = vrot.slane %v5250_v30, 4  ;;  %v5052_v23 = vpack.c.bf16 %v5014_v61, %v5012_v31 }
 0x8cb   :  { %v5208_v20 = vor.u32 %v5207_v48, %v5204_v46  ;;  %v5220_v57 = vshrl.u32 %v5047_v58, 16  ;;  %v5253_v46 = vor.u32 %v5252_v27, %v5249_v44  ;;  %v5265_v48 = vshrl.u32 %v5052_v23, 16  ;;  %v5017_v44 = vld [vmem:[#allocation2 + $0x20] sm:$0xff]  ;;  %v5020_v27 = vld [vmem:[#allocation2 + $0x88] sm:$0xff] }
 0x8cd   :  { %v5209_v22 = vsel %vm1486_vm0, %v5190_v60, %v5208_v20  ;;  %v5222_v55 = vrot.slane %v5220_v57, 3  ;;  %v5018_v60 = vld [vmem:[#allocation2 + $0x1b8] sm:$0xff]  ;;  %v5254_v49 = vsel %vm1486_vm0, %v5235_v5, %v5253_v46  ;;  %v5267_v30 = vrot.slane %v5265_v48, 3 }
 0x8cf   :  { %5614 = vmatmul.mubr.bf16.gmra.mxu0 %v5173_v56  ;;  %v5223_v56 = vshll.u32 %v5047_v58, 16  ;;  %v5268_v58 = vshll.u32 %v5052_v23, 16 }
 0x8d0   :  { %5623 = vmatprep.mubr.bf16.mxu0 %v5200_v8  ;;  %v5007_v8 = vld [vmem:[#allocation2 + $0x38] sm:$0xff] }
 0x8d1   :  { %v5225_v52 = vrot.slane %v5223_v56, 4  ;;  %v5049_v19 = vpack.c.bf16 %v5009_v15, %v5007_v8  ;;  %v5270_v8 = vrot.slane %v5268_v58, 4  ;;  %v5054_v15 = vpack.c.bf16 %v5018_v60, %v5016_v18 }
 0x8d3   :  { %v5226_v38 = vor.u32 %v5225_v52, %v5222_v55  ;;  %v5238_v47 = vshrl.u32 %v5049_v19, 16  ;;  %v5271_v55 = vor.u32 %v5270_v8, %v5267_v30  ;;  %v5283_v52 = vshrl.u32 %v5054_v15, 16  ;;  %v5021_v30 = vld [vmem:[#allocation2 + $0x1e0] sm:$0xff] }
 0x8d4   :  { %v5024_v8 = vld [vmem:[#allocation2 + $0x60] sm:$0xff] }
 0x8d5   :  { %v5227_v34 = vsel %vm1486_vm0, %v5208_v20, %v5226_v38  ;;  %v5240_v57 = vrot.slane %v5238_v47, 3  ;;  %v5022_v20 = vld [vmem:[#allocation2 + $0x140] sm:$0xff]  ;;  %v5272_v48 = vsel %vm1486_vm0, %v5253_v46, %v5271_v55  ;;  %v5285_v58 = vrot.slane %v5283_v52, 3 }
 0x8d7   :  { %5624 = vmatmul.mubr.bf16.gmra.mxu0 %v5191_v24  ;;  %v5241_v24 = vshll.u32 %v5049_v19, 16  ;;  %v5286_v19 = vshll.u32 %v5054_v15, 16 }
 0x8d8   :  { %5633 = vmatprep.mubr.bf16.mxu0 %v5218_v45  ;;  %v5011_v45 = vld [vmem:[#allocation2 + $0x110] sm:$0xff] }
 0x8d9   :  { %v5243_v56 = vrot.slane %v5241_v24, 4  ;;  %v5051_v16 = vpack.c.bf16 %v5013_v43, %v5011_v45  ;;  %v5288_v45 = vrot.slane %v5286_v19, 4  ;;  %v5056_v43 = vpack.c.bf16 %v5022_v20, %v5020_v27 }
 0x8db   :  { %v5244_v31 = vor.u32 %v5243_v56, %v5240_v57  ;;  %v5256_v61 = vshrl.u32 %v5051_v16, 16  ;;  %v5289_v57 = vor.u32 %v5288_v45, %v5285_v58  ;;  %v5301_v56 = vshrl.u32 %v5056_v43, 16  ;;  %v5025_v58 = vld [vmem:[#allocation2 + $0x180] sm:$0xff]  ;;  %v5028_v45 = vld [vmem:[#allocation2 + $0x1b0] sm:$0xff] }
 0x8dd   :  { %v5245_v23 = vsel %vm1486_vm0, %v5226_v38, %v5244_v31  ;;  %v5258_v47 = vrot.slane %v5256_v61, 3  ;;  %v5026_v38 = vld [vmem:[#allocation2 + $0x30] sm:$0xff]  ;;  %v5290_v52 = vsel %vm1486_vm0, %v5271_v55, %v5289_v57  ;;  %v5303_v19 = vrot.slane %v5301_v56, 3 }
 0x8df   :  { %5634 = vmatmul.mubr.bf16.gmra.mxu0 %v5209_v22  ;;  %v5259_v22 = vshll.u32 %v5051_v16, 16  ;;  %v5304_v16 = vshll.u32 %v5056_v43, 16 }
 0x8e0   :  { %5643 = vmatprep.mubr.bf16.mxu0 %v5236_v37  ;;  %v5015_v37 = vld [vmem:[#allocation2 + $0x128] sm:$0xff] }
 0x8e1   :  { %v5261_v24 = vrot.slane %v5259_v22, 4  ;;  %v5053_v5 = vpack.c.bf16 %v5017_v44, %v5015_v37  ;;  %v5306_v37 = vrot.slane %v5304_v16, 4  ;;  %v5058_v44 = vpack.c.bf16 %v5026_v38, %v5024_v8 }
 0x8e3   :  { %v5262_v18 = vor.u32 %v5261_v24, %v5258_v47  ;;  %v5274_v60 = vshrl.u32 %v5053_v5, 16  ;;  %v5307_v47 = vor.u32 %v5306_v37, %v5303_v19  ;;  %v5319_v24 = vshrl.u32 %v5058_v44, 16  ;;  %v5029_v19 = vld [vmem:[#allocation2 + $0xc8] sm:$0xff]  ;;  %v5032_v37 = vld [vmem:[#allocation2 + $0x100] sm:$0x7f] }
 0x8e5   :  { %v5263_v15 = vsel %vm1486_vm0, %v5244_v31, %v5262_v18  ;;  %v5276_v61 = vrot.slane %v5274_v60, 3  ;;  %v5030_v31 = vld [vmem:[#allocation2 + $0x48] sm:$0xff]  ;;  %v5308_v56 = vsel %vm1486_vm0, %v5289_v57, %v5307_v47  ;;  %v5321_v16 = vrot.slane %v5319_v24, 3 }
 0x8e7   :  { %5644 = vmatmul.mubr.bf16.gmra.mxu0 %v5227_v34  ;;  %v5277_v34 = vshll.u32 %v5053_v5, 16  ;;  %v5322_v5 = vshll.u32 %v5058_v44, 16 }
 0x8e8   :  { %5653 = vmatprep.mubr.bf16.mxu0 %v5254_v49  ;;  %v5019_v49 = vld [vmem:[#allocation2 + $0x18] sm:$0xff] }
 0x8e9   :  { %v5279_v22 = vrot.slane %v5277_v34, 4  ;;  %v5055_v46 = vpack.c.bf16 %v5021_v30, %v5019_v49  ;;  %v5324_v49 = vrot.slane %v5322_v5, 4  ;;  %v5060_v30 = vpack.c.bf16 %v5030_v31, %v5028_v45 }
 0x8eb   :  { %v5280_v27 = vor.u32 %v5279_v22, %v5276_v61  ;;  %v5292_v20 = vshrl.u32 %v5055_v46, 16  ;;  %v5325_v61 = vor.u32 %v5324_v49, %v5321_v16  ;;  %v5337_v22 = vshrl.u32 %v5060_v30, 16 }
 0x8ed   :  { %v5281_v43 = vsel %vm1486_vm0, %v5262_v18, %v5280_v27  ;;  %v5294_v60 = vrot.slane %v5292_v20, 3  ;;  %v5326_v57 = vsel %vm1486_vm0, %v5307_v47, %v5325_v61  ;;  %v5339_v24 = vrot.slane %v5337_v22, 3 }
 0x8ef   :  { %5654 = vmatmul.mubr.bf16.gmra.mxu0 %v5245_v23  ;;  %v5295_v23 = vshll.u32 %v5055_v46, 16  ;;  %v5340_v46 = vshll.u32 %v5060_v30, 16 }
 0x8f0   :  { %5663 = vmatprep.mubr.bf16.mxu0 %v5272_v48  ;;  %v5023_v48 = vld [vmem:[#allocation2 + $0xf8] sm:$0xff] }
 0x8f1   :  { %v5297_v34 = vrot.slane %v5295_v23, 4  ;;  %v5057_v55 = vpack.c.bf16 %v5025_v58, %v5023_v48  ;;  %v5342_v5 = vrot.slane %v5340_v46, 4  ;;  %v5062_v48 = vpack.c.bf16 %v5032_v37, %v5032_v37 }
 0x8f3   :  { %v5298_v8 = vor.u32 %v5297_v34, %v5294_v60  ;;  %v5310_v38 = vshrl.u32 %v5057_v55, 16  ;;  %v5355_v60 = vshrl.u32 %v5062_v48, 16  ;;  %v5358_v34 = vshll.u32 %v5062_v48, 16 }
 0x8f5   :  { %v5299_v18 = vsel %vm1486_vm0, %v5280_v27, %v5298_v8  ;;  %v5312_v44 = vrot.slane %v5310_v38, 3  ;;  %v5357_v47 = vrot.slane %v5355_v60, 3  ;;  %v5360_v38 = vrot.slane %v5358_v34, 4 }
 0x8f7   :  { %5664 = vmatmul.mubr.bf16.gmra.mxu0 %v5263_v15  ;;  %v5313_v15 = vshll.u32 %v5057_v55, 16  ;;  %v5031_v55 = vld [vmem:[#allocation2 + $0xd0] sm:$0x7f] }
 0x8f8   :  { %5673 = vmatprep.mubr.bf16.mxu0 %v5290_v52  ;;  %v5027_v52 = vld [vmem:[#allocation2 + $0x150] sm:$0xff]  ;;  %v5061_v49 = vpack.c.bf16 %v5031_v55, %v5031_v55 }
 0x8f9   :  { %v5315_v20 = vrot.slane %v5313_v15, 4  ;;  %v5059_v23 = vpack.c.bf16 %v5029_v19, %v5027_v52  ;;  %v5361_v52 = vor.u32 %v5360_v38, %v5357_v47 }
 0x8fa   :  { %v5346_v22 = vshrl.u32 %v5061_v49, 16  ;;  %v5349_v46 = vshll.u32 %v5061_v49, 16 }
 0x8fb   :  { %v5316_v58 = vor.u32 %v5315_v20, %v5312_v44  ;;  %v5328_v45 = vshrl.u32 %v5059_v23, 16  ;;  %v5331_v31 = vshll.u32 %v5059_v23, 16 }
 0x8fc   :  { %v5348_v37 = vrot.slane %v5346_v22, 3 }
 0x8fd   :  { %v5330_v27 = vrot.slane %v5328_v45, 3  ;;  %v5333_v16 = vrot.slane %v5331_v31, 4 }
 0x8ff   :  { %5674 = vmatmul.mubr.bf16.gmra.mxu0 %v5281_v43  ;;  %v5343_v43 = vor.u32 %v5342_v5, %v5339_v24  ;;  %v5334_v15 = vor.u32 %v5333_v16, %v5330_v27 }
 0x900   :  { %5683 = vmatprep.mubr.bf16.mxu0 %v5308_v56  ;;  %v5317_v56 = vsel %vm1486_vm0, %v5298_v8, %v5316_v58 }
 0x901   :  { %v5344_v30 = vsel %vm1486_vm0, %v5325_v61, %v5343_v43  ;;  %v5335_v19 = vsel %vm1486_vm0, %v5316_v58, %v5334_v15  ;;  %v5362_v44 = vsel %vm1486_vm0, %v5343_v43, %v5361_v52 }
 0x907   :  { %5684 = vmatmul.mubr.bf16.gmra.mxu0 %v5299_v18  ;;  %v5351_v18 = vrot.slane %v5349_v46, 4 }
 0x908   :  { %5693 = vmatprep.mubr.bf16.mxu0 %v5326_v57 }
 0x909   :  { %v5352_v8 = vor.u32 %v5351_v18, %v5348_v37 }
 0x90b   :  { %v5353_v20 = vsel %vm1486_vm0, %v5334_v15, %v5352_v8 }
 0x90f   :  { %5694 = vmatmul.mubr.bf16.gmra.mxu0 %v5317_v56 }
 0x910   :  { %5703 = vmatprep.mubr.bf16.mxu0 %v5344_v30 }
 0x917   :  { %5704 = vmatmul.mubr.bf16.gmra.mxu0 %v5335_v19 }
 0x918   :  { %5713 = vmatprep.mubr.bf16.mxu0 %v5362_v44 }
 0x91f   :  { %5714 = vmatmul.mubr.bf16.gmra.mxu0 %v5353_v20 }
 0x977   :  { %v5585_v61 = vpop.f32.mrf.mxu0 }
 0x978   :  { %v11786_v23 = vadd.f32 %v5585_v61, %v11586_v41 }
 0x979   :  { %v5587_v57 = vpop.f32.mrf.mxu0 }
 0x97a   :  { %v11789_v24 = vadd.f32 %v5587_v57, %v11589_v25 }
 0x97b   :  { %v5589_v5 = vpop.f32.mrf.mxu0 }
 0x97c   :  { %v11792_v48 = vadd.f32 %v5589_v5, %v11592_v21 }
 0x97d   :  { %v5591_v58 = vpop.f32.mrf.mxu0 }
 0x97e   :  { %v11795_v45 = vadd.f32 %v5591_v58, %v11595_v35 }
 0x97f   :  { %v5595_v31 = vpop.f32.mrf.mxu0 }
 0x980   :  { %v11798_v43 = vadd.f32 %v5595_v31, %v11598_v59 }
 0x981   :  { %v5597_v60 = vpop.f32.mrf.mxu0 }
 0x982   :  { %v11801_v41 = vadd.f32 %v5597_v60, %v11601_v0 }
 0x983   :  { %v5599_v34 = vpop.f32.mrf.mxu0 }
 0x984   :  { %v11804_v25 = vadd.f32 %v5599_v34, %v11604_v6 }
 0x985   :  { %v5601_v55 = vpop.f32.mrf.mxu0 }
 0x986   :  { %v11807_v21 = vadd.f32 %v5601_v55, %v11607_v17 }
 0x987   :  { %v5605_v56 = vpop.f32.mrf.mxu0 }
 0x988   :  { %v11810_v35 = vadd.f32 %v5605_v56, %v11610_v29 }
 0x989   :  { %v5607_v27 = vpop.f32.mrf.mxu0 }
 0x98a   :  { %v11813_v59 = vadd.f32 %v5607_v27, %v11613_v32 }
 0x98b   :  { %v5609_v16 = vpop.f32.mrf.mxu0 }
 0x98c   :  { %v11816_v0 = vadd.f32 %v5609_v16, %v11616_v50  ;;  %v13914_v16 = vld [vmem:[#allocation90_spill] sm:$0xff] }
 0x98d   :  { %v5611_v49 = vpop.f32.mrf.mxu0 }
 0x98e   :  { %v11819_v6 = vadd.f32 %v5611_v49, %v11619_v51 }
 0x98f   :  { %v5615_v30 = vpop.f32.mrf.mxu0 }
 0x990   :  { %v11822_v17 = vadd.f32 %v5615_v30, %v11622_v9  ;;  %v13915_v30 = vld [vmem:[#allocation43_spill] sm:$0xff] }
 0x991   :  { %v5617_v47 = vpop.f32.mrf.mxu0 }
 0x992   :  { %v11825_v29 = vadd.f32 %v5617_v47, %v11625_v1 }
 0x993   :  { %v5619_v38 = vpop.f32.mrf.mxu0 }
 0x994   :  { %v11828_v32 = vadd.f32 %v5619_v38, %v11628_v33  ;;  %v13916_v38 = vld [vmem:[#allocation45_spill] sm:$0xff] }
 0x995   :  { %v5621_v15 = vpop.f32.mrf.mxu0 }
 0x996   :  { %v11831_v50 = vadd.f32 %v5621_v15, %v11631_v3 }
 0x997   :  { %v5625_v22 = vpop.f32.mrf.mxu0 }
 0x998   :  { %v11834_v51 = vadd.f32 %v5625_v22, %v11634_v53  ;;  %v13917_v22 = vld [vmem:[#allocation54_spill] sm:$0xff] }
 0x999   :  { %v5627_v46 = vpop.f32.mrf.mxu0 }
 0x99a   :  { %v11837_v9 = vadd.f32 %v5627_v46, %v11637_v11 }
 0x99b   :  { %v5629_v52 = vpop.f32.mrf.mxu0 }
 0x99c   :  { %v11840_v1 = vadd.f32 %v5629_v52, %v11640_v13  ;;  %v13918_v52 = vld [vmem:[#allocation88_spill] sm:$0xff] }
 0x99d   :  { %v5631_v19 = vpop.f32.mrf.mxu0 }
 0x99e   :  { %v11843_v33 = vadd.f32 %v5631_v19, %v11643_v40 }
 0x99f   :  { %v5635_v37 = vpop.f32.mrf.mxu0 }
 0x9a0   :  { %v11846_v3 = vadd.f32 %v5635_v37, %v11646_v42  ;;  %v13919_v37 = vld [vmem:[#allocation89_spill] sm:$0xff] }
 0x9a1   :  { %v5637_v18 = vpop.f32.mrf.mxu0 }
 0x9a2   :  { %v11849_v53 = vadd.f32 %v5637_v18, %v11649_v7 }
 0x9a3   :  { %v5639_v44 = vpop.f32.mrf.mxu0 }
 0x9a4   :  { %v11852_v11 = vadd.f32 %v5639_v44, %v11652_v2 }
 0x9a5   :  { %v5641_v8 = vpop.f32.mrf.mxu0 }
 0x9a6   :  { %v11855_v13 = vadd.f32 %v5641_v8, %v11655_v10  ;;  %v13920_v8 = vld [vmem:[#allocation58_spill] sm:$0xff] }
 0x9a7   :  { %v5645_v20 = vpop.f32.mrf.mxu0 }
 0x9a8   :  { %v11858_v40 = vadd.f32 %v5645_v20, %v11658_v62 }
 0x9a9   :  { %v5647_v61 = vpop.f32.mrf.mxu0 }
 0x9aa   :  { %v11861_v42 = vadd.f32 %v5647_v61, %v11661_v28 }
 0x9ab   :  { %v5649_v57 = vpop.f32.mrf.mxu0 }
 0x9ac   :  { %v11864_v7 = vadd.f32 %v5649_v57, %v11664_v4  ;;  %v13921_v57 = vld [vmem:[#allocation62_spill] sm:$0xff] }
 0x9ad   :  { %v5651_v5 = vpop.f32.mrf.mxu0 }
 0x9ae   :  { %v11867_v2 = vadd.f32 %v5651_v5, %v11667_v36 }
 0x9af   :  { %v5655_v58 = vpop.f32.mrf.mxu0 }
 0x9b0   :  { %v11870_v10 = vadd.f32 %v5655_v58, %v11670_v14 }
 0x9b1   :  { %v5657_v31 = vpop.f32.mrf.mxu0 }
 0x9b2   :  { %v11873_v62 = vadd.f32 %v5657_v31, %v11673_v54  ;;  %v13922_v31 = vld [vmem:[#allocation74_spill] sm:$0xff] }
 0x9b3   :  { %v5659_v60 = vpop.f32.mrf.mxu0 }
 0x9b4   :  { %v11876_v28 = vadd.f32 %v5659_v60, %v11676_v39 }
 0x9b5   :  { %v5661_v34 = vpop.f32.mrf.mxu0 }
 0x9b6   :  { %v11879_v4 = vadd.f32 %v5661_v34, %v11679_v26 }
 0x9b7   :  { %v5665_v55 = vpop.f32.mrf.mxu0 }
 0x9b8   :  { %v11882_v36 = vadd.f32 %v5665_v55, %v11682_v63  ;;  %v13923_v55 = vld [vmem:[#allocation91_spill] sm:$0xff] }
 0x9b9   :  { %v5667_v56 = vpop.f32.mrf.mxu0 }
 0x9ba   :  { %v11885_v14 = vadd.f32 %v5667_v56, %v11685_v12 }
 0x9bb   :  { %v5669_v27 = vpop.f32.mrf.mxu0 }
 0x9bc   :  { %v11888_v54 = vadd.f32 %v5669_v27, %v13914_v16  ;;  %v13924_v16 = vld [vmem:[#allocation51_spill] sm:$0xff] }
 0x9bd   :  { %v5671_v49 = vpop.f32.mrf.mxu0 }
 0x9be   :  { %v11891_v39 = vadd.f32 %v5671_v49, %v13915_v30 }
 0x9bf   :  { %v5675_v47 = vpop.f32.mrf.mxu0 }
 0x9c0   :  { %v11894_v26 = vadd.f32 %v5675_v47, %v13916_v38  ;;  %v13925_v47 = vld [vmem:[#allocation52_spill] sm:$0xff] }
 0x9c1   :  { %v5677_v15 = vpop.f32.mrf.mxu0 }
 0x9c2   :  { %v11897_v63 = vadd.f32 %v5677_v15, %v13917_v22  ;;  %v13927_v22 = vld [vmem:[#allocation55_spill] sm:$0xff] }
 0x9c3   :  { %v5679_v46 = vpop.f32.mrf.mxu0 }
 0x9c4   :  { %v11900_v12 = vadd.f32 %v5679_v46, %v13918_v52 }
 0x9c5   :  { %v5681_v19 = vpop.f32.mrf.mxu0 }
 0x9c6   :  { %v11903_v18 = vadd.f32 %v5681_v19, %v13919_v37  ;;  %v13929_v19 = vld [vmem:[#allocation56_spill] sm:$0xff] }
 0x9c7   :  { %v5685_v44 = vpop.f32.mrf.mxu0 }
 0x9c8   :  { %v11906_v20 = vadd.f32 %v5685_v44, %v13920_v8  ;;  %v13931_v8 = vld [vmem:[#allocation92_spill] sm:$0xff] }
 0x9c9   :  { %v5687_v61 = vpop.f32.mrf.mxu0 }
 0x9ca   :  { %v11909_v5 = vadd.f32 %v5687_v61, %v13921_v57 }
 0x9cb   :  { %v5689_v58 = vpop.f32.mrf.mxu0 }
 0x9cc   :  { %v11912_v60 = vadd.f32 %v5689_v58, %v13922_v31  ;;  %v13933_v58 = vld [vmem:[#allocation93_spill] sm:$0xff] }
 0x9cd   :  { %v5691_v34 = vpop.f32.mrf.mxu0 }
 0x9ce   :  { %v11915_v56 = vadd.f32 %v5691_v34, %v13923_v55  ;;  %v13935_v55 = vld [vmem:[#allocation94_spill] sm:$0xff] }
 0x9cf   :  { %v5695_v27 = vpop.f32.mrf.mxu0 }
 0x9d0   :  { %v11918_v49 = vadd.f32 %v5695_v27, %v13924_v16 }
 0x9d1   :  { %v5697_v30 = vpop.f32.mrf.mxu0 }
 0x9d2   :  { %v11921_v38 = vadd.f32 %v5697_v30, %v13925_v47  ;;  %v13937_v30 = vld [vmem:[#allocation95_spill] sm:$0xff] }
 0x9d3   :  { %v5699_v15 = vpop.f32.mrf.mxu0 }
 0x9d4   :  { %13926 = vst [vmem:[#allocation80_spill] sm:$0xff] %v11921_v38  ;;  %v11924_v46 = vadd.f32 %v5699_v15, %v13927_v22  ;;  %v13939_v22 = vld [vmem:[#allocation78_spill] sm:$0xff] }
 0x9d5   :  { %v5701_v52 = vpop.f32.mrf.mxu0 }
 0x9d6   :  { %13928 = vst [vmem:[#allocation60_spill] sm:$0xff] %v11924_v46  ;;  %v11927_v37 = vadd.f32 %v5701_v52, %v13929_v19 }
 0x9d7   :  { %v5705_v44 = vpop.f32.mrf.mxu0 }
 0x9d8   :  { %13930 = vst [vmem:[#allocation81_spill] sm:$0xff] %v11927_v37  ;;  %v11930_v61 = vadd.f32 %v5705_v44, %v13931_v8  ;;  %v13941_v37 = vld [vmem:[#allocation57_spill] sm:$0xff] }
 0x9d9   :  { %v5707_v57 = vpop.f32.mrf.mxu0 }
 0x9da   :  { %13932 = vst [vmem:[#allocation61_spill] sm:$0xff] %v11930_v61  ;;  %v11933_v31 = vadd.f32 %v5707_v57, %v13933_v58  ;;  %v13943_v61 = vld [vmem:[#allocation79_spill] sm:$0xff] }
 0x9db   :  { %v5709_v34 = vpop.f32.mrf.mxu0 }
 0x9dc   :  { %13934 = vst [vmem:[#allocation96_spill] sm:$0xff] %v11933_v31  ;;  %v11936_v27 = vadd.f32 %v5709_v34, %v13935_v55  ;;  %v13945_v31 = vld [vmem:[#allocation59_spill] sm:$0xff] }
 0x9dd   :  { %v5711_v16 = vpop.f32.mrf.mxu0 }
 0x9de   :  { %13936 = vst [vmem:[#allocation97_spill] sm:$0xff] %v11936_v27  ;;  %v11939_v47 = vadd.f32 %v5711_v16, %v13937_v30 }
 0x9df   :  { %v5715_v15 = vpop.f32.mrf.mxu0 }
 0x9e0   :  { %13938 = vst [vmem:[#allocation98_spill] sm:$0xff] %v11939_v47  ;;  %v11942_v52 = vadd.f32 %v5715_v15, %v13939_v22 }
 0x9e1   :  { %v5717_v19 = vpop.f32.mrf.mxu0 }
 0x9e2   :  { %13940 = vst [vmem:[#allocation99_spill] sm:$0xff] %v11942_v52  ;;  %v11945_v44 = vadd.f32 %v5717_v19, %v13941_v37 }
 0x9e3   :  { %v5719_v8 = vpop.f32.mrf.mxu0 }
 0x9e4   :  { %13942 = vst [vmem:[#allocation82_spill] sm:$0xff] %v11945_v44  ;;  %v11948_v57 = vadd.f32 %v5719_v8, %v13943_v61 }
 0x9e5   :  { %v5721_v58 = vpop.f32.mrf.mxu0 }
 0x9e6   :  { %13944 = vst [vmem:[#allocation63_spill] sm:$0xff] %v11948_v57  ;;  %v11951_v34 = vadd.f32 %v5721_v58, %v13945_v31 }
 0x9e8   :  { %13946 = vst [vmem:[#allocation83_spill] sm:$0xff] %v11951_v34 }
 0x9e9   :  { %9149 = dma.done.wait [#allocation4 + $0x7], 4096 }
 0x9ea   :  { %9150 = vsyncadd [#allocation4 + $0x7], 4294963200  ;;  %v8831_v55 = vld [vmem:[#allocation3 + $0x774] ss:$8 sps:$4 sm:$0xff]   ;;  %v8833_v16 = vld [vmem:[#allocation3 + $0x770] ss:$8 sps:$4 sm:$0xff]  }
 0x9eb   :  { %6058 = vmatprep.subr.bf16.mxu1 %v8831_v55  ;;  %v8834_v30 = vld [vmem:[#allocation3 + $0x764] ss:$8 sps:$4 sm:$0xff]   ;;  %v8836_v15 = vld [vmem:[#allocation3 + $0x760] ss:$8 sps:$4 sm:$0xff]   ;;  %v8837_v22 = vld [vmem:[#allocation3 + $0x754] ss:$8 sps:$4 sm:$0xff]  }
 0x9ec   :  { %6059 = vmatpush1.bf16.msra.mxu1 %v8833_v16  ;;  %v8839_v37 = vld [vmem:[#allocation3 + $0x750] ss:$8 sps:$4 sm:$0xff]   ;;  %v8840_v19 = vld [vmem:[#allocation3 + $0x744] ss:$8 sps:$4 sm:$0xff]   ;;  %v8842_v61 = vld [vmem:[#allocation3 + $0x740] ss:$8 sps:$4 sm:$0xff]  }
 0x9ed   :  { %6060 = vmatprep.subr.bf16.mxu1 %v8834_v30  ;;  %v8843_v8 = vld [vmem:[#allocation3 + $0x734] ss:$8 sps:$4 sm:$0xff]   ;;  %v8845_v31 = vld [vmem:[#allocation3 + $0x730] ss:$8 sps:$4 sm:$0xff]   ;;  %v8846_v58 = vld [vmem:[#allocation3 + $0x724] ss:$8 sps:$4 sm:$0xff]  }
 0x9ee   :  { %v8848_v34 = vld [vmem:[#allocation3 + $0x720] ss:$8 sps:$4 sm:$0xff]   ;;  %v8849_v55 = vld [vmem:[#allocation3 + $0x714] ss:$8 sps:$4 sm:$0xff]   ;;  %v8863_v44 = vld [vmem:[#allocation3 + $0x7d0] ss:$8 sps:$4 sm:$0xff]  }
 0x9ef   :  { %v5783_v16 = vld [vmem:[#allocation2] sm:$0xff]  ;;  %v5785_v57 = vld [vmem:[#allocation2 + $0x170] sm:$0xff]  ;;  %v5793_v52 = vld [vmem:[#allocation2 + $0xa8] sm:$0xff] }
 0x9f0   :  { %6061 = vmatpush1.bf16.msra.mxu1 %v8836_v15  ;;  %v5839_v30 = vpack.c.bf16 %v5785_v57, %v5783_v16  ;;  %v8851_v15 = vld [vmem:[#allocation3 + $0x710] ss:$8 sps:$4 sm:$0xff]   ;;  %v8864_v57 = vld [vmem:[#allocation3 + $0x7c4] ss:$8 sps:$4 sm:$0xff]  }
 0x9f1   :  { %6062 = vmatprep.subr.bf16.mxu1 %v8837_v22  ;;  %v8852_v22 = vld [vmem:[#allocation3 + $0x704] ss:$8 sps:$4 sm:$0xff]   ;;  %v8869_v16 = vld [vmem:[#allocation3 + $0x7b0] ss:$8 sps:$4 sm:$0xff]  }
 0x9f2   :  { %6090 = vmatprep.mubr.bf16.mxu1 %v5839_v30  ;;  %v8870_v30 = vld [vmem:[#allocation3 + $0x7a4] ss:$8 sps:$4 sm:$0xff]  }
 0x9f3   :  { %v5795_v27 = vld [vmem:[#allocation2 + $0x208] sm:$0xff]  ;;  %v5797_v46 = vld [vmem:[#allocation2 + $0x1c0] sm:$0xff] }
 0x9f4   :  { %6063 = vmatpush1.bf16.msra.mxu1 %v8839_v37  ;;  %v8854_v37 = vld [vmem:[#allocation3 + $0x700] ss:$8 sps:$4 sm:$0xff]   ;;  %v5845_v38 = vpack.c.bf16 %v5797_v46, %v5795_v27  ;;  %v5807_v27 = vld [vmem:[#allocation2 + $0x210] sm:$0xff] }
 0x9f5   :  { %6064 = vmatprep.subr.bf16.mxu1 %v8840_v19  ;;  %v8855_v19 = vld [vmem:[#allocation3 + $0x7f4] ss:$8 sps:$4 sm:$0xff]   ;;  %v5804_v46 = vld [vmem:[#allocation2 + $0xa0] sm:$0xff] }
 0x9f8   :  { %6065 = vmatpush1.bf16.msra.mxu1 %v8842_v61  ;;  %v8857_v61 = vld [vmem:[#allocation3 + $0x7f0] ss:$8 sps:$4 sm:$0xff]  }
 0x9f9   :  { %6066 = vmatprep.subr.bf16.mxu1 %v8843_v8  ;;  %v8858_v8 = vld [vmem:[#allocation3 + $0x7e4] ss:$8 sps:$4 sm:$0xff]  }
 0x9fc   :  { %6067 = vmatpush1.bf16.msra.mxu1 %v8845_v31  ;;  %v8860_v31 = vld [vmem:[#allocation3 + $0x7e0] ss:$8 sps:$4 sm:$0xff]  }
 0x9fd   :  { %6068 = vmatprep.subr.bf16.mxu1 %v8846_v58  ;;  %v8861_v58 = vld [vmem:[#allocation3 + $0x7d4] ss:$8 sps:$4 sm:$0xff]  }
 0xa00   :  { %6069 = vmatpush1.bf16.msra.mxu1 %v8848_v34  ;;  %v8866_v34 = vld [vmem:[#allocation3 + $0x7c0] ss:$8 sps:$4 sm:$0xff]  }
 0xa01   :  { %6070 = vmatprep.subr.bf16.mxu1 %v8849_v55  ;;  %v8867_v55 = vld [vmem:[#allocation3 + $0x7b4] ss:$8 sps:$4 sm:$0xff]  }
 0xa04   :  { %6071 = vmatpush1.bf16.msra.mxu1 %v8851_v15  ;;  %v8872_v15 = vld [vmem:[#allocation3 + $0x7a0] ss:$8 sps:$4 sm:$0xff]  }
 0xa05   :  { %6072 = vmatprep.subr.bf16.mxu1 %v8852_v22  ;;  %v8873_v22 = vld [vmem:[#allocation3 + $0x794] ss:$8 sps:$4 sm:$0xff]  }
 0xa08   :  { %6073 = vmatpush1.bf16.msra.mxu1 %v8854_v37  ;;  %v8875_v37 = vld [vmem:[#allocation3 + $0x790] ss:$8 sps:$4 sm:$0xff]  }
 0xa09   :  { %6074 = vmatprep.subr.bf16.mxu1 %v8855_v19  ;;  %v8876_v19 = vld [vmem:[#allocation3 + $0x784] ss:$8 sps:$4 sm:$0xff]  }
 0xa0c   :  { %6075 = vmatpush2.bf16.msra.mxu1 %v8857_v61  ;;  %v8878_v61 = vld [vmem:[#allocation3 + $0x780] ss:$8 sps:$4 sm:$0xff]  }
 0xa0d   :  { %6076 = vmatprep.subr.bf16.mxu1 %v8858_v8  ;;  %v5782_v8 = vld [vmem:[#allocation2 + $0x1d8] sm:$0xff] }
 0xa10   :  { %6077 = vmatpush2.bf16.msra.mxu1 %v8860_v31  ;;  %v5784_v31 = vld [vmem:[#allocation2 + $0x160] sm:$0xff] }
 0xa11   :  { %6078 = vmatprep.subr.bf16.mxu1 %v8861_v58  ;;  %v5789_v58 = vld [vmem:[#allocation2 + $0x118] sm:$0xff] }
 0xa14   :  { %6079 = vmatpush2.bf16.msra.mxu1 %v8863_v44  ;;  %v5787_v44 = vld [vmem:[#allocation2 + $0x1a0] sm:$0xff] }
 0xa15   :  { %6080 = vmatprep.subr.bf16.mxu1 %v8864_v57  ;;  %v5838_v57 = vpack.c.bf16 %v5784_v31, %v5782_v8  ;;  %v5796_v8 = vld [vmem:[#allocation2 + $0x188] sm:$0xff]  ;;  %v5799_v31 = vld [vmem:[#allocation2 + $0x158] sm:$0xff] }
 0xa18   :  { %6081 = vmatpush2.bf16.msra.mxu1 %v8866_v34  ;;  %v5841_v34 = vpack.c.bf16 %v5789_v58, %v5787_v44  ;;  %v5801_v44 = vld [vmem:[#allocation2 + $0x190] sm:$0xff] }
 0xa19   :  { %6082 = vmatprep.subr.bf16.mxu1 %v8867_v55  ;;  %v5786_v55 = vld [vmem:[#allocation2 + $0x120] sm:$0xff] }
 0xa1c   :  { %6083 = vmatpush2.bf16.msra.mxu1 %v8869_v16  ;;  %v5788_v16 = vld [vmem:[#allocation2 + $0xb0] sm:$0xff] }
 0xa1d   :  { %6084 = vmatprep.subr.bf16.mxu1 %v8870_v30  ;;  %v5791_v30 = vld [vmem:[#allocation2 + $0x198] sm:$0xff] }
 0xa1e   :  { %v5843_v47 = vpack.c.bf16 %v5793_v52, %v5791_v30  ;;  %v5800_v52 = vld [vmem:[#allocation2 + $0x218] sm:$0xff] }
 0xa20   :  { %6085 = vmatpush2.bf16.msra.mxu1 %v8872_v15  ;;  %v5840_v15 = vpack.c.bf16 %v5788_v16, %v5786_v55  ;;  %v5803_v55 = vld [vmem:[#allocation2 + $0x70] sm:$0xff] }
 0xa21   :  { %6086 = vmatprep.subr.bf16.mxu1 %v8873_v22  ;;  %v5790_v22 = vld [vmem:[#allocation2 + $0x40] sm:$0xff] }
 0xa24   :  { %6087 = vmatpush2.bf16.msra.mxu1 %v8875_v37  ;;  %v5792_v37 = vld [vmem:[#allocation2 + $0x68] sm:$0xff] }
 0xa25   :  { %6088 = vmatprep.subr.bf16.mxu1 %v8876_v19  ;;  %v5842_v19 = vpack.c.bf16 %v5792_v37, %v5790_v22 }
 0xa28   :  { %6089 = vmatpush2.bf16.msra.mxu1 %v8878_v61  ;;  %v5794_v61 = vld [vmem:[#allocation2 + $0x168] sm:$0xff] }
 0xa29   :  { %v5844_v58 = vpack.c.bf16 %v5796_v8, %v5794_v61  ;;  %v5808_v61 = vld [vmem:[#allocation2 + $0x108] sm:$0xff] }
 0xa2a   :  { %v5811_v8 = vld [vmem:[#allocation2 + $0x1e8] sm:$0xff] }
 0xa2b   :  { %6091 = vmatmul.mubr.bf16.vlgmr.msra.gmra.mxu1 %v5838_v57  ;;  %v5847_v57 = vpack.c.bf16 %v5801_v44, %v5799_v31  ;;  %v5813_v31 = vld [vmem:[#allocation2 + $0x1f0] sm:$0xff] }
 0xa2c   :  { %6100 = vmatprep.mubr.bf16.mxu1 %v5841_v34  ;;  %v5798_v34 = vld [vmem:[#allocation2 + $0x78] sm:$0xff] }
 0xa2d   :  { %v5846_v16 = vpack.c.bf16 %v5800_v52, %v5798_v34  ;;  %v5812_v34 = vld [vmem:[#allocation2 + $0x38] sm:$0xff]  ;;  %v5815_v52 = vld [vmem:[#allocation2 + $0x148] sm:$0xff] }
 0xa33   :  { %6101 = vmatmul.mubr.bf16.gmra.mxu1 %v5840_v15  ;;  %v5802_v15 = vld [vmem:[#allocation2 + $0xd8] sm:$0xff] }
 0xa34   :  { %6110 = vmatprep.mubr.bf16.mxu1 %v5843_v47  ;;  %v5805_v47 = vld [vmem:[#allocation2 + $0x58] sm:$0xff]  ;;  %v5848_v22 = vpack.c.bf16 %v5804_v46, %v5802_v15  ;;  %v5816_v15 = vld [vmem:[#allocation2 + $0x110] sm:$0xff] }
 0xa35   :  { %v5849_v30 = vpack.c.bf16 %v5805_v47, %v5803_v55  ;;  %v5817_v55 = vld [vmem:[#allocation2 + $0xe0] sm:$0xff]  ;;  %v5819_v46 = vld [vmem:[#allocation2 + $0x1d0] sm:$0xff] }
 0xa3b   :  { %6111 = vmatmul.mubr.bf16.gmra.mxu1 %v5842_v19  ;;  %v5806_v19 = vld [vmem:[#allocation2 + $0x178] sm:$0xff] }
 0xa3c   :  { %6120 = vmatprep.mubr.bf16.mxu1 %v5845_v38  ;;  %v5809_v38 = vld [vmem:[#allocation2 + $0x1a8] sm:$0xff]  ;;  %v5850_v44 = vpack.c.bf16 %v5808_v61, %v5806_v19  ;;  %v5823_v61 = vld [vmem:[#allocation2 + $0x1b8] sm:$0xff] }
 0xa3d   :  { %v5851_v37 = vpack.c.bf16 %v5809_v38, %v5807_v27  ;;  %v5821_v27 = vld [vmem:[#allocation2 + $0x80] sm:$0xff]  ;;  %v5820_v19 = vld [vmem:[#allocation2 + $0x128] sm:$0xff] }
 0xa43   :  { %6121 = vmatmul.mubr.bf16.gmra.mxu1 %v5844_v58  ;;  %v5853_v58 = vpack.c.bf16 %v5813_v31, %v5811_v8  ;;  %v5825_v8 = vld [vmem:[#allocation2 + $0x88] sm:$0xff] }
 0xa44   :  { %6130 = vmatprep.mubr.bf16.mxu1 %v5847_v57  ;;  %v5810_v57 = vld [vmem:[#allocation2 + $0x1c8] sm:$0xff] }
 0xa45   :  { %v5852_v47 = vpack.c.bf16 %v5812_v34, %v5810_v57  ;;  %v5824_v57 = vld [vmem:[#allocation2 + $0x18] sm:$0xff]  ;;  %v5827_v34 = vld [vmem:[#allocation2 + $0x140] sm:$0xff] }
 0xa4b   :  { %6131 = vmatmul.mubr.bf16.gmra.mxu1 %v5846_v16  ;;  %v5855_v16 = vpack.c.bf16 %v5817_v55, %v5815_v52  ;;  %v5829_v52 = vld [vmem:[#allocation2 + $0x60] sm:$0xff] }
 0xa4c   :  { %6140 = vmatprep.mubr.bf16.mxu1 %v5849_v30  ;;  %v5814_v30 = vld [vmem:[#allocation2 + $0x1f8] sm:$0xff] }
 0xa4d   :  { %v5854_v38 = vpack.c.bf16 %v5816_v15, %v5814_v30  ;;  %v5828_v30 = vld [vmem:[#allocation2 + $0xf8] sm:$0xff]  ;;  %v5831_v15 = vld [vmem:[#allocation2 + $0x30] sm:$0xff] }
 0xa53   :  { %6141 = vmatmul.mubr.bf16.gmra.mxu1 %v5848_v22  ;;  %v5857_v22 = vpack.c.bf16 %v5821_v27, %v5819_v46  ;;  %v5833_v46 = vld [vmem:[#allocation2 + $0x1b0] sm:$0xff] }
 0xa54   :  { %6150 = vmatprep.mubr.bf16.mxu1 %v5851_v37  ;;  %v5818_v37 = vld [vmem:[#allocation2 + $0x50] sm:$0xff] }
 0xa55   :  { %v5856_v31 = vpack.c.bf16 %v5820_v19, %v5818_v37  ;;  %v5832_v37 = vld [vmem:[#allocation2 + $0x150] sm:$0xff]  ;;  %v5835_v19 = vld [vmem:[#allocation2 + $0x48] sm:$0xff] }
 0xa5b   :  { %6151 = vmatmul.mubr.bf16.gmra.mxu1 %v5850_v44  ;;  %v5859_v44 = vpack.c.bf16 %v5825_v8, %v5823_v61  ;;  %v5837_v61 = vld [vmem:[#allocation2 + $0x100] sm:$0xff] }
 0xa5c   :  { %6160 = vmatprep.mubr.bf16.mxu1 %v5853_v58  ;;  %v5822_v58 = vld [vmem:[#allocation2 + $0x20] sm:$0xff] }
 0xa5d   :  { %v5858_v55 = vpack.c.bf16 %v5824_v57, %v5822_v58  ;;  %v5836_v58 = vld [vmem:[#allocation2 + $0xd0] sm:$0xff] }
 0xa63   :  { %6161 = vmatmul.mubr.bf16.gmra.mxu1 %v5852_v47  ;;  %v5861_v47 = vpack.c.bf16 %v5829_v52, %v5827_v34 }
 0xa64   :  { %6170 = vmatprep.mubr.bf16.mxu1 %v5855_v16  ;;  %v5826_v16 = vld [vmem:[#allocation2 + $0x1e0] sm:$0xff] }
 0xa65   :  { %v5860_v27 = vpack.c.bf16 %v5828_v30, %v5826_v16 }
 0xa6b   :  { %6171 = vmatmul.mubr.bf16.gmra.mxu1 %v5854_v38  ;;  %v5863_v38 = vpack.c.bf16 %v5833_v46, %v5831_v15 }
 0xa6c   :  { %6180 = vmatprep.mubr.bf16.mxu1 %v5857_v22  ;;  %v5830_v22 = vld [vmem:[#allocation2 + $0x180] sm:$0xff] }
 0xa6d   :  { %v5862_v8 = vpack.c.bf16 %v5832_v37, %v5830_v22 }
 0xa73   :  { %6181 = vmatmul.mubr.bf16.gmra.mxu1 %v5856_v31  ;;  %v5865_v31 = vpack.c.bf16 %v5837_v61, %v5835_v19 }
 0xa74   :  { %6190 = vmatprep.mubr.bf16.mxu1 %v5859_v44  ;;  %v5834_v44 = vld [vmem:[#allocation2 + $0xc8] sm:$0xff] }
 0xa75   :  { %v5864_v57 = vpack.c.bf16 %v5836_v58, %v5834_v44 }
 0xa7b   :  { %6191 = vmatmul.mubr.bf16.gmra.mxu1 %v5858_v55 }
 0xa7c   :  { %6200 = vmatprep.mubr.bf16.mxu1 %v5861_v47 }
 0xa83   :  { %6201 = vmatmul.mubr.bf16.gmra.mxu1 %v5860_v27 }
 0xa84   :  { %6210 = vmatprep.mubr.bf16.mxu1 %v5863_v38 }
 0xa8b   :  { %6211 = vmatmul.mubr.bf16.gmra.mxu1 %v5862_v8 }
 0xa8c   :  { %6220 = vmatprep.mubr.bf16.mxu1 %v5865_v31 }
 0xa93   :  { %6221 = vmatmul.mubr.bf16.gmra.mxu1 %v5864_v57 }
 0xaeb   :  { %v6092_v34 = vpop.f32.mrf.mxu1 }
 0xaec   :  { %v11954_v52 = vadd.f32 %v6092_v34, %v11786_v23 }
 0xaed   :  { %v6094_v55 = vpop.f32.mrf.mxu1 }
 0xaee   :  { %v11957_v47 = vadd.f32 %v6094_v55, %v11789_v24 }
 0xaef   :  { %v6096_v16 = vpop.f32.mrf.mxu1 }
 0xaf0   :  { %v11960_v30 = vadd.f32 %v6096_v16, %v11792_v48 }
 0xaf1   :  { %v6098_v15 = vpop.f32.mrf.mxu1 }
 0xaf2   :  { %v11963_v46 = vadd.f32 %v6098_v15, %v11795_v45 }
 0xaf3   :  { %v6102_v27 = vpop.f32.mrf.mxu1 }
 0xaf4   :  { %v11966_v38 = vadd.f32 %v6102_v27, %v11798_v43 }
 0xaf5   :  { %v6104_v22 = vpop.f32.mrf.mxu1 }
 0xaf6   :  { %v11969_v23 = vadd.f32 %v6104_v22, %v11801_v41 }
 0xaf7   :  { %v6106_v37 = vpop.f32.mrf.mxu1 }
 0xaf8   :  { %v11972_v24 = vadd.f32 %v6106_v37, %v11804_v25 }
 0xaf9   :  { %v6108_v19 = vpop.f32.mrf.mxu1 }
 0xafa   :  { %v11975_v48 = vadd.f32 %v6108_v19, %v11807_v21 }
 0xafb   :  { %v6112_v61 = vpop.f32.mrf.mxu1 }
 0xafc   :  { %v11978_v45 = vadd.f32 %v6112_v61, %v11810_v35 }
 0xafd   :  { %v6114_v8 = vpop.f32.mrf.mxu1 }
 0xafe   :  { %v11981_v43 = vadd.f32 %v6114_v8, %v11813_v59 }
 0xaff   :  { %v6116_v31 = vpop.f32.mrf.mxu1 }
 0xb00   :  { %v11984_v41 = vadd.f32 %v6116_v31, %v11816_v0 }
 0xb01   :  { %v6118_v44 = vpop.f32.mrf.mxu1 }
 0xb02   :  { %v11987_v25 = vadd.f32 %v6118_v44, %v11819_v6 }
 0xb03   :  { %v6122_v58 = vpop.f32.mrf.mxu1 }
 0xb04   :  { %v11990_v21 = vadd.f32 %v6122_v58, %v11822_v17 }
 0xb05   :  { %v6124_v57 = vpop.f32.mrf.mxu1 }
 0xb06   :  { %v11993_v35 = vadd.f32 %v6124_v57, %v11825_v29 }
 0xb07   :  { %v6126_v34 = vpop.f32.mrf.mxu1 }
 0xb08   :  { %v11996_v59 = vadd.f32 %v6126_v34, %v11828_v32 }
 0xb09   :  { %v6128_v55 = vpop.f32.mrf.mxu1 }
 0xb0a   :  { %v11999_v0 = vadd.f32 %v6128_v55, %v11831_v50 }
 0xb0b   :  { %v6132_v16 = vpop.f32.mrf.mxu1 }
 0xb0c   :  { %v12002_v6 = vadd.f32 %v6132_v16, %v11834_v51 }
 0xb0d   :  { %v6134_v15 = vpop.f32.mrf.mxu1 }
 0xb0e   :  { %v12005_v17 = vadd.f32 %v6134_v15, %v11837_v9 }
 0xb0f   :  { %v6136_v27 = vpop.f32.mrf.mxu1 }
 0xb10   :  { %v12008_v29 = vadd.f32 %v6136_v27, %v11840_v1 }
 0xb11   :  { %v6138_v22 = vpop.f32.mrf.mxu1 }
 0xb12   :  { %v12011_v32 = vadd.f32 %v6138_v22, %v11843_v33 }
 0xb13   :  { %v6142_v37 = vpop.f32.mrf.mxu1 }
 0xb14   :  { %v12014_v50 = vadd.f32 %v6142_v37, %v11846_v3 }
 0xb15   :  { %v6144_v19 = vpop.f32.mrf.mxu1 }
 0xb16   :  { %v12017_v51 = vadd.f32 %v6144_v19, %v11849_v53 }
 0xb17   :  { %v6146_v61 = vpop.f32.mrf.mxu1 }
 0xb18   :  { %13947 = vst [vmem:[#allocation64_spill] sm:$0xff] %v12017_v51  ;;  %v12020_v9 = vadd.f32 %v6146_v61, %v11852_v11 }
 0xb19   :  { %v6148_v8 = vpop.f32.mrf.mxu1 }
 0xb1a   :  { %13948 = vst [vmem:[#allocation84_spill] sm:$0xff] %v12020_v9  ;;  %v12023_v1 = vadd.f32 %v6148_v8, %v11855_v13 }
 0xb1b   :  { %v6152_v31 = vpop.f32.mrf.mxu1 }
 0xb1c   :  { %13949 = vst [vmem:[#allocation66_spill] sm:$0xff] %v12023_v1  ;;  %v12026_v33 = vadd.f32 %v6152_v31, %v11858_v40 }
 0xb1d   :  { %v6154_v44 = vpop.f32.mrf.mxu1 }
 0xb1e   :  { %13950 = vst [vmem:[#allocation85_spill] sm:$0xff] %v12026_v33  ;;  %v12029_v3 = vadd.f32 %v6154_v44, %v11861_v42 }
 0xb1f   :  { %v6156_v58 = vpop.f32.mrf.mxu1 }
 0xb20   :  { %13951 = vst [vmem:[#allocation67_spill] sm:$0xff] %v12029_v3  ;;  %v12032_v53 = vadd.f32 %v6156_v58, %v11864_v7 }
 0xb21   :  { %v6158_v57 = vpop.f32.mrf.mxu1 }
 0xb22   :  { %13952 = vst [vmem:[#allocation100_spill] sm:$0xff] %v12032_v53  ;;  %v12035_v11 = vadd.f32 %v6158_v57, %v11867_v2 }
 0xb23   :  { %v6162_v34 = vpop.f32.mrf.mxu1 }
 0xb24   :  { %13953 = vst [vmem:[#allocation101_spill] sm:$0xff] %v12035_v11  ;;  %v12038_v13 = vadd.f32 %v6162_v34, %v11870_v10 }
 0xb25   :  { %v6164_v55 = vpop.f32.mrf.mxu1 }
 0xb26   :  { %13954 = vst [vmem:[#allocation102_spill] sm:$0xff] %v12038_v13  ;;  %v12041_v40 = vadd.f32 %v6164_v55, %v11873_v62 }
 0xb27   :  { %v6166_v16 = vpop.f32.mrf.mxu1 }
 0xb28   :  { %13955 = vst [vmem:[#allocation103_spill] sm:$0xff] %v12041_v40  ;;  %v12044_v42 = vadd.f32 %v6166_v16, %v11876_v28 }
 0xb29   :  { %v6168_v15 = vpop.f32.mrf.mxu1 }
 0xb2a   :  { %13956 = vst [vmem:[#allocation86_spill] sm:$0xff] %v12044_v42  ;;  %v12047_v7 = vadd.f32 %v6168_v15, %v11879_v4 }
 0xb2b   :  { %v6172_v27 = vpop.f32.mrf.mxu1 }
 0xb2c   :  { %13957 = vst [vmem:[#allocation40_spill] sm:$0xff] %v12047_v7  ;;  %v12050_v2 = vadd.f32 %v6172_v27, %v11882_v36  ;;  %v13971_v27 = vld [vmem:[#allocation80_spill] sm:$0xff] }
 0xb2d   :  { %v6174_v22 = vpop.f32.mrf.mxu1 }
 0xb2e   :  { %13958 = vst [vmem:[#allocation37_spill] sm:$0xff] %v12050_v2  ;;  %v12053_v10 = vadd.f32 %v6174_v22, %v11885_v14 }
 0xb2f   :  { %v6176_v37 = vpop.f32.mrf.mxu1 }
 0xb30   :  { %13959 = vst [vmem:[#allocation44_spill] sm:$0xff] %v12053_v10  ;;  %v12056_v62 = vadd.f32 %v6176_v37, %v11888_v54  ;;  %v13973_v37 = vld [vmem:[#allocation60_spill] sm:$0xff] }
 0xb31   :  { %v6178_v19 = vpop.f32.mrf.mxu1 }
 0xb32   :  { %13960 = vst [vmem:[#allocation42_spill] sm:$0xff] %v12056_v62  ;;  %v12059_v28 = vadd.f32 %v6178_v19, %v11891_v39 }
 0xb33   :  { %v6182_v61 = vpop.f32.mrf.mxu1 }
 0xb34   :  { %13961 = vst [vmem:[#allocation47_spill] sm:$0xff] %v12059_v28  ;;  %v12062_v4 = vadd.f32 %v6182_v61, %v11894_v26  ;;  %v13975_v61 = vld [vmem:[#allocation81_spill] sm:$0xff] }
 0xb35   :  { %v6184_v8 = vpop.f32.mrf.mxu1 }
 0xb36   :  { %13962 = vst [vmem:[#allocation46_spill] sm:$0xff] %v12062_v4  ;;  %v12065_v36 = vadd.f32 %v6184_v8, %v11897_v63 }
 0xb37   :  { %v6186_v31 = vpop.f32.mrf.mxu1 }
 0xb38   :  { %13963 = vst [vmem:[#allocation50_spill] sm:$0xff] %v12065_v36  ;;  %v12068_v14 = vadd.f32 %v6186_v31, %v11900_v12  ;;  %v13977_v31 = vld [vmem:[#allocation61_spill] sm:$0xff] }
 0xb39   :  { %v6188_v44 = vpop.f32.mrf.mxu1 }
 0xb3a   :  { %13964 = vst [vmem:[#allocation48_spill] sm:$0xff] %v12068_v14  ;;  %v12071_v54 = vadd.f32 %v6188_v44, %v11903_v18 }
 0xb3b   :  { %v6192_v58 = vpop.f32.mrf.mxu1 }
 0xb3c   :  { %13965 = vst [vmem:[#allocation38_spill] sm:$0xff] %v12071_v54  ;;  %v12074_v39 = vadd.f32 %v6192_v58, %v11906_v20  ;;  %v13979_v58 = vld [vmem:[#allocation96_spill] sm:$0xff] }
 0xb3d   :  { %v6194_v57 = vpop.f32.mrf.mxu1 }
 0xb3e   :  { %13966 = vst [vmem:[#allocation36_spill] sm:$0xff] %v12074_v39  ;;  %v12077_v26 = vadd.f32 %v6194_v57, %v11909_v5 }
 0xb3f   :  { %v6196_v34 = vpop.f32.mrf.mxu1 }
 0xb40   :  { %13967 = vst [vmem:[#allocation39_spill] sm:$0xff] %v12077_v26  ;;  %v12080_v63 = vadd.f32 %v6196_v34, %v11912_v60  ;;  %v13981_v34 = vld [vmem:[#allocation97_spill] sm:$0xff] }
 0xb41   :  { %v6198_v55 = vpop.f32.mrf.mxu1 }
 0xb42   :  { %13968 = vst [vmem:[#allocation41_spill] sm:$0xff] %v12080_v63  ;;  %v12083_v12 = vadd.f32 %v6198_v55, %v11915_v56 }
 0xb43   :  { %v6202_v16 = vpop.f32.mrf.mxu1 }
 0xb44   :  { %13969 = vst [vmem:[#allocation49_spill] sm:$0xff] %v12083_v12  ;;  %v12086_v18 = vadd.f32 %v6202_v16, %v11918_v49 }
 0xb45   :  { %v6204_v15 = vpop.f32.mrf.mxu1 }
 0xb46   :  { %13970 = vst [vmem:[#allocation65_spill] sm:$0xff] %v12086_v18  ;;  %v12089_v20 = vadd.f32 %v6204_v15, %v13971_v27  ;;  %v13983_v15 = vld [vmem:[#allocation98_spill] sm:$0xff] }
 0xb47   :  { %v6206_v22 = vpop.f32.mrf.mxu1 }
 0xb48   :  { %13972 = vst [vmem:[#allocation70_spill] sm:$0xff] %v12089_v20  ;;  %v12092_v5 = vadd.f32 %v6206_v22, %v13973_v37  ;;  %v13985_v37 = vld [vmem:[#allocation99_spill] sm:$0xff]  ;;  %v13987_v20 = vld [vmem:[#allocation82_spill] sm:$0xff] }
 0xb49   :  { %v6208_v19 = vpop.f32.mrf.mxu1 }
 0xb4a   :  { %13974 = vst [vmem:[#allocation71_spill] sm:$0xff] %v12092_v5  ;;  %v12095_v60 = vadd.f32 %v6208_v19, %v13975_v61 }
 0xb4b   :  { %v6212_v8 = vpop.f32.mrf.mxu1 }
 0xb4c   :  { %13976 = vst [vmem:[#allocation75_spill] sm:$0xff] %v12095_v60  ;;  %v12098_v56 = vadd.f32 %v6212_v8, %v13977_v31 }
 0xb4d   :  { %v6214_v44 = vpop.f32.mrf.mxu1 }
 0xb4e   :  { %13978 = vst [vmem:[#allocation76_spill] sm:$0xff] %v12098_v56  ;;  %v12101_v49 = vadd.f32 %v6214_v44, %v13979_v58  ;;  %v13989_v56 = vld [vmem:[#allocation63_spill] sm:$0xff] }
 0xb4f   :  { %v6216_v57 = vpop.f32.mrf.mxu1 }
 0xb50   :  { %13980 = vst [vmem:[#allocation77_spill] sm:$0xff] %v12101_v49  ;;  %v12104_v55 = vadd.f32 %v6216_v57, %v13981_v34  ;;  %v13991_v49 = vld [vmem:[#allocation83_spill] sm:$0xff] }
 0xb51   :  { %v6218_v16 = vpop.f32.mrf.mxu1 }
 0xb52   :  { %13982 = vst [vmem:[#allocation72_spill] sm:$0xff] %v12104_v55  ;;  %v12107_v27 = vadd.f32 %v6218_v16, %v13983_v15 }
 0xb53   :  { %v6222_v22 = vpop.f32.mrf.mxu1 }
 0xb54   :  { %13984 = vst [vmem:[#allocation73_spill] sm:$0xff] %v12107_v27  ;;  %v12110_v19 = vadd.f32 %v6222_v22, %v13985_v37 }
 0xb55   :  { %v6224_v61 = vpop.f32.mrf.mxu1 }
 0xb56   :  { %13986 = vst [vmem:[#allocation68_spill] sm:$0xff] %v12110_v19  ;;  %v12113_v8 = vadd.f32 %v6224_v61, %v13987_v20 }
 0xb57   :  { %v6226_v31 = vpop.f32.mrf.mxu1 }
 0xb58   :  { %13988 = vst [vmem:[#allocation90_spill] sm:$0xff] %v12113_v8  ;;  %v12116_v44 = vadd.f32 %v6226_v31, %v13989_v56 }
 0xb59   :  { %v6228_v58 = vpop.f32.mrf.mxu1 }
 0xb5a   :  { %13990 = vst [vmem:[#allocation43_spill] sm:$0xff] %v12116_v44  ;;  %v12119_v57 = vadd.f32 %v6228_v58, %v13991_v49 }
 0xb5c   :  { %13992 = vst [vmem:[#allocation45_spill] sm:$0xff] %v12119_v57 }
 0xb5d   :  { %9151 = dma.done.wait [#allocation4 + $0x8], 4096 }
 0xb5e   :  { %9152 = vsyncadd [#allocation4 + $0x8], 4294963200  ;;  %v8879_v34 = vld [vmem:[#allocation3 + $0x874] ss:$8 sps:$4 sm:$0xff]   ;;  %v8881_v16 = vld [vmem:[#allocation3 + $0x870] ss:$8 sps:$4 sm:$0xff]  }
 0xb5f   :  { %6829 = vmatprep.subr.bf16.mxu0 %v8879_v34  ;;  %v8882_v15 = vld [vmem:[#allocation3 + $0x864] ss:$8 sps:$4 sm:$0xff]   ;;  %8497 = vmatprep.subr.bf16.mxu1 %v8879_v34  ;;  %v8884_v22 = vld [vmem:[#allocation3 + $0x860] ss:$8 sps:$4 sm:$0xff]   ;;  %v8885_v20 = vld [vmem:[#allocation3 + $0x854] ss:$8 sps:$4 sm:$0xff]  }
 0xb60   :  { %6830 = vmatpush1.bf16.msra.mxu0 %v8881_v16  ;;  %8513 = vmatpush1.bf16.msra.mxu1 %v8881_v16  ;;  %v8887_v56 = vld [vmem:[#allocation3 + $0x850] ss:$8 sps:$4 sm:$0xff]   ;;  %v8888_v37 = vld [vmem:[#allocation3 + $0x844] ss:$8 sps:$4 sm:$0xff]   ;;  %v8890_v49 = vld [vmem:[#allocation3 + $0x840] ss:$8 sps:$4 sm:$0xff]  }
 0xb61   :  { %6831 = vmatprep.subr.bf16.mxu0 %v8882_v15  ;;  %8498 = vmatprep.subr.bf16.mxu1 %v8882_v15  ;;  %v8891_v61 = vld [vmem:[#allocation3 + $0x834] ss:$8 sps:$4 sm:$0xff]   ;;  %v8893_v31 = vld [vmem:[#allocation3 + $0x830] ss:$8 sps:$4 sm:$0xff]   ;;  %v8894_v58 = vld [vmem:[#allocation3 + $0x824] ss:$8 sps:$4 sm:$0xff]  }
 0xb62   :  { %v8896_v34 = vld [vmem:[#allocation3 + $0x820] ss:$8 sps:$4 sm:$0xff]   ;;  %v8897_v16 = vld [vmem:[#allocation3 + $0x814] ss:$8 sps:$4 sm:$0xff]   ;;  %v8899_v8 = vld [vmem:[#allocation3 + $0x810] ss:$8 sps:$4 sm:$0xff]  }
 0xb63   :  { %v6290_v15 = vld [vmem:[#allocation2] sm:$0xfe]  ;;  %v6296_v57 = vld [vmem:[#allocation2 + $0x118] sm:$0xff]  ;;  %v6295_v5 = vld [vmem:[#allocation2 + $0xb0] sm:$0xff] }
 0xb64   :  { %6832 = vmatpush1.bf16.msra.mxu0 %v8884_v22  ;;  %8514 = vmatpush1.bf16.msra.mxu1 %v8884_v22  ;;  %v6292_v22 = vld [vmem:[#allocation2 + $0x170] sm:$0xff]  ;;  %v6324_v55 = vld [vmem:[#allocation2 + $0xe0] sm:$0xff]  ;;  %v6299_v2 = vld [vmem:[#allocation2 + $0x68] sm:$0xff] }
 0xb65   :  { %6833 = vmatprep.subr.bf16.mxu0 %v8885_v20  ;;  %8499 = vmatprep.subr.bf16.mxu1 %v8885_v20  ;;  %v6294_v20 = vld [vmem:[#allocation2 + $0x1a0] sm:$0xff]  ;;  %v6323_v39 = vld [vmem:[#allocation2 + $0x110] sm:$0xff]  ;;  %v6330_v62 = vld [vmem:[#allocation2 + $0x1b8] sm:$0xff] }
 0xb66   :  { %v6326_v12 = vld [vmem:[#allocation2 + $0x1d0] sm:$0xff]  ;;  %v6328_v63 = vld [vmem:[#allocation2 + $0x80] sm:$0xff] }
 0xb67   :  { %v6297_v10 = vld [vmem:[#allocation2 + $0x40] sm:$0xff] }
 0xb68   :  { %6834 = vmatpush1.bf16.msra.mxu0 %v8887_v56  ;;  %8515 = vmatpush1.bf16.msra.mxu1 %v8887_v56  ;;  %v6348_v56 = vpack.c.bf16 %v6292_v22, %v6290_v15  ;;  %v8903_v15 = vld [vmem:[#allocation3 + $0x8f4] ss:$8 sps:$4 sm:$0xff]   ;;  %v8926_v7 = vld [vmem:[#allocation3 + $0x880] ss:$8 sps:$4 sm:$0xff]  }
 0xb69   :  { %6835 = vmatprep.subr.bf16.mxu0 %v8888_v37  ;;  %8500 = vmatprep.subr.bf16.mxu1 %v8888_v37  ;;  %v12121_v37 = vpack.c.bf16 %v6296_v57, %v6294_v20  ;;  %v6320_v57 = vld [vmem:[#allocation2 + $0x1f0] sm:$0xff] }
 0xb6a   :  { %v6424_v19 = vshll.u32 %v6348_v56, 16 }
 0xb6c   :  { %6836 = vmatpush1.bf16.msra.mxu0 %v8890_v49  ;;  %8516 = vmatpush1.bf16.msra.mxu1 %v8890_v49  ;;  %v8900_v49 = vld [vmem:[#allocation3 + $0x804] ss:$8 sps:$4 sm:$0xff]   ;;  %v6426_v44 = vrot.slane %v6424_v19, 1 }
 0xb6d   :  { %6837 = vmatprep.subr.bf16.mxu0 %v8891_v61  ;;  %8501 = vmatprep.subr.bf16.mxu1 %v8891_v61  ;;  %v6422_v61 = vshrl.u32 %v6348_v56, 16  ;;  %v8905_v56 = vld [vmem:[#allocation3 + $0x8f0] ss:$8 sps:$4 sm:$0xff]   ;;  %v8906_v19 = vld [vmem:[#allocation3 + $0x8e4] ss:$8 sps:$4 sm:$0xff]  }
 0xb6f   :  { %v6427_v22 = vor.u32 %v6426_v44, %v6422_v61  ;;  %v8908_v44 = vld [vmem:[#allocation3 + $0x8e0] ss:$8 sps:$4 sm:$0xff]  }
 0xb70   :  { %6838 = vmatpush1.bf16.msra.mxu0 %v8893_v31  ;;  %8517 = vmatpush1.bf16.msra.mxu1 %v8893_v31  ;;  %v6429_v31 = vshll.u32 %v12121_v37, 16 }
 0xb71   :  { %6839 = vmatprep.subr.bf16.mxu0 %v8894_v58  ;;  %8502 = vmatprep.subr.bf16.mxu1 %v8894_v58  ;;  %v8902_v58 = vld [vmem:[#allocation3 + $0x800] ss:$8 sps:$4 sm:$0xff]  }
 0xb72   :  { %v12124_v27 = vrot.slane %v6429_v31, 1 }
 0xb74   :  { %6840 = vmatpush1.bf16.msra.mxu0 %v8896_v34  ;;  %8518 = vmatpush1.bf16.msra.mxu1 %v8896_v34  ;;  %v6318_v34 = vld [vmem:[#allocation2 + $0x1e8] sm:$0xff]  ;;  %v6432_v20 = vsel %vm2238_vm1, %v6427_v22, %v12124_v27  ;;  %v8909_v22 = vld [vmem:[#allocation3 + $0x8d4] ss:$8 sps:$4 sm:$0xff]  }
 0xb75   :  { %6841 = vmatprep.subr.bf16.mxu0 %v8897_v16  ;;  %8503 = vmatprep.subr.bf16.mxu1 %v8897_v16  ;;  %v6322_v16 = vld [vmem:[#allocation2 + $0x148] sm:$0xff] }
 0xb76   :  { %6861 = vmatprep.mubr.bf16.mxu0 %v6432_v20  ;;  %v12128_v31 = vpack.c.bf16 %v6324_v55, %v6322_v16  ;;  %v8912_v55 = vld [vmem:[#allocation3 + $0x8c4] ss:$8 sps:$4 sm:$0xff]   ;;  %v8914_v20 = vld [vmem:[#allocation3 + $0x8c0] ss:$8 sps:$4 sm:$0xff]   ;;  %v8915_v16 = vld [vmem:[#allocation3 + $0x8b4] ss:$8 sps:$4 sm:$0xff]  }
 0xb78   :  { %6842 = vmatpush1.bf16.msra.mxu0 %v8899_v8  ;;  %8519 = vmatpush1.bf16.msra.mxu1 %v8899_v8  ;;  %v6362_v8 = vpack.c.bf16 %v6320_v57, %v6318_v34  ;;  %v6541_v61 = vshll.u32 %v12128_v31, 16  ;;  %v8911_v34 = vld [vmem:[#allocation3 + $0x8d0] ss:$8 sps:$4 sm:$0xff]  }
 0xb79   :  { %6843 = vmatprep.subr.bf16.mxu0 %v8900_v49  ;;  %8504 = vmatprep.subr.bf16.mxu1 %v8900_v49 }
 0xb7a   :  { %v6525_v60 = vshll.u32 %v6362_v8, 16  ;;  %v6537_v49 = vshrl.u32 %v6362_v8, 16  ;;  %v6319_v8 = vld [vmem:[#allocation2 + $0x38] sm:$0xff] }
 0xb7c   :  { %6844 = vmatpush1.bf16.msra.mxu0 %v8902_v58  ;;  %8520 = vmatpush1.bf16.msra.mxu1 %v8902_v58  ;;  %v12131_v18 = vrot.slane %v6525_v60, 1  ;;  %v12133_v58 = vrot.slane %v6541_v61, 1  ;;  %v6289_v60 = vld [vmem:[#allocation2 + $0x1d8] sm:$0xfe]  ;;  %v6293_v61 = vld [vmem:[#allocation2 + $0x120] sm:$0xff] }
 0xb7d   :  { %6845 = vmatprep.subr.bf16.mxu0 %v8903_v15  ;;  %8505 = vmatprep.subr.bf16.mxu1 %v8903_v15  ;;  %v12138_v36 = vpack.c.bf16 %v6295_v5, %v6293_v61  ;;  %v6441_v61 = vshrl.u32 %v12121_v37, 16 }
 0xb7e   :  { %v6539_v15 = vor.u32 %v6537_v49, %v12131_v18  ;;  %v8917_v49 = vld [vmem:[#allocation3 + $0x8b0] ss:$8 sps:$4 sm:$0xff]  }
 0xb7f   :  { %v6417_v5 = vshll.u32 %v12138_v36, 16  ;;  %v6443_v40 = vor.u32 %v6441_v61, %v12124_v27 }
 0xb80   :  { %6846 = vmatpush2.bf16.msra.mxu0 %v8905_v56  ;;  %8521 = vmatpush2.bf16.msra.mxu1 %v8905_v56  ;;  %v6544_v57 = vsel %vm2238_vm1, %v6539_v15, %v12133_v58  ;;  %v6291_v56 = vld [vmem:[#allocation2 + $0x160] sm:$0xff]  ;;  %v6298_v15 = vld [vmem:[#allocation2 + $0x198] sm:$0xff] }
 0xb81   :  { %6847 = vmatprep.subr.bf16.mxu0 %v8906_v19  ;;  %8506 = vmatprep.subr.bf16.mxu1 %v8906_v19  ;;  %v6317_v19 = vld [vmem:[#allocation2 + $0x1c8] sm:$0xff] }
 0xb82   :  { %6931 = vmatprep.mubr.bf16.mxu1 %v6544_v57  ;;  %v6361_v26 = vpack.c.bf16 %v6319_v8, %v6317_v19  ;;  %v6321_v57 = vld [vmem:[#allocation2 + $0x1f8] sm:$0xff]  ;;  %v8924_v19 = vld [vmem:[#allocation3 + $0x884] ss:$8 sps:$4 sm:$0xff]  }
 0xb83   :  { %v12140_v4 = vpack.c.bf16 %v6323_v39, %v6321_v57  ;;  %v6304_v57 = vld [vmem:[#allocation2 + $0x1c0] sm:$0xff] }
 0xb84   :  { %6848 = vmatpush2.bf16.msra.mxu0 %v8908_v44  ;;  %8522 = vmatpush2.bf16.msra.mxu1 %v8908_v44  ;;  %v8918_v44 = vld [vmem:[#allocation3 + $0x8a4] ss:$8 sps:$4 sm:$0xff]   ;;  %v6517_v14 = vshll.u32 %v6361_v26, 16 }
 0xb85   :  { %6849 = vmatprep.subr.bf16.mxu0 %v8909_v22  ;;  %8507 = vmatprep.subr.bf16.mxu1 %v8909_v22  ;;  %v6347_v22 = vpack.c.bf16 %v6291_v56, %v6289_v60  ;;  %v8923_v56 = vld [vmem:[#allocation3 + $0x890] ss:$8 sps:$4 sm:$0xff]  }
 0xb86   :  { %v12148_v28 = vrot.slane %v6517_v14, 1  ;;  %v12155_v14 = vpack.c.bf16 %v6299_v2, %v6297_v10  ;;  %v6433_v2 = vshrl.u32 %v12138_v36, 16 }
 0xb87   :  { %v6412_v54 = vshll.u32 %v6347_v22, 16  ;;  %v6410_v8 = vshrl.u32 %v6347_v22, 16  ;;  %v6325_v22 = vld [vmem:[#allocation2 + $0x50] sm:$0xff] }
 0xb88   :  { %6850 = vmatpush2.bf16.msra.mxu0 %v8911_v34  ;;  %8523 = vmatpush2.bf16.msra.mxu1 %v8911_v34  ;;  %v6300_v34 = vld [vmem:[#allocation2 + $0xa8] sm:$0xff]  ;;  %v6437_v10 = vshll.u32 %v12155_v14, 16 }
 0xb89   :  { %6851 = vmatprep.subr.bf16.mxu0 %v8912_v55  ;;  %8508 = vmatprep.subr.bf16.mxu1 %v8912_v55  ;;  %v8920_v55 = vld [vmem:[#allocation3 + $0x8a0] ss:$8 sps:$4 sm:$0xff]   ;;  %v12142_v60 = vpack.c.bf16 %v6300_v34, %v6298_v15  ;;  %v6414_v39 = vrot.slane %v6412_v54, 1  ;;  %v6529_v15 = vshrl.u32 %v6361_v26, 16 }
 0xb8a   :  { %v6327_v34 = vld [vmem:[#allocation2 + $0x128] sm:$0xff] }
 0xb8b   :  { %v6332_v54 = vld [vmem:[#allocation2 + $0x88] sm:$0xff]  ;;  %v6415_v13 = vor.u32 %v6414_v39, %v6410_v8  ;;  %v12160_v11 = vpack.c.bf16 %v6327_v34, %v6325_v22  ;;  %v6457_v8 = vshrl.u32 %v12142_v60, 16  ;;  %v6439_v34 = vrot.slane %v6437_v10, 1 }
 0xb8c   :  { %6852 = vmatpush2.bf16.msra.mxu0 %v8914_v20  ;;  %8524 = vmatpush2.bf16.msra.mxu1 %v8914_v20  ;;  %v8921_v20 = vld [vmem:[#allocation3 + $0x894] ss:$8 sps:$4 sm:$0xff]   ;;  %v12163_v27 = vpack.c.bf16 %v6332_v54, %v6330_v62  ;;  %v6301_v39 = vld [vmem:[#allocation2 + $0x168] sm:$0xff]  ;;  %v6545_v62 = vshrl.u32 %v12140_v4, 16 }
 0xb8d   :  { %6853 = vmatprep.subr.bf16.mxu0 %v8915_v16  ;;  %8509 = vmatprep.subr.bf16.mxu1 %v8915_v16  ;;  %v12144_v16 = vpack.c.bf16 %v6328_v63, %v6326_v12  ;;  %v6533_v63 = vshll.u32 %v12140_v4, 16  ;;  %v6445_v12 = vshll.u32 %v12142_v60, 16 }
 0xb8f   :  { %v6557_v37 = vshll.u32 %v12144_v16, 16  ;;  %v6447_v42 = vrot.slane %v6445_v12, 1  ;;  %v6573_v12 = vshll.u32 %v12163_v27, 16 }
 0xb90   :  { %6854 = vmatpush2.bf16.msra.mxu0 %v8917_v49  ;;  %8525 = vmatpush2.bf16.msra.mxu1 %v8917_v49  ;;  %v6302_v49 = vld [vmem:[#allocation2 + $0x208] sm:$0xff] }
 0xb91   :  { %6855 = vmatprep.subr.bf16.mxu0 %v8918_v44  ;;  %8510 = vmatprep.subr.bf16.mxu1 %v8918_v44  ;;  %v6553_v44 = vshrl.u32 %v12128_v31, 16  ;;  %v12157_v26 = vpack.c.bf16 %v6304_v57, %v6302_v49  ;;  %v6535_v31 = vrot.slane %v6533_v63, 1  ;;  %v6559_v53 = vrot.slane %v6557_v37, 1  ;;  %v6303_v49 = vld [vmem:[#allocation2 + $0x188] sm:$0xff]  ;;  %v6334_v37 = vld [vmem:[#allocation2 + $0x140] sm:$0xff] }
 0xb92   :  { %v6549_v57 = vshll.u32 %v12160_v11, 16  ;;  %v6448_v36 = vsel %vm2238_vm1, %v6443_v40, %v6447_v42  ;;  %v6569_v63 = vshrl.u32 %v12144_v16, 16  ;;  %v6459_v54 = vor.u32 %v6457_v8, %v6447_v42 }
 0xb93   :  { %v12177_v4 = vpack.c.bf16 %v6303_v49, %v6301_v39  ;;  %v6575_v1 = vrot.slane %v6573_v12, 1  ;;  %v6449_v42 = vshrl.u32 %v12155_v14, 16  ;;  %v6473_v10 = vshrl.u32 %v12157_v26, 16 }
 0xb94   :  { %6856 = vmatpush2.bf16.msra.mxu0 %v8920_v55  ;;  %8526 = vmatpush2.bf16.msra.mxu1 %v8920_v55  ;;  %v6419_v55 = vrot.slane %v6417_v5, 1  ;;  %v6555_v5 = vor.u32 %v6553_v44, %v12133_v58  ;;  %v6306_v58 = vld [vmem:[#allocation2 + $0x158] sm:$0xff]  ;;  %v6571_v33 = vor.u32 %v6569_v63, %v6559_v53  ;;  %v6585_v14 = vshrl.u32 %v12163_v27, 16 }
 0xb95   :  { %6857 = vmatprep.subr.bf16.mxu0 %v8921_v20  ;;  %8511 = vmatprep.subr.bf16.mxu1 %v8921_v20  ;;  %v6531_v20 = vor.u32 %v6529_v15, %v12148_v28  ;;  %v6308_v15 = vld [vmem:[#allocation2 + $0x190] sm:$0xff]  ;;  %v6331_v44 = vld [vmem:[#allocation2 + $0x18] sm:$0xff]  ;;  %v6451_v63 = vor.u32 %v6449_v42, %v6439_v34 }
 0xb96   :  { %v6420_v61 = vsel %vm2238_vm1, %v6415_v13, %v6419_v55  ;;  %v6560_v60 = vsel %vm2238_vm1, %v6555_v5, %v6559_v53  ;;  %v6329_v13 = vld [vmem:[#allocation2 + $0x20] sm:$0xff]  ;;  %v6435_v22 = vor.u32 %v6433_v2, %v6419_v55  ;;  %v12179_v40 = vpack.c.bf16 %v6308_v15, %v6306_v58  ;;  %v6338_v15 = vld [vmem:[#allocation2 + $0x30] sm:$0xff] }
 0xb97   :  { %v6551_v5 = vrot.slane %v6549_v57, 1  ;;  %v12181_v16 = vpack.c.bf16 %v6331_v44, %v6329_v13  ;;  %v6453_v2 = vshll.u32 %v12177_v4, 16  ;;  %v6576_v58 = vsel %vm2238_vm1, %v6571_v33, %v6575_v1  ;;  %v6335_v57 = vld [vmem:[#allocation2 + $0xf8] sm:$0xff] }
 0xb98   :  { %6858 = vmatpush2.bf16.msra.mxu0 %v8923_v56  ;;  %8527 = vmatpush2.bf16.msra.mxu1 %v8923_v56  ;;  %v6461_v56 = vshll.u32 %v12157_v26, 16  ;;  %v6440_v55 = vsel %vm2238_vm1, %v6435_v22, %v6439_v34  ;;  %v6477_v8 = vshll.u32 %v12179_v40, 16  ;;  %v6333_v26 = vld [vmem:[#allocation2 + $0x1e0] sm:$0xff]  ;;  %v6587_v22 = vor.u32 %v6585_v14, %v6575_v1 }
 0xb99   :  { %6859 = vmatprep.subr.bf16.mxu0 %v8924_v19  ;;  %8512 = vmatprep.subr.bf16.mxu1 %v8924_v19  ;;  %v6536_v19 = vsel %vm2238_vm1, %v6531_v20, %v6535_v31  ;;  %v6547_v20 = vor.u32 %v6545_v62, %v6535_v31  ;;  %v6307_v31 = vld [vmem:[#allocation2 + $0x218] sm:$0xff]  ;;  %v6565_v53 = vshll.u32 %v12181_v16, 16  ;;  %v6455_v12 = vrot.slane %v6453_v2, 1  ;;  %v6344_v14 = vld [vmem:[#allocation2 + $0x100] sm:$0xff] }
 0xb9a   :  { %v6463_v3 = vrot.slane %v6461_v56, 1  ;;  %v6561_v56 = vshrl.u32 %v12160_v11, 16  ;;  %v6479_v44 = vrot.slane %v6477_v8, 1  ;;  %v12199_v27 = vpack.c.bf16 %v6335_v57, %v6333_v26 }
 0xb9b   :  { %v6552_v39 = vsel %vm2238_vm1, %v6547_v20, %v6551_v5  ;;  %v6465_v34 = vshrl.u32 %v12177_v4, 16  ;;  %v6489_v42 = vshrl.u32 %v12179_v40, 16  ;;  %v6577_v1 = vshrl.u32 %v12181_v16, 16  ;;  %v6337_v40 = vld [vmem:[#allocation2 + $0x180] sm:$0xff] }
 0xb9c   :  { %6860 = vmatpush2.bf16.msra.mxu0 %v8926_v7  ;;  %8528 = vmatpush2.bf16.msra.mxu1 %v8926_v7  ;;  %v6336_v7 = vld [vmem:[#allocation2 + $0x60] sm:$0xff]  ;;  %v6464_v49 = vsel %vm2238_vm1, %v6459_v54, %v6463_v3  ;;  %v6475_v11 = vor.u32 %v6473_v10, %v6463_v3  ;;  %v6563_v33 = vor.u32 %v6561_v56, %v6551_v5  ;;  %v6309_v10 = vld [vmem:[#allocation2 + $0xd8] sm:$0xff]  ;;  %v6316_v56 = vld [vmem:[#allocation2 + $0x1a8] sm:$0xff] }
 0xb9d   :  { %v12183_v51 = vpack.c.bf16 %v6336_v7, %v6334_v37  ;;  %v6567_v37 = vrot.slane %v6565_v53, 1  ;;  %v6311_v5 = vld [vmem:[#allocation2 + $0xa0] sm:$0xff]  ;;  %v6491_v57 = vor.u32 %v6489_v42, %v6479_v44  ;;  %v6315_v42 = vld [vmem:[#allocation2 + $0x108] sm:$0xff] }
 0xb9e   :  { %v6480_v2 = vsel %vm2238_vm1, %v6475_v11, %v6479_v44 }
 0xb9f   :  { %6862 = vmatmul.mubr.bf16.vlgmr.msra.gmra.mxu0 %v6420_v61  ;;  %6932 = vmatmul.mubr.bf16.vlgmr.msra.gmra.mxu1 %v6536_v19  ;;  %v6305_v61 = vld [vmem:[#allocation2 + $0x78] sm:$0xff]  ;;  %v6310_v19 = vld [vmem:[#allocation2 + $0x70] sm:$0xff]  ;;  %v6589_v62 = vshll.u32 %v12183_v51, 16  ;;  %v6568_v8 = vsel %vm2238_vm1, %v6563_v33, %v6567_v37  ;;  %v6601_v4 = vshrl.u32 %v12183_v51, 16 }
 0xba0   :  { %6871 = vmatprep.mubr.bf16.mxu0 %v6448_v36  ;;  %6941 = vmatprep.mubr.bf16.mxu1 %v6560_v60  ;;  %v6312_v36 = vld [vmem:[#allocation2 + $0x58] sm:$0xff]  ;;  %v6340_v60 = vld [vmem:[#allocation2 + $0x1b0] sm:$0xff]  ;;  %v12197_v13 = vpack.c.bf16 %v6307_v31, %v6305_v61  ;;  %v6581_v31 = vshll.u32 %v12199_v27, 16 }
 0xba1   :  { %v6358_v7 = vpack.c.bf16 %v6312_v36, %v6310_v19  ;;  %v6591_v54 = vrot.slane %v6589_v62, 1  ;;  %v12201_v20 = vpack.c.bf16 %v6340_v60, %v6338_v15  ;;  %v6314_v61 = vld [vmem:[#allocation2 + $0x210] sm:$0xff]  ;;  %v6467_v62 = vor.u32 %v6465_v34, %v6455_v12 }
 0xba2   :  { %v6469_v3 = vshll.u32 %v12197_v13, 16  ;;  %v6339_v19 = vld [vmem:[#allocation2 + $0x150] sm:$0xff]  ;;  %v6357_v36 = vpack.c.bf16 %v6311_v5, %v6309_v10  ;;  %v12214_v16 = vpack.c.bf16 %v6316_v56, %v6314_v61  ;;  %v6579_v15 = vor.u32 %v6577_v1, %v6567_v37  ;;  %v6341_v1 = vld [vmem:[#allocation2 + $0xc8] sm:$0xff] }
 0xba3   :  { %v6592_v53 = vsel %vm2238_vm1, %v6587_v22, %v6591_v54  ;;  %v6583_v60 = vrot.slane %v6581_v31, 1  ;;  %v6603_v11 = vor.u32 %v6601_v4, %v6591_v54  ;;  %v6505_v34 = vshrl.u32 %v6358_v7, 16  ;;  %v6346_v31 = vld [vmem:[#allocation2 + $0x10] sm:$0x1] }
 0xba4   :  { %v6471_v26 = vrot.slane %v6469_v3, 1  ;;  %v6509_v44 = vshll.u32 %v12214_v16, 16  ;;  %v6313_v3 = vld [vmem:[#allocation2 + $0x178] sm:$0xff]  ;;  %v6593_v37 = vshrl.u32 %v12199_v27, 16 }
 0xba6   :  { %v6472_v9 = vsel %vm2238_vm1, %v6467_v62, %v6471_v26  ;;  %v6511_v4 = vrot.slane %v6509_v44, 1  ;;  %v6595_v27 = vor.u32 %v6593_v37, %v6583_v60  ;;  %v6497_v62 = vshrl.u32 %v6357_v36, 16 }
 0xba7   :  { %6872 = vmatmul.mubr.bf16.gmra.mxu0 %v6440_v55  ;;  %6942 = vmatmul.mubr.bf16.gmra.mxu1 %v6552_v39  ;;  %v6456_v55 = vsel %vm2238_vm1, %v6451_v63, %v6455_v12  ;;  %v6493_v39 = vshll.u32 %v6358_v7, 16  ;;  %v6371_v63 = vpack.c.bf16 %v6339_v19, %v6337_v40  ;;  %v6485_v12 = vshll.u32 %v6357_v36, 16 }
 0xba8   :  { %6881 = vmatprep.mubr.bf16.mxu0 %v6464_v49  ;;  %6951 = vmatprep.mubr.bf16.mxu1 %v6576_v58  ;;  %v6605_v49 = vshll.u32 %v12201_v20, 16  ;;  %v6342_v58 = vld [vmem:[#allocation2 + $0x48] sm:$0xff] }
 0xba9   :  { %v6495_v51 = vrot.slane %v6493_v39, 1  ;;  %v6374_v22 = vpack.c.bf16 %v6344_v14, %v6342_v58  ;;  %v6597_v10 = vshll.u32 %v6371_v63, 16  ;;  %v6487_v39 = vrot.slane %v6485_v12, 1 }
 0xbaa   :  { %v6607_v33 = vrot.slane %v6605_v49, 1  ;;  %v6376_v14 = vpack.c.bf16 %v6346_v31, %v6346_v31 }
 0xbab   :  { %v6496_v5 = vsel %vm2238_vm1, %v6491_v57, %v6495_v51  ;;  %v6621_v61 = vshll.u32 %v6374_v22, 16  ;;  %v6507_v56 = vor.u32 %v6505_v34, %v6495_v51  ;;  %v6599_v49 = vrot.slane %v6597_v10, 1  ;;  %v6345_v34 = vld [vmem:[#allocation2 + $0xb8] sm:$0x1] }
 0xbac   :  { %v6608_v54 = vsel %vm2238_vm1, %v6603_v11, %v6607_v33  ;;  %v6521_v11 = vshrl.u32 %v12214_v16, 16  ;;  %v6637_v12 = vshll.u32 %v6376_v14, 16 }
 0xbad   :  { %v6623_v58 = vrot.slane %v6621_v61, 1 }
 0xbaf   :  { %6882 = vmatmul.mubr.bf16.gmra.mxu0 %v6456_v55  ;;  %6952 = vmatmul.mubr.bf16.gmra.mxu1 %v6568_v8  ;;  %v6481_v55 = vshrl.u32 %v12197_v13, 16  ;;  %v6617_v8 = vshrl.u32 %v12201_v20, 16  ;;  %v6343_v13 = vld [vmem:[#allocation2 + $0xd0] sm:$0xff] }
 0xbb0   :  { %6891 = vmatprep.mubr.bf16.mxu0 %v6480_v2  ;;  %6961 = vmatprep.mubr.bf16.mxu1 %v6592_v53  ;;  %v6584_v2 = vsel %vm2238_vm1, %v6579_v15, %v6583_v60  ;;  %v6359_v53 = vpack.c.bf16 %v6315_v42, %v6313_v3  ;;  %v6373_v40 = vpack.c.bf16 %v6343_v13, %v6341_v1  ;;  %v6609_v15 = vshrl.u32 %v6371_v63, 16 }
 0xbb1   :  { %v6483_v7 = vor.u32 %v6481_v55, %v6471_v26  ;;  %v6619_v19 = vor.u32 %v6617_v8, %v6607_v33  ;;  %v6600_v26 = vsel %vm2238_vm1, %v6595_v27, %v6599_v49  ;;  %v6633_v60 = vshrl.u32 %v6374_v22, 16  ;;  %v13993_v27 = vld [vmem:[#allocation53_spill] sm:$0xff] }
 0xbb2   :  { %v6501_v57 = vshll.u32 %v6359_v53, 16  ;;  %v6613_v51 = vshll.u32 %v6373_v40, 16  ;;  %v6499_v33 = vor.u32 %v6497_v62, %v6487_v39  ;;  %v6611_v36 = vor.u32 %v6609_v15, %v6599_v49 }
 0xbb3   :  { %v6488_v20 = vsel %vm2238_vm1, %v6483_v7, %v6487_v39  ;;  %v6624_v55 = vsel %vm2238_vm1, %v6619_v19, %v6623_v58  ;;  %v6375_v42 = vpack.c.bf16 %v6345_v34, %v6345_v34  ;;  %v6635_v37 = vor.u32 %v6633_v60, %v6623_v58 }
 0xbb4   :  { %v6503_v44 = vrot.slane %v6501_v57, 1  ;;  %v6615_v3 = vrot.slane %v6613_v51, 1  ;;  %v6639_v63 = vrot.slane %v6637_v12, 1  ;;  %v6513_v10 = vshrl.u32 %v6359_v53, 16 }
 0xbb5   :  { %v6625_v22 = vshrl.u32 %v6373_v40, 16  ;;  %v7060_v49 = vadd.s32 8, %v13993_v27  ;;  %v7062_v57 = vadd.s32 24, %v13993_v27  ;;  %v13994_v60 = vmov 0.0  }
 0xbb6   :  { %v6504_v16 = vsel %vm2238_vm1, %v6499_v33, %v6503_v44  ;;  %v6640_v61 = vsel %vm2238_vm1, %v6635_v37, %v6639_v63  ;;  %v6515_v1 = vor.u32 %v6513_v10, %v6503_v44 }
 0xbb7   :  { %6892 = vmatmul.mubr.bf16.gmra.mxu0 %v6472_v9  ;;  %6962 = vmatmul.mubr.bf16.gmra.mxu1 %v6584_v2  ;;  %v6512_v9 = vsel %vm2238_vm1, %v6507_v56, %v6511_v4  ;;  %v6523_v2 = vor.u32 %v6521_v11, %v6511_v4  ;;  %v6627_v13 = vor.u32 %v6625_v22, %v6615_v3 }
 0xbb8   :  { %6901 = vmatprep.mubr.bf16.mxu0 %v6496_v5  ;;  %6971 = vmatprep.mubr.bf16.mxu1 %v6608_v54  ;;  %v6616_v5 = vsel %vm2238_vm1, %v6611_v36, %v6615_v3  ;;  %v6629_v54 = vshll.u32 %v6375_v42, 16  ;;  %v6520_v7 = vsel %vm2238_vm1, %v6515_v1, %v12148_v28  ;;  %v7064_v36 = vadd.s32 40, %v13993_v27 }
 0xbb9   :  { %v6528_v8 = vsel %vm2238_vm1, %v6523_v2, %v12131_v18 }
 0xbba   :  { %v6631_v31 = vrot.slane %v6629_v54, 1  ;;  %v7066_v54 = vadd.s32 56, %v13993_v27 }
 0xbbc   :  { %v6632_v39 = vsel %vm2238_vm1, %v6627_v13, %v6631_v31 }
 0xbbf   :  { %6902 = vmatmul.mubr.bf16.gmra.mxu0 %v6488_v20  ;;  %6972 = vmatmul.mubr.bf16.gmra.mxu1 %v6600_v26  ;;  %v7098_v20 = vand.u32 15, %v7060_v49 }
 0xbc0   :  { %6911 = vmatprep.mubr.bf16.mxu0 %v6512_v9  ;;  %6981 = vmatprep.mubr.bf16.mxu1 %v6624_v55  ;;  %v7112_v55 = vand.u32 15, %v7062_v57 }
 0xbc1   :  { %vm7424_vm2 = vcmp.lt.s32.totalorder %v7098_v20, 14  ;;  %v7068_v20 = vadd.s32 72, %v13993_v27 }
 0xbc2   :  { %v12257_v12 = vsel %vm7424_vm2, 1.0, %v13994_v60  ;;  %vm7426_vm3 = vcmp.lt.s32.totalorder %v7112_v55, 14 }
 0xbc7   :  { %6912 = vmatmul.mubr.bf16.gmra.mxu0 %v6504_v16  ;;  %6982 = vmatmul.mubr.bf16.gmra.mxu1 %v6616_v5  ;;  %v7126_v16 = vand.u32 15, %v7064_v36  ;;  %v12280_v5 = vsel %vm7426_vm3, 1.0, %v13994_v60 }
 0xbc8   :  { %6921 = vmatprep.mubr.bf16.mxu0 %v6528_v8  ;;  %6991 = vmatprep.mubr.bf16.mxu1 %v6640_v61 }
 0xbc9   :  { %vm7428_vm4 = vcmp.lt.s32.totalorder %v7126_v16, 14 }
 0xbcf   :  { %6922 = vmatmul.mubr.bf16.gmra.mxu0 %v6520_v7  ;;  %6992 = vmatmul.mubr.bf16.gmra.mxu1 %v6632_v39 }
 0xc5f   :  { %v6863_v56 = vpop.f32.mrf.mxu0  ;;  %v12237_v53 = vpop.f32.mrf.mxu1 }
 0xc60   :  { %v12272_v63 = vadd.f32 %v6863_v56, %v11954_v52 }
 0xc61   :  { %v6865_v18 = vpop.f32.mrf.mxu0  ;;  %v12239_v4 = vpop.f32.mrf.mxu1 }
 0xc62   :  { %v12286_v61 = vadd.f32 %v6865_v18, %v11957_v47 }
 0xc63   :  { %v6867_v40 = vpop.f32.mrf.mxu0  ;;  %v12242_v19 = vpop.f32.mrf.mxu1 }
 0xc64   :  { %v12254_v11 = vadd.f32 %v6867_v40, %v11960_v30  ;;  %v7140_v40 = vand.u32 15, %v7066_v54  ;;  %v7070_v54 = vadd.s32 88, %v13993_v27 }
 0xc65   :  { %v6869_v58 = vpop.f32.mrf.mxu0  ;;  %v12244_v14 = vpop.f32.mrf.mxu1 }
 0xc66   :  { %v12262_v44 = vadd.f32 %v6869_v58, %v11963_v46  ;;  %v7509_v2 = vmul.f32 %v12257_v12, %v12254_v11  ;;  %vm7430_vm5 = vcmp.lt.s32.totalorder %v7140_v40, 14 }
 0xc67   :  { %v6873_v28 = vpop.f32.mrf.mxu0  ;;  %v12246_v62 = vpop.f32.mrf.mxu1 }
 0xc68   :  { %v7510_v10 = vmul.f32 %v12257_v12, %v12262_v44  ;;  %v12289_v52 = vadd.f32 %v6873_v28, %v11966_v38  ;;  %v7563_v1 = vadd.f32 %v7509_v2, %v12272_v63 }
 0xc69   :  { %v6875_v9 = vpop.f32.mrf.mxu0  ;;  %v12249_v26 = vpop.f32.mrf.mxu1 }
 0xc6a   :  { %v12298_v7 = vadd.f32 %v6875_v9, %v11969_v23  ;;  %v7596_v39 = vadd.f32 %v7510_v10, %v12286_v61  ;;  %v7564_v18 = vadd.f32 %v7563_v1, %v12289_v52  ;;  %v12312_v23 = vsel %vm7428_vm4, 1.0, %v13994_v60 }
 0xc6b   :  { %v6877_v15 = vpop.f32.mrf.mxu0  ;;  %v12251_v51 = vpop.f32.mrf.mxu1 }
 0xc6c   :  { %v12277_v46 = vadd.f32 %v6877_v15, %v11972_v24  ;;  %13996 = vst [vmem:[#allocation88_spill] sm:$0xff] %v12298_v7  ;;  %v7597_v57 = vadd.f32 %v7596_v39, %v12298_v7  ;;  %v14012_v7 = vld [vmem:[#allocation100_spill] sm:$0xff] }
 0xc6d   :  { %v6879_v34 = vpop.f32.mrf.mxu0  ;;  %v12259_v33 = vpop.f32.mrf.mxu1 }
 0xc6e   :  { %v12293_v24 = vadd.f32 %v6879_v34, %v11975_v48  ;;  %v7513_v47 = vmul.f32 %v12280_v5, %v12277_v46 }
 0xc6f   :  { %v6883_v3 = vpop.f32.mrf.mxu0  ;;  %v12265_v42 = vpop.f32.mrf.mxu1 }
 0xc70   :  { %13995 = vst [vmem:[#allocation54_spill] sm:$0xff] %v12293_v24  ;;  %v7514_v48 = vmul.f32 %v12280_v5, %v12293_v24  ;;  %v12319_v9 = vadd.f32 %v6883_v3, %v11978_v45  ;;  %v7565_v15 = vadd.f32 %v7564_v18, %v7513_v47  ;;  %v7154_v3 = vand.u32 15, %v7068_v20 }
 0xc71   :  { %v6885_v30 = vpop.f32.mrf.mxu0  ;;  %v12269_v37 = vpop.f32.mrf.mxu1 }
 0xc72   :  { %v12325_v34 = vadd.f32 %v6885_v30, %v11981_v43  ;;  %v7598_v36 = vadd.f32 %v7597_v57, %v7514_v48  ;;  %v12338_v43 = vsel %vm7430_vm5, 1.0, %v13994_v60  ;;  %vm7432_vm6 = vcmp.lt.s32.totalorder %v7154_v3, 14 }
 0xc73   :  { %v6887_v22 = vpop.f32.mrf.mxu0  ;;  %v12283_v8 = vpop.f32.mrf.mxu1 }
 0xc74   :  { %v12309_v49 = vadd.f32 %v6887_v22, %v11984_v41  ;;  %13998 = vst [vmem:[#allocation58_spill] sm:$0xff] %v12325_v34  ;;  %v7566_v22 = vadd.f32 %v7565_v15, %v12319_v9  ;;  %v7599_v1 = vadd.f32 %v7598_v36, %v12325_v34 }
 0xc75   :  { %v6889_v13 = vpop.f32.mrf.mxu0  ;;  %v12295_v31 = vpop.f32.mrf.mxu1 }
 0xc76   :  { %v12322_v55 = vadd.f32 %v6889_v13, %v11987_v25  ;;  %v7517_v2 = vmul.f32 %v12312_v23, %v12309_v49 }
 0xc77   :  { %v6893_v56 = vpop.f32.mrf.mxu0  ;;  %v12303_v38 = vpop.f32.mrf.mxu1 }
 0xc78   :  { %13997 = vst [vmem:[#allocation89_spill] sm:$0xff] %v12322_v55  ;;  %v7518_v45 = vmul.f32 %v12312_v23, %v12322_v55  ;;  %v12343_v13 = vadd.f32 %v6893_v56, %v11990_v21  ;;  %v7567_v39 = vadd.f32 %v7566_v22, %v7517_v2  ;;  %v7168_v56 = vand.u32 15, %v7070_v54 }
 0xc79   :  { %v6895_v58 = vpop.f32.mrf.mxu0  ;;  %v12315_v28 = vpop.f32.mrf.mxu1 }
 0xc7a   :  { %v7600_v40 = vadd.f32 %v7599_v1, %v7518_v45  ;;  %v7568_v15 = vadd.f32 %v7567_v39, %v12343_v13  ;;  %vm7434_vm7 = vcmp.lt.s32.totalorder %v7168_v56, 14  ;;  %v14004_v56 = vld [vmem:[#allocation84_spill] sm:$0xff] }
 0xc7b   :  { %v6897_v41 = vpop.f32.mrf.mxu0  ;;  %v12329_v16 = vpop.f32.mrf.mxu1 }
 0xc7c   :  { %v12335_v25 = vadd.f32 %v6897_v41, %v11996_v59  ;;  %v12351_v59 = vadd.f32 %v6895_v58, %v11993_v35  ;;  %v12362_v41 = vsel %vm7432_vm6, 1.0, %v13994_v60 }
 0xc7d   :  { %v6899_v10 = vpop.f32.mrf.mxu0  ;;  %v12348_v48 = vpop.f32.mrf.mxu1 }
 0xc7e   :  { %v12346_v47 = vadd.f32 %v6899_v10, %v11999_v0  ;;  %14000 = vst [vmem:[#allocation74_spill] sm:$0xff] %v12351_v59  ;;  %v7521_v20 = vmul.f32 %v12338_v43, %v12335_v25  ;;  %v7601_v36 = vadd.f32 %v7600_v40, %v12351_v59 }
 0xc7f   :  { %v6903_v30 = vpop.f32.mrf.mxu0  ;;  %v12364_v58 = vpop.f32.mrf.mxu1 }
 0xc80   :  { %13999 = vst [vmem:[#allocation62_spill] sm:$0xff] %v12346_v47  ;;  %v7522_v21 = vmul.f32 %v12338_v43, %v12346_v47  ;;  %v12368_v2 = vadd.f32 %v6903_v30, %v12002_v6  ;;  %v7569_v10 = vadd.f32 %v7568_v15, %v7521_v20  ;;  %v7074_v30 = vadd.s32 120, %v13993_v27 }
 0xc81   :  { %v6905_v18 = vpop.f32.mrf.mxu0  ;;  %v12379_v40 = vpop.f32.mrf.mxu1 }
 0xc82   :  { %v12375_v3 = vadd.f32 %v6905_v18, %v12005_v17  ;;  %v7602_v54 = vadd.f32 %v7601_v36, %v7522_v21  ;;  %v7570_v6 = vadd.f32 %v7569_v10, %v12368_v2 }
 0xc83   :  { %v6907_v57 = vpop.f32.mrf.mxu0  ;;  %v12395_v10 = vpop.f32.mrf.mxu1 }
 0xc84   :  { %v12359_v0 = vadd.f32 %v6907_v57, %v12008_v29  ;;  %v7072_v29 = vadd.s32 104, %v13993_v27  ;;  %14002 = vst [vmem:[#allocation51_spill] sm:$0xff] %v12375_v3  ;;  %v12386_v57 = vsel %vm7434_vm7, 1.0, %v13994_v60  ;;  %v7603_v18 = vadd.f32 %v7602_v54, %v12375_v3 }
 0xc85   :  { %v6909_v35 = vpop.f32.mrf.mxu0  ;;  %14003 = vst [vmem:[#allocation52_spill] sm:$0xff] %v12386_v57  ;;  %v7196_v54 = vand.u32 15, %v7074_v30 }
 0xc86   :  { %v12371_v22 = vadd.f32 %v6909_v35, %v12011_v32  ;;  %v7525_v1 = vmul.f32 %v12362_v41, %v12359_v0  ;;  %v7182_v17 = vand.u32 15, %v7072_v29  ;;  %v14007_v29 = vld [vmem:[#allocation66_spill] sm:$0xff] }
 0xc87   :  { %v6913_v45 = vpop.f32.mrf.mxu0  ;;  %vm7438_vm9 = vcmp.lt.s32.totalorder %v7196_v54, 14 }
 0xc88   :  { %14001 = vst [vmem:[#allocation91_spill] sm:$0xff] %v12371_v22  ;;  %v7526_v32 = vmul.f32 %v12362_v41, %v12371_v22  ;;  %v12390_v15 = vadd.f32 %v6913_v45, %v12014_v50  ;;  %v7571_v21 = vadd.f32 %v7570_v6, %v7525_v1  ;;  %v14005_v22 = vld [vmem:[#allocation64_spill] sm:$0xff]  ;;  %v7076_v50 = vadd.s32 136, %v13993_v27 }
 0xc89   :  { %v6915_v39 = vpop.f32.mrf.mxu0  ;;  %vm7436_vm8 = vcmp.lt.s32.totalorder %v7182_v17, 14 }
 0xc8a   :  { %v12398_v59 = vadd.f32 %v6915_v39, %v14005_v22  ;;  %v7604_v47 = vadd.f32 %v7603_v18, %v7526_v32  ;;  %v7572_v1 = vadd.f32 %v7571_v21, %v12390_v15  ;;  %v12409_v22 = vpop.f32.mrf.mxu1  ;;  %v14009_v32 = vld [vmem:[#allocation85_spill] sm:$0xff]  ;;  %v12417_v30 = vsel %vm7436_vm8, 1.0, %v13994_v60  ;;  %v14010_v21 = vld [vmem:[#allocation67_spill] sm:$0xff] }
 0xc8b   :  { %v6917_v20 = vpop.f32.mrf.mxu0 }
 0xc8c   :  { %v12393_v35 = vadd.f32 %v6917_v20, %v14004_v56  ;;  %14006 = vst [vmem:[#allocation55_spill] sm:$0xff] %v12398_v59  ;;  %v7605_v39 = vadd.f32 %v7604_v47, %v12398_v59  ;;  %v7080_v47 = vadd.s32 168, %v13993_v27  ;;  %v14018_v59 = vld [vmem:[#allocation40_spill] sm:$0xff] }
 0xc8d   :  { %v6919_v36 = vpop.f32.mrf.mxu0 }
 0xc8e   :  { %v7529_v34 = vmul.f32 %v12386_v57, %v12393_v35  ;;  %v12403_v55 = vadd.f32 %v6919_v36, %v14007_v29  ;;  %v7210_v36 = vand.u32 15, %v7076_v50  ;;  %v7078_v29 = vadd.s32 152, %v13993_v27 }
 0xc8f   :  { %v6923_v45 = vpop.f32.mrf.mxu0 }
 0xc90   :  { %14008 = vst [vmem:[#allocation56_spill] sm:$0xff] %v12403_v55  ;;  %v7530_v6 = vmul.f32 %v12386_v57, %v12403_v55  ;;  %v12413_v18 = vadd.f32 %v6923_v45, %v14009_v32  ;;  %v7573_v56 = vadd.f32 %v7572_v1, %v7529_v34  ;;  %v12426_v32 = vpop.f32.mrf.mxu1  ;;  %v14013_v34 = vld [vmem:[#allocation86_spill] sm:$0xff]  ;;  %vm7440_vm10 = vcmp.lt.s32.totalorder %v7210_v36, 14 }
 0xc91   :  { %v6925_v20 = vpop.f32.mrf.mxu0  ;;  %v12430_v50 = vadd.f32 %v12242_v19, %v14013_v34  ;;  %v12447_v19 = vadd.f32 %v12244_v14, %v14018_v59 }
 0xc92   :  { %v12420_v55 = vadd.f32 %v6925_v20, %v14010_v21  ;;  %v7606_v17 = vadd.f32 %v7605_v39, %v7530_v6  ;;  %v7574_v1 = vadd.f32 %v7573_v56, %v12413_v18  ;;  %v14014_v20 = vld [vmem:[#allocation101_spill] sm:$0xff]  ;;  %v14016_v6 = vld [vmem:[#allocation102_spill] sm:$0xff]  ;;  %v7224_v39 = vand.u32 15, %v7078_v29 }
 0xc93   :  { %v6927_v3 = vpop.f32.mrf.mxu0  ;;  %14019 = vst [vmem:[#allocation95_spill] sm:$0xff] %v12447_v19  ;;  %v14021_v29 = vld [vmem:[#allocation42_spill] sm:$0xff] }
 0xc94   :  { %14011 = vst [vmem:[#allocation92_spill] sm:$0xff] %v12420_v55  ;;  %v12423_v57 = vadd.f32 %v6927_v3, %v14012_v7  ;;  %v12440_v7 = vadd.f32 %v12237_v53, %v14016_v6  ;;  %v12443_v3 = vsel %vm7438_vm9, 1.0, %v13994_v60  ;;  %v7607_v56 = vadd.f32 %v7606_v17, %v12420_v55  ;;  %v12456_v6 = vpop.f32.mrf.mxu1  ;;  %v14025_v55 = vld [vmem:[#allocation37_spill] sm:$0xff] }
 0xc95   :  { %v6929_v45 = vpop.f32.mrf.mxu0  ;;  %14017 = vst [vmem:[#allocation94_spill] sm:$0xff] %v12443_v3  ;;  %v7238_v53 = vand.u32 15, %v7080_v47  ;;  %v7537_v36 = vmul.f32 %v12443_v3, %v12430_v50  ;;  %v12462_v14 = vadd.f32 %v12251_v51, %v14021_v29  ;;  %vm7442_vm11 = vcmp.lt.s32.totalorder %v7224_v39, 14 }
 0xc96   :  { %v7533_v54 = vmul.f32 %v12417_v30, %v12423_v57  ;;  %v12436_v21 = vadd.f32 %v6929_v45, %v14014_v20  ;;  %v14020_v20 = vld [vmem:[#allocation103_spill] sm:$0xff]  ;;  %v7082_v47 = vadd.s32 184, %v13993_v27  ;;  %v12477_v51 = vadd.f32 %v12246_v62, %v14025_v55 }
 0xc97   :  { %v12454_v24 = vadd.f32 %v12239_v4, %v14020_v20  ;;  %v7538_v20 = vmul.f32 %v12443_v3, %v12447_v19  ;;  %vm7444_vm12 = vcmp.lt.s32.totalorder %v7238_v53, 14  ;;  %v7084_v53 = vadd.s32 200, %v13993_v27  ;;  %v14036_v3 = vld [vmem:[#allocation36_spill] sm:$0xff] }
 0xc98   :  { %14015 = vst [vmem:[#allocation93_spill] sm:$0xff] %v12436_v21  ;;  %v7575_v34 = vadd.f32 %v7574_v1, %v7533_v54  ;;  %v7534_v45 = vmul.f32 %v12417_v30, %v12436_v21  ;;  %v12466_v1 = vsel %vm7440_vm10, 1.0, %v13994_v60  ;;  %v14023_v54 = vld [vmem:[#allocation47_spill] sm:$0xff] }
 0xc99   :  { %14022 = vst [vmem:[#allocation78_spill] sm:$0xff] %v12466_v1  ;;  %v12470_v4 = vadd.f32 %v12259_v33, %v14023_v54  ;;  %v6987_v33 = vpop.f32.mrf.mxu1  ;;  %v7541_v39 = vmul.f32 %v12466_v1, %v12462_v14  ;;  %v14027_v54 = vld [vmem:[#allocation48_spill] sm:$0xff] }
 0xc9a   :  { %v7576_v59 = vadd.f32 %v7575_v34, %v12440_v7  ;;  %v7608_v17 = vadd.f32 %v7607_v56, %v7534_v45  ;;  %v14026_v34 = vld [vmem:[#allocation44_spill] sm:$0xff]  ;;  %v12488_v21 = vadd.f32 %v12283_v8, %v14027_v54 }
 0xc9b   :  { %14024 = vst [vmem:[#allocation57_spill] sm:$0xff] %v12470_v4  ;;  %v12482_v45 = vadd.f32 %v12249_v26, %v14026_v34  ;;  %v7542_v55 = vmul.f32 %v12466_v1, %v12470_v4  ;;  %v7252_v26 = vand.u32 15, %v7082_v47  ;;  %v14030_v34 = vld [vmem:[#allocation38_spill] sm:$0xff]  ;;  %v12511_v4 = vsel %vm7444_vm12, 1.0, %v13994_v60  ;;  %v6989_v47 = vpop.f32.mrf.mxu1 }
 0xc9c   :  { %v7577_v29 = vadd.f32 %v7576_v59, %v7537_v36  ;;  %v7609_v56 = vadd.f32 %v7608_v17, %v12454_v24  ;;  %14028 = vst [vmem:[#allocation79_spill] sm:$0xff] %v12488_v21  ;;  %v12494_v36 = vsel %vm7442_vm11, 1.0, %v13994_v60  ;;  %v14029_v59 = vld [vmem:[#allocation46_spill] sm:$0xff]  ;;  %v12503_v8 = vadd.f32 %v12295_v31, %v14030_v34 }
 0xc9d   :  { %v12499_v17 = vadd.f32 %v12265_v42, %v14029_v59  ;;  %v7545_v1 = vmul.f32 %v12494_v36, %v12488_v21  ;;  %v14033_v42 = vld [vmem:[#allocation41_spill] sm:$0xff]  ;;  %vm7446_vm13 = vcmp.lt.s32.totalorder %v7252_v26, 14  ;;  %v12529_v21 = vadd.f32 %v12303_v38, %v14036_v3 }
 0xc9e   :  { %v7578_v19 = vadd.f32 %v7577_v29, %v12477_v51  ;;  %v7610_v62 = vadd.f32 %v7609_v56, %v7538_v20  ;;  %14031 = vst [vmem:[#allocation59_spill] sm:$0xff] %v12503_v8  ;;  %v14032_v56 = vld [vmem:[#allocation50_spill] sm:$0xff]  ;;  %v12517_v59 = vadd.f32 %v12329_v16, %v14033_v42  ;;  %v14038_v42 = vld [vmem:[#allocation71_spill] sm:$0xff]  ;;  %v12546_v3 = vsel %vm7446_vm13, 1.0, %v13994_v60 }
 0xc9f   :  { %v12508_v54 = vadd.f32 %v12269_v37, %v14032_v56  ;;  %v7266_v37 = vand.u32 15, %v7084_v53  ;;  %v7546_v56 = vmul.f32 %v12494_v36, %v12503_v8  ;;  %14039 = vst [vmem:[#allocation60_spill] sm:$0xff] %v12546_v3 }
 0xca0   :  { %v7611_v29 = vadd.f32 %v7610_v62, %v12482_v45  ;;  %v7579_v20 = vadd.f32 %v7578_v19, %v7541_v39  ;;  %v14034_v62 = vld [vmem:[#allocation49_spill] sm:$0xff]  ;;  %v7086_v39 = vadd.s32 216, %v13993_v27  ;;  %v7549_v26 = vmul.f32 %v12511_v4, %v12517_v59 }
 0xca1   :  { %v12522_v19 = vadd.f32 %v12348_v48, %v14034_v62  ;;  %v6993_v48 = vpop.f32.mrf.mxu1  ;;  %v12541_v62 = vadd.f32 %v12395_v10, %v14038_v42  ;;  %vm7448_vm14 = vcmp.lt.s32.totalorder %v7266_v37, 14  ;;  %v14043_v10 = vld [vmem:[#allocation70_spill] sm:$0xff] }
 0xca2   :  { %v7612_v31 = vadd.f32 %v7611_v29, %v7542_v55  ;;  %v7580_v34 = vadd.f32 %v7579_v20, %v12499_v17  ;;  %v14037_v29 = vld [vmem:[#allocation39_spill] sm:$0xff] }
 0xca3   :  { %14035 = vst [vmem:[#allocation80_spill] sm:$0xff] %v12522_v19  ;;  %v12534_v20 = vadd.f32 %v12315_v28, %v14037_v29  ;;  %v7550_v38 = vmul.f32 %v12511_v4, %v12522_v19  ;;  %v7280_v28 = vand.u32 15, %v7086_v39  ;;  %v12559_v29 = vadd.f32 %v12379_v40, %v14043_v10  ;;  %v6995_v42 = vpop.f32.mrf.mxu1 }
 0xca4   :  { %v7581_v16 = vadd.f32 %v7580_v34, %v7545_v1  ;;  %v7613_v55 = vadd.f32 %v7612_v31, %v12508_v54  ;;  %v14040_v1 = vld [vmem:[#allocation65_spill] sm:$0xff]  ;;  %v7553_v39 = vmul.f32 %v12546_v3, %v12541_v62 }
 0xca5   :  { %v12550_v31 = vadd.f32 %v12364_v58, %v14040_v1  ;;  %v14044_v58 = vld [vmem:[#allocation72_spill] sm:$0xff]  ;;  %vm7450_vm15 = vcmp.lt.s32.totalorder %v7280_v28, 14  ;;  %v6997_v10 = vpop.f32.mrf.mxu1 }
 0xca6   :  { %v7582_v27 = vadd.f32 %v7581_v16, %v12529_v21  ;;  %v7614_v53 = vadd.f32 %v7613_v55, %v7546_v56  ;;  %v14041_v56 = vld [vmem:[#allocation75_spill] sm:$0xff]  ;;  %v12565_v1 = vadd.f32 %v6987_v33, %v14044_v58  ;;  %v14049_v33 = vld [vmem:[#allocation73_spill] sm:$0xff] }
 0xca7   :  { %v12555_v55 = vadd.f32 %v12409_v22, %v14041_v56  ;;  %v12582_v56 = vadd.f32 %v6989_v47, %v14049_v33  ;;  %v14055_v33 = vld [vmem:[#allocation90_spill] sm:$0xff] }
 0xca8   :  { %v7583_v34 = vadd.f32 %v7582_v27, %v7549_v26  ;;  %v7615_v16 = vadd.f32 %v7614_v53, %v12534_v20  ;;  %v12568_v26 = vsel %vm7448_vm14, 1.0, %v13994_v60  ;;  %v14046_v27 = vld [vmem:[#allocation76_spill] sm:$0xff] }
 0xca9   :  { %14042 = vst [vmem:[#allocation81_spill] sm:$0xff] %v12555_v55  ;;  %14045 = vst [vmem:[#allocation61_spill] sm:$0xff] %v12568_v26  ;;  %v7554_v40 = vmul.f32 %v12546_v3, %v12555_v55  ;;  %v12575_v53 = vadd.f32 %v12426_v32, %v14046_v27  ;;  %v14051_v55 = vld [vmem:[#allocation43_spill] sm:$0xff]  ;;  %v12591_v32 = vsel %vm7450_vm15, 1.0, %v13994_v60  ;;  %v7558_v27 = vmul.f32 %v12568_v26, %v12582_v56 }
 0xcaa   :  { %v7584_v19 = vadd.f32 %v7583_v34, %v12550_v31  ;;  %v7616_v37 = vadd.f32 %v7615_v16, %v7550_v38  ;;  %v14048_v34 = vld [vmem:[#allocation77_spill] sm:$0xff]  ;;  %14050 = vst [vmem:[#allocation97_spill] sm:$0xff] %v12582_v56  ;;  %v12588_v8 = vadd.f32 %v6997_v10, %v14051_v55  ;;  %v7055_v60 = vadd.f32 %v6995_v42, %v14055_v33 }
 0xcab   :  { %14047 = vst [vmem:[#allocation96_spill] sm:$0xff] %v12575_v53  ;;  %v12579_v16 = vadd.f32 %v12456_v6, %v14048_v34  ;;  %v14053_v6 = vld [vmem:[#allocation68_spill] sm:$0xff]  ;;  %v14056_v10 = vld [vmem:[#allocation45_spill] sm:$0xff] }
 0xcac   :  { %v7617_v22 = vadd.f32 %v7616_v37, %v12559_v29  ;;  %v7585_v38 = vadd.f32 %v7584_v19, %v7553_v39  ;;  %v7557_v37 = vmul.f32 %v12568_v26, %v12565_v1  ;;  %14052 = vst [vmem:[#allocation98_spill] sm:$0xff] %v12588_v8  ;;  %v12595_v39 = vadd.f32 %v6993_v48, %v14053_v6 }
 0xcae   :  { %v7586_v28 = vadd.f32 %v7585_v38, %v12575_v53  ;;  %v7618_v58 = vadd.f32 %v7617_v22, %v7554_v40  ;;  %14054 = vst [vmem:[#allocation99_spill] sm:$0xff] %v12595_v39  ;;  %v7561_v40 = vmul.f32 %v12591_v32, %v12588_v8  ;;  %v6999_v38 = vpop.f32.mrf.mxu1 }
 0xcaf   :  { %v12604_v3 = vadd.f32 %v6999_v38, %v14056_v10 }
 0xcb0   :  { %v7619_v19 = vadd.f32 %v7618_v58, %v12579_v16  ;;  %v7587_v47 = vadd.f32 %v7586_v28, %v7557_v37 }
 0xcb1   :  { %v7562_v28 = vmul.f32 %v12591_v32, %v12604_v3 }
 0xcb2   :  { %v7588_v22 = vadd.f32 %v7587_v47, %v12595_v39  ;;  %v7620_v55 = vadd.f32 %v7619_v19, %v7558_v27 }
 0xcb4   :  { %v7589_v34 = vadd.f32 %v7588_v22, %v7561_v40  ;;  %v7621_v48 = vadd.f32 %v7620_v55, %v7055_v60 }
 0xcb6   :  { %v7590_v58 = vrot.slane %v7589_v34, 4  ;;  %v7622_v56 = vadd.f32 %v7621_v48, %v7562_v28 }
 0xcb8   :  { %v7591_v6 = vadd.f32 %v7590_v58, %v7589_v34  ;;  %v7623_v39 = vrot.slane %v7622_v56, 4 }
 0xcba   :  { %v7592_v37 = vrot.slane %v7591_v6, 2  ;;  %v7624_v53 = vadd.f32 %v7623_v39, %v7622_v56 }
 0xcbc   :  { %v7593_v47 = vadd.f32 %v7592_v37, %v7591_v6  ;;  %v7625_v27 = vrot.slane %v7624_v53, 2 }
 0xcbe   :  { %v7594_v26 = vrot.slane %v7593_v47, 1  ;;  %v7626_v22 = vadd.f32 %v7625_v27, %v7624_v53 }
 0xcc0   :  { %v7595_v8 = vadd.f32 %v7594_v26, %v7593_v47  ;;  %v7627_v26 = vrot.slane %v7626_v22, 1 }
 0xcc2   :  { %v12608_v19 = vmul.f32 0.0051020407, %v7595_v8  ;;  %v7628_v39 = vadd.f32 %v7627_v26, %v7626_v22 }
 0xcc4   :  { %v12612_v42 = vsub.f32 %v12254_v11, %v12608_v19  ;;  %v12618_v38 = vsub.f32 %v12272_v63, %v12608_v19  ;;  %v12622_v55 = vsub.f32 %v12277_v46, %v12608_v19  ;;  %v12626_v8 = vsub.f32 %v12289_v52, %v12608_v19 }
 0xcc5   :  { %v12631_v53 = vsub.f32 %v12309_v49, %v12608_v19  ;;  %v12639_v46 = vsub.f32 %v12319_v9, %v12608_v19  ;;  %v12645_v33 = vsub.f32 %v12335_v25, %v12608_v19  ;;  %v12650_v48 = vmul.f32 0.0051020407, %v7628_v39 }
 0xcc6   :  { %v7689_v40 = vmul.f32 %v12612_v42, %v12612_v42  ;;  %v7687_v56 = vmul.f32 %v12618_v38, %v12618_v38  ;;  %v7693_v63 = vmul.f32 %v12622_v55, %v12622_v55  ;;  %v7691_v52 = vmul.f32 %v12626_v8, %v12626_v8 }
 0xcc7   :  { %v7697_v49 = vmul.f32 %v12631_v53, %v12631_v53  ;;  %v12654_v9 = vsub.f32 %v12343_v13, %v12608_v19  ;;  %v7695_v6 = vmul.f32 %v12639_v46, %v12639_v46  ;;  %v12660_v25 = vsub.f32 %v12359_v0, %v12608_v19 }
 0xcc8   :  { %v7745_v11 = vmul.f32 %v12257_v12, %v7689_v40  ;;  %v7749_v10 = vmul.f32 %v12280_v5, %v7693_v63  ;;  %v7701_v37 = vmul.f32 %v12645_v33, %v12645_v33  ;;  %v12667_v22 = vsub.f32 %v12454_v24, %v12650_v48 }
 0xcc9   :  { %v7753_v47 = vmul.f32 %v12312_v23, %v7697_v49  ;;  %v12671_v13 = vsub.f32 %v12482_v45, %v12650_v48  ;;  %v12675_v40 = vsub.f32 %v12508_v54, %v12650_v48  ;;  %v12679_v0 = vsub.f32 %v12534_v20, %v12650_v48 }
 0xcca   :  { %v7799_v34 = vadd.f32 %v7745_v11, %v7687_v56  ;;  %v12683_v26 = vsub.f32 %v12368_v2, %v12608_v19  ;;  %v7699_v24 = vmul.f32 %v12654_v9, %v12654_v9  ;;  %v12689_v45 = vsub.f32 %v12559_v29, %v12650_v48 }
 0xccb   :  { %v12693_v54 = vsub.f32 %v12393_v35, %v12608_v19  ;;  %v12697_v20 = vsub.f32 %v12579_v16, %v12650_v48  ;;  %v12700_v56 = vsub.f32 %v7055_v60, %v12650_v48  ;;  %v7705_v2 = vmul.f32 %v12660_v25, %v12660_v25 }
 0xccc   :  { %v7800_v58 = vadd.f32 %v7799_v34, %v7691_v52  ;;  %v7757_v63 = vmul.f32 %v12338_v43, %v7701_v37  ;;  %v12707_v29 = vsub.f32 %v12262_v44, %v12650_v48  ;;  %v12711_v35 = vsub.f32 %v12390_v15, %v12608_v19 }
 0xccd   :  { %14057 = vst [vmem:[#allocation82_spill] sm:$0xff] %v12700_v56  ;;  %v7703_v16 = vmul.f32 %v12683_v26, %v12683_v26  ;;  %v12717_v60 = vsub.f32 %v12423_v57, %v12608_v19  ;;  %v7709_v34 = vmul.f32 %v12693_v54, %v12693_v54  ;;  %v7761_v49 = vmul.f32 %v12362_v41, %v7705_v2  ;;  %v14064_v2 = vld [vmem:[#allocation88_spill] sm:$0xff] }
 0xcce   :  { %v7801_v28 = vadd.f32 %v7800_v58, %v7749_v10  ;;  %14058 = vst [vmem:[#allocation63_spill] sm:$0xff] %v12707_v29  ;;  %v7690_v44 = vmul.f32 %v12707_v29, %v12707_v29  ;;  %v12726_v15 = vsub.f32 %v12413_v18, %v12608_v19  ;;  %v7707_v58 = vmul.f32 %v12711_v35, %v12711_v35 }
 0xccf   :  { %v12732_v57 = vsub.f32 %v12286_v61, %v12650_v48  ;;  %v7713_v18 = vmul.f32 %v12717_v60, %v12717_v60 }
 0xcd0   :  { %v7802_v27 = vadd.f32 %v7801_v28, %v7695_v6  ;;  %v14060_v28 = vld [vmem:[#allocation54_spill] sm:$0xff]  ;;  %v7746_v61 = vmul.f32 %v12257_v12, %v7690_v44  ;;  %v12766_v12 = vsub.f32 %v12462_v14, %v12608_v19 }
 0xcd1   :  { %14059 = vst [vmem:[#allocation83_spill] sm:$0xff] %v12732_v57  ;;  %v12736_v37 = vsub.f32 %v14060_v28, %v12650_v48  ;;  %v7769_v44 = vmul.f32 %v12417_v30, %v7713_v18 }
 0xcd2   :  { %v7803_v11 = vadd.f32 %v7802_v27, %v7753_v47  ;;  %v12740_v47 = vsub.f32 %v12430_v50, %v12608_v19  ;;  %v14063_v27 = vld [vmem:[#allocation52_spill] sm:$0xff]  ;;  %v7711_v50 = vmul.f32 %v12726_v15, %v12726_v15 }
 0xcd3   :  { %14061 = vst [vmem:[#allocation53_spill] sm:$0xff] %v12736_v37 }
 0xcd4   :  { %v7804_v39 = vadd.f32 %v7803_v11, %v7699_v24  ;;  %14062 = vst [vmem:[#allocation84_spill] sm:$0xff] %v12740_v47  ;;  %v7765_v24 = vmul.f32 %v14063_v27, %v7709_v34  ;;  %v7688_v34 = vmul.f32 %v12732_v57, %v12732_v57 }
 0xcd6   :  { %v7805_v52 = vadd.f32 %v7804_v39, %v7757_v63  ;;  %v12747_v63 = vsub.f32 %v14064_v2, %v12650_v48  ;;  %v12752_v39 = vsub.f32 %v12440_v7, %v12608_v19  ;;  %v7717_v7 = vmul.f32 %v12740_v47, %v12740_v47 }
 0xcd7   :  { %v12779_v2 = vsub.f32 %v12477_v51, %v12608_v19  ;;  %v7721_v51 = vmul.f32 %v12766_v12, %v12766_v12 }
 0xcd8   :  { %v7806_v10 = vadd.f32 %v7805_v52, %v7703_v16  ;;  %14065 = vst [vmem:[#allocation64_spill] sm:$0xff] %v12747_v63  ;;  %v14066_v52 = vld [vmem:[#allocation89_spill] sm:$0xff]  ;;  %v7715_v14 = vmul.f32 %v12752_v39, %v12752_v39 }
 0xcda   :  { %v7807_v6 = vadd.f32 %v7806_v10, %v7761_v49  ;;  %v12758_v49 = vsub.f32 %v14066_v52, %v12650_v48  ;;  %v7694_v10 = vmul.f32 %v12736_v37, %v12736_v37  ;;  %v14070_v52 = vld [vmem:[#allocation62_spill] sm:$0xff] }
 0xcdb   :  { %v12785_v37 = vsub.f32 %v14070_v52, %v12650_v48  ;;  %v14074_v52 = vld [vmem:[#allocation74_spill] sm:$0xff] }
 0xcdc   :  { %v7808_v11 = vadd.f32 %v7807_v6, %v7707_v58  ;;  %14067 = vst [vmem:[#allocation66_spill] sm:$0xff] %v12758_v49  ;;  %v14068_v6 = vld [vmem:[#allocation58_spill] sm:$0xff]  ;;  %v12799_v47 = vsub.f32 %v14074_v52, %v12650_v48 }
 0xcdd   :  { %v12773_v28 = vsub.f32 %v14068_v6, %v12650_v48  ;;  %14071 = vst [vmem:[#allocation67_spill] sm:$0xff] %v12785_v37 }
 0xcde   :  { %v7809_v16 = vadd.f32 %v7808_v11, %v7765_v24  ;;  %v7692_v24 = vmul.f32 %v12747_v63, %v12747_v63  ;;  %v7832_v11 = vadd.f32 %v7746_v61, %v7688_v34  ;;  %v14072_v61 = vld [vmem:[#allocation79_spill] sm:$0xff]  ;;  %v14073_v63 = vld [vmem:[#allocation94_spill] sm:$0xff] }
 0xcdf   :  { %14069 = vst [vmem:[#allocation85_spill] sm:$0xff] %v12773_v28  ;;  %v12792_v34 = vsub.f32 %v14072_v61, %v12608_v19  ;;  %v7773_v29 = vmul.f32 %v14073_v63, %v7717_v7 }
 0xce0   :  { %v7810_v58 = vadd.f32 %v7809_v16, %v7711_v50  ;;  %v7698_v50 = vmul.f32 %v12758_v49, %v12758_v49  ;;  %v7750_v16 = vmul.f32 %v12280_v5, %v7694_v10  ;;  %v7833_v6 = vadd.f32 %v7832_v11, %v7692_v24  ;;  %v14075_v24 = vld [vmem:[#allocation91_spill] sm:$0xff] }
 0xce1   :  { %v12805_v5 = vsub.f32 %v12499_v17, %v12608_v19  ;;  %v7719_v10 = vmul.f32 %v12779_v2, %v12779_v2  ;;  %v12811_v11 = vsub.f32 %v14075_v24, %v12650_v48  ;;  %v7725_v17 = vmul.f32 %v12792_v34, %v12792_v34  ;;  %v14078_v24 = vld [vmem:[#allocation51_spill] sm:$0xff] }
 0xce2   :  { %v7811_v18 = vadd.f32 %v7810_v58, %v7769_v44  ;;  %v7696_v44 = vmul.f32 %v12773_v28, %v12773_v28  ;;  %v7834_v58 = vadd.f32 %v7833_v6, %v7750_v16  ;;  %v12818_v16 = vsub.f32 %v12517_v59, %v12608_v19  ;;  %v14077_v6 = vld [vmem:[#allocation78_spill] sm:$0xff] }
 0xce3   :  { %14076 = vst [vmem:[#allocation100_spill] sm:$0xff] %v12811_v11  ;;  %v7777_v52 = vmul.f32 %v14077_v6, %v7721_v51  ;;  %v12825_v28 = vsub.f32 %v14078_v24, %v12650_v48  ;;  %v7723_v59 = vmul.f32 %v12805_v5, %v12805_v5 }
 0xce4   :  { %v7812_v57 = vadd.f32 %v7811_v18, %v7715_v14  ;;  %v7702_v14 = vmul.f32 %v12785_v37, %v12785_v37  ;;  %v7754_v18 = vmul.f32 %v12312_v23, %v7698_v50  ;;  %v7835_v61 = vadd.f32 %v7834_v58, %v7696_v44  ;;  %v14080_v50 = vld [vmem:[#allocation56_spill] sm:$0xff] }
 0xce5   :  { %14079 = vst [vmem:[#allocation86_spill] sm:$0xff] %v12825_v28  ;;  %v12831_v23 = vsub.f32 %v12529_v21, %v12608_v19  ;;  %v12837_v44 = vsub.f32 %v14080_v50, %v12650_v48  ;;  %v7706_v58 = vmul.f32 %v12811_v11, %v12811_v11  ;;  %v7729_v21 = vmul.f32 %v12818_v16, %v12818_v16  ;;  %v14082_v50 = vld [vmem:[#allocation55_spill] sm:$0xff] }
 0xce6   :  { %v7813_v7 = vadd.f32 %v7812_v57, %v7773_v29  ;;  %v7700_v29 = vmul.f32 %v12799_v47, %v12799_v47  ;;  %v7836_v57 = vadd.f32 %v7835_v61, %v7754_v18  ;;  %v12844_v18 = vsub.f32 %v12541_v62, %v12608_v19 }
 0xce7   :  { %14081 = vst [vmem:[#allocation101_spill] sm:$0xff] %v12837_v44  ;;  %v7781_v61 = vmul.f32 %v12494_v36, %v7725_v17  ;;  %v12851_v37 = vsub.f32 %v14082_v50, %v12650_v48  ;;  %v7727_v62 = vmul.f32 %v12831_v23, %v12831_v23 }
 0xce8   :  { %v7814_v49 = vadd.f32 %v7813_v7, %v7719_v10  ;;  %v7758_v10 = vmul.f32 %v12338_v43, %v7702_v14  ;;  %v7837_v7 = vadd.f32 %v7836_v57, %v7700_v29  ;;  %v12857_v43 = vsub.f32 %v12550_v31, %v12608_v19  ;;  %v14084_v14 = vld [vmem:[#allocation93_spill] sm:$0xff] }
 0xce9   :  { %14083 = vst [vmem:[#allocation102_spill] sm:$0xff] %v12851_v37  ;;  %v12863_v29 = vsub.f32 %v14084_v14, %v12650_v48  ;;  %v7710_v57 = vmul.f32 %v12837_v44, %v12837_v44  ;;  %v7733_v31 = vmul.f32 %v12844_v18, %v12844_v18  ;;  %v14086_v14 = vld [vmem:[#allocation92_spill] sm:$0xff] }
 0xcea   :  { %v7815_v51 = vadd.f32 %v7814_v49, %v7777_v52  ;;  %v7704_v49 = vmul.f32 %v12825_v28, %v12825_v28  ;;  %v7838_v52 = vadd.f32 %v7837_v7, %v7758_v10  ;;  %v12870_v10 = vsub.f32 %v12565_v1, %v12608_v19  ;;  %v14092_v44 = vld [vmem:[#allocation60_spill] sm:$0xff] }
 0xceb   :  { %14085 = vst [vmem:[#allocation40_spill] sm:$0xff] %v12863_v29  ;;  %v7785_v7 = vmul.f32 %v12511_v4, %v7729_v21  ;;  %v12877_v11 = vsub.f32 %v14086_v14, %v12650_v48  ;;  %v7731_v1 = vmul.f32 %v12857_v43, %v12857_v43 }
 0xcec   :  { %v7816_v24 = vadd.f32 %v7815_v51, %v7723_v59  ;;  %v7762_v59 = vmul.f32 %v12362_v41, %v7706_v58  ;;  %v7839_v51 = vadd.f32 %v7838_v52, %v7704_v49  ;;  %v14088_v41 = vld [vmem:[#allocation96_spill] sm:$0xff]  ;;  %v14089_v49 = vld [vmem:[#allocation95_spill] sm:$0xff] }
 0xced   :  { %14087 = vst [vmem:[#allocation103_spill] sm:$0xff] %v12877_v11  ;;  %v12883_v58 = vsub.f32 %v14088_v41, %v12608_v19  ;;  %v12889_v52 = vsub.f32 %v14089_v49, %v12650_v48  ;;  %v7737_v41 = vmul.f32 %v12870_v10, %v12870_v10  ;;  %v7712_v49 = vmul.f32 %v12877_v11, %v12877_v11 }
 0xcee   :  { %v7817_v17 = vadd.f32 %v7816_v24, %v7781_v61  ;;  %v7708_v61 = vmul.f32 %v12851_v37, %v12851_v37  ;;  %v7840_v24 = vadd.f32 %v7839_v51, %v7762_v59  ;;  %v14091_v59 = vld [vmem:[#allocation98_spill] sm:$0xff]  ;;  %v7789_v37 = vmul.f32 %v14092_v44, %v7733_v31 }
 0xcef   :  { %14090 = vst [vmem:[#allocation42_spill] sm:$0xff] %v12889_v52  ;;  %v12896_v51 = vsub.f32 %v14091_v59, %v12608_v19  ;;  %v7718_v31 = vmul.f32 %v12889_v52, %v12889_v52 }
 0xcf0   :  { %v7818_v50 = vadd.f32 %v7817_v17, %v7727_v62  ;;  %v7714_v62 = vmul.f32 %v12863_v29, %v12863_v29  ;;  %v7766_v17 = vmul.f32 %v14063_v27, %v7710_v57  ;;  %v7841_v14 = vadd.f32 %v7840_v24, %v7708_v61  ;;  %v14094_v57 = vld [vmem:[#allocation57_spill] sm:$0xff] }
 0xcf1   :  { %v7735_v27 = vmul.f32 %v12883_v58, %v12883_v58  ;;  %v12911_v61 = vsub.f32 %v14094_v57, %v12650_v48 }
 0xcf2   :  { %v7819_v21 = vadd.f32 %v7818_v50, %v7785_v7  ;;  %v7842_v7 = vadd.f32 %v7841_v14, %v7766_v17  ;;  %v14093_v50 = vld [vmem:[#allocation99_spill] sm:$0xff]  ;;  %v7741_v17 = vmul.f32 %v12896_v51, %v12896_v51  ;;  %v14096_v14 = vld [vmem:[#allocation61_spill] sm:$0xff] }
 0xcf3   :  { %v12905_v29 = vsub.f32 %v14093_v50, %v12608_v19  ;;  %14095 = vst [vmem:[#allocation47_spill] sm:$0xff] %v12911_v61  ;;  %v7793_v19 = vmul.f32 %v14096_v14, %v7737_v41  ;;  %v7716_v50 = vmul.f32 %v12667_v22, %v12667_v22 }
 0xcf4   :  { %v7820_v28 = vadd.f32 %v7819_v21, %v7731_v1  ;;  %v7770_v1 = vmul.f32 %v12417_v30, %v7714_v62  ;;  %v7843_v21 = vadd.f32 %v7842_v7, %v7712_v49  ;;  %v7722_v30 = vmul.f32 %v12911_v61, %v12911_v61 }
 0xcf5   :  { %v7739_v57 = vmul.f32 %v12905_v29, %v12905_v29  ;;  %v7774_v62 = vmul.f32 %v14073_v63, %v7718_v31  ;;  %v7797_v41 = vmul.f32 %v12591_v32, %v7741_v17  ;;  %v14099_v31 = vld [vmem:[#allocation81_spill] sm:$0xff] }
 0xcf6   :  { %v7821_v24 = vadd.f32 %v7820_v28, %v7789_v37  ;;  %v7844_v11 = vadd.f32 %v7843_v21, %v7770_v1  ;;  %v14097_v37 = vld [vmem:[#allocation59_spill] sm:$0xff]  ;;  %v14098_v1 = vld [vmem:[#allocation80_spill] sm:$0xff]  ;;  %v12944_v17 = vsub.f32 %v14099_v31, %v12650_v48 }
 0xcf7   :  { %v12925_v28 = vsub.f32 %v14097_v37, %v12650_v48  ;;  %v12935_v21 = vsub.f32 %v14098_v1, %v12650_v48 }
 0xcf8   :  { %v7822_v59 = vadd.f32 %v7821_v24, %v7735_v27  ;;  %v7845_v49 = vadd.f32 %v7844_v11, %v7716_v50  ;;  %v7720_v27 = vmul.f32 %v12671_v13, %v12671_v13  ;;  %v7724_v11 = vmul.f32 %v12675_v40, %v12675_v40 }
 0xcfa   :  { %v7823_v52 = vadd.f32 %v7822_v59, %v7793_v19  ;;  %v7846_v24 = vadd.f32 %v7845_v49, %v7774_v62  ;;  %v7726_v19 = vmul.f32 %v12925_v28, %v12925_v28  ;;  %v7778_v59 = vmul.f32 %v14077_v6, %v7722_v30 }
 0xcfb   :  { %v7728_v6 = vmul.f32 %v12679_v0, %v12679_v0 }
 0xcfc   :  { %v7824_v7 = vadd.f32 %v7823_v52, %v7739_v57  ;;  %v7847_v61 = vadd.f32 %v7846_v24, %v7720_v27  ;;  %v7730_v57 = vmul.f32 %v12935_v21, %v12935_v21  ;;  %v7782_v62 = vmul.f32 %v12494_v36, %v7726_v19 }
 0xcfd   :  { %v7734_v24 = vmul.f32 %v12944_v17, %v12944_v17  ;;  %v7732_v36 = vmul.f32 %v12689_v45, %v12689_v45 }
 0xcfe   :  { %v7825_v37 = vadd.f32 %v7824_v7, %v7797_v41  ;;  %v7848_v52 = vadd.f32 %v7847_v61, %v7778_v59  ;;  %v14100_v7 = vld [vmem:[#allocation97_spill] sm:$0xff]  ;;  %v7786_v1 = vmul.f32 %v12511_v4, %v7730_v57  ;;  %v7736_v4 = vmul.f32 %v12697_v20, %v12697_v20 }
 0xcff   :  { %v12953_v27 = vsub.f32 %v14100_v7, %v12650_v48  ;;  %v7790_v31 = vmul.f32 %v14092_v44, %v7734_v24 }
 0xd00   :  { %v7826_v63 = vrot.slane %v7825_v37, 4  ;;  %v7849_v49 = vadd.f32 %v7848_v52, %v7724_v11 }
 0xd01   :  { %14101 = vst [vmem:[#allocation37_spill] sm:$0xff] %v12953_v27  ;;  %v7738_v52 = vmul.f32 %v12953_v27, %v12953_v27 }
 0xd02   :  { %v7827_v50 = vadd.f32 %v7826_v63, %v7825_v37  ;;  %v7850_v30 = vadd.f32 %v7849_v49, %v7782_v62  ;;  %v12962_v63 = vsub.f32 %v12604_v3, %v12650_v48  ;;  %v7740_v48 = vmul.f32 %v12700_v56, %v12700_v56 }
 0xd04   :  { %v7828_v41 = vrot.slane %v7827_v50, 2  ;;  %v7851_v37 = vadd.f32 %v7850_v30, %v7728_v6  ;;  %14102 = vst [vmem:[#allocation44_spill] sm:$0xff] %v12962_v63  ;;  %v7794_v6 = vmul.f32 %v14096_v14, %v7738_v52 }
 0xd06   :  { %v7829_v61 = vadd.f32 %v7828_v41, %v7827_v50  ;;  %v7852_v19 = vadd.f32 %v7851_v37, %v7786_v1  ;;  %v7742_v41 = vmul.f32 %v12962_v63, %v12962_v63 }
 0xd08   :  { %v7830_v59 = vrot.slane %v7829_v61, 1  ;;  %v7853_v50 = vadd.f32 %v7852_v19, %v7732_v36  ;;  %v7798_v44 = vmul.f32 %v12591_v32, %v7742_v41  ;;  %v14103_v36 = vld [vmem:[#allocation69_spill] sm:$0xff]  ;;  %v14104_v19 = vld [vmem:[#allocation34_spill] sm:$0xff] }
 0xd0a   :  { %v7831_v11 = vadd.f32 %v7830_v59, %v7829_v61  ;;  %v7854_v57 = vadd.f32 %v7853_v50, %v7790_v31  ;;  %v14105_v31 = vld [vmem:[#allocation35_spill] sm:$0xff] }
 0xd0b   :  { %v12979_v14 = vrot.slane %v14105_v31, %v14103_v36 }
 0xd0c   :  { %v7865_v62 = vmul.f32 0.0051020407, %v7831_v11  ;;  %v7855_v3 = vadd.f32 %v7854_v57, %v7736_v4  ;;  %v7931_v11 = vrot.slane %v14104_v19, %v14103_v36 }
 0xd0e   :  { %v7867_v49 = vadd.f32 1e-05, %v7865_v62  ;;  %v7856_v30 = vadd.f32 %v7855_v3, %v7794_v6 }
 0xd10   :  { %8927 = vrsqrt.f32 %v7867_v49  ;;  %v7857_v7 = vadd.f32 %v7856_v30, %v7740_v48  ;;  %v14106_v30 = vld [vmem:[#allocation84_spill] sm:$0xff] }
 0xd12   :  { %v7858_v61 = vadd.f32 %v7857_v7, %v7798_v44 }
 0xd14   :  { %v7859_v24 = vrot.slane %v7858_v61, 4 }
 0xd16   :  { %v7860_v1 = vadd.f32 %v7859_v24, %v7858_v61 }
 0xd18   :  { %v7861_v37 = vrot.slane %v7860_v1, 2 }
 0xd1a   :  { %v12981_v52 = vadd.f32 %v7861_v37, %v7860_v1 }
 0xd1d   :  { %v8928_v59 = vpop.eup %8927 }
 0xd1e   :  { %v7871_v50 = vmul.f32 %v8928_v59, %v12618_v38  ;;  %v7873_v62 = vmul.f32 %v8928_v59, %v12612_v42  ;;  %v7875_v32 = vmul.f32 %v8928_v59, %v12626_v8  ;;  %v7877_v4 = vmul.f32 %v8928_v59, %v12622_v55 }
 0xd1f   :  { %v7879_v57 = vmul.f32 %v8928_v59, %v12639_v46  ;;  %v7881_v49 = vmul.f32 %v8928_v59, %v12631_v53  ;;  %v7883_v41 = vmul.f32 %v8928_v59, %v12654_v9  ;;  %v7885_v6 = vmul.f32 %v8928_v59, %v12645_v33 }
 0xd20   :  { %v7887_v3 = vmul.f32 %v8928_v59, %v12683_v26  ;;  %v7889_v48 = vmul.f32 %v8928_v59, %v12660_v25  ;;  %v7891_v38 = vmul.f32 %v8928_v59, %v12711_v35  ;;  %v7893_v42 = vmul.f32 %v8928_v59, %v12693_v54 }
 0xd21   :  { %v7895_v8 = vmul.f32 %v8928_v59, %v12726_v15  ;;  %v7897_v55 = vmul.f32 %v8928_v59, %v12717_v60  ;;  %v7899_v46 = vmul.f32 %v8928_v59, %v12752_v39  ;;  %v7901_v53 = vmul.f32 %v8928_v59, %v14106_v30 }
 0xd22   :  { %v7903_v9 = vmul.f32 %v8928_v59, %v12779_v2  ;;  %v7905_v33 = vmul.f32 %v8928_v59, %v12766_v12  ;;  %v7907_v26 = vmul.f32 %v8928_v59, %v12805_v5  ;;  %v7909_v25 = vmul.f32 %v8928_v59, %v12792_v34 }
 0xd23   :  { %v7911_v35 = vmul.f32 %v8928_v59, %v12831_v23  ;;  %v7913_v54 = vmul.f32 %v8928_v59, %v12818_v16  ;;  %v7915_v15 = vmul.f32 %v8928_v59, %v12857_v43  ;;  %v7917_v60 = vmul.f32 %v8928_v59, %v12844_v18 }
 0xd24   :  { %v7919_v39 = vmul.f32 %v8928_v59, %v12883_v58  ;;  %v7921_v44 = vmul.f32 %v8928_v59, %v12870_v10  ;;  %v7923_v2 = vmul.f32 %v8928_v59, %v12905_v29  ;;  %v7925_v12 = vmul.f32 %v8928_v59, %v12896_v51 }
 0xd25   :  { %v7938_v7 = vmul.f32 %v7931_v11, %v7871_v50  ;;  %v7940_v5 = vmul.f32 %v7931_v11, %v7873_v62  ;;  %v7942_v61 = vmul.f32 %v7931_v11, %v7875_v32  ;;  %v7944_v34 = vmul.f32 %v7931_v11, %v7877_v4 }
 0xd26   :  { %v7946_v24 = vmul.f32 %v7931_v11, %v7879_v57  ;;  %v7948_v23 = vmul.f32 %v7931_v11, %v7881_v49  ;;  %v7950_v1 = vmul.f32 %v7931_v11, %v7883_v41  ;;  %v7952_v16 = vmul.f32 %v7931_v11, %v7885_v6 }
 0xd27   :  { %v7954_v37 = vmul.f32 %v7931_v11, %v7887_v3  ;;  %v7956_v43 = vmul.f32 %v7931_v11, %v7889_v48  ;;  %v7958_v36 = vmul.f32 %v7931_v11, %v7891_v38  ;;  %v7960_v18 = vmul.f32 %v7931_v11, %v7893_v42 }
 0xd28   :  { %v7962_v30 = vmul.f32 %v7931_v11, %v7895_v8  ;;  %v7964_v58 = vmul.f32 %v7931_v11, %v7897_v55  ;;  %v7966_v63 = vmul.f32 %v7931_v11, %v7899_v46  ;;  %v7968_v10 = vmul.f32 %v7931_v11, %v7901_v53 }
 0xd29   :  { %v7970_v56 = vmul.f32 %v7931_v11, %v7903_v9  ;;  %v7972_v29 = vmul.f32 %v7931_v11, %v7905_v33  ;;  %v7974_v27 = vmul.f32 %v7931_v11, %v7907_v26  ;;  %v7976_v51 = vmul.f32 %v7931_v11, %v7909_v25 }
 0xd2a   :  { %v7978_v59 = vmul.f32 %v7931_v11, %v7911_v35  ;;  %v7980_v50 = vmul.f32 %v7931_v11, %v7913_v54  ;;  %v7982_v62 = vmul.f32 %v7931_v11, %v7915_v15  ;;  %v7984_v32 = vmul.f32 %v7931_v11, %v7917_v60 }
 0xd2b   :  { %v7986_v4 = vmul.f32 %v7931_v11, %v7919_v39  ;;  %v7988_v57 = vmul.f32 %v7931_v11, %v7921_v44  ;;  %v7990_v49 = vmul.f32 %v7931_v11, %v7923_v2  ;;  %v7992_v41 = vmul.f32 %v7931_v11, %v7925_v12 }
 0xd2c   :  { %v8005_v6 = vadd.f32 %v12979_v14, %v7938_v7  ;;  %v8007_v3 = vadd.f32 %v12979_v14, %v7940_v5  ;;  %v8009_v48 = vadd.f32 %v12979_v14, %v7942_v61  ;;  %v8011_v38 = vadd.f32 %v12979_v14, %v7944_v34 }
 0xd2d   :  { %v8013_v42 = vadd.f32 %v12979_v14, %v7946_v24  ;;  %v8015_v8 = vadd.f32 %v12979_v14, %v7948_v23  ;;  %v8017_v55 = vadd.f32 %v12979_v14, %v7950_v1  ;;  %v8019_v46 = vadd.f32 %v12979_v14, %v7952_v16  ;;  %v14107_v16 = vld [vmem:[#allocation87_spill] sm:$0xff] }
 0xd2e   :  { %v8021_v53 = vadd.f32 %v12979_v14, %v7954_v37  ;;  %v8023_v11 = vadd.f32 %v12979_v14, %v7956_v43  ;;  %v8025_v9 = vadd.f32 %v12979_v14, %v7958_v36  ;;  %v8027_v33 = vadd.f32 %v12979_v14, %v7960_v18  ;;  %8061 = vst [vmem:[%s13272_s4] sm:$0xff] %v8005_v6  ;;  %v14108_v36 = vld [vmem:[#allocation83_spill] sm:$0xff] }
 0xd2f   :  { %8063 = vst [vmem:[%s13272_s4 + $0x10] sm:$0xff] %v8007_v3  ;;  %8065 = vst [vmem:[%s13272_s4 + $0x20] sm:$0xff] %v8009_v48  ;;  %v8029_v26 = vadd.f32 %v12979_v14, %v7962_v30  ;;  %v8031_v25 = vadd.f32 %v12979_v14, %v7964_v58  ;;  %v8033_v35 = vadd.f32 %v12979_v14, %v7966_v63  ;;  %v14109_v30 = vld [vmem:[#allocation63_spill] sm:$0xff]  ;;  %v14117_v3 = vld [vmem:[#allocation102_spill] sm:$0xff] }
 0xd30   :  { %8067 = vst [vmem:[%s13272_s4 + $0x30] sm:$0xff] %v8011_v38  ;;  %v8035_v54 = vadd.f32 %v12979_v14, %v7968_v10  ;;  %8069 = vst [vmem:[%s13272_s4 + $0x40] sm:$0xff] %v8013_v42  ;;  %v8037_v63 = vadd.f32 %v12979_v14, %v7970_v56  ;;  %v8039_v15 = vadd.f32 %v12979_v14, %v7972_v29  ;;  %v14110_v10 = vld [vmem:[#allocation64_spill] sm:$0xff]  ;;  %v14118_v38 = vld [vmem:[#allocation101_spill] sm:$0xff] }
 0xd31   :  { %8071 = vst [vmem:[%s13272_s4 + $0x50] sm:$0xff] %v8015_v8  ;;  %8073 = vst [vmem:[%s13272_s4 + $0x60] sm:$0xff] %v8017_v55  ;;  %v8041_v60 = vadd.f32 %v12979_v14, %v7974_v27  ;;  %v8043_v39 = vadd.f32 %v12979_v14, %v7976_v51  ;;  %v8045_v56 = vadd.f32 %v12979_v14, %v7978_v59  ;;  %v14111_v51 = vld [vmem:[#allocation53_spill] sm:$0xff]  ;;  %v14119_v8 = vld [vmem:[#allocation103_spill] sm:$0xff] }
 0xd32   :  { %8075 = vst [vmem:[%s13272_s4 + $0x70] sm:$0xff] %v8019_v46  ;;  %8077 = vst [vmem:[%s13272_s4 + $0x80] sm:$0xff] %v8021_v53  ;;  %v8047_v27 = vadd.f32 %v12979_v14, %v7980_v50  ;;  %v8049_v44 = vadd.f32 %v12979_v14, %v7982_v62  ;;  %v8051_v2 = vadd.f32 %v12979_v14, %v7984_v32  ;;  %v14113_v62 = vld [vmem:[#allocation66_spill] sm:$0xff]  ;;  %v14120_v46 = vld [vmem:[#allocation40_spill] sm:$0xff] }
 0xd33   :  { %8079 = vst [vmem:[%s13272_s4 + $0x90] sm:$0xff] %v8023_v11  ;;  %8081 = vst [vmem:[%s13272_s4 + $0xa0] sm:$0xff] %v8025_v9  ;;  %v8053_v12 = vadd.f32 %v12979_v14, %v7986_v4  ;;  %v8055_v7 = vadd.f32 %v12979_v14, %v7988_v57  ;;  %v8057_v5 = vadd.f32 %v12979_v14, %v7990_v49  ;;  %v14114_v57 = vld [vmem:[#allocation67_spill] sm:$0xff]  ;;  %v14115_v49 = vld [vmem:[#allocation86_spill] sm:$0xff] }
 0xd34   :  { %8083 = vst [vmem:[%s13272_s4 + $0xb0] sm:$0xff] %v8027_v33  ;;  %8085 = vst [vmem:[%s13272_s4 + $0xc0] sm:$0xff] %v8029_v26  ;;  %v8059_v61 = vadd.f32 %v12979_v14, %v7992_v41  ;;  %v7863_v14 = vrot.slane %v12981_v52, 1  ;;  %v7935_v37 = vrot.slane %v14104_v19, %v14107_v16  ;;  %v13129_v43 = vrot.slane %v14105_v31, %v14107_v16  ;;  %v14116_v31 = vld [vmem:[#allocation100_spill] sm:$0xff]  ;;  %v14121_v9 = vld [vmem:[#allocation42_spill] sm:$0xff] }
 0xd35   :  { %8087 = vst [vmem:[%s13272_s4 + $0xd0] sm:$0xff] %v8031_v25  ;;  %8089 = vst [vmem:[%s13272_s4 + $0xe0] sm:$0xff] %v8033_v35  ;;  %v14122_v26 = vld [vmem:[#allocation47_spill] sm:$0xff] }
 0xd36   :  { %8091 = vst [vmem:[%s13272_s4 + $0xf0] sm:$0xff] %v8035_v54  ;;  %8093 = vst [vmem:[%s13272_s4 + $0x100] sm:$0xff] %v8037_v63  ;;  %v7864_v34 = vadd.f32 %v7863_v14, %v12981_v52  ;;  %v14112_v52 = vld [vmem:[#allocation85_spill] sm:$0xff] }
 0xd37   :  { %8095 = vst [vmem:[%s13272_s4 + $0x110] sm:$0xff] %v8039_v15  ;;  %8097 = vst [vmem:[%s13272_s4 + $0x120] sm:$0xff] %v8041_v60 }
 0xd38   :  { %8099 = vst [vmem:[%s13272_s4 + $0x130] sm:$0xff] %v8043_v39  ;;  %8101 = vst [vmem:[%s13272_s4 + $0x140] sm:$0xff] %v8045_v56  ;;  %v7866_v24 = vmul.f32 0.0051020407, %v7864_v34  ;;  %v14123_v56 = vld [vmem:[#allocation37_spill] sm:$0xff] }
 0xd39   :  { %8103 = vst [vmem:[%s13272_s4 + $0x150] sm:$0xff] %v8047_v27  ;;  %8105 = vst [vmem:[%s13272_s4 + $0x160] sm:$0xff] %v8049_v44  ;;  %v14124_v44 = vld [vmem:[#allocation82_spill] sm:$0xff] }
 0xd3a   :  { %8107 = vst [vmem:[%s13272_s4 + $0x170] sm:$0xff] %v8051_v2  ;;  %8109 = vst [vmem:[%s13272_s4 + $0x180] sm:$0xff] %v8053_v12  ;;  %v7868_v23 = vadd.f32 1e-05, %v7866_v24  ;;  %v14125_v2 = vld [vmem:[#allocation44_spill] sm:$0xff] }
 0xd3b   :  { %8111 = vst [vmem:[%s13272_s4 + $0x190] sm:$0xff] %v8055_v7  ;;  %8113 = vst [vmem:[%s13272_s4 + $0x1a0] sm:$0xff] %v8057_v5 }
 0xd3c   :  { %8115 = vst [vmem:[%s13272_s4 + $0x1b0] sm:$0xff] %v8059_v61  ;;  %8929 = vrsqrt.f32 %v7868_v23 }
 0xd49   :  { %v8930_v1 = vpop.eup %8929 }
 0xd4a   :  { %v7872_v18 = vmul.f32 %v8930_v1, %v14108_v36  ;;  %v7874_v58 = vmul.f32 %v8930_v1, %v14109_v30  ;;  %v7876_v29 = vmul.f32 %v8930_v1, %v14110_v10  ;;  %v7878_v59 = vmul.f32 %v8930_v1, %v14111_v51 }
 0xd4b   :  { %v7880_v50 = vmul.f32 %v8930_v1, %v14112_v52  ;;  %v7882_v32 = vmul.f32 %v8930_v1, %v14113_v62  ;;  %v7884_v4 = vmul.f32 %v8930_v1, %v12799_v47  ;;  %v7886_v19 = vmul.f32 %v8930_v1, %v14114_v57 }
 0xd4c   :  { %v7888_v41 = vmul.f32 %v8930_v1, %v14115_v49  ;;  %v7890_v6 = vmul.f32 %v8930_v1, %v14116_v31  ;;  %v7892_v48 = vmul.f32 %v8930_v1, %v14117_v3  ;;  %v7894_v42 = vmul.f32 %v8930_v1, %v14118_v38 }
 0xd4d   :  { %v7896_v55 = vmul.f32 %v8930_v1, %v14119_v8  ;;  %v7898_v53 = vmul.f32 %v8930_v1, %v14120_v46  ;;  %v7900_v11 = vmul.f32 %v8930_v1, %v12667_v22  ;;  %v7902_v33 = vmul.f32 %v8930_v1, %v14121_v9 }
 0xd4e   :  { %v7904_v47 = vmul.f32 %v8930_v1, %v12671_v13  ;;  %v7906_v25 = vmul.f32 %v8930_v1, %v14122_v26  ;;  %v7908_v35 = vmul.f32 %v8930_v1, %v12675_v40  ;;  %v7910_v54 = vmul.f32 %v8930_v1, %v12925_v28 }
 0xd4f   :  { %v7912_v63 = vmul.f32 %v8930_v1, %v12679_v0  ;;  %v7914_v15 = vmul.f32 %v8930_v1, %v12935_v21  ;;  %v7916_v60 = vmul.f32 %v8930_v1, %v12689_v45  ;;  %v7918_v39 = vmul.f32 %v8930_v1, %v12944_v17 }
 0xd50   :  { %v7920_v22 = vmul.f32 %v8930_v1, %v12697_v20  ;;  %v7922_v27 = vmul.f32 %v8930_v1, %v14123_v56  ;;  %v7924_v13 = vmul.f32 %v8930_v1, %v14124_v44  ;;  %v7926_v12 = vmul.f32 %v8930_v1, %v14125_v2 }
 0xd51   :  { %v7939_v7 = vmul.f32 %v7935_v37, %v7872_v18  ;;  %v7941_v40 = vmul.f32 %v7935_v37, %v7874_v58  ;;  %v7943_v5 = vmul.f32 %v7935_v37, %v7876_v29  ;;  %v7945_v28 = vmul.f32 %v7935_v37, %v7878_v59 }
 0xd52   :  { %v7947_v61 = vmul.f32 %v7935_v37, %v7880_v50  ;;  %v7949_v0 = vmul.f32 %v7935_v37, %v7882_v32  ;;  %v7951_v14 = vmul.f32 %v7935_v37, %v7884_v4  ;;  %v7953_v21 = vmul.f32 %v7935_v37, %v7886_v19 }
 0xd53   :  { %v7955_v34 = vmul.f32 %v7935_v37, %v7888_v41  ;;  %v7957_v45 = vmul.f32 %v7935_v37, %v7890_v6  ;;  %v7959_v24 = vmul.f32 %v7935_v37, %v7892_v48  ;;  %v7961_v17 = vmul.f32 %v7935_v37, %v7894_v42 }
 0xd54   :  { %v7963_v23 = vmul.f32 %v7935_v37, %v7896_v55  ;;  %v7965_v20 = vmul.f32 %v7935_v37, %v7898_v53  ;;  %v7967_v16 = vmul.f32 %v7935_v37, %v7900_v11  ;;  %v7969_v36 = vmul.f32 %v7935_v37, %v7902_v33 }
 0xd55   :  { %v7971_v30 = vmul.f32 %v7935_v37, %v7904_v47  ;;  %v7973_v10 = vmul.f32 %v7935_v37, %v7906_v25  ;;  %v7975_v51 = vmul.f32 %v7935_v37, %v7908_v35  ;;  %v7977_v1 = vmul.f32 %v7935_v37, %v7910_v54 }
 0xd56   :  { %v7979_v18 = vmul.f32 %v7935_v37, %v7912_v63  ;;  %v7981_v58 = vmul.f32 %v7935_v37, %v7914_v15  ;;  %v7983_v29 = vmul.f32 %v7935_v37, %v7916_v60  ;;  %v7985_v59 = vmul.f32 %v7935_v37, %v7918_v39 }
 0xd57   :  { %v7987_v52 = vmul.f32 %v7935_v37, %v7920_v22  ;;  %v7989_v50 = vmul.f32 %v7935_v37, %v7922_v27  ;;  %v7991_v62 = vmul.f32 %v7935_v37, %v7924_v13  ;;  %v7993_v32 = vmul.f32 %v7935_v37, %v7926_v12 }
 0xd58   :  { %v8006_v4 = vadd.f32 %v13129_v43, %v7939_v7  ;;  %v8008_v57 = vadd.f32 %v13129_v43, %v7941_v40  ;;  %v8010_v19 = vadd.f32 %v13129_v43, %v7943_v5  ;;  %v8012_v49 = vadd.f32 %v13129_v43, %v7945_v28 }
 0xd59   :  { %v8014_v41 = vadd.f32 %v13129_v43, %v7947_v61  ;;  %v8016_v31 = vadd.f32 %v13129_v43, %v7949_v0  ;;  %v8018_v6 = vadd.f32 %v13129_v43, %v7951_v14  ;;  %v8020_v3 = vadd.f32 %v13129_v43, %v7953_v21 }
 0xd5a   :  { %v8022_v48 = vadd.f32 %v13129_v43, %v7955_v34  ;;  %v8024_v37 = vadd.f32 %v13129_v43, %v7957_v45  ;;  %v8026_v38 = vadd.f32 %v13129_v43, %v7959_v24  ;;  %v8028_v42 = vadd.f32 %v13129_v43, %v7961_v17  ;;  %8062 = vst [vmem:[%s13272_s4 + $0x8] sm:$0xff] %v8006_v4 }
 0xd5b   :  { %8064 = vst [vmem:[%s13272_s4 + $0x18] sm:$0xff] %v8008_v57  ;;  %8066 = vst [vmem:[%s13272_s4 + $0x28] sm:$0xff] %v8010_v19  ;;  %v8030_v8 = vadd.f32 %v13129_v43, %v7963_v23  ;;  %v8032_v55 = vadd.f32 %v13129_v43, %v7965_v20  ;;  %v8034_v46 = vadd.f32 %v13129_v43, %v7967_v16 }
 0xd5c   :  { %8068 = vst [vmem:[%s13272_s4 + $0x38] sm:$0xff] %v8012_v49  ;;  %v8036_v53 = vadd.f32 %v13129_v43, %v7969_v36  ;;  %8070 = vst [vmem:[%s13272_s4 + $0x48] sm:$0xff] %v8014_v41  ;;  %v8038_v11 = vadd.f32 %v13129_v43, %v7971_v30  ;;  %v8040_v9 = vadd.f32 %v13129_v43, %v7973_v10 }
 0xd5d   :  { %8072 = vst [vmem:[%s13272_s4 + $0x58] sm:$0xff] %v8016_v31  ;;  %8074 = vst [vmem:[%s13272_s4 + $0x68] sm:$0xff] %v8018_v6  ;;  %v8042_v33 = vadd.f32 %v13129_v43, %v7975_v51  ;;  %v8044_v47 = vadd.f32 %v13129_v43, %v7977_v1  ;;  %v8046_v26 = vadd.f32 %v13129_v43, %v7979_v18 }
 0xd5e   :  { %8076 = vst [vmem:[%s13272_s4 + $0x78] sm:$0xff] %v8020_v3  ;;  %8078 = vst [vmem:[%s13272_s4 + $0x88] sm:$0xff] %v8022_v48  ;;  %v8048_v25 = vadd.f32 %v13129_v43, %v7981_v58  ;;  %v8050_v35 = vadd.f32 %v13129_v43, %v7983_v29  ;;  %v8052_v54 = vadd.f32 %v13129_v43, %v7985_v59 }
 0xd5f   :  { %8080 = vst [vmem:[%s13272_s4 + $0x98] sm:$0xff] %v8024_v37  ;;  %8082 = vst [vmem:[%s13272_s4 + $0xa8] sm:$0xff] %v8026_v38  ;;  %v8054_v63 = vadd.f32 %v13129_v43, %v7987_v52  ;;  %v8056_v15 = vadd.f32 %v13129_v43, %v7989_v50  ;;  %v8058_v60 = vadd.f32 %v13129_v43, %v7991_v62 }
 0xd60   :  { %8084 = vst [vmem:[%s13272_s4 + $0xb8] sm:$0xff] %v8028_v42  ;;  %8086 = vst [vmem:[%s13272_s4 + $0xc8] sm:$0xff] %v8030_v8  ;;  %v8060_v39 = vadd.f32 %v13129_v43, %v7993_v32 }
 0xd61   :  { %8088 = vst [vmem:[%s13272_s4 + $0xd8] sm:$0xff] %v8032_v55  ;;  %8090 = vst [vmem:[%s13272_s4 + $0xe8] sm:$0xff] %v8034_v46 }
 0xd62   :  { %8092 = vst [vmem:[%s13272_s4 + $0xf8] sm:$0xff] %v8036_v53  ;;  %8094 = vst [vmem:[%s13272_s4 + $0x108] sm:$0xff] %v8038_v11 }
 0xd63   :  { %8096 = vst [vmem:[%s13272_s4 + $0x118] sm:$0xff] %v8040_v9  ;;  %8098 = vst [vmem:[%s13272_s4 + $0x128] sm:$0xff] %v8042_v33 }
 0xd64   :  { %8100 = vst [vmem:[%s13272_s4 + $0x138] sm:$0xff] %v8044_v47  ;;  %8102 = vst [vmem:[%s13272_s4 + $0x148] sm:$0xff] %v8046_v26 }
 0xd65   :  { %8104 = vst [vmem:[%s13272_s4 + $0x158] sm:$0xff] %v8048_v25  ;;  %8106 = vst [vmem:[%s13272_s4 + $0x168] sm:$0xff] %v8050_v35 }
 0xd66   :  { %8108 = vst [vmem:[%s13272_s4 + $0x178] sm:$0xff] %v8052_v54  ;;  %8110 = vst [vmem:[%s13272_s4 + $0x188] sm:$0xff] %v8054_v63 }
 0xd67   :  { %8112 = vst [vmem:[%s13272_s4 + $0x198] sm:$0xff] %v8056_v15  ;;  %8114 = vst [vmem:[%s13272_s4 + $0x1a8] sm:$0xff] %v8058_v60 }
 0xd68   :  { %8116 = vst [vmem:[%s13272_s4 + $0x1b8] sm:$0xff] %v8060_v39 }
 0xd69   :  { %8121 = vsyncmov [#allocation4] }
 0xd6c   :  { %s8122_s13 = vpop.sfrf %8121 }
 0xd6d   :  { %p8488_p3 = scmp.ne.s32.totalorder %s8122_s13, 0 }
 0xd6f   :  { %8126 = shalt.err (%p8488_p3)  }
 0xd70   :  { %8128 = vsyncmov [#allocation4 + $0x1] }
 0xd73   :  { %s8129_s24 = vpop.sfrf %8128 }
 0xd74   :  { %p8489_p4 = scmp.ne.s32.totalorder %s8129_s24, 0 }
 0xd76   :  { %8133 = shalt.err (%p8489_p4)  }
 0xd77   :  { %8135 = vsyncmov [#allocation4 + $0x2] }
 0xd7a   :  { %s8136_s26 = vpop.sfrf %8135 }
 0xd7b   :  { %p8490_p5 = scmp.ne.s32.totalorder %s8136_s26, 0 }
 0xd7d   :  { %8140 = shalt.err (%p8490_p5)  }
 0xd7e   :  { %8142 = vsyncmov [#allocation4 + $0x3] }
 0xd81   :  { %s8143_s25 = vpop.sfrf %8142 }
 0xd82   :  { %p8491_p6 = scmp.ne.s32.totalorder %s8143_s25, 0 }
 0xd84   :  { %8147 = shalt.err (%p8491_p6)  }
 0xd85   :  { %8149 = vsyncmov [#allocation4 + $0x4] }
 0xd88   :  { %s8150_s27 = vpop.sfrf %8149 }
 0xd89   :  { %p8492_p7 = scmp.ne.s32.totalorder %s8150_s27, 0 }
 0xd8b   :  { %8154 = shalt.err (%p8492_p7)  }
 0xd8c   :  { %8156 = vsyncmov [#allocation4 + $0x5] }
 0xd8f   :  { %s8157_s4 = vpop.sfrf %8156 }
 0xd90   :  { %p8493_p8 = scmp.ne.s32.totalorder %s8157_s4, 0 }
 0xd92   :  { %8161 = shalt.err (%p8493_p8)  }
 0xd93   :  { %8163 = vsyncmov [#allocation4 + $0x6] }
 0xd96   :  { %s8164_s19 = vpop.sfrf %8163 }
 0xd97   :  { %p8494_p9 = scmp.ne.s32.totalorder %s8164_s19, 0 }
 0xd99   :  { %8168 = shalt.err (%p8494_p9)  }
 0xd9a   :  { %8170 = vsyncmov [#allocation4 + $0x7] }
 0xd9d   :  { %s8171_s23 = vpop.sfrf %8170 }
 0xd9e   :  { %p8495_p10 = scmp.ne.s32.totalorder %s8171_s23, 0 }
 0xda0   :  { %8175 = shalt.err (%p8495_p10)  }
 0xda1   :  { %8177 = vsyncmov [#allocation4 + $0x8] }
 0xda4   :  { %s8178_s28 = vpop.sfrf %8177 }
 0xda5   :  { %p8496_p11 = scmp.ne.s32.totalorder %s8178_s28, 0 }
 0xda7   :  { %8182 = shalt.err (%p8496_p11)  }

</bundles_post_ra>
